<compile_context>
chip_gen: v7x
topology: tpu7x:2x2x1
jax: 0.10.0
libtpu: 0.0.40
codegen_flags: <defaults>
</compile_context>

<pallas_src>
import jax
import jax.numpy as jnp
from jax.experimental import pallas as pl
from jax.experimental.pallas import tpu as pltpu


# ----------------------------- in-kernel helpers -----------------------------

def _erf(x):
    # Abramowitz & Stegun 7.1.26 polynomial erf (max abs err ~1.5e-7); keeps
    # exact-GELU semantics of nn.GELU() using only exp/mul/div ops.
    p = 0.3275911
    a1, a2, a3, a4, a5 = (0.254829592, -0.284496736, 1.421413741,
                          -1.453152027, 1.061405429)
    s = jnp.where(x < 0.0, -1.0, 1.0)
    ax = jnp.abs(x)
    t = 1.0 / (1.0 + p * ax)
    poly = ((((a5 * t + a4) * t + a3) * t + a2) * t + a1) * t
    return s * (1.0 - poly * jnp.exp(-ax * ax))


def _gelu_exact(y):
    return 0.5 * y * (1.0 + _erf(y * 0.7071067811865476))


def _instance_norm(y, eps=1e-5):
    # y: (H*W, C) f32; per-channel, per-sample stats over spatial positions
    # (biased variance), matching nn.InstanceNorm2d(affine=False).
    mu = jnp.mean(y, axis=0, keepdims=True)
    var = jnp.mean((y - mu) ** 2, axis=0, keepdims=True)
    return (y - mu) * jax.lax.rsqrt(var + eps)


def _reflect_pad_into(xp_ref, x_hwc, H, W):
    # Write ReflectionPad2d(1) of x_hwc (H, W, C) into xp_ref (H+2, W+2, C).
    xp_ref[1:H + 1, 1:W + 1, :] = x_hwc
    xp_ref[0:1, 1:W + 1, :] = x_hwc[1:2, :, :]                  # top    = row 1
    xp_ref[H + 1:H + 2, 1:W + 1, :] = x_hwc[H - 2:H - 1, :, :]  # bottom = row H-2
    # Columns reflected from the already row-padded slab (corners fall out right).
    xp_ref[:, 0:1, :] = xp_ref[:, 2:3, :]                       # left  = col 1
    xp_ref[:, W + 1:W + 2, :] = xp_ref[:, W - 1:W, :]           # right = col W-2


def _conv3x3(xp_ref, w_ref, H, W, C):
    # Direct 9-tap accumulation: no im2col scratch.  Each tap is one MXU matmul
    # (H*W, Cin) x (Cin, Cout), accumulated in f32.
    acc = None
    for kh in range(3):
        for kw in range(3):
            tap = xp_ref[kh:kh + H, kw:kw + W, :].reshape(H * W, C)
            d = jnp.dot(tap, w_ref[kh * 3 + kw],
                        preferred_element_type=jnp.float32)
            acc = d if acc is None else acc + d
    return acc                                                   # (H*W, C) f32


# --------------------------------- kernel ------------------------------------

def resblock_kernel(x_ref, w1_ref, b1_ref, w2_ref, b2_ref, out_ref, xp_ref):
    H = xp_ref.shape[0] - 2
    W = xp_ref.shape[1] - 2
    C = xp_ref.shape[2]

    x_cs = x_ref[0]                               # (C, H*W), model dtype
    x_sc = jnp.transpose(x_cs)                    # (H*W, C)
    x_hwc = x_sc.reshape(H, W, C)                 # (H, W, C)

    # ---- stage 1: ReflectionPad -> Conv3x3(+bias) -> InstanceNorm -> GELU ----
    _reflect_pad_into(xp_ref, x_hwc, H, W)
    y = _conv3x3(xp_ref, w1_ref, H, W, C)
    y = y + b1_ref[...].astype(jnp.float32)
    y = _instance_norm(y)
    y = _gelu_exact(y)
    # TODO(synk): nn.Dropout(0.5) is eval-mode identity here; training-mode
    # random masking (pltpu.prng_*) not implemented.

    # ---- stage 2: ReflectionPad -> Conv3x3(+bias) -> InstanceNorm ------------
    _reflect_pad_into(xp_ref, y.reshape(H, W, C).astype(xp_ref.dtype), H, W)
    y = _conv3x3(xp_ref, w2_ref, H, W, C)
    y = y + b2_ref[...].astype(jnp.float32)
    y = _instance_norm(y)

    # ---- residual add; store channels-major (lane-dense, maps to NCHW) ------
    res = x_sc.astype(jnp.float32) + y                          # (H*W, C)
    out_ref[0] = jnp.transpose(res).astype(out_ref.dtype)       # (C, H*W)


# --------------------------------- wrapper -----------------------------------

def resblock_forward(x_nchw, w1, b1, w2, b2):
    """x_nchw: (N,C,H,W); w*: PyTorch layout (Cout,Cin,3,3); b*: (C,)."""
    N, C, H, W = x_nchw.shape
    dt = x_nchw.dtype
    HW = H * W

    # Free layout plumbing outside the kernel: NCHW flattened to (N, C, H*W),
    # weights to (tap=kh*3+kw, Cin, Cout) so each tap is a leading-dim index.
    x_flat = x_nchw.reshape(N, C, HW)
    w1t = jnp.transpose(w1, (2, 3, 1, 0)).reshape(9, C, C)
    w2t = jnp.transpose(w2, (2, 3, 1, 0)).reshape(9, C, C)
    b1k = b1.reshape(1, C)
    b2k = b2.reshape(1, C)

    itemsize = jnp.dtype(dt).itemsize
    conv_flops = 2 * N * HW * 9 * C * C                         # per conv
    cost = pl.CostEstimate(
        flops=2 * conv_flops + 12 * N * C * HW,
        transcendentals=N * C * HW,                             # exp inside erf
        bytes_accessed=int(2 * N * C * HW * itemsize
                           + (w1t.size + w2t.size + 2 * C)
                           * jnp.dtype(w1t.dtype).itemsize),
    )

    # Per-step VMEM footprint (in/out blocks are double-buffered by the pipeline).
    footprint = itemsize * (4 * C * HW                          # x + out blocks, 2x buffered
                            + (H + 2) * (W + 2) * C             # padded scratch slab
                            + 2 * (9 * C * C + C))              # weights + biases
    vmem_limit = int(min(max(2 * footprint, 32 * 1024 * 1024), 64 * 1024 * 1024))

    out_flat = pl.pallas_call(
        resblock_kernel,
        out_shape=jax.ShapeDtypeStruct((N, C, HW), dt),
        grid=(N,),
        in_specs=[
            pl.BlockSpec((1, C, HW), lambda n: (n, 0, 0)),      # x (channels-major)
            pl.BlockSpec((9, C, C), lambda n: (0, 0, 0)),       # w1 tap matrices
            pl.BlockSpec((1, C), lambda n: (0, 0)),             # b1
            pl.BlockSpec((9, C, C), lambda n: (0, 0, 0)),       # w2 tap matrices
            pl.BlockSpec((1, C), lambda n: (0, 0)),             # b2
        ],
        out_specs=pl.BlockSpec((1, C, HW), lambda n: (n, 0, 0)),
        scratch_shapes=[
            pltpu.VMEM((H + 2, W + 2, C), dt),                  # padded image slab
        ],
        compiler_params=pltpu.CompilerParams(
            dimension_semantics=("parallel",),
            vmem_limit_bytes=vmem_limit,
        ),
        cost_estimate=cost,
    )(x_flat, w1t, b1k, w2t, b2k)

    return out_flat.reshape(N, C, H, W)


# ----------------------------- pure-JAX reference -----------------------------

def _ref_resblock(x, w1, b1, w2, b2):
    def conv(xin, w, b):
        xp = jnp.pad(xin, ((0, 0), (0, 0), (1, 1), (1, 1)), mode="reflect")
        y = jax.lax.conv_general_dilated(
            xp, w, window_strides=(1, 1), padding="VALID",
            dimension_numbers=("NCHW", "OIHW", "NCHW"))
        return y + b[None, :, None, None]

    def inorm(y, eps=1e-5):
        mu = jnp.mean(y, axis=(2, 3), keepdims=True)
        var = jnp.mean((y - mu) ** 2, axis=(2, 3), keepdims=True)
        return (y - mu) * jax.lax.rsqrt(var + eps)

    h = jax.nn.gelu(inorm(conv(x, w1, b1)), approximate=False)
    h = inorm(conv(h, w2, b2))
    return x + h


# ----------------------------------- main -------------------------------------

if __name__ == "__main__":
    N, C, H, W = 2, 4, 16, 16
    key = jax.random.PRNGKey(0)
    kx, kw1, kb1, kw2, kb2 = jax.random.split(key, 5)

    x = jax.random.normal(kx, (N, C, H, W), dtype=jnp.float32)
    w1 = jax.random.normal(kw1, (C, C, 3, 3), dtype=jnp.float32) * 0.1
    b1 = jax.random.normal(kb1, (C,), dtype=jnp.float32) * 0.1
    w2 = jax.random.normal(kw2, (C, C, 3, 3), dtype=jnp.float32) * 0.1
    b2 = jax.random.normal(kb2, (C,), dtype=jnp.float32) * 0.1

    out = resblock_forward(x, w1, b1, w2, b2)
    out = jax.block_until_ready(out)

    ref = _ref_resblock(x, w1, b1, w2, b2)
    assert out.shape == (N, C, H, W)
    assert jnp.allclose(out, ref, atol=1e-3, rtol=1e-3), "mismatch vs reference"

    print("KERNEL_OK")
</pallas_src>

<mosaic_0001>
module attributes {stable_mosaic.version = 11 : i64} {
  func.func @resblock_kernel(%arg0: i32, %arg1: memref<1x4x256xf32, #tpu.memory_space<vmem>>, %arg2: memref<9x4x4xf32, #tpu.memory_space<vmem>>, %arg3: memref<1x4xf32, #tpu.memory_space<vmem>>, %arg4: memref<9x4x4xf32, #tpu.memory_space<vmem>>, %arg5: memref<1x4xf32, #tpu.memory_space<vmem>>, %arg6: memref<1x4x256xf32, #tpu.memory_space<vmem>>, %arg7: memref<18x18x4xf32, #tpu.memory_space<vmem>>) attributes {dimension_semantics = [#tpu.dimension_semantics<parallel>], iteration_bounds = array<i64: 2>, scalar_prefetch = 0 : i64, scratch_operands = 1 : i64, tpu.core_type = #tpu.core_type<tc>, window_params = [{transform_indices = @transform_0, window_bounds = array<i64: 1, 4, 256>}, {pipeline_mode = #tpu.pipeline_mode<synchronous>, transform_indices = @transform_1, window_bounds = array<i64: 9, 4, 4>}, {pipeline_mode = #tpu.pipeline_mode<synchronous>, transform_indices = @transform_2, window_bounds = array<i64: 1, 4>}, {pipeline_mode = #tpu.pipeline_mode<synchronous>, transform_indices = @transform_3, window_bounds = array<i64: 9, 4, 4>}, {pipeline_mode = #tpu.pipeline_mode<synchronous>, transform_indices = @transform_4, window_bounds = array<i64: 1, 4>}, {transform_indices = @transform_5, window_bounds = array<i64: 1, 4, 256>}]} {
    %c0 = arith.constant 0 : index
    %c0_0 = arith.constant 0 : index
    %c0_1 = arith.constant 0 : index
    %0 = vector.load %arg1[%c0, %c0_0, %c0_1] : memref<1x4x256xf32, #tpu.memory_space<vmem>>, vector<1x4x256xf32>
    %1 = vector.shape_cast %0 : vector<1x4x256xf32> to vector<4x256xf32>
    %2 = tpu.transpose %1, [1, 0] : vector<4x256xf32> -> vector<256x4xf32>
    %3 = vector.shape_cast %2 : vector<256x4xf32> to vector<16x16x4xf32>
    %c1 = arith.constant 1 : index
    %c1_2 = arith.constant 1 : index
    %c0_3 = arith.constant 0 : index
    %4 = vector.load %arg7[%c1, %c1_2, %c0_3] : memref<18x18x4xf32, #tpu.memory_space<vmem>>, vector<16x16x4xf32>
    tpu.vector_store %arg7[%c1, %c1_2, %c0_3], %3 {strides = array<i32>} : memref<18x18x4xf32, #tpu.memory_space<vmem>>, vector<16x16x4xf32>,
    %5 = vector.extract_strided_slice %3 {offsets = [1, 0, 0], sizes = [1, 16, 4], strides = [1, 1, 1]} : vector<16x16x4xf32> to vector<1x16x4xf32>
    %c0_4 = arith.constant 0 : index
    %c1_5 = arith.constant 1 : index
    %c0_6 = arith.constant 0 : index
    %6 = vector.load %arg7[%c0_4, %c1_5, %c0_6] : memref<18x18x4xf32, #tpu.memory_space<vmem>>, vector<1x16x4xf32>
    tpu.vector_store %arg7[%c0_4, %c1_5, %c0_6], %5 {strides = array<i32>} : memref<18x18x4xf32, #tpu.memory_space<vmem>>, vector<1x16x4xf32>,
    %7 = vector.extract_strided_slice %3 {offsets = [14, 0, 0], sizes = [1, 16, 4], strides = [1, 1, 1]} : vector<16x16x4xf32> to vector<1x16x4xf32>
    %c17 = arith.constant 17 : index
    %c1_7 = arith.constant 1 : index
    %c0_8 = arith.constant 0 : index
    %8 = vector.load %arg7[%c17, %c1_7, %c0_8] : memref<18x18x4xf32, #tpu.memory_space<vmem>>, vector<1x16x4xf32>
    tpu.vector_store %arg7[%c17, %c1_7, %c0_8], %7 {strides = array<i32>} : memref<18x18x4xf32, #tpu.memory_space<vmem>>, vector<1x16x4xf32>,
    %c0_9 = arith.constant 0 : index
    %c2 = arith.constant 2 : index
    %c0_10 = arith.constant 0 : index
    %9 = vector.load %arg7[%c0_9, %c2, %c0_10] : memref<18x18x4xf32, #tpu.memory_space<vmem>>, vector<18x1x4xf32>
    %c0_11 = arith.constant 0 : index
    %c0_12 = arith.constant 0 : index
    %c0_13 = arith.constant 0 : index
    %10 = vector.load %arg7[%c0_11, %c0_12, %c0_13] : memref<18x18x4xf32, #tpu.memory_space<vmem>>, vector<18x1x4xf32>
    tpu.vector_store %arg7[%c0_11, %c0_12, %c0_13], %9 {strides = array<i32>} : memref<18x18x4xf32, #tpu.memory_space<vmem>>, vector<18x1x4xf32>,
    %c0_14 = arith.constant 0 : index
    %c15 = arith.constant 15 : index
    %c0_15 = arith.constant 0 : index
    %11 = vector.load %arg7[%c0_14, %c15, %c0_15] : memref<18x18x4xf32, #tpu.memory_space<vmem>>, vector<18x1x4xf32>
    %c0_16 = arith.constant 0 : index
    %c17_17 = arith.constant 17 : index
    %c0_18 = arith.constant 0 : index
    %12 = vector.load %arg7[%c0_16, %c17_17, %c0_18] : memref<18x18x4xf32, #tpu.memory_space<vmem>>, vector<18x1x4xf32>
    tpu.vector_store %arg7[%c0_16, %c17_17, %c0_18], %11 {strides = array<i32>} : memref<18x18x4xf32, #tpu.memory_space<vmem>>, vector<18x1x4xf32>,
    %c0_19 = arith.constant 0 : index
    %c0_20 = arith.constant 0 : index
    %c0_21 = arith.constant 0 : index
    %13 = vector.load %arg7[%c0_19, %c0_20, %c0_21] : memref<18x18x4xf32, #tpu.memory_space<vmem>>, vector<16x16x4xf32>
    %14 = vector.shape_cast %13 : vector<16x16x4xf32> to vector<256x4xf32>
    %c0_22 = arith.constant 0 : index
    %c0_23 = arith.constant 0 : index
    %c0_24 = arith.constant 0 : index
    %15 = vector.load %arg2[%c0_22, %c0_23, %c0_24] : memref<9x4x4xf32, #tpu.memory_space<vmem>>, vector<1x4x4xf32>
    %16 = vector.shape_cast %15 : vector<1x4x4xf32> to vector<4x4xf32>
    %cst = arith.constant dense<0.000000e+00> : vector<256x4xf32>
    %17 = tpu.matmul %14, %16, %cst {dimension_numbers = #tpu.dot_dimension_numbers<[1], [0], [0], [1], [0, 0, 1, 1], [], []>} : vector<256x4xf32>, vector<4x4xf32>, vector<256x4xf32> -> vector<256x4xf32>
    %c0_25 = arith.constant 0 : index
    %c1_26 = arith.constant 1 : index
    %c0_27 = arith.constant 0 : index
    %18 = vector.load %arg7[%c0_25, %c1_26, %c0_27] : memref<18x18x4xf32, #tpu.memory_space<vmem>>, vector<16x16x4xf32>
    %19 = vector.shape_cast %18 : vector<16x16x4xf32> to vector<256x4xf32>
    %c1_28 = arith.constant 1 : index
    %c0_29 = arith.constant 0 : index
    %c0_30 = arith.constant 0 : index
    %20 = vector.load %arg2[%c1_28, %c0_29, %c0_30] : memref<9x4x4xf32, #tpu.memory_space<vmem>>, vector<1x4x4xf32>
    %21 = vector.shape_cast %20 : vector<1x4x4xf32> to vector<4x4xf32>
    %cst_31 = arith.constant dense<0.000000e+00> : vector<256x4xf32>
    %22 = tpu.matmul %19, %21, %cst_31 {dimension_numbers = #tpu.dot_dimension_numbers<[1], [0], [0], [1], [0, 0, 1, 1], [], []>} : vector<256x4xf32>, vector<4x4xf32>, vector<256x4xf32> -> vector<256x4xf32>
    %23 = arith.addf %17, %22 : vector<256x4xf32>
    %c0_32 = arith.constant 0 : index
    %c2_33 = arith.constant 2 : index
    %c0_34 = arith.constant 0 : index
    %24 = vector.load %arg7[%c0_32, %c2_33, %c0_34] : memref<18x18x4xf32, #tpu.memory_space<vmem>>, vector<16x16x4xf32>
    %25 = vector.shape_cast %24 : vector<16x16x4xf32> to vector<256x4xf32>
    %c2_35 = arith.constant 2 : index
    %c0_36 = arith.constant 0 : index
    %c0_37 = arith.constant 0 : index
    %26 = vector.load %arg2[%c2_35, %c0_36, %c0_37] : memref<9x4x4xf32, #tpu.memory_space<vmem>>, vector<1x4x4xf32>
    %27 = vector.shape_cast %26 : vector<1x4x4xf32> to vector<4x4xf32>
    %cst_38 = arith.constant dense<0.000000e+00> : vector<256x4xf32>
    %28 = tpu.matmul %25, %27, %cst_38 {dimension_numbers = #tpu.dot_dimension_numbers<[1], [0], [0], [1], [0, 0, 1, 1], [], []>} : vector<256x4xf32>, vector<4x4xf32>, vector<256x4xf32> -> vector<256x4xf32>
    %29 = arith.addf %23, %28 : vector<256x4xf32>
    %c1_39 = arith.constant 1 : index
    %c0_40 = arith.constant 0 : index
    %c0_41 = arith.constant 0 : index
    %30 = vector.load %arg7[%c1_39, %c0_40, %c0_41] : memref<18x18x4xf32, #tpu.memory_space<vmem>>, vector<16x16x4xf32>
    %31 = vector.shape_cast %30 : vector<16x16x4xf32> to vector<256x4xf32>
    %c3 = arith.constant 3 : index
    %c0_42 = arith.constant 0 : index
    %c0_43 = arith.constant 0 : index
    %32 = vector.load %arg2[%c3, %c0_42, %c0_43] : memref<9x4x4xf32, #tpu.memory_space<vmem>>, vector<1x4x4xf32>
    %33 = vector.shape_cast %32 : vector<1x4x4xf32> to vector<4x4xf32>
    %cst_44 = arith.constant dense<0.000000e+00> : vector<256x4xf32>
    %34 = tpu.matmul %31, %33, %cst_44 {dimension_numbers = #tpu.dot_dimension_numbers<[1], [0], [0], [1], [0, 0, 1, 1], [], []>} : vector<256x4xf32>, vector<4x4xf32>, vector<256x4xf32> -> vector<256x4xf32>
    %35 = arith.addf %29, %34 : vector<256x4xf32>
    %c1_45 = arith.constant 1 : index
    %c1_46 = arith.constant 1 : index
    %c0_47 = arith.constant 0 : index
    %36 = vector.load %arg7[%c1_45, %c1_46, %c0_47] : memref<18x18x4xf32, #tpu.memory_space<vmem>>, vector<16x16x4xf32>
    %37 = vector.shape_cast %36 : vector<16x16x4xf32> to vector<256x4xf32>
    %c4 = arith.constant 4 : index
    %c0_48 = arith.constant 0 : index
    %c0_49 = arith.constant 0 : index
    %38 = vector.load %arg2[%c4, %c0_48, %c0_49] : memref<9x4x4xf32, #tpu.memory_space<vmem>>, vector<1x4x4xf32>
    %39 = vector.shape_cast %38 : vector<1x4x4xf32> to vector<4x4xf32>
    %cst_50 = arith.constant dense<0.000000e+00> : vector<256x4xf32>
    %40 = tpu.matmul %37, %39, %cst_50 {dimension_numbers = #tpu.dot_dimension_numbers<[1], [0], [0], [1], [0, 0, 1, 1], [], []>} : vector<256x4xf32>, vector<4x4xf32>, vector<256x4xf32> -> vector<256x4xf32>
    %41 = arith.addf %35, %40 : vector<256x4xf32>
    %c1_51 = arith.constant 1 : index
    %c2_52 = arith.constant 2 : index
    %c0_53 = arith.constant 0 : index
    %42 = vector.load %arg7[%c1_51, %c2_52, %c0_53] : memref<18x18x4xf32, #tpu.memory_space<vmem>>, vector<16x16x4xf32>
    %43 = vector.shape_cast %42 : vector<16x16x4xf32> to vector<256x4xf32>
    %c5 = arith.constant 5 : index
    %c0_54 = arith.constant 0 : index
    %c0_55 = arith.constant 0 : index
    %44 = vector.load %arg2[%c5, %c0_54, %c0_55] : memref<9x4x4xf32, #tpu.memory_space<vmem>>, vector<1x4x4xf32>
    %45 = vector.shape_cast %44 : vector<1x4x4xf32> to vector<4x4xf32>
    %cst_56 = arith.constant dense<0.000000e+00> : vector<256x4xf32>
    %46 = tpu.matmul %43, %45, %cst_56 {dimension_numbers = #tpu.dot_dimension_numbers<[1], [0], [0], [1], [0, 0, 1, 1], [], []>} : vector<256x4xf32>, vector<4x4xf32>, vector<256x4xf32> -> vector<256x4xf32>
    %47 = arith.addf %41, %46 : vector<256x4xf32>
    %c2_57 = arith.constant 2 : index
    %c0_58 = arith.constant 0 : index
    %c0_59 = arith.constant 0 : index
    %48 = vector.load %arg7[%c2_57, %c0_58, %c0_59] : memref<18x18x4xf32, #tpu.memory_space<vmem>>, vector<16x16x4xf32>
    %49 = vector.shape_cast %48 : vector<16x16x4xf32> to vector<256x4xf32>
    %c6 = arith.constant 6 : index
    %c0_60 = arith.constant 0 : index
    %c0_61 = arith.constant 0 : index
    %50 = vector.load %arg2[%c6, %c0_60, %c0_61] : memref<9x4x4xf32, #tpu.memory_space<vmem>>, vector<1x4x4xf32>
    %51 = vector.shape_cast %50 : vector<1x4x4xf32> to vector<4x4xf32>
    %cst_62 = arith.constant dense<0.000000e+00> : vector<256x4xf32>
    %52 = tpu.matmul %49, %51, %cst_62 {dimension_numbers = #tpu.dot_dimension_numbers<[1], [0], [0], [1], [0, 0, 1, 1], [], []>} : vector<256x4xf32>, vector<4x4xf32>, vector<256x4xf32> -> vector<256x4xf32>
    %53 = arith.addf %47, %52 : vector<256x4xf32>
    %c2_63 = arith.constant 2 : index
    %c1_64 = arith.constant 1 : index
    %c0_65 = arith.constant 0 : index
    %54 = vector.load %arg7[%c2_63, %c1_64, %c0_65] : memref<18x18x4xf32, #tpu.memory_space<vmem>>, vector<16x16x4xf32>
    %55 = vector.shape_cast %54 : vector<16x16x4xf32> to vector<256x4xf32>
    %c7 = arith.constant 7 : index
    %c0_66 = arith.constant 0 : index
    %c0_67 = arith.constant 0 : index
    %56 = vector.load %arg2[%c7, %c0_66, %c0_67] : memref<9x4x4xf32, #tpu.memory_space<vmem>>, vector<1x4x4xf32>
    %57 = vector.shape_cast %56 : vector<1x4x4xf32> to vector<4x4xf32>
    %cst_68 = arith.constant dense<0.000000e+00> : vector<256x4xf32>
    %58 = tpu.matmul %55, %57, %cst_68 {dimension_numbers = #tpu.dot_dimension_numbers<[1], [0], [0], [1], [0, 0, 1, 1], [], []>} : vector<256x4xf32>, vector<4x4xf32>, vector<256x4xf32> -> vector<256x4xf32>
    %59 = arith.addf %53, %58 : vector<256x4xf32>
    %c2_69 = arith.constant 2 : index
    %c2_70 = arith.constant 2 : index
    %c0_71 = arith.constant 0 : index
    %60 = vector.load %arg7[%c2_69, %c2_70, %c0_71] : memref<18x18x4xf32, #tpu.memory_space<vmem>>, vector<16x16x4xf32>
    %61 = vector.shape_cast %60 : vector<16x16x4xf32> to vector<256x4xf32>
    %c8 = arith.constant 8 : index
    %c0_72 = arith.constant 0 : index
    %c0_73 = arith.constant 0 : index
    %62 = vector.load %arg2[%c8, %c0_72, %c0_73] : memref<9x4x4xf32, #tpu.memory_space<vmem>>, vector<1x4x4xf32>
    %63 = vector.shape_cast %62 : vector<1x4x4xf32> to vector<4x4xf32>
    %cst_74 = arith.constant dense<0.000000e+00> : vector<256x4xf32>
    %64 = tpu.matmul %61, %63, %cst_74 {dimension_numbers = #tpu.dot_dimension_numbers<[1], [0], [0], [1], [0, 0, 1, 1], [], []>} : vector<256x4xf32>, vector<4x4xf32>, vector<256x4xf32> -> vector<256x4xf32>
    %65 = arith.addf %59, %64 : vector<256x4xf32>
    %c0_75 = arith.constant 0 : index
    %c0_76 = arith.constant 0 : index
    %66 = vector.load %arg3[%c0_75, %c0_76] : memref<1x4xf32, #tpu.memory_space<vmem>>, vector<1x4xf32>
    %67 = vector.broadcast %66 : vector<1x4xf32> to vector<256x4xf32>
    %68 = arith.addf %65, %67 : vector<256x4xf32>
    %cst_77 = arith.constant dense<0.000000e+00> : vector<4xf32>
    %69 = vector.multi_reduction <add>, %68, %cst_77 [0] : vector<256x4xf32> to vector<4xf32>
    %70 = vector.shape_cast %69 : vector<4xf32> to vector<1x4xf32>
    %cst_78 = arith.constant 2.560000e+02 : f32
    %71 = vector.broadcast %cst_78 : f32 to vector<1x4xf32>
    %72 = arith.divf %70, %71 : vector<1x4xf32>
    %73 = vector.broadcast %72 : vector<1x4xf32> to vector<256x4xf32>
    %74 = arith.subf %68, %73 : vector<256x4xf32>
    %75 = arith.mulf %74, %74 : vector<256x4xf32>
    %cst_79 = arith.constant dense<0.000000e+00> : vector<4xf32>
    %76 = vector.multi_reduction <add>, %75, %cst_79 [0] : vector<256x4xf32> to vector<4xf32>
    %77 = vector.shape_cast %76 : vector<4xf32> to vector<1x4xf32>
    %cst_80 = arith.constant 2.560000e+02 : f32
    %78 = vector.broadcast %cst_80 : f32 to vector<1x4xf32>
    %79 = arith.divf %77, %78 : vector<1x4xf32>
    %80 = vector.broadcast %72 : vector<1x4xf32> to vector<256x4xf32>
    %81 = arith.subf %68, %80 : vector<256x4xf32>
    %cst_81 = arith.constant 9.99999974E-6 : f32
    %82 = vector.broadcast %cst_81 : f32 to vector<1x4xf32>
    %83 = arith.addf %79, %82 : vector<1x4xf32>
    %84 = math.rsqrt %83 : vector<1x4xf32>
    %85 = vector.broadcast %84 : vector<1x4xf32> to vector<256x4xf32>
    %86 = arith.mulf %81, %85 : vector<256x4xf32>
    %cst_82 = arith.constant 5.000000e-01 : f32
    %87 = vector.broadcast %cst_82 : f32 to vector<256x4xf32>
    %88 = arith.mulf %87, %86 : vector<256x4xf32>
    %cst_83 = arith.constant 0.707106769 : f32
    %89 = vector.broadcast %cst_83 : f32 to vector<256x4xf32>
    %90 = arith.mulf %86, %89 : vector<256x4xf32>
    %cst_84 = arith.constant 0.000000e+00 : f32
    %91 = vector.broadcast %cst_84 : f32 to vector<256x4xf32>
    %92 = arith.cmpf olt, %90, %91 : vector<256x4xf32>
    %cst_85 = arith.constant -1.000000e+00 : f32
    %cst_86 = arith.constant 1.000000e+00 : f32
    %93 = vector.broadcast %cst_85 : f32 to vector<256x4xf32>
    %94 = vector.broadcast %cst_86 : f32 to vector<256x4xf32>
    %95 = arith.select %92, %93, %94 : vector<256x4xi1>, vector<256x4xf32>
    %96 = math.absf %90 : vector<256x4xf32>
    %cst_87 = arith.constant 0.327591091 : f32
    %97 = vector.broadcast %cst_87 : f32 to vector<256x4xf32>
    %98 = arith.mulf %97, %96 : vector<256x4xf32>
    %cst_88 = arith.constant 1.000000e+00 : f32
    %99 = vector.broadcast %cst_88 : f32 to vector<256x4xf32>
    %100 = arith.addf %99, %98 : vector<256x4xf32>
    %cst_89 = arith.constant 1.000000e+00 : f32
    %101 = vector.broadcast %cst_89 : f32 to vector<256x4xf32>
    %102 = arith.divf %101, %100 : vector<256x4xf32>
    %cst_90 = arith.constant 1.06140542 : f32
    %103 = vector.broadcast %cst_90 : f32 to vector<256x4xf32>
    %104 = arith.mulf %103, %102 : vector<256x4xf32>
    %cst_91 = arith.constant -1.45315206 : f32
    %105 = vector.broadcast %cst_91 : f32 to vector<256x4xf32>
    %106 = arith.addf %104, %105 : vector<256x4xf32>
    %107 = arith.mulf %106, %102 : vector<256x4xf32>
    %cst_92 = arith.constant 1.42141378 : f32
    %108 = vector.broadcast %cst_92 : f32 to vector<256x4xf32>
    %109 = arith.addf %107, %108 : vector<256x4xf32>
    %110 = arith.mulf %109, %102 : vector<256x4xf32>
    %cst_93 = arith.constant -0.284496725 : f32
    %111 = vector.broadcast %cst_93 : f32 to vector<256x4xf32>
    %112 = arith.addf %110, %111 : vector<256x4xf32>
    %113 = arith.mulf %112, %102 : vector<256x4xf32>
    %cst_94 = arith.constant 0.254829586 : f32
    %114 = vector.broadcast %cst_94 : f32 to vector<256x4xf32>
    %115 = arith.addf %113, %114 : vector<256x4xf32>
    %116 = arith.mulf %115, %102 : vector<256x4xf32>
    %cst_95 = arith.constant 0.000000e+00 : f32
    %117 = vector.broadcast %cst_95 : f32 to vector<256x4xf32>
    %118 = arith.subf %117, %96 : vector<256x4xf32>
    %119 = arith.mulf %118, %96 : vector<256x4xf32>
    %120 = math.exp %119 : vector<256x4xf32>
    %121 = arith.mulf %116, %120 : vector<256x4xf32>
    %cst_96 = arith.constant 1.000000e+00 : f32
    %122 = vector.broadcast %cst_96 : f32 to vector<256x4xf32>
    %123 = arith.subf %122, %121 : vector<256x4xf32>
    %124 = arith.mulf %95, %123 : vector<256x4xf32>
    %cst_97 = arith.constant 1.000000e+00 : f32
    %125 = vector.broadcast %cst_97 : f32 to vector<256x4xf32>
    %126 = arith.addf %125, %124 : vector<256x4xf32>
    %127 = arith.mulf %88, %126 : vector<256x4xf32>
    %128 = vector.shape_cast %127 : vector<256x4xf32> to vector<16x16x4xf32>
    %c1_98 = arith.constant 1 : index
    %c1_99 = arith.constant 1 : index
    %c0_100 = arith.constant 0 : index
    %129 = vector.load %arg7[%c1_98, %c1_99, %c0_100] : memref<18x18x4xf32, #tpu.memory_space<vmem>>, vector<16x16x4xf32>
    tpu.vector_store %arg7[%c1_98, %c1_99, %c0_100], %128 {strides = array<i32>} : memref<18x18x4xf32, #tpu.memory_space<vmem>>, vector<16x16x4xf32>,
    %130 = vector.extract_strided_slice %128 {offsets = [1, 0, 0], sizes = [1, 16, 4], strides = [1, 1, 1]} : vector<16x16x4xf32> to vector<1x16x4xf32>
    %c0_101 = arith.constant 0 : index
    %c1_102 = arith.constant 1 : index
    %c0_103 = arith.constant 0 : index
    %131 = vector.load %arg7[%c0_101, %c1_102, %c0_103] : memref<18x18x4xf32, #tpu.memory_space<vmem>>, vector<1x16x4xf32>
    tpu.vector_store %arg7[%c0_101, %c1_102, %c0_103], %130 {strides = array<i32>} : memref<18x18x4xf32, #tpu.memory_space<vmem>>, vector<1x16x4xf32>,
    %132 = vector.extract_strided_slice %128 {offsets = [14, 0, 0], sizes = [1, 16, 4], strides = [1, 1, 1]} : vector<16x16x4xf32> to vector<1x16x4xf32>
    %c17_104 = arith.constant 17 : index
    %c1_105 = arith.constant 1 : index
    %c0_106 = arith.constant 0 : index
    %133 = vector.load %arg7[%c17_104, %c1_105, %c0_106] : memref<18x18x4xf32, #tpu.memory_space<vmem>>, vector<1x16x4xf32>
    tpu.vector_store %arg7[%c17_104, %c1_105, %c0_106], %132 {strides = array<i32>} : memref<18x18x4xf32, #tpu.memory_space<vmem>>, vector<1x16x4xf32>,
    %c0_107 = arith.constant 0 : index
    %c2_108 = arith.constant 2 : index
    %c0_109 = arith.constant 0 : index
    %134 = vector.load %arg7[%c0_107, %c2_108, %c0_109] : memref<18x18x4xf32, #tpu.memory_space<vmem>>, vector<18x1x4xf32>
    %c0_110 = arith.constant 0 : index
    %c0_111 = arith.constant 0 : index
    %c0_112 = arith.constant 0 : index
    %135 = vector.load %arg7[%c0_110, %c0_111, %c0_112] : memref<18x18x4xf32, #tpu.memory_space<vmem>>, vector<18x1x4xf32>
    tpu.vector_store %arg7[%c0_110, %c0_111, %c0_112], %134 {strides = array<i32>} : memref<18x18x4xf32, #tpu.memory_space<vmem>>, vector<18x1x4xf32>,
    %c0_113 = arith.constant 0 : index
    %c15_114 = arith.constant 15 : index
    %c0_115 = arith.constant 0 : index
    %136 = vector.load %arg7[%c0_113, %c15_114, %c0_115] : memref<18x18x4xf32, #tpu.memory_space<vmem>>, vector<18x1x4xf32>
    %c0_116 = arith.constant 0 : index
    %c17_117 = arith.constant 17 : index
    %c0_118 = arith.constant 0 : index
    %137 = vector.load %arg7[%c0_116, %c17_117, %c0_118] : memref<18x18x4xf32, #tpu.memory_space<vmem>>, vector<18x1x4xf32>
    tpu.vector_store %arg7[%c0_116, %c17_117, %c0_118], %136 {strides = array<i32>} : memref<18x18x4xf32, #tpu.memory_space<vmem>>, vector<18x1x4xf32>,
    %c0_119 = arith.constant 0 : index
    %c0_120 = arith.constant 0 : index
    %c0_121 = arith.constant 0 : index
    %138 = vector.load %arg7[%c0_119, %c0_120, %c0_121] : memref<18x18x4xf32, #tpu.memory_space<vmem>>, vector<16x16x4xf32>
    %139 = vector.shape_cast %138 : vector<16x16x4xf32> to vector<256x4xf32>
    %c0_122 = arith.constant 0 : index
    %c0_123 = arith.constant 0 : index
    %c0_124 = arith.constant 0 : index
    %140 = vector.load %arg4[%c0_122, %c0_123, %c0_124] : memref<9x4x4xf32, #tpu.memory_space<vmem>>, vector<1x4x4xf32>
    %141 = vector.shape_cast %140 : vector<1x4x4xf32> to vector<4x4xf32>
    %cst_125 = arith.constant dense<0.000000e+00> : vector<256x4xf32>
    %142 = tpu.matmul %139, %141, %cst_125 {dimension_numbers = #tpu.dot_dimension_numbers<[1], [0], [0], [1], [0, 0, 1, 1], [], []>} : vector<256x4xf32>, vector<4x4xf32>, vector<256x4xf32> -> vector<256x4xf32>
    %c0_126 = arith.constant 0 : index
    %c1_127 = arith.constant 1 : index
    %c0_128 = arith.constant 0 : index
    %143 = vector.load %arg7[%c0_126, %c1_127, %c0_128] : memref<18x18x4xf32, #tpu.memory_space<vmem>>, vector<16x16x4xf32>
    %144 = vector.shape_cast %143 : vector<16x16x4xf32> to vector<256x4xf32>
    %c1_129 = arith.constant 1 : index
    %c0_130 = arith.constant 0 : index
    %c0_131 = arith.constant 0 : index
    %145 = vector.load %arg4[%c1_129, %c0_130, %c0_131] : memref<9x4x4xf32, #tpu.memory_space<vmem>>, vector<1x4x4xf32>
    %146 = vector.shape_cast %145 : vector<1x4x4xf32> to vector<4x4xf32>
    %cst_132 = arith.constant dense<0.000000e+00> : vector<256x4xf32>
    %147 = tpu.matmul %144, %146, %cst_132 {dimension_numbers = #tpu.dot_dimension_numbers<[1], [0], [0], [1], [0, 0, 1, 1], [], []>} : vector<256x4xf32>, vector<4x4xf32>, vector<256x4xf32> -> vector<256x4xf32>
    %148 = arith.addf %142, %147 : vector<256x4xf32>
    %c0_133 = arith.constant 0 : index
    %c2_134 = arith.constant 2 : index
    %c0_135 = arith.constant 0 : index
    %149 = vector.load %arg7[%c0_133, %c2_134, %c0_135] : memref<18x18x4xf32, #tpu.memory_space<vmem>>, vector<16x16x4xf32>
    %150 = vector.shape_cast %149 : vector<16x16x4xf32> to vector<256x4xf32>
    %c2_136 = arith.constant 2 : index
    %c0_137 = arith.constant 0 : index
    %c0_138 = arith.constant 0 : index
    %151 = vector.load %arg4[%c2_136, %c0_137, %c0_138] : memref<9x4x4xf32, #tpu.memory_space<vmem>>, vector<1x4x4xf32>
    %152 = vector.shape_cast %151 : vector<1x4x4xf32> to vector<4x4xf32>
    %cst_139 = arith.constant dense<0.000000e+00> : vector<256x4xf32>
    %153 = tpu.matmul %150, %152, %cst_139 {dimension_numbers = #tpu.dot_dimension_numbers<[1], [0], [0], [1], [0, 0, 1, 1], [], []>} : vector<256x4xf32>, vector<4x4xf32>, vector<256x4xf32> -> vector<256x4xf32>
    %154 = arith.addf %148, %153 : vector<256x4xf32>
    %c1_140 = arith.constant 1 : index
    %c0_141 = arith.constant 0 : index
    %c0_142 = arith.constant 0 : index
    %155 = vector.load %arg7[%c1_140, %c0_141, %c0_142] : memref<18x18x4xf32, #tpu.memory_space<vmem>>, vector<16x16x4xf32>
    %156 = vector.shape_cast %155 : vector<16x16x4xf32> to vector<256x4xf32>
    %c3_143 = arith.constant 3 : index
    %c0_144 = arith.constant 0 : index
    %c0_145 = arith.constant 0 : index
    %157 = vector.load %arg4[%c3_143, %c0_144, %c0_145] : memref<9x4x4xf32, #tpu.memory_space<vmem>>, vector<1x4x4xf32>
    %158 = vector.shape_cast %157 : vector<1x4x4xf32> to vector<4x4xf32>
    %cst_146 = arith.constant dense<0.000000e+00> : vector<256x4xf32>
    %159 = tpu.matmul %156, %158, %cst_146 {dimension_numbers = #tpu.dot_dimension_numbers<[1], [0], [0], [1], [0, 0, 1, 1], [], []>} : vector<256x4xf32>, vector<4x4xf32>, vector<256x4xf32> -> vector<256x4xf32>
    %160 = arith.addf %154, %159 : vector<256x4xf32>
    %c1_147 = arith.constant 1 : index
    %c1_148 = arith.constant 1 : index
    %c0_149 = arith.constant 0 : index
    %161 = vector.load %arg7[%c1_147, %c1_148, %c0_149] : memref<18x18x4xf32, #tpu.memory_space<vmem>>, vector<16x16x4xf32>
    %162 = vector.shape_cast %161 : vector<16x16x4xf32> to vector<256x4xf32>
    %c4_150 = arith.constant 4 : index
    %c0_151 = arith.constant 0 : index
    %c0_152 = arith.constant 0 : index
    %163 = vector.load %arg4[%c4_150, %c0_151, %c0_152] : memref<9x4x4xf32, #tpu.memory_space<vmem>>, vector<1x4x4xf32>
    %164 = vector.shape_cast %163 : vector<1x4x4xf32> to vector<4x4xf32>
    %cst_153 = arith.constant dense<0.000000e+00> : vector<256x4xf32>
    %165 = tpu.matmul %162, %164, %cst_153 {dimension_numbers = #tpu.dot_dimension_numbers<[1], [0], [0], [1], [0, 0, 1, 1], [], []>} : vector<256x4xf32>, vector<4x4xf32>, vector<256x4xf32> -> vector<256x4xf32>
    %166 = arith.addf %160, %165 : vector<256x4xf32>
    %c1_154 = arith.constant 1 : index
    %c2_155 = arith.constant 2 : index
    %c0_156 = arith.constant 0 : index
    %167 = vector.load %arg7[%c1_154, %c2_155, %c0_156] : memref<18x18x4xf32, #tpu.memory_space<vmem>>, vector<16x16x4xf32>
    %168 = vector.shape_cast %167 : vector<16x16x4xf32> to vector<256x4xf32>
    %c5_157 = arith.constant 5 : index
    %c0_158 = arith.constant 0 : index
    %c0_159 = arith.constant 0 : index
    %169 = vector.load %arg4[%c5_157, %c0_158, %c0_159] : memref<9x4x4xf32, #tpu.memory_space<vmem>>, vector<1x4x4xf32>
    %170 = vector.shape_cast %169 : vector<1x4x4xf32> to vector<4x4xf32>
    %cst_160 = arith.constant dense<0.000000e+00> : vector<256x4xf32>
    %171 = tpu.matmul %168, %170, %cst_160 {dimension_numbers = #tpu.dot_dimension_numbers<[1], [0], [0], [1], [0, 0, 1, 1], [], []>} : vector<256x4xf32>, vector<4x4xf32>, vector<256x4xf32> -> vector<256x4xf32>
    %172 = arith.addf %166, %171 : vector<256x4xf32>
    %c2_161 = arith.constant 2 : index
    %c0_162 = arith.constant 0 : index
    %c0_163 = arith.constant 0 : index
    %173 = vector.load %arg7[%c2_161, %c0_162, %c0_163] : memref<18x18x4xf32, #tpu.memory_space<vmem>>, vector<16x16x4xf32>
    %174 = vector.shape_cast %173 : vector<16x16x4xf32> to vector<256x4xf32>
    %c6_164 = arith.constant 6 : index
    %c0_165 = arith.constant 0 : index
    %c0_166 = arith.constant 0 : index
    %175 = vector.load %arg4[%c6_164, %c0_165, %c0_166] : memref<9x4x4xf32, #tpu.memory_space<vmem>>, vector<1x4x4xf32>
    %176 = vector.shape_cast %175 : vector<1x4x4xf32> to vector<4x4xf32>
    %cst_167 = arith.constant dense<0.000000e+00> : vector<256x4xf32>
    %177 = tpu.matmul %174, %176, %cst_167 {dimension_numbers = #tpu.dot_dimension_numbers<[1], [0], [0], [1], [0, 0, 1, 1], [], []>} : vector<256x4xf32>, vector<4x4xf32>, vector<256x4xf32> -> vector<256x4xf32>
    %178 = arith.addf %172, %177 : vector<256x4xf32>
    %c2_168 = arith.constant 2 : index
    %c1_169 = arith.constant 1 : index
    %c0_170 = arith.constant 0 : index
    %179 = vector.load %arg7[%c2_168, %c1_169, %c0_170] : memref<18x18x4xf32, #tpu.memory_space<vmem>>, vector<16x16x4xf32>
    %180 = vector.shape_cast %179 : vector<16x16x4xf32> to vector<256x4xf32>
    %c7_171 = arith.constant 7 : index
    %c0_172 = arith.constant 0 : index
    %c0_173 = arith.constant 0 : index
    %181 = vector.load %arg4[%c7_171, %c0_172, %c0_173] : memref<9x4x4xf32, #tpu.memory_space<vmem>>, vector<1x4x4xf32>
    %182 = vector.shape_cast %181 : vector<1x4x4xf32> to vector<4x4xf32>
    %cst_174 = arith.constant dense<0.000000e+00> : vector<256x4xf32>
    %183 = tpu.matmul %180, %182, %cst_174 {dimension_numbers = #tpu.dot_dimension_numbers<[1], [0], [0], [1], [0, 0, 1, 1], [], []>} : vector<256x4xf32>, vector<4x4xf32>, vector<256x4xf32> -> vector<256x4xf32>
    %184 = arith.addf %178, %183 : vector<256x4xf32>
    %c2_175 = arith.constant 2 : index
    %c2_176 = arith.constant 2 : index
    %c0_177 = arith.constant 0 : index
    %185 = vector.load %arg7[%c2_175, %c2_176, %c0_177] : memref<18x18x4xf32, #tpu.memory_space<vmem>>, vector<16x16x4xf32>
    %186 = vector.shape_cast %185 : vector<16x16x4xf32> to vector<256x4xf32>
    %c8_178 = arith.constant 8 : index
    %c0_179 = arith.constant 0 : index
    %c0_180 = arith.constant 0 : index
    %187 = vector.load %arg4[%c8_178, %c0_179, %c0_180] : memref<9x4x4xf32, #tpu.memory_space<vmem>>, vector<1x4x4xf32>
    %188 = vector.shape_cast %187 : vector<1x4x4xf32> to vector<4x4xf32>
    %cst_181 = arith.constant dense<0.000000e+00> : vector<256x4xf32>
    %189 = tpu.matmul %186, %188, %cst_181 {dimension_numbers = #tpu.dot_dimension_numbers<[1], [0], [0], [1], [0, 0, 1, 1], [], []>} : vector<256x4xf32>, vector<4x4xf32>, vector<256x4xf32> -> vector<256x4xf32>
    %190 = arith.addf %184, %189 : vector<256x4xf32>
    %c0_182 = arith.constant 0 : index
    %c0_183 = arith.constant 0 : index
    %191 = vector.load %arg5[%c0_182, %c0_183] : memref<1x4xf32, #tpu.memory_space<vmem>>, vector<1x4xf32>
    %192 = vector.broadcast %191 : vector<1x4xf32> to vector<256x4xf32>
    %193 = arith.addf %190, %192 : vector<256x4xf32>
    %cst_184 = arith.constant dense<0.000000e+00> : vector<4xf32>
    %194 = vector.multi_reduction <add>, %193, %cst_184 [0] : vector<256x4xf32> to vector<4xf32>
    %195 = vector.shape_cast %194 : vector<4xf32> to vector<1x4xf32>
    %cst_185 = arith.constant 2.560000e+02 : f32
    %196 = vector.broadcast %cst_185 : f32 to vector<1x4xf32>
    %197 = arith.divf %195, %196 : vector<1x4xf32>
    %198 = vector.broadcast %197 : vector<1x4xf32> to vector<256x4xf32>
    %199 = arith.subf %193, %198 : vector<256x4xf32>
    %200 = arith.mulf %199, %199 : vector<256x4xf32>
    %cst_186 = arith.constant dense<0.000000e+00> : vector<4xf32>
    %201 = vector.multi_reduction <add>, %200, %cst_186 [0] : vector<256x4xf32> to vector<4xf32>
    %202 = vector.shape_cast %201 : vector<4xf32> to vector<1x4xf32>
    %cst_187 = arith.constant 2.560000e+02 : f32
    %203 = vector.broadcast %cst_187 : f32 to vector<1x4xf32>
    %204 = arith.divf %202, %203 : vector<1x4xf32>
    %205 = vector.broadcast %197 : vector<1x4xf32> to vector<256x4xf32>
    %206 = arith.subf %193, %205 : vector<256x4xf32>
    %cst_188 = arith.constant 9.99999974E-6 : f32
    %207 = vector.broadcast %cst_188 : f32 to vector<1x4xf32>
    %208 = arith.addf %204, %207 : vector<1x4xf32>
    %209 = math.rsqrt %208 : vector<1x4xf32>
    %210 = vector.broadcast %209 : vector<1x4xf32> to vector<256x4xf32>
    %211 = arith.mulf %206, %210 : vector<256x4xf32>
    %212 = arith.addf %2, %211 : vector<256x4xf32>
    %213 = tpu.transpose %212, [1, 0] : vector<256x4xf32> -> vector<4x256xf32>
    %c0_189 = arith.constant 0 : index
    %c0_190 = arith.constant 0 : index
    %c0_191 = arith.constant 0 : index
    %214 = vector.load %arg6[%c0_189, %c0_190, %c0_191] : memref<1x4x256xf32, #tpu.memory_space<vmem>>, vector<1x4x256xf32>
    %215 = vector.shape_cast %214 : vector<1x4x256xf32> to vector<4x256xf32>
    %216 = vector.shape_cast %213 : vector<4x256xf32> to vector<1x4x256xf32>
    tpu.vector_store %arg6[%c0_189, %c0_190, %c0_191], %216 {strides = array<i32>} : memref<1x4x256xf32, #tpu.memory_space<vmem>>, vector<1x4x256xf32>,
    return
  }
  func.func @transform_0(%arg0: i32) -> (i32, i32, i32) {
    %c0_i32 = arith.constant 0 : i32
    %c0_i32_0 = arith.constant 0 : i32
    %c0_i32_1 = arith.constant 0 : i32
    return %arg0, %c0_i32, %c0_i32_0 : i32, i32, i32
  }
  func.func @transform_1(%arg0: i32) -> (i32, i32, i32) {
    %c0_i32 = arith.constant 0 : i32
    %c0_i32_0 = arith.constant 0 : i32
    %c0_i32_1 = arith.constant 0 : i32
    %c0_i32_2 = arith.constant 0 : i32
    return %c0_i32, %c0_i32_0, %c0_i32_1 : i32, i32, i32
  }
  func.func @transform_2(%arg0: i32) -> (i32, i32) {
    %c0_i32 = arith.constant 0 : i32
    %c0_i32_0 = arith.constant 0 : i32
    %c0_i32_1 = arith.constant 0 : i32
    return %c0_i32, %c0_i32_0 : i32, i32
  }
  func.func @transform_3(%arg0: i32) -> (i32, i32, i32) {
    %c0_i32 = arith.constant 0 : i32
    %c0_i32_0 = arith.constant 0 : i32
    %c0_i32_1 = arith.constant 0 : i32
    %c0_i32_2 = arith.constant 0 : i32
    return %c0_i32, %c0_i32_0, %c0_i32_1 : i32, i32, i32
  }
  func.func @transform_4(%arg0: i32) -> (i32, i32) {
    %c0_i32 = arith.constant 0 : i32
    %c0_i32_0 = arith.constant 0 : i32
    %c0_i32_1 = arith.constant 0 : i32
    return %c0_i32, %c0_i32_0 : i32, i32
  }
  func.func @transform_5(%arg0: i32) -> (i32, i32, i32) {
    %c0_i32 = arith.constant 0 : i32
    %c0_i32_0 = arith.constant 0 : i32
    %c0_i32_1 = arith.constant 0 : i32
    return %arg0, %c0_i32, %c0_i32_0 : i32, i32, i32
  }
}

</mosaic_0001>

<bundles_post_ra>
// kernel: tpu_custom_call.1
= control target key start
LH: loop header
LB: loop body
LE: loop exit
PB: predicated region body
PF: predicated region fallthrough
CT: control target
= control target key end

     0   :  { %10 = vsyncpa [#allocation4], 0  ;;  %s15812_s0 = inlined_call_operand.vmem [shape: f32[2,4,256], index: 0, kind: input, shape index: {}]   ;;  %s15813_s1 = inlined_call_operand.vmem [shape: f32[9,4,4], index: 1, kind: input, shape index: {}]   ;;  %s15814_s2 = inlined_call_operand.vmem [shape: f32[1,4], index: 2, kind: input, shape index: {}]   ;;  %s15815_s3 = inlined_call_operand.vmem [shape: f32[9,4,4], index: 3, kind: input, shape index: {}]   ;;  %s15816_s4 = inlined_call_operand.vmem [shape: f32[1,4], index: 4, kind: input, shape index: {}]   ;;  %s15817_s5 = inlined_call_operand.hbm [shape: f32[2,4,256], index: 5, kind: output, shape index: {}]  }
   0x1   :  { %12 = vsyncpa [#allocation4 + $0x1], 0  ;;  %s11900_s18 = smov 0   ;;  %s11902_s19 = smov 0  }
   0x2   :  { %s11904_s20 = smov 0   ;;  %s11906_s21 = smov 0  }
   0x3 LB: > { %s11921_s22 = sadd.s32 4294967295, %s11866_s21   ;;  %s8997_s23 = sadd.s32 4294967294, %s11866_s21   ;;  %s11866_s21 = sphi %s11906_s21, %s17000_s21   ;;  %s11862_s20 = sphi %s11904_s20, %s16999_s20   ;;  %s11858_s19 = sphi %s11902_s19, %s16998_s19   ;;  %s11854_s18 = sphi %s11900_s18, %s16997_s18  }
   0x4   : > { %s11925_s24 = sadd.s32 1, %s11866_s21   ;;  %s135_s25 = sadd.s32 1, %s11862_s20 }
   0x5   : > { %s132_s26 = ssub.s32 %s11866_s21, %s11925_s24  ;;  %p145_p0 = scmp.ne.s32.totalorder %s11862_s20, %s11858_s19 }
   0x6   : > { %p133_p1 = scmp.eq.s32.totalorder %s132_s26, 0  ;;  %p146_p2 = scmp.eq.s32.totalorder %s11921_s22, 1 }
   0x7   : > { %p151_p3 = scmp.ne.s32.totalorder %s11858_s19, %s11854_s18  ;;  %p152_p4 = scmp.eq.s32.totalorder %s8997_s23, 1 }
   0x8   : > { %s11936_s27 = scalar_select %p133_p1, %s11862_s20, %s135_s25  }
   0x9   : > { %p11938_p5 = por %p146_p2, %p145_p0  ;;  %p11942_p6 = por %p152_p4, %p151_p3 }
   0xa   : > { %p9000_p7 = scmp.ge.s32.totalorder %s11866_s21, 1  ;;  %p190_p8 = scmp.lt.s32.totalorder %s11866_s21, 3 }
   0xc   : > { %p191_p9 = pnand %p9000_p7, %p190_p8 }
   0xe   : > { %194 = sbr.rel (%p191_p9) target bundleno = 2514 (0x9d2), region = 40 }
  0x15   : > { %p218_p10 = scmp.lt.s32.totalorder %s11921_s22, 1  ;;  %v9004_v1 = vld [vmem:[%s15813_s1 + $0x4] sm:$0xf]  ;;  %vm15908_vm0 = vcmask 1043456   ;;  %v435_v3 = vld [vmem:[%s15813_s1] sm:$0xf] }
  0x16   : > { %10217 = vmatprep.subr.msk.mxu0 %vm15908_vm0, %v9004_v1  ;;  %vm15909_vm1 = vcmask 31744   ;;  %vm15907_vm2 = vcmask 24576   ;;  %v11994_v14 = vld [vmem:[%s15813_s1 + $0x8] sm:$0xf]  ;;  %s215_s26 = sand.u32 1, %s11858_s19  }
  0x17   : > { %s219_s30 = scalar_select %p218_p10, %s11921_s22, 1  ;;  %10218 = vmatpush3.msk.msra.mxu0 %vm15908_vm0, %v9004_v1 }
  0x18   : > { %10267 = vmatprep.subr.msk.mxu0 %vm15908_vm0, %v435_v3  ;;  %s8924_s12 = scalar_lea.sflag [#allocation4], %s215_s26 }
  0x19   : > { %s9621_s6 = sshll.u32 %s219_s30, 3  ;;  %s9001_s30 = sshll.u32 %s215_s26, 3 }
  0x1a   : > { %s222_s9 = scalar_lea.vmem %s15812_s0, %s9621_s6  ;;  %s9622_s6 = sshll.u32 %s11921_s22, 7 }
  0x1b   : > { %v223_v0 = vld [vmem:[%s222_s9] sm:$0xff]  ;;  %s217_s7 = scalar_lea.vmem [#allocation3], %s9001_s30  ;;  %s15770_s11 = scalar_lea.hbm %s15817_s5, %s9622_s6 }
  0x1c   : > { %227 = vxpose.xlu0.b32.start.end [1/1] (short) %v223_v0, 128  ;;  %v225_v2 = vcombine.high %v223_v0, %v223_v0  ;;  %s8938_s8 = sshll.u32 %s217_s7, 4  ;;  %s11869_s22 = smov [#allocation3]   ;;  %s15772_s8 = int_to_ptr.vmem [resolvable:$true] %s8938_s8 }
  0x1d   : > { %s11804_s13 = scalar_lea.vmem %s15772_s8, 128  ;;  %s11808_s14 = sshll.u32 %s11869_s22, 4  ;;  %s11809_s14 = int_to_ptr.vmem [resolvable:$false] %s11808_s14 }
  0x1e   : > { %p11805_p11 = scmp.ne.s32.totalorder %s15772_s8, %s11804_s13  ;;  %s11810_s15 = scalar_lea.vmem %s11809_s14, 256 }
  0x1f   : > { %p11811_p0 = scmp.lt.s32.totalorder %s15772_s8, %s11809_s14  ;;  %p11812_p1 = scmp.lt.s32.totalorder %s11810_s15, %s11804_s13 }
  0x20   : > { %p11806_p12 = pnand %p11805_p11, %p11938_p5 }
  0x21   : > { %p11813_p2 = por %p11812_p1, %p11811_p0 }
  0x22   : > { %p11807_p13 = pneg %p11806_p12 }
  0x24   : > { %p11814_p3 = pnand %p11813_p2, %p11807_p13 }
  0x59   : > { %259 = vxpose.xlu0.b32.start.end [1/1] (short) %v225_v2, 128 }
  0x9c   : > { %v11962_v4 = vpop.trf.xlu0 }
  0x9d   : > { %16060 = vst [vmem:[#allocation6_spill] sm:$0xff] %v11962_v4  ;;  %293 = vst.msk [vmem:[#allocation2 + $0x19] sm:$0xff] %vm15909_vm1, %v11962_v4  ;;  %v12399_v4 = vld [vmem:[%s15813_s1 + $0x10] sm:$0xf] }
  0xa0   : > { %v11966_v5 = vpop.trf.xlu0 }
  0xa1   : > { %16061 = vst [vmem:[#allocation7_spill] sm:$0xff] %v11966_v5  ;;  %294 = vst.msk [vmem:[#allocation2 + $0x21] sm:$0xff] %vm15909_vm1, %v11966_v5 }
  0xa4   : > { %v331_v6 = vld [vmem:[#allocation2 + $0x1a] sm:$0x1]  ;;  %v11970_v7 = vpop.trf.xlu0 }
  0xa5   : > { %16062 = vst [vmem:[#allocation8_spill] sm:$0xff] %v11970_v7  ;;  %350 = vst.msk [vmem:[#allocation2 + $0x18] sm:$0x1] %vm15907_vm2, %v331_v6  ;;  %v12003_v19 = vld [vmem:[#allocation2 + $0x19] sm:$0xff] }
  0xa6   : > { %295 = vst.msk [vmem:[#allocation2 + $0x31] sm:$0xff] %vm15909_vm1, %v11970_v7  ;;  %325 = vst.msk [vmem:[#allocation2 + $0x1] sm:$0xff] %vm15909_vm1, %v11970_v7 }
  0xa8   : > { %v368_v8 = vld [vmem:[#allocation2 + $0x27] sm:$0x1]  ;;  %v11977_v9 = vpop.trf.xlu0 }
  0xa9   : > { %16063 = vst [vmem:[#allocation9_spill] sm:$0xff] %v11977_v9  ;;  %386 = vst.msk [vmem:[#allocation2 + $0x29] sm:$0x1] %vm15907_vm2, %v368_v8  ;;  %v12012_v22 = vld [vmem:[#allocation2 + $0x21] sm:$0xff] }
  0xaa   : > { %296 = vst.msk [vmem:[#allocation2 + $0x39] sm:$0xff] %vm15909_vm1, %v11977_v9  ;;  %326 = vst.msk [vmem:[#allocation2 + $0x9] sm:$0xff] %vm15909_vm1, %v11977_v9 }
  0xac   : > { %v11984_v12 = vpop.trf.xlu0 }
  0xad   : > { %v330_v10 = vld [vmem:[#allocation2 + $0x2] sm:$0x1]  ;;  %v332_v11 = vld [vmem:[#allocation2 + $0x32] sm:$0x1]  ;;  %16064 = vst [vmem:[#allocation10_spill] sm:$0xff] %v11984_v12  ;;  %297 = vst.msk [vmem:[#allocation2 + $0x49] sm:$0xff] %vm15909_vm1, %v11984_v12 }
  0xae   : > { %v436_v13 = vld [vmem:[#allocation2 + $0x1] sm:$0xff]  ;;  %349 = vst.msk [vmem:[#allocation2] sm:$0x1] %vm15907_vm2, %v330_v10  ;;  %351 = vst.msk [vmem:[#allocation2 + $0x30] sm:$0x1] %vm15907_vm2, %v332_v11  ;;  %v12019_v23 = vld [vmem:[#allocation2 + $0x31] sm:$0xff] }
  0xaf   : > { %10219 = vmatprep.mubr.msk.f32.mxu0 %vm15909_vm1, %v436_v13 }
  0xb0   : > { %v11996_v17 = vpop.trf.xlu0 }
  0xb1   : > { %v367_v15 = vld [vmem:[#allocation2 + $0xf] sm:$0x1]  ;;  %v369_v16 = vld [vmem:[#allocation2 + $0x3f] sm:$0x1]  ;;  %16065 = vst [vmem:[#allocation11_spill] sm:$0xff] %v11996_v17  ;;  %298 = vst.msk [vmem:[#allocation2 + $0x51] sm:$0xff] %vm15909_vm1, %v11996_v17 }
  0xb2   : > { %v437_v18 = vld [vmem:[#allocation2 + $0x9] sm:$0xff]  ;;  %385 = vst.msk [vmem:[#allocation2 + $0x11] sm:$0x1] %vm15907_vm2, %v367_v15  ;;  %387 = vst.msk [vmem:[#allocation2 + $0x41] sm:$0x1] %vm15907_vm2, %v369_v16  ;;  %v12025_v26 = vld [vmem:[#allocation2 + $0x39] sm:$0xff] }
  0xb3   : > { %10220 = vmatmul.mubr.msk.f32.vlgmr.msra.gmra.mrb[0].mxu0 %vm15909_vm1, %v437_v18  ;;  %v1119_v7 = vld [vmem:[#allocation2 + $0x2] sm:$0xff] }
  0xb4   : > { %10222 = vmatprep.mubr.msk.f32.mxu0 %vm15909_vm1, %v12003_v19  ;;  %10268 = vmatpush3.msk.msra.mxu0 %vm15908_vm0, %v435_v3  ;;  %v333_v20 = vld [vmem:[#allocation2 + $0x4a] sm:$0x1]  ;;  %v12010_v21 = vpop.trf.xlu0 }
  0xb5   : > { %10317 = vmatprep.subr.msk.mxu0 %vm15908_vm0, %v11994_v14  ;;  %16066 = vst [vmem:[#allocation12_spill] sm:$0xff] %v12010_v21  ;;  %352 = vst.msk [vmem:[#allocation2 + $0x48] sm:$0x1] %vm15907_vm2, %v333_v20  ;;  %v12032_v27 = vld [vmem:[#allocation2 + $0x49] sm:$0xff] }
  0xb6   : > { %299 = vst.msk [vmem:[#allocation2 + $0x61] sm:$0xff] %vm15909_vm1, %v12010_v21 }
  0xb7   : > { %10223 = vmatmul.mubr.msk.f32.gmra.mrb[2].mxu0 %vm15909_vm1, %v12012_v22 }
  0xb8   : > { %10225 = vmatprep.mubr.msk.f32.mxu0 %vm15909_vm1, %v12019_v23  ;;  %v370_v24 = vld [vmem:[#allocation2 + $0x57] sm:$0x1]  ;;  %v12023_v25 = vpop.trf.xlu0 }
  0xb9   : > { %16067 = vst [vmem:[#allocation13_spill] sm:$0xff] %v12023_v25  ;;  %388 = vst.msk [vmem:[#allocation2 + $0x59] sm:$0x1] %vm15907_vm2, %v370_v24  ;;  %v12038_v30 = vld [vmem:[#allocation2 + $0x51] sm:$0xff] }
  0xba   : > { %300 = vst.msk [vmem:[#allocation2 + $0x69] sm:$0xff] %vm15909_vm1, %v12023_v25  ;;  %v1120_v5 = vld [vmem:[#allocation2 + $0xa] sm:$0xff] }
  0xbb   : > { %10226 = vmatmul.mubr.msk.f32.gmra.mrb[4].mxu0 %vm15909_vm1, %v12025_v26 }
  0xbc   : > { %10228 = vmatprep.mubr.msk.f32.mxu0 %vm15909_vm1, %v12032_v27  ;;  %v12036_v29 = vpop.trf.xlu0 }
  0xbd   : > { %v334_v28 = vld [vmem:[#allocation2 + $0x62] sm:$0x1]  ;;  %16068 = vst [vmem:[#allocation14_spill] sm:$0xff] %v12036_v29  ;;  %301 = vst.msk [vmem:[#allocation2 + $0x79] sm:$0xff] %vm15909_vm1, %v12036_v29 }
  0xbe   : > { %v12040_v31 = vld [vmem:[#allocation2 + $0x61] sm:$0xff]  ;;  %353 = vst.msk [vmem:[#allocation2 + $0x60] sm:$0x1] %vm15907_vm2, %v334_v28 }
  0xbf   : > { %10229 = vmatmul.mubr.msk.f32.gmra.mrb[6].mxu0 %vm15909_vm1, %v12038_v30 }
  0xc0   : > { %10231 = vmatprep.mubr.msk.f32.mxu0 %vm15909_vm1, %v12040_v31  ;;  %v12049_v33 = vpop.trf.xlu0 }
  0xc1   : > { %v371_v32 = vld [vmem:[#allocation2 + $0x6f] sm:$0x1]  ;;  %16069 = vst [vmem:[#allocation15_spill] sm:$0xff] %v12049_v33  ;;  %302 = vst.msk [vmem:[#allocation2 + $0x81] sm:$0xff] %vm15909_vm1, %v12049_v33 }
  0xc2   : > { %v12051_v34 = vld [vmem:[#allocation2 + $0x69] sm:$0xff]  ;;  %389 = vst.msk [vmem:[#allocation2 + $0x71] sm:$0x1] %vm15907_vm2, %v371_v32 }
  0xc3   : > { %10232 = vmatmul.mubr.msk.f32.gmra.mrb[8].mxu0 %vm15909_vm1, %v12051_v34 }
  0xc4   : > { %v335_v35 = vld [vmem:[#allocation2 + $0x7a] sm:$0x1]  ;;  %v12058_v36 = vpop.trf.xlu0 }
  0xc5   : > { %16070 = vst [vmem:[#allocation16_spill] sm:$0xff] %v12058_v36  ;;  %v12060_v37 = vld [vmem:[#allocation2 + $0x79] sm:$0xff]  ;;  %354 = vst.msk [vmem:[#allocation2 + $0x78] sm:$0x1] %vm15907_vm2, %v335_v35 }
  0xc6   : > { %303 = vst.msk [vmem:[#allocation2 + $0x91] sm:$0xff] %vm15909_vm1, %v12058_v36  ;;  %10234 = vmatprep.mubr.msk.f32.mxu0 %vm15909_vm1, %v12060_v37 }
  0xc8   : > { %v372_v38 = vld [vmem:[#allocation2 + $0x87] sm:$0x1]  ;;  %v12067_v39 = vpop.trf.xlu0 }
  0xc9   : > { %16071 = vst [vmem:[#allocation17_spill] sm:$0xff] %v12067_v39  ;;  %v12069_v40 = vld [vmem:[#allocation2 + $0x81] sm:$0xff]  ;;  %390 = vst.msk [vmem:[#allocation2 + $0x89] sm:$0x1] %vm15907_vm2, %v372_v38 }
  0xca   : > { %304 = vst.msk [vmem:[#allocation2 + $0x99] sm:$0xff] %vm15909_vm1, %v12067_v39  ;;  %10235 = vmatmul.mubr.msk.f32.gmra.mrb[10].mxu0 %vm15909_vm1, %v12069_v40 }
  0xcc   : > { %v12076_v42 = vpop.trf.xlu0 }
  0xcd   : > { %v336_v41 = vld [vmem:[#allocation2 + $0x92] sm:$0x1]  ;;  %16072 = vst [vmem:[#allocation18_spill] sm:$0xff] %v12076_v42  ;;  %305 = vst.msk [vmem:[#allocation2 + $0xa9] sm:$0xff] %vm15909_vm1, %v12076_v42 }
  0xce   : > { %v12078_v43 = vld [vmem:[#allocation2 + $0x91] sm:$0xff]  ;;  %355 = vst.msk [vmem:[#allocation2 + $0x90] sm:$0x1] %vm15907_vm2, %v336_v41 }
  0xcf   : > { %10237 = vmatprep.mubr.msk.f32.mxu0 %vm15909_vm1, %v12078_v43 }
  0xd0   : > { %v12085_v45 = vpop.trf.xlu0 }
  0xd1   : > { %v373_v44 = vld [vmem:[#allocation2 + $0x9f] sm:$0x1]  ;;  %16073 = vst [vmem:[#allocation19_spill] sm:$0xff] %v12085_v45  ;;  %306 = vst.msk [vmem:[#allocation2 + $0xb1] sm:$0xff] %vm15909_vm1, %v12085_v45 }
  0xd2   : > { %v12087_v46 = vld [vmem:[#allocation2 + $0x99] sm:$0xff]  ;;  %391 = vst.msk [vmem:[#allocation2 + $0xa1] sm:$0x1] %vm15907_vm2, %v373_v44 }
  0xd3   : > { %10238 = vmatmul.mubr.msk.f32.gmra.mrb[12].mxu0 %vm15909_vm1, %v12087_v46 }
  0xd4   : > { %v337_v47 = vld [vmem:[#allocation2 + $0xaa] sm:$0x1]  ;;  %v12094_v48 = vpop.trf.xlu0 }
  0xd5   : > { %16074 = vst [vmem:[#allocation20_spill] sm:$0xff] %v12094_v48  ;;  %v12096_v49 = vld [vmem:[#allocation2 + $0xa9] sm:$0xff]  ;;  %356 = vst.msk [vmem:[#allocation2 + $0xa8] sm:$0x1] %vm15907_vm2, %v337_v47 }
  0xd6   : > { %307 = vst.msk [vmem:[#allocation2 + $0xc1] sm:$0xff] %vm15909_vm1, %v12094_v48  ;;  %10240 = vmatprep.mubr.msk.f32.mxu0 %vm15909_vm1, %v12096_v49 }
  0xd8   : > { %v374_v50 = vld [vmem:[#allocation2 + $0xb7] sm:$0x1]  ;;  %v12103_v51 = vpop.trf.xlu0 }
  0xd9   : > { %16075 = vst [vmem:[#allocation21_spill] sm:$0xff] %v12103_v51  ;;  %v12105_v52 = vld [vmem:[#allocation2 + $0xb1] sm:$0xff]  ;;  %392 = vst.msk [vmem:[#allocation2 + $0xb9] sm:$0x1] %vm15907_vm2, %v374_v50 }
  0xda   : > { %308 = vst.msk [vmem:[#allocation2 + $0xc9] sm:$0xff] %vm15909_vm1, %v12103_v51  ;;  %10241 = vmatmul.mubr.msk.f32.gmra.mrb[14].mxu0 %vm15909_vm1, %v12105_v52 }
  0xdc   : > { %v12112_v54 = vpop.trf.xlu0 }
  0xdd   : > { %v338_v53 = vld [vmem:[#allocation2 + $0xc2] sm:$0x1]  ;;  %16076 = vst [vmem:[#allocation22_spill] sm:$0xff] %v12112_v54  ;;  %309 = vst.msk [vmem:[#allocation2 + $0xd9] sm:$0xff] %vm15909_vm1, %v12112_v54 }
  0xde   : > { %v12114_v55 = vld [vmem:[#allocation2 + $0xc1] sm:$0xff]  ;;  %357 = vst.msk [vmem:[#allocation2 + $0xc0] sm:$0x1] %vm15907_vm2, %v338_v53 }
  0xdf   : > { %10243 = vmatprep.mubr.msk.f32.mxu0 %vm15909_vm1, %v12114_v55 }
  0xe0   : > { %v12121_v57 = vpop.trf.xlu0 }
  0xe1   : > { %v375_v56 = vld [vmem:[#allocation2 + $0xcf] sm:$0x1]  ;;  %16077 = vst [vmem:[#allocation23_spill] sm:$0xff] %v12121_v57  ;;  %310 = vst.msk [vmem:[#allocation2 + $0xe1] sm:$0xff] %vm15909_vm1, %v12121_v57 }
  0xe2   : > { %v12123_v58 = vld [vmem:[#allocation2 + $0xc9] sm:$0xff]  ;;  %393 = vst.msk [vmem:[#allocation2 + $0xd1] sm:$0x1] %vm15907_vm2, %v375_v56 }
  0xe3   : > { %10244 = vmatmul.mubr.msk.f32.gmra.mrb[16].mxu0 %vm15909_vm1, %v12123_v58  ;;  %v12325_v57 = vld [vmem:[#allocation2 + $0xc8] sm:$0xff] }
  0xe4   : > { %v339_v59 = vld [vmem:[#allocation2 + $0xda] sm:$0x1]  ;;  %v12130_v60 = vpop.trf.xlu0 }
  0xe5   : > { %16078 = vst [vmem:[#allocation24_spill] sm:$0xff] %v12130_v60  ;;  %v12132_v61 = vld [vmem:[#allocation2 + $0xd9] sm:$0xff]  ;;  %358 = vst.msk [vmem:[#allocation2 + $0xd8] sm:$0x1] %vm15907_vm2, %v339_v59 }
  0xe6   : > { %311 = vst.msk [vmem:[#allocation2 + $0xf1] sm:$0xff] %vm15909_vm1, %v12130_v60  ;;  %10246 = vmatprep.mubr.msk.f32.mxu0 %vm15909_vm1, %v12132_v61  ;;  %v12321_v60 = vld [vmem:[#allocation2 + $0xc0] sm:$0xff] }
  0xe8   : > { %v376_v62 = vld [vmem:[#allocation2 + $0xe7] sm:$0x1]  ;;  %v12139_v63 = vpop.trf.xlu0 }
  0xe9   : > { %16079 = vst [vmem:[#allocation25_spill] sm:$0xff] %v12139_v63  ;;  %v12141_v0 = vld [vmem:[#allocation2 + $0xe1] sm:$0xff]  ;;  %394 = vst.msk [vmem:[#allocation2 + $0xe9] sm:$0x1] %vm15907_vm2, %v376_v62 }
  0xea   : > { %312 = vst.msk [vmem:[#allocation2 + $0xf9] sm:$0xff] %vm15909_vm1, %v12139_v63  ;;  %10247 = vmatmul.mubr.msk.f32.gmra.mrb[18].mxu0 %vm15909_vm1, %v12141_v0  ;;  %v12317_v63 = vld [vmem:[#allocation2 + $0xb0] sm:$0xff]  ;;  %v12337_v48 = vld [vmem:[#allocation2 + $0xe0] sm:$0xff] }
  0xec   : > { %v12148_v2 = vpop.trf.xlu0  ;;  %v12329_v54 = vld [vmem:[#allocation2 + $0xd8] sm:$0xff] }
  0xed   : > { %v340_v1 = vld [vmem:[#allocation2 + $0xf2] sm:$0x1]  ;;  %16080 = vst [vmem:[#allocation26_spill] sm:$0xff] %v12148_v2  ;;  %313 = vst.msk [vmem:[#allocation2 + $0x109] sm:$0xff] %vm15909_vm1, %v12148_v2  ;;  %v12313_v2 = vld [vmem:[#allocation2 + $0xa8] sm:$0xff] }
  0xee   : > { %v12150_v3 = vld [vmem:[#allocation2 + $0xf1] sm:$0xff]  ;;  %359 = vst.msk [vmem:[#allocation2 + $0xf0] sm:$0x1] %vm15907_vm2, %v340_v1 }
  0xef   : > { %10249 = vmatprep.mubr.msk.f32.mxu0 %vm15909_vm1, %v12150_v3 }
  0xf0   : > { %v12157_v8 = vpop.trf.xlu0 }
  0xf1   : > { %v377_v6 = vld [vmem:[#allocation2 + $0xff] sm:$0x1]  ;;  %16081 = vst [vmem:[#allocation27_spill] sm:$0xff] %v12157_v8  ;;  %314 = vst.msk [vmem:[#allocation2 + $0x111] sm:$0xff] %vm15909_vm1, %v12157_v8 }
  0xf2   : > { %v12159_v10 = vld [vmem:[#allocation2 + $0xf9] sm:$0xff]  ;;  %395 = vst.msk [vmem:[#allocation2 + $0x101] sm:$0x1] %vm15907_vm2, %v377_v6 }
  0xf3   : > { %10250 = vmatmul.mubr.msk.f32.gmra.mrb[20].mxu0 %vm15909_vm1, %v12159_v10  ;;  %v12309_v8 = vld [vmem:[#allocation2 + $0x98] sm:$0xff] }
  0xf4   : > { %v341_v11 = vld [vmem:[#allocation2 + $0x10a] sm:$0x1]  ;;  %v12166_v13 = vpop.trf.xlu0  ;;  %v12345_v42 = vld [vmem:[#allocation2 + $0xf8] sm:$0xff] }
  0xf5   : > { %16082 = vst [vmem:[#allocation28_spill] sm:$0xff] %v12166_v13  ;;  %v12168_v15 = vld [vmem:[#allocation2 + $0x109] sm:$0xff]  ;;  %360 = vst.msk [vmem:[#allocation2 + $0x108] sm:$0x1] %vm15907_vm2, %v341_v11 }
  0xf6   : > { %315 = vst.msk [vmem:[#allocation2 + $0x121] sm:$0xff] %vm15909_vm1, %v12166_v13  ;;  %10252 = vmatprep.mubr.msk.f32.mxu0 %vm15909_vm1, %v12168_v15  ;;  %v12305_v13 = vld [vmem:[#allocation2 + $0x90] sm:$0xff] }
  0xf7   : > { %v12341_v45 = vld [vmem:[#allocation2 + $0xf0] sm:$0xff] }
  0xf8   : > { %v378_v16 = vld [vmem:[#allocation2 + $0x117] sm:$0x1]  ;;  %v12175_v18 = vpop.trf.xlu0 }
  0xf9   : > { %16083 = vst [vmem:[#allocation29_spill] sm:$0xff] %v12175_v18  ;;  %v12177_v20 = vld [vmem:[#allocation2 + $0x111] sm:$0xff]  ;;  %396 = vst.msk [vmem:[#allocation2 + $0x119] sm:$0x1] %vm15907_vm2, %v378_v16 }
  0xfa   : > { %316 = vst.msk [vmem:[#allocation2 + $0x129] sm:$0xff] %vm15909_vm1, %v12175_v18  ;;  %10253 = vmatmul.mubr.msk.f32.gmra.mrb[22].mxu0 %vm15909_vm1, %v12177_v20  ;;  %v12301_v18 = vld [vmem:[#allocation2 + $0x80] sm:$0xff]  ;;  %v12358_v33 = vld [vmem:[#allocation2 + $0x110] sm:$0xff] }
  0xfc   : > { %v12184_v28 = vpop.trf.xlu0  ;;  %v12349_v39 = vld [vmem:[#allocation2 + $0x108] sm:$0xff] }
  0xfd   : > { %v342_v24 = vld [vmem:[#allocation2 + $0x122] sm:$0x1]  ;;  %16084 = vst [vmem:[#allocation30_spill] sm:$0xff] %v12184_v28  ;;  %317 = vst.msk [vmem:[#allocation2 + $0x139] sm:$0xff] %vm15909_vm1, %v12184_v28  ;;  %v12297_v28 = vld [vmem:[#allocation2 + $0x78] sm:$0xff] }
  0xfe   : > { %v12186_v32 = vld [vmem:[#allocation2 + $0x121] sm:$0xff]  ;;  %361 = vst.msk [vmem:[#allocation2 + $0x120] sm:$0x1] %vm15907_vm2, %v342_v24 }
  0xff   : > { %10255 = vmatprep.mubr.msk.f32.mxu0 %vm15909_vm1, %v12186_v32 }
 0x100   : > { %v12193_v38 = vpop.trf.xlu0 }
 0x101   : > { %v379_v35 = vld [vmem:[#allocation2 + $0x12f] sm:$0x1]  ;;  %16085 = vst [vmem:[#allocation31_spill] sm:$0xff] %v12193_v38  ;;  %318 = vst.msk [vmem:[#allocation2 + $0x141] sm:$0xff] %vm15909_vm1, %v12193_v38 }
 0x102   : > { %v12195_v41 = vld [vmem:[#allocation2 + $0x129] sm:$0xff]  ;;  %397 = vst.msk [vmem:[#allocation2 + $0x131] sm:$0x1] %vm15907_vm2, %v379_v35 }
 0x103   : > { %10256 = vmatmul.mubr.msk.f32.gmra.mrb[24].mxu0 %vm15909_vm1, %v12195_v41  ;;  %v12293_v38 = vld [vmem:[#allocation2 + $0x68] sm:$0xff] }
 0x104   : > { %v343_v44 = vld [vmem:[#allocation2 + $0x13a] sm:$0x1]  ;;  %v12202_v47 = vpop.trf.xlu0  ;;  %v12366_v25 = vld [vmem:[#allocation2 + $0x128] sm:$0xff] }
 0x105   : > { %16086 = vst [vmem:[#allocation32_spill] sm:$0xff] %v12202_v47  ;;  %v12204_v50 = vld [vmem:[#allocation2 + $0x139] sm:$0xff]  ;;  %362 = vst.msk [vmem:[#allocation2 + $0x138] sm:$0x1] %vm15907_vm2, %v343_v44 }
 0x106   : > { %319 = vst.msk [vmem:[#allocation2 + $0x151] sm:$0xff] %vm15909_vm1, %v12202_v47  ;;  %10258 = vmatprep.mubr.msk.f32.mxu0 %vm15909_vm1, %v12204_v50  ;;  %v12289_v47 = vld [vmem:[#allocation2 + $0x60] sm:$0xff] }
 0x107   : > { %v12362_v29 = vld [vmem:[#allocation2 + $0x120] sm:$0xff] }
 0x108   : > { %v380_v53 = vld [vmem:[#allocation2 + $0x147] sm:$0x1]  ;;  %v12211_v56 = vpop.trf.xlu0 }
 0x109   : > { %16087 = vst [vmem:[#allocation33_spill] sm:$0xff] %v12211_v56  ;;  %v12213_v59 = vld [vmem:[#allocation2 + $0x141] sm:$0xff]  ;;  %398 = vst.msk [vmem:[#allocation2 + $0x149] sm:$0x1] %vm15907_vm2, %v380_v53 }
 0x10a   : > { %320 = vst.msk [vmem:[#allocation2 + $0x159] sm:$0xff] %vm15909_vm1, %v12211_v56  ;;  %10259 = vmatmul.mubr.msk.f32.gmra.mrb[26].mxu0 %vm15909_vm1, %v12213_v59  ;;  %v12261_v56 = vld [vmem:[#allocation2 + $0x18] sm:$0xff] }
 0x10c   : > { %v12220_v1 = vpop.trf.xlu0  ;;  %v12370_v21 = vld [vmem:[#allocation2 + $0x138] sm:$0xff] }
 0x10d   : > { %v344_v62 = vld [vmem:[#allocation2 + $0x152] sm:$0x1]  ;;  %16088 = vst [vmem:[#allocation34_spill] sm:$0xff] %v12220_v1  ;;  %321 = vst.msk [vmem:[#allocation2 + $0x169] sm:$0xff] %vm15909_vm1, %v12220_v1 }
 0x10e   : > { %v12222_v6 = vld [vmem:[#allocation2 + $0x151] sm:$0xff]  ;;  %363 = vst.msk [vmem:[#allocation2 + $0x150] sm:$0x1] %vm15907_vm2, %v344_v62 }
 0x10f   : > { %328 = vst.msk [vmem:[#allocation2 + $0x199] sm:$0xff] %vm15909_vm1, %v12220_v1  ;;  %10261 = vmatprep.mubr.msk.f32.mxu0 %vm15909_vm1, %v12222_v6 }
 0x110   : > { %v12231_v16 = vpop.trf.xlu0 }
 0x111   : > { %v381_v11 = vld [vmem:[#allocation2 + $0x15f] sm:$0x1]  ;;  %16089 = vst [vmem:[#allocation35_spill] sm:$0xff] %v12231_v16  ;;  %322 = vst.msk [vmem:[#allocation2 + $0x171] sm:$0xff] %vm15909_vm1, %v12231_v16 }
 0x112   : > { %v12233_v24 = vld [vmem:[#allocation2 + $0x159] sm:$0xff]  ;;  %399 = vst.msk [vmem:[#allocation2 + $0x161] sm:$0x1] %vm15907_vm2, %v381_v11 }
 0x113   : > { %329 = vst.msk [vmem:[#allocation2 + $0x1a1] sm:$0xff] %vm15909_vm1, %v12231_v16  ;;  %10262 = vmatmul.mubr.msk.f32.gmra.mrb[28].mxu0 %vm15909_vm1, %v12233_v24  ;;  %v403_v16 = vld [vmem:[#allocation2] sm:$0xff]  ;;  %v12383_v12 = vld [vmem:[#allocation2 + $0x158] sm:$0xff] }
 0x114   : > { %v345_v35 = vld [vmem:[#allocation2 + $0x16a] sm:$0x1]  ;;  %v12333_v51 = vpop.trf.xlu0 }
 0x115   : > { %v12242_v53 = vld [vmem:[#allocation2 + $0x169] sm:$0xff]  ;;  %364 = vst.msk [vmem:[#allocation2 + $0x168] sm:$0x1] %vm15907_vm2, %v345_v35  ;;  %16092 = vst [vmem:[#allocation38_spill] sm:$0xff] %v12333_v51 }
 0x116   : > { %v347_v44 = vld [vmem:[#allocation2 + $0x19a] sm:$0x1]  ;;  %16090 = vst [vmem:[#allocation36_spill] sm:$0xff] %v12242_v53  ;;  %10264 = vmatprep.mubr.msk.f32.mxu0 %vm15909_vm1, %v12242_v53  ;;  %v404_v35 = vld [vmem:[#allocation2 + $0x8] sm:$0xff]  ;;  %323 = vst.msk [vmem:[#allocation2 + $0x181] sm:$0xff] %vm15909_vm1, %v12333_v51 }
 0x117   : > { %366 = vst.msk [vmem:[#allocation2 + $0x198] sm:$0x1] %vm15907_vm2, %v347_v44  ;;  %v12258_v44 = vld [vmem:[%s15813_s1 + $0xc] sm:$0xf]  ;;  %v12379_v17 = vld [vmem:[#allocation2 + $0x150] sm:$0xff] }
 0x118   : > { %v382_v62 = vld [vmem:[#allocation2 + $0x177] sm:$0x1]  ;;  %v12353_v36 = vpop.trf.xlu0 }
 0x119   : > { %v12248_v1 = vld [vmem:[#allocation2 + $0x171] sm:$0xff]  ;;  %400 = vst.msk [vmem:[#allocation2 + $0x179] sm:$0x1] %vm15907_vm2, %v382_v62  ;;  %16093 = vst [vmem:[#allocation39_spill] sm:$0xff] %v12353_v36 }
 0x11a   : > { %v384_v11 = vld [vmem:[#allocation2 + $0x1a7] sm:$0x1]  ;;  %16091 = vst [vmem:[#allocation37_spill] sm:$0xff] %v12248_v1  ;;  %10265 = vmatmul.mubr.msk.f32.gmra.mrb[30].mxu0 %vm15909_vm1, %v12248_v1  ;;  %v12273_v62 = vld [vmem:[#allocation2 + $0x30] sm:$0xff]  ;;  %324 = vst.msk [vmem:[#allocation2 + $0x189] sm:$0xff] %vm15909_vm1, %v12353_v36 }
 0x11b   : > { %402 = vst.msk [vmem:[#allocation2 + $0x1a9] sm:$0x1] %vm15907_vm2, %v384_v11  ;;  %10269 = vmatprep.mubr.msk.f32.mxu0 %vm15909_vm1, %v403_v16  ;;  %v12269_v16 = vld [vmem:[#allocation2 + $0x20] sm:$0xff]  ;;  %v12277_v11 = vld [vmem:[#allocation2 + $0x38] sm:$0xff] }
 0x11c   : > { %v12375_v36 = vld [vmem:[#allocation2 + $0x140] sm:$0xff]  ;;  %v12387_v9 = vld [vmem:[#allocation2 + $0x168] sm:$0xff]  ;;  %v12414_v53 = vld [vmem:[#allocation2 + $0x32] sm:$0xff] }
 0x11d   : > { %v346_v51 = vld [vmem:[#allocation2 + $0x182] sm:$0x1]  ;;  %v12402_v1 = vld [vmem:[#allocation2 + $0x1a] sm:$0xff]  ;;  %16096 = vst [vmem:[#allocation42_spill] sm:$0xff] %v12414_v53 }
 0x11e   : > { %10270 = vmatmul.mubr.msk.f32.vlgmr.msra.gmra.mrb[0].mxu0 %vm15909_vm1, %v404_v35  ;;  %v12285_v35 = vld [vmem:[#allocation2 + $0x50] sm:$0xff]  ;;  %365 = vst.msk [vmem:[#allocation2 + $0x180] sm:$0x1] %vm15907_vm2, %v346_v51  ;;  %16094 = vst [vmem:[#allocation40_spill] sm:$0xff] %v12402_v1 }
 0x11f   : > { %10318 = vmatpush3.msk.msra.mxu0 %vm15908_vm0, %v11994_v14  ;;  %10272 = vmatprep.mubr.msk.f32.mxu0 %vm15909_vm1, %v12261_v56  ;;  %v12281_v14 = vld [vmem:[#allocation2 + $0x48] sm:$0xff] }
 0x120   : > { %10367 = vmatprep.subr.msk.mxu0 %vm15908_vm0, %v12258_v44 }
 0x121   : > { %v383_v51 = vld [vmem:[#allocation2 + $0x18f] sm:$0x1] }
 0x122   : > { %10273 = vmatmul.mubr.msk.f32.gmra.mrb[2].mxu0 %vm15909_vm1, %v12269_v16  ;;  %401 = vst.msk [vmem:[#allocation2 + $0x191] sm:$0x1] %vm15907_vm2, %v383_v51  ;;  %v12391_v51 = vld [vmem:[#allocation2 + $0x170] sm:$0xff] }
 0x123   : > { %10275 = vmatprep.mubr.msk.f32.mxu0 %vm15909_vm1, %v12273_v62 }
 0x126   : > { %10276 = vmatmul.mubr.msk.f32.gmra.mrb[4].mxu0 %vm15909_vm1, %v12277_v11 }
 0x127   : > { %10278 = vmatprep.mubr.msk.f32.mxu0 %vm15909_vm1, %v12281_v14 }
 0x12a   : > { %10279 = vmatmul.mubr.msk.f32.gmra.mrb[6].mxu0 %vm15909_vm1, %v12285_v35 }
 0x12b   : > { %10281 = vmatprep.mubr.msk.f32.mxu0 %vm15909_vm1, %v12289_v47 }
 0x12e   : > { %10282 = vmatmul.mubr.msk.f32.gmra.mrb[8].mxu0 %vm15909_vm1, %v12293_v38 }
 0x12f   : > { %10284 = vmatprep.mubr.msk.f32.mxu0 %vm15909_vm1, %v12297_v28 }
 0x132   : > { %10285 = vmatmul.mubr.msk.f32.gmra.mrb[10].mxu0 %vm15909_vm1, %v12301_v18 }
 0x133   : > { %10287 = vmatprep.mubr.msk.f32.mxu0 %vm15909_vm1, %v12305_v13 }
 0x136   : > { %10288 = vmatmul.mubr.msk.f32.gmra.mrb[12].mxu0 %vm15909_vm1, %v12309_v8 }
 0x137   : > { %10290 = vmatprep.mubr.msk.f32.mxu0 %vm15909_vm1, %v12313_v2 }
 0x13a   : > { %10291 = vmatmul.mubr.msk.f32.gmra.mrb[14].mxu0 %vm15909_vm1, %v12317_v63 }
 0x13b   : > { %10293 = vmatprep.mubr.msk.f32.mxu0 %vm15909_vm1, %v12321_v60 }
 0x13e   : > { %10294 = vmatmul.mubr.msk.f32.gmra.mrb[16].mxu0 %vm15909_vm1, %v12325_v57 }
 0x13f   : > { %10296 = vmatprep.mubr.msk.f32.mxu0 %vm15909_vm1, %v12329_v54 }
 0x142   : > { %10297 = vmatmul.mubr.msk.f32.gmra.mrb[18].mxu0 %vm15909_vm1, %v12337_v48 }
 0x143   : > { %10299 = vmatprep.mubr.msk.f32.mxu0 %vm15909_vm1, %v12341_v45 }
 0x146   : > { %10300 = vmatmul.mubr.msk.f32.gmra.mrb[20].mxu0 %vm15909_vm1, %v12345_v42 }
 0x147   : > { %10302 = vmatprep.mubr.msk.f32.mxu0 %vm15909_vm1, %v12349_v39 }
 0x14a   : > { %10303 = vmatmul.mubr.msk.f32.gmra.mrb[22].mxu0 %vm15909_vm1, %v12358_v33 }
 0x14b   : > { %10305 = vmatprep.mubr.msk.f32.mxu0 %vm15909_vm1, %v12362_v29 }
 0x14e   : > { %10306 = vmatmul.mubr.msk.f32.gmra.mrb[24].mxu0 %vm15909_vm1, %v12366_v25 }
 0x14f   : > { %10308 = vmatprep.mubr.msk.f32.mxu0 %vm15909_vm1, %v12370_v21 }
 0x152   : > { %10309 = vmatmul.mubr.msk.f32.gmra.mrb[26].mxu0 %vm15909_vm1, %v12375_v36 }
 0x153   : > { %10311 = vmatprep.mubr.msk.f32.mxu0 %vm15909_vm1, %v12379_v17 }
 0x156   : > { %10312 = vmatmul.mubr.msk.f32.gmra.mrb[28].mxu0 %vm15909_vm1, %v12383_v12 }
 0x157   : > { %10314 = vmatprep.mubr.msk.f32.mxu0 %vm15909_vm1, %v12387_v9 }
 0x15a   : > { %10315 = vmatmul.mubr.msk.f32.gmra.mrb[30].mxu0 %vm15909_vm1, %v12391_v51 }
 0x15b   : > { %10319 = vmatprep.mubr.msk.f32.mxu0 %vm15909_vm1, %v1119_v7  ;;  %v12410_v7 = vld [vmem:[#allocation2 + $0x22] sm:$0xff] }
 0x15c   : > { %16095 = vst [vmem:[#allocation41_spill] sm:$0xff] %v12410_v7 }
 0x15e   : > { %10320 = vmatmul.mubr.msk.f32.vlgmr.msra.gmra.mrb[0].mxu0 %vm15909_vm1, %v1120_v5  ;;  %v12418_v5 = vld [vmem:[#allocation2 + $0x3a] sm:$0xff] }
 0x15f   : > { %10368 = vmatpush3.msk.msra.mxu0 %vm15908_vm0, %v12258_v44  ;;  %10322 = vmatprep.mubr.msk.f32.mxu0 %vm15909_vm1, %v12402_v1  ;;  %16097 = vst [vmem:[#allocation43_spill] sm:$0xff] %v12418_v5  ;;  %v12422_v44 = vld [vmem:[#allocation2 + $0x4a] sm:$0xff]  ;;  %v12426_v1 = vld [vmem:[#allocation2 + $0x52] sm:$0xff] }
 0x160   : > { %10417 = vmatprep.subr.msk.mxu0 %vm15908_vm0, %v12399_v4  ;;  %16098 = vst [vmem:[#allocation44_spill] sm:$0xff] %v12422_v44  ;;  %16099 = vst [vmem:[#allocation45_spill] sm:$0xff] %v12426_v1 }
 0x162   : > { %10323 = vmatmul.mubr.msk.f32.gmra.mrb[2].mxu0 %vm15909_vm1, %v12410_v7  ;;  %v12430_v7 = vld [vmem:[#allocation2 + $0x62] sm:$0xff] }
 0x163   : > { %10325 = vmatprep.mubr.msk.f32.mxu0 %vm15909_vm1, %v12414_v53  ;;  %16100 = vst [vmem:[#allocation46_spill] sm:$0xff] %v12430_v7  ;;  %v12434_v53 = vld [vmem:[#allocation2 + $0x6a] sm:$0xff] }
 0x164   : > { %16101 = vst [vmem:[#allocation47_spill] sm:$0xff] %v12434_v53 }
 0x166   : > { %10326 = vmatmul.mubr.msk.f32.gmra.mrb[4].mxu0 %vm15909_vm1, %v12418_v5  ;;  %v12438_v5 = vld [vmem:[#allocation2 + $0x7a] sm:$0xff] }
 0x167   : > { %10328 = vmatprep.mubr.msk.f32.mxu0 %vm15909_vm1, %v12422_v44  ;;  %16102 = vst [vmem:[#allocation48_spill] sm:$0xff] %v12438_v5  ;;  %v12442_v44 = vld [vmem:[#allocation2 + $0x82] sm:$0xff] }
 0x168   : > { %16103 = vst [vmem:[#allocation49_spill] sm:$0xff] %v12442_v44 }
 0x16a   : > { %10329 = vmatmul.mubr.msk.f32.gmra.mrb[6].mxu0 %vm15909_vm1, %v12426_v1  ;;  %v12446_v1 = vld [vmem:[#allocation2 + $0x92] sm:$0xff] }
 0x16b   : > { %10331 = vmatprep.mubr.msk.f32.mxu0 %vm15909_vm1, %v12430_v7  ;;  %16104 = vst [vmem:[#allocation50_spill] sm:$0xff] %v12446_v1  ;;  %v12450_v7 = vld [vmem:[#allocation2 + $0x9a] sm:$0xff] }
 0x16c   : > { %16105 = vst [vmem:[#allocation51_spill] sm:$0xff] %v12450_v7 }
 0x16e   : > { %10332 = vmatmul.mubr.msk.f32.gmra.mrb[8].mxu0 %vm15909_vm1, %v12434_v53  ;;  %v12454_v53 = vld [vmem:[#allocation2 + $0xaa] sm:$0xff] }
 0x16f   : > { %10334 = vmatprep.mubr.msk.f32.mxu0 %vm15909_vm1, %v12438_v5  ;;  %16106 = vst [vmem:[#allocation52_spill] sm:$0xff] %v12454_v53  ;;  %v12458_v5 = vld [vmem:[#allocation2 + $0xb2] sm:$0xff] }
 0x170   : > { %16107 = vst [vmem:[#allocation53_spill] sm:$0xff] %v12458_v5 }
 0x172   : > { %10335 = vmatmul.mubr.msk.f32.gmra.mrb[10].mxu0 %vm15909_vm1, %v12442_v44  ;;  %v12462_v44 = vld [vmem:[#allocation2 + $0xc2] sm:$0xff] }
 0x173   : > { %10337 = vmatprep.mubr.msk.f32.mxu0 %vm15909_vm1, %v12446_v1  ;;  %16108 = vst [vmem:[#allocation54_spill] sm:$0xff] %v12462_v44  ;;  %v12466_v1 = vld [vmem:[#allocation2 + $0xca] sm:$0xff] }
 0x174   : > { %16109 = vst [vmem:[#allocation55_spill] sm:$0xff] %v12466_v1 }
 0x176   : > { %10338 = vmatmul.mubr.msk.f32.gmra.mrb[12].mxu0 %vm15909_vm1, %v12450_v7  ;;  %v12470_v7 = vld [vmem:[#allocation2 + $0xda] sm:$0xff] }
 0x177   : > { %10340 = vmatprep.mubr.msk.f32.mxu0 %vm15909_vm1, %v12454_v53  ;;  %16110 = vst [vmem:[#allocation56_spill] sm:$0xff] %v12470_v7  ;;  %v12474_v53 = vld [vmem:[#allocation2 + $0xe2] sm:$0xff] }
 0x178   : > { %16111 = vst [vmem:[#allocation57_spill] sm:$0xff] %v12474_v53 }
 0x17a   : > { %10341 = vmatmul.mubr.msk.f32.gmra.mrb[14].mxu0 %vm15909_vm1, %v12458_v5  ;;  %v12478_v5 = vld [vmem:[#allocation2 + $0xf2] sm:$0xff] }
 0x17b   : > { %10343 = vmatprep.mubr.msk.f32.mxu0 %vm15909_vm1, %v12462_v44  ;;  %16112 = vst [vmem:[#allocation58_spill] sm:$0xff] %v12478_v5  ;;  %v12482_v44 = vld [vmem:[#allocation2 + $0xfa] sm:$0xff] }
 0x17c   : > { %16113 = vst [vmem:[#allocation59_spill] sm:$0xff] %v12482_v44 }
 0x17e   : > { %10344 = vmatmul.mubr.msk.f32.gmra.mrb[16].mxu0 %vm15909_vm1, %v12466_v1  ;;  %v12486_v1 = vld [vmem:[#allocation2 + $0x10a] sm:$0xff] }
 0x17f   : > { %10346 = vmatprep.mubr.msk.f32.mxu0 %vm15909_vm1, %v12470_v7  ;;  %16114 = vst [vmem:[#allocation60_spill] sm:$0xff] %v12486_v1  ;;  %v12490_v7 = vld [vmem:[#allocation2 + $0x112] sm:$0xff] }
 0x180   : > { %16115 = vst [vmem:[#allocation61_spill] sm:$0xff] %v12490_v7 }
 0x182   : > { %10347 = vmatmul.mubr.msk.f32.gmra.mrb[18].mxu0 %vm15909_vm1, %v12474_v53  ;;  %v12494_v53 = vld [vmem:[#allocation2 + $0x122] sm:$0xff] }
 0x183   : > { %10349 = vmatprep.mubr.msk.f32.mxu0 %vm15909_vm1, %v12478_v5  ;;  %16116 = vst [vmem:[#allocation62_spill] sm:$0xff] %v12494_v53  ;;  %v12498_v5 = vld [vmem:[#allocation2 + $0x12a] sm:$0xff] }
 0x184   : > { %16117 = vst [vmem:[#allocation63_spill] sm:$0xff] %v12498_v5 }
 0x186   : > { %10350 = vmatmul.mubr.msk.f32.gmra.mrb[20].mxu0 %vm15909_vm1, %v12482_v44  ;;  %v12502_v44 = vld [vmem:[#allocation2 + $0x13a] sm:$0xff] }
 0x187   : > { %10352 = vmatprep.mubr.msk.f32.mxu0 %vm15909_vm1, %v12486_v1  ;;  %16118 = vst [vmem:[#allocation64_spill] sm:$0xff] %v12502_v44  ;;  %v12506_v1 = vld [vmem:[#allocation2 + $0x142] sm:$0xff] }
 0x18a   : > { %10353 = vmatmul.mubr.msk.f32.gmra.mrb[22].mxu0 %vm15909_vm1, %v12490_v7  ;;  %v12510_v7 = vld [vmem:[#allocation2 + $0x152] sm:$0xff] }
 0x18b   : > { %10355 = vmatprep.mubr.msk.f32.mxu0 %vm15909_vm1, %v12494_v53  ;;  %16119 = vst [vmem:[#allocation65_spill] sm:$0xff] %v12510_v7  ;;  %v12514_v53 = vld [vmem:[#allocation2 + $0x15a] sm:$0xff] }
 0x18e   : > { %10356 = vmatmul.mubr.msk.f32.gmra.mrb[24].mxu0 %vm15909_vm1, %v12498_v5  ;;  %v12518_v5 = vld [vmem:[#allocation2 + $0x16a] sm:$0xff] }
 0x18f   : > { %10358 = vmatprep.mubr.msk.f32.mxu0 %vm15909_vm1, %v12502_v44  ;;  %16120 = vst [vmem:[#allocation66_spill] sm:$0xff] %v12518_v5  ;;  %v12522_v44 = vld [vmem:[#allocation2 + $0x172] sm:$0xff] }
 0x192   : > { %10359 = vmatmul.mubr.msk.f32.gmra.mrb[26].mxu0 %vm15909_vm1, %v12506_v1 }
 0x193   : > { %10361 = vmatprep.mubr.msk.f32.mxu0 %vm15909_vm1, %v12510_v7  ;;  %v9173_v7 = vld [vmem:[%s15813_s1 + $0x14] sm:$0xf] }
 0x196   : > { %10362 = vmatmul.mubr.msk.f32.gmra.mrb[28].mxu0 %vm15909_vm1, %v12514_v53 }
 0x197   : > { %10364 = vmatprep.mubr.msk.f32.mxu0 %vm15909_vm1, %v12518_v5 }
 0x19a   : > { %10365 = vmatmul.mubr.msk.f32.gmra.mrb[30].mxu0 %vm15909_vm1, %v12522_v44 }
 0x19b   : > { %10369 = vmatprep.mubr.msk.f32.mxu0 %vm15909_vm1, %v12261_v56  ;;  %v12596_v56 = vld [vmem:[#allocation2 + $0x188] sm:$0xff] }
 0x19e   : > { %10370 = vmatmul.mubr.msk.f32.vlgmr.msra.gmra.mrb[0].mxu0 %vm15909_vm1, %v12269_v16  ;;  %v9207_v16 = vld [vmem:[%s15813_s1 + $0x18] sm:$0xf] }
 0x19f   : > { %10418 = vmatpush3.msk.msra.mxu0 %vm15908_vm0, %v12399_v4  ;;  %10372 = vmatprep.mubr.msk.f32.mxu0 %vm15909_vm1, %v12273_v62  ;;  %v12592_v4 = vld [vmem:[#allocation2 + $0x180] sm:$0xff] }
 0x1a0   : > { %10467 = vmatprep.subr.msk.mxu0 %vm15908_vm0, %v9173_v7 }
 0x1a2   : > { %10373 = vmatmul.mubr.msk.f32.gmra.mrb[2].mxu0 %vm15909_vm1, %v12277_v11 }
 0x1a3   : > { %10375 = vmatprep.mubr.msk.f32.mxu0 %vm15909_vm1, %v12281_v14 }
 0x1a6   : > { %10376 = vmatmul.mubr.msk.f32.gmra.mrb[4].mxu0 %vm15909_vm1, %v12285_v35 }
 0x1a7   : > { %10378 = vmatprep.mubr.msk.f32.mxu0 %vm15909_vm1, %v12289_v47 }
 0x1aa   : > { %10379 = vmatmul.mubr.msk.f32.gmra.mrb[6].mxu0 %vm15909_vm1, %v12293_v38 }
 0x1ab   : > { %10381 = vmatprep.mubr.msk.f32.mxu0 %vm15909_vm1, %v12297_v28 }
 0x1ae   : > { %10382 = vmatmul.mubr.msk.f32.gmra.mrb[8].mxu0 %vm15909_vm1, %v12301_v18 }
 0x1af   : > { %10384 = vmatprep.mubr.msk.f32.mxu0 %vm15909_vm1, %v12305_v13 }
 0x1b2   : > { %10385 = vmatmul.mubr.msk.f32.gmra.mrb[10].mxu0 %vm15909_vm1, %v12309_v8 }
 0x1b3   : > { %10387 = vmatprep.mubr.msk.f32.mxu0 %vm15909_vm1, %v12313_v2 }
 0x1b6   : > { %10388 = vmatmul.mubr.msk.f32.gmra.mrb[12].mxu0 %vm15909_vm1, %v12317_v63 }
 0x1b7   : > { %10390 = vmatprep.mubr.msk.f32.mxu0 %vm15909_vm1, %v12321_v60 }
 0x1ba   : > { %10391 = vmatmul.mubr.msk.f32.gmra.mrb[14].mxu0 %vm15909_vm1, %v12325_v57 }
 0x1bb   : > { %10393 = vmatprep.mubr.msk.f32.mxu0 %vm15909_vm1, %v12329_v54 }
 0x1be   : > { %10394 = vmatmul.mubr.msk.f32.gmra.mrb[16].mxu0 %vm15909_vm1, %v12337_v48 }
 0x1bf   : > { %10396 = vmatprep.mubr.msk.f32.mxu0 %vm15909_vm1, %v12341_v45 }
 0x1c2   : > { %10397 = vmatmul.mubr.msk.f32.gmra.mrb[18].mxu0 %vm15909_vm1, %v12345_v42 }
 0x1c3   : > { %10399 = vmatprep.mubr.msk.f32.mxu0 %vm15909_vm1, %v12349_v39 }
 0x1c6   : > { %10400 = vmatmul.mubr.msk.f32.gmra.mrb[20].mxu0 %vm15909_vm1, %v12358_v33 }
 0x1c7   : > { %10402 = vmatprep.mubr.msk.f32.mxu0 %vm15909_vm1, %v12362_v29 }
 0x1ca   : > { %10403 = vmatmul.mubr.msk.f32.gmra.mrb[22].mxu0 %vm15909_vm1, %v12366_v25 }
 0x1cb   : > { %10405 = vmatprep.mubr.msk.f32.mxu0 %vm15909_vm1, %v12370_v21 }
 0x1ce   : > { %10406 = vmatmul.mubr.msk.f32.gmra.mrb[24].mxu0 %vm15909_vm1, %v12375_v36 }
 0x1cf   : > { %10408 = vmatprep.mubr.msk.f32.mxu0 %vm15909_vm1, %v12379_v17 }
 0x1d2   : > { %10409 = vmatmul.mubr.msk.f32.gmra.mrb[26].mxu0 %vm15909_vm1, %v12383_v12 }
 0x1d3   : > { %10411 = vmatprep.mubr.msk.f32.mxu0 %vm15909_vm1, %v12387_v9 }
 0x1d6   : > { %10412 = vmatmul.mubr.msk.f32.gmra.mrb[28].mxu0 %vm15909_vm1, %v12391_v51 }
 0x1d7   : > { %10414 = vmatprep.mubr.msk.f32.mxu0 %vm15909_vm1, %v12592_v4 }
 0x1da   : > { %10415 = vmatmul.mubr.msk.f32.gmra.mrb[30].mxu0 %vm15909_vm1, %v12596_v56 }
 0x1db   : > { %10419 = vmatprep.mubr.msk.f32.mxu0 %vm15909_vm1, %v12003_v19  ;;  %v16121_v19 = vld [vmem:[#allocation36_spill] sm:$0xff] }
 0x1de   : > { %10420 = vmatmul.mubr.msk.f32.vlgmr.msra.gmra.mrb[0].mxu0 %vm15909_vm1, %v12012_v22  ;;  %v16122_v22 = vld [vmem:[#allocation37_spill] sm:$0xff] }
 0x1df   : > { %10468 = vmatpush3.msk.msra.mxu0 %vm15908_vm0, %v9173_v7  ;;  %10422 = vmatprep.mubr.msk.f32.mxu0 %vm15909_vm1, %v12019_v23  ;;  %v12665_v23 = vld [vmem:[#allocation2 + $0x181] sm:$0xff]  ;;  %v16136_v7 = vld [vmem:[#allocation53_spill] sm:$0xff] }
 0x1e0   : > { %10517 = vmatprep.subr.msk.mxu0 %vm15908_vm0, %v9207_v16 }
 0x1e2   : > { %10423 = vmatmul.mubr.msk.f32.gmra.mrb[2].mxu0 %vm15909_vm1, %v12025_v26  ;;  %v12669_v26 = vld [vmem:[#allocation2 + $0x189] sm:$0xff] }
 0x1e3   : > { %10425 = vmatprep.mubr.msk.f32.mxu0 %vm15909_vm1, %v12032_v27  ;;  %v16123_v27 = vld [vmem:[#allocation40_spill] sm:$0xff] }
 0x1e6   : > { %10426 = vmatmul.mubr.msk.f32.gmra.mrb[4].mxu0 %vm15909_vm1, %v12038_v30  ;;  %v9241_v30 = vld [vmem:[%s15813_s1 + $0x1c] sm:$0xf] }
 0x1e7   : > { %10428 = vmatprep.mubr.msk.f32.mxu0 %vm15909_vm1, %v12040_v31  ;;  %v16124_v31 = vld [vmem:[#allocation41_spill] sm:$0xff] }
 0x1ea   : > { %10429 = vmatmul.mubr.msk.f32.gmra.mrb[6].mxu0 %vm15909_vm1, %v12051_v34  ;;  %v16125_v34 = vld [vmem:[#allocation42_spill] sm:$0xff] }
 0x1eb   : > { %10431 = vmatprep.mubr.msk.f32.mxu0 %vm15909_vm1, %v12060_v37  ;;  %v16126_v37 = vld [vmem:[#allocation43_spill] sm:$0xff] }
 0x1ee   : > { %10432 = vmatmul.mubr.msk.f32.gmra.mrb[8].mxu0 %vm15909_vm1, %v12069_v40  ;;  %v16127_v40 = vld [vmem:[#allocation44_spill] sm:$0xff] }
 0x1ef   : > { %10434 = vmatprep.mubr.msk.f32.mxu0 %vm15909_vm1, %v12078_v43  ;;  %v16128_v43 = vld [vmem:[#allocation45_spill] sm:$0xff] }
 0x1f2   : > { %10435 = vmatmul.mubr.msk.f32.gmra.mrb[10].mxu0 %vm15909_vm1, %v12087_v46  ;;  %v16129_v46 = vld [vmem:[#allocation46_spill] sm:$0xff] }
 0x1f3   : > { %10437 = vmatprep.mubr.msk.f32.mxu0 %vm15909_vm1, %v12096_v49  ;;  %v16130_v49 = vld [vmem:[#allocation47_spill] sm:$0xff] }
 0x1f6   : > { %10438 = vmatmul.mubr.msk.f32.gmra.mrb[12].mxu0 %vm15909_vm1, %v12105_v52  ;;  %v16131_v52 = vld [vmem:[#allocation48_spill] sm:$0xff] }
 0x1f7   : > { %10440 = vmatprep.mubr.msk.f32.mxu0 %vm15909_vm1, %v12114_v55  ;;  %v16132_v55 = vld [vmem:[#allocation49_spill] sm:$0xff] }
 0x1fa   : > { %10441 = vmatmul.mubr.msk.f32.gmra.mrb[14].mxu0 %vm15909_vm1, %v12123_v58  ;;  %v16133_v58 = vld [vmem:[#allocation50_spill] sm:$0xff] }
 0x1fb   : > { %10443 = vmatprep.mubr.msk.f32.mxu0 %vm15909_vm1, %v12132_v61  ;;  %v16134_v61 = vld [vmem:[#allocation51_spill] sm:$0xff] }
 0x1fe   : > { %10444 = vmatmul.mubr.msk.f32.gmra.mrb[16].mxu0 %vm15909_vm1, %v12141_v0  ;;  %v16135_v0 = vld [vmem:[#allocation52_spill] sm:$0xff] }
 0x1ff   : > { %10446 = vmatprep.mubr.msk.f32.mxu0 %vm15909_vm1, %v12150_v3 }
 0x202   : > { %10447 = vmatmul.mubr.msk.f32.gmra.mrb[18].mxu0 %vm15909_vm1, %v12159_v10 }
 0x203   : > { %10449 = vmatprep.mubr.msk.f32.mxu0 %vm15909_vm1, %v12168_v15 }
 0x206   : > { %10450 = vmatmul.mubr.msk.f32.gmra.mrb[20].mxu0 %vm15909_vm1, %v12177_v20 }
 0x207   : > { %10452 = vmatprep.mubr.msk.f32.mxu0 %vm15909_vm1, %v12186_v32 }
 0x20a   : > { %10453 = vmatmul.mubr.msk.f32.gmra.mrb[22].mxu0 %vm15909_vm1, %v12195_v41 }
 0x20b   : > { %10455 = vmatprep.mubr.msk.f32.mxu0 %vm15909_vm1, %v12204_v50 }
 0x20e   : > { %10456 = vmatmul.mubr.msk.f32.gmra.mrb[24].mxu0 %vm15909_vm1, %v12213_v59 }
 0x20f   : > { %10458 = vmatprep.mubr.msk.f32.mxu0 %vm15909_vm1, %v12222_v6 }
 0x212   : > { %10459 = vmatmul.mubr.msk.f32.gmra.mrb[26].mxu0 %vm15909_vm1, %v12233_v24 }
 0x213   : > { %10461 = vmatprep.mubr.msk.f32.mxu0 %vm15909_vm1, %v16121_v19 }
 0x216   : > { %10462 = vmatmul.mubr.msk.f32.gmra.mrb[28].mxu0 %vm15909_vm1, %v16122_v22 }
 0x217   : > { %10464 = vmatprep.mubr.msk.f32.mxu0 %vm15909_vm1, %v12665_v23 }
 0x21a   : > { %10465 = vmatmul.mubr.msk.f32.gmra.mrb[30].mxu0 %vm15909_vm1, %v12669_v26 }
 0x21b   : > { %10469 = vmatprep.mubr.msk.f32.mxu0 %vm15909_vm1, %v16123_v27  ;;  %v16138_v27 = vld [vmem:[#allocation55_spill] sm:$0xff] }
 0x21e   : > { %10470 = vmatmul.mubr.msk.f32.vlgmr.msra.gmra.mrb[0].mxu0 %vm15909_vm1, %v16124_v31  ;;  %v16139_v31 = vld [vmem:[#allocation56_spill] sm:$0xff] }
 0x21f   : > { %10518 = vmatpush3.msk.msra.mxu0 %vm15908_vm0, %v9207_v16  ;;  %10472 = vmatprep.mubr.msk.f32.mxu0 %vm15909_vm1, %v16125_v34  ;;  %v16137_v16 = vld [vmem:[#allocation54_spill] sm:$0xff] }
 0x220   : > { %10567 = vmatprep.subr.msk.mxu0 %vm15908_vm0, %v9241_v30 }
 0x222   : > { %10473 = vmatmul.mubr.msk.f32.gmra.mrb[2].mxu0 %vm15909_vm1, %v16126_v37 }
 0x223   : > { %10475 = vmatprep.mubr.msk.f32.mxu0 %vm15909_vm1, %v16127_v40 }
 0x226   : > { %10476 = vmatmul.mubr.msk.f32.gmra.mrb[4].mxu0 %vm15909_vm1, %v16128_v43 }
 0x227   : > { %10478 = vmatprep.mubr.msk.f32.mxu0 %vm15909_vm1, %v16129_v46 }
 0x22a   : > { %10479 = vmatmul.mubr.msk.f32.gmra.mrb[6].mxu0 %vm15909_vm1, %v16130_v49 }
 0x22b   : > { %10481 = vmatprep.mubr.msk.f32.mxu0 %vm15909_vm1, %v16131_v52 }
 0x22e   : > { %10482 = vmatmul.mubr.msk.f32.gmra.mrb[8].mxu0 %vm15909_vm1, %v16132_v55  ;;  %v16140_v55 = vld [vmem:[#allocation57_spill] sm:$0xff] }
 0x22f   : > { %10484 = vmatprep.mubr.msk.f32.mxu0 %vm15909_vm1, %v16133_v58  ;;  %v16141_v58 = vld [vmem:[#allocation58_spill] sm:$0xff] }
 0x232   : > { %10485 = vmatmul.mubr.msk.f32.gmra.mrb[10].mxu0 %vm15909_vm1, %v16134_v61  ;;  %v16142_v61 = vld [vmem:[#allocation59_spill] sm:$0xff] }
 0x233   : > { %10487 = vmatprep.mubr.msk.f32.mxu0 %vm15909_vm1, %v16135_v0  ;;  %v16143_v0 = vld [vmem:[#allocation60_spill] sm:$0xff] }
 0x236   : > { %10488 = vmatmul.mubr.msk.f32.gmra.mrb[12].mxu0 %vm15909_vm1, %v16136_v7  ;;  %v16144_v7 = vld [vmem:[#allocation61_spill] sm:$0xff] }
 0x237   : > { %10490 = vmatprep.mubr.msk.f32.mxu0 %vm15909_vm1, %v16137_v16  ;;  %v16145_v16 = vld [vmem:[#allocation62_spill] sm:$0xff] }
 0x23a   : > { %10491 = vmatmul.mubr.msk.f32.gmra.mrb[14].mxu0 %vm15909_vm1, %v16138_v27  ;;  %v16146_v27 = vld [vmem:[#allocation63_spill] sm:$0xff] }
 0x23b   : > { %10493 = vmatprep.mubr.msk.f32.mxu0 %vm15909_vm1, %v16139_v31  ;;  %v16147_v31 = vld [vmem:[#allocation64_spill] sm:$0xff] }
 0x23e   : > { %10494 = vmatmul.mubr.msk.f32.gmra.mrb[16].mxu0 %vm15909_vm1, %v16140_v55 }
 0x23f   : > { %10496 = vmatprep.mubr.msk.f32.mxu0 %vm15909_vm1, %v16141_v58  ;;  %v16148_v58 = vld [vmem:[#allocation65_spill] sm:$0xff] }
 0x242   : > { %10497 = vmatmul.mubr.msk.f32.gmra.mrb[18].mxu0 %vm15909_vm1, %v16142_v61 }
 0x243   : > { %10499 = vmatprep.mubr.msk.f32.mxu0 %vm15909_vm1, %v16143_v0 }
 0x246   : > { %10500 = vmatmul.mubr.msk.f32.gmra.mrb[20].mxu0 %vm15909_vm1, %v16144_v7 }
 0x247   : > { %10502 = vmatprep.mubr.msk.f32.mxu0 %vm15909_vm1, %v16145_v16  ;;  %v12738_v16 = vld [vmem:[#allocation2 + $0x182] sm:$0xff] }
 0x24a   : > { %10503 = vmatmul.mubr.msk.f32.gmra.mrb[22].mxu0 %vm15909_vm1, %v16146_v27 }
 0x24b   : > { %10505 = vmatprep.mubr.msk.f32.mxu0 %vm15909_vm1, %v16147_v31  ;;  %v12742_v31 = vld [vmem:[#allocation2 + $0x18a] sm:$0xff] }
 0x24e   : > { %10506 = vmatmul.mubr.msk.f32.gmra.mrb[24].mxu0 %vm15909_vm1, %v12506_v1 }
 0x24f   : > { %10508 = vmatprep.mubr.msk.f32.mxu0 %vm15909_vm1, %v16148_v58 }
 0x252   : > { %10509 = vmatmul.mubr.msk.f32.gmra.mrb[26].mxu0 %vm15909_vm1, %v12514_v53 }
 0x253   : > { %10511 = vmatprep.mubr.msk.f32.mxu0 %vm15909_vm1, %v12518_v5  ;;  %v9275_v5 = vld [vmem:[%s15813_s1 + $0x20] sm:$0xf] }
 0x256   : > { %10512 = vmatmul.mubr.msk.f32.gmra.mrb[28].mxu0 %vm15909_vm1, %v12522_v44 }
 0x257   : > { %10514 = vmatprep.mubr.msk.f32.mxu0 %vm15909_vm1, %v12738_v16 }
 0x25a   : > { %10515 = vmatmul.mubr.msk.f32.gmra.mrb[30].mxu0 %vm15909_vm1, %v12742_v31 }
 0x25b   : > { %10519 = vmatprep.mubr.msk.f32.mxu0 %vm15909_vm1, %v12273_v62 }
 0x25e   : > { %10520 = vmatmul.mubr.msk.f32.vlgmr.msra.gmra.mrb[0].mxu0 %vm15909_vm1, %v12277_v11 }
 0x25f   : > { %10568 = vmatpush3.msk.msra.mxu0 %vm15908_vm0, %v9241_v30  ;;  %10522 = vmatprep.mubr.msk.f32.mxu0 %vm15909_vm1, %v12281_v14 }
 0x260   : > { %10617 = vmatprep.subr.msk.mxu0 %vm15908_vm0, %v9275_v5 }
 0x262   : > { %10523 = vmatmul.mubr.msk.f32.gmra.mrb[2].mxu0 %vm15909_vm1, %v12285_v35 }
 0x263   : > { %10525 = vmatprep.mubr.msk.f32.mxu0 %vm15909_vm1, %v12289_v47  ;;  %v16157_v47 = vld [vmem:[#allocation58_spill] sm:$0xff] }
 0x266   : > { %10526 = vmatmul.mubr.msk.f32.gmra.mrb[4].mxu0 %vm15909_vm1, %v12293_v38  ;;  %v16155_v38 = vld [vmem:[#allocation55_spill] sm:$0xff] }
 0x267   : > { %10528 = vmatprep.mubr.msk.f32.mxu0 %vm15909_vm1, %v12297_v28  ;;  %v16153_v28 = vld [vmem:[#allocation53_spill] sm:$0xff] }
 0x26a   : > { %10529 = vmatmul.mubr.msk.f32.gmra.mrb[6].mxu0 %vm15909_vm1, %v12301_v18  ;;  %v16151_v18 = vld [vmem:[#allocation51_spill] sm:$0xff] }
 0x26b   : > { %10531 = vmatprep.mubr.msk.f32.mxu0 %vm15909_vm1, %v12305_v13  ;;  %v16149_v13 = vld [vmem:[#allocation49_spill] sm:$0xff] }
 0x26e   : > { %10532 = vmatmul.mubr.msk.f32.gmra.mrb[8].mxu0 %vm15909_vm1, %v12309_v8  ;;  %v3085_v8 = vld [vmem:[#allocation2 + $0xe1] sm:$0xff] }
 0x26f   : > { %10534 = vmatprep.mubr.msk.f32.mxu0 %vm15909_vm1, %v12313_v2  ;;  %v3084_v2 = vld [vmem:[#allocation2 + $0xd9] sm:$0xff] }
 0x272   : > { %10535 = vmatmul.mubr.msk.f32.gmra.mrb[10].mxu0 %vm15909_vm1, %v12317_v63  ;;  %v3083_v63 = vld [vmem:[#allocation2 + $0xc9] sm:$0xff] }
 0x273   : > { %10537 = vmatprep.mubr.msk.f32.mxu0 %vm15909_vm1, %v12321_v60  ;;  %v3082_v60 = vld [vmem:[#allocation2 + $0xc1] sm:$0xff] }
 0x276   : > { %10538 = vmatmul.mubr.msk.f32.gmra.mrb[12].mxu0 %vm15909_vm1, %v12325_v57  ;;  %v3081_v57 = vld [vmem:[#allocation2 + $0xb1] sm:$0xff] }
 0x277   : > { %10540 = vmatprep.mubr.msk.f32.mxu0 %vm15909_vm1, %v12329_v54  ;;  %v3080_v54 = vld [vmem:[#allocation2 + $0xa9] sm:$0xff] }
 0x27a   : > { %10541 = vmatmul.mubr.msk.f32.gmra.mrb[14].mxu0 %vm15909_vm1, %v12337_v48  ;;  %v3079_v48 = vld [vmem:[#allocation2 + $0x99] sm:$0xff] }
 0x27b   : > { %10543 = vmatprep.mubr.msk.f32.mxu0 %vm15909_vm1, %v12341_v45  ;;  %v3078_v45 = vld [vmem:[#allocation2 + $0x91] sm:$0xff] }
 0x27e   : > { %10544 = vmatmul.mubr.msk.f32.gmra.mrb[16].mxu0 %vm15909_vm1, %v12345_v42  ;;  %v3077_v42 = vld [vmem:[#allocation2 + $0x81] sm:$0xff] }
 0x27f   : > { %10546 = vmatprep.mubr.msk.f32.mxu0 %vm15909_vm1, %v12349_v39  ;;  %v3076_v39 = vld [vmem:[#allocation2 + $0x79] sm:$0xff] }
 0x282   : > { %10547 = vmatmul.mubr.msk.f32.gmra.mrb[18].mxu0 %vm15909_vm1, %v12358_v33  ;;  %v3074_v33 = vld [vmem:[#allocation2 + $0x61] sm:$0xff] }
 0x283   : > { %10549 = vmatprep.mubr.msk.f32.mxu0 %vm15909_vm1, %v12362_v29  ;;  %v3073_v29 = vld [vmem:[#allocation2 + $0x51] sm:$0xff] }
 0x286   : > { %10550 = vmatmul.mubr.msk.f32.gmra.mrb[20].mxu0 %vm15909_vm1, %v12366_v25  ;;  %v2711_v25 = vld [vmem:[#allocation2 + $0x1a0] sm:$0xff] }
 0x287   : > { %10552 = vmatprep.mubr.msk.f32.mxu0 %vm15909_vm1, %v12370_v21  ;;  %v2710_v21 = vld [vmem:[#allocation2 + $0x198] sm:$0xff] }
 0x28a   : > { %10553 = vmatmul.mubr.msk.f32.gmra.mrb[22].mxu0 %vm15909_vm1, %v12375_v36  ;;  %v3075_v36 = vld [vmem:[#allocation2 + $0x69] sm:$0xff] }
 0x28b   : > { %10555 = vmatprep.mubr.msk.f32.mxu0 %vm15909_vm1, %v12379_v17  ;;  %v3070_v17 = vld [vmem:[#allocation2 + $0x31] sm:$0xff] }
 0x28e   : > { %10556 = vmatmul.mubr.msk.f32.gmra.mrb[24].mxu0 %vm15909_vm1, %v12383_v12  ;;  %v3071_v12 = vld [vmem:[#allocation2 + $0x39] sm:$0xff] }
 0x28f   : > { %10558 = vmatprep.mubr.msk.f32.mxu0 %vm15909_vm1, %v12387_v9  ;;  %v3072_v9 = vld [vmem:[#allocation2 + $0x49] sm:$0xff] }
 0x292   : > { %10559 = vmatmul.mubr.msk.f32.gmra.mrb[26].mxu0 %vm15909_vm1, %v12391_v51 }
 0x293   : > { %10561 = vmatprep.mubr.msk.f32.mxu0 %vm15909_vm1, %v12592_v4 }
 0x296   : > { %10562 = vmatmul.mubr.msk.f32.gmra.mrb[28].mxu0 %vm15909_vm1, %v12596_v56 }
 0x297   : > { %10564 = vmatprep.mubr.msk.f32.mxu0 %vm15909_vm1, %v2710_v21 }
 0x29a   : > { %10565 = vmatmul.mubr.msk.f32.gmra.mrb[30].mxu0 %vm15909_vm1, %v2711_v25 }
 0x29b   : > { %10569 = vmatprep.mubr.msk.f32.mxu0 %vm15909_vm1, %v3070_v17 }
 0x29e   : > { %10570 = vmatmul.mubr.msk.f32.vlgmr.msra.gmra.mrb[0].mxu0 %vm15909_vm1, %v3071_v12 }
 0x29f   : > { %10618 = vmatpush3.msk.msra.mxu0 %vm15908_vm0, %v9275_v5  ;;  %10572 = vmatprep.mubr.msk.f32.mxu0 %vm15909_vm1, %v3072_v9 }
 0x2a2   : > { %10573 = vmatmul.mubr.msk.f32.gmra.mrb[2].mxu0 %vm15909_vm1, %v3073_v29 }
 0x2a3   : > { %10575 = vmatprep.mubr.msk.f32.mxu0 %vm15909_vm1, %v3074_v33 }
 0x2a6   : > { %10576 = vmatmul.mubr.msk.f32.gmra.mrb[4].mxu0 %vm15909_vm1, %v3075_v36 }
 0x2a7   : > { %10578 = vmatprep.mubr.msk.f32.mxu0 %vm15909_vm1, %v3076_v39 }
 0x2aa   : > { %10579 = vmatmul.mubr.msk.f32.gmra.mrb[6].mxu0 %vm15909_vm1, %v3077_v42 }
 0x2ab   : > { %10581 = vmatprep.mubr.msk.f32.mxu0 %vm15909_vm1, %v3078_v45 }
 0x2ae   : > { %10582 = vmatmul.mubr.msk.f32.gmra.mrb[8].mxu0 %vm15909_vm1, %v3079_v48 }
 0x2af   : > { %10584 = vmatprep.mubr.msk.f32.mxu0 %vm15909_vm1, %v3080_v54 }
 0x2b2   : > { %10585 = vmatmul.mubr.msk.f32.gmra.mrb[10].mxu0 %vm15909_vm1, %v3081_v57 }
 0x2b3   : > { %10587 = vmatprep.mubr.msk.f32.mxu0 %vm15909_vm1, %v3082_v60 }
 0x2b6   : > { %10588 = vmatmul.mubr.msk.f32.gmra.mrb[12].mxu0 %vm15909_vm1, %v3083_v63 }
 0x2b7   : > { %10590 = vmatprep.mubr.msk.f32.mxu0 %vm15909_vm1, %v3084_v2 }
 0x2ba   : > { %10591 = vmatmul.mubr.msk.f32.gmra.mrb[14].mxu0 %vm15909_vm1, %v3085_v8 }
 0x2bb   : > { %10593 = vmatprep.mubr.msk.f32.mxu0 %vm15909_vm1, %v12150_v3  ;;  %v3100_v3 = vld [vmem:[#allocation2 + $0x199] sm:$0xff] }
 0x2be   : > { %10594 = vmatmul.mubr.msk.f32.gmra.mrb[16].mxu0 %vm15909_vm1, %v12159_v10  ;;  %v3101_v10 = vld [vmem:[#allocation2 + $0x1a1] sm:$0xff] }
 0x2bf   : > { %10596 = vmatprep.mubr.msk.f32.mxu0 %vm15909_vm1, %v12168_v15  ;;  %v16150_v15 = vld [vmem:[#allocation50_spill] sm:$0xff] }
 0x2c2   : > { %10597 = vmatmul.mubr.msk.f32.gmra.mrb[18].mxu0 %vm15909_vm1, %v12177_v20  ;;  %v16152_v20 = vld [vmem:[#allocation52_spill] sm:$0xff] }
 0x2c3   : > { %10599 = vmatprep.mubr.msk.f32.mxu0 %vm15909_vm1, %v12186_v32  ;;  %v16154_v32 = vld [vmem:[#allocation54_spill] sm:$0xff] }
 0x2c6   : > { %10600 = vmatmul.mubr.msk.f32.gmra.mrb[20].mxu0 %vm15909_vm1, %v12195_v41  ;;  %v16156_v41 = vld [vmem:[#allocation56_spill] sm:$0xff] }
 0x2c7   : > { %10602 = vmatprep.mubr.msk.f32.mxu0 %vm15909_vm1, %v12204_v50  ;;  %v16158_v50 = vld [vmem:[#allocation62_spill] sm:$0xff] }
 0x2ca   : > { %10603 = vmatmul.mubr.msk.f32.gmra.mrb[22].mxu0 %vm15909_vm1, %v12213_v59  ;;  %v16159_v59 = vld [vmem:[#allocation64_spill] sm:$0xff] }
 0x2cb   : > { %10605 = vmatprep.mubr.msk.f32.mxu0 %vm15909_vm1, %v12222_v6  ;;  %v16160_v6 = vld [vmem:[#allocation66_spill] sm:$0xff] }
 0x2ce   : > { %10606 = vmatmul.mubr.msk.f32.gmra.mrb[24].mxu0 %vm15909_vm1, %v12233_v24  ;;  %v3490_v24 = vld [vmem:[#allocation2 + $0x19a] sm:$0xff] }
 0x2cf   : > { %10608 = vmatprep.mubr.msk.f32.mxu0 %vm15909_vm1, %v16121_v19 }
 0x2d2   : > { %10609 = vmatmul.mubr.msk.f32.gmra.mrb[26].mxu0 %vm15909_vm1, %v16122_v22 }
 0x2d3   : > { %10611 = vmatprep.mubr.msk.f32.mxu0 %vm15909_vm1, %v12665_v23 }
 0x2d6   : > { %10612 = vmatmul.mubr.msk.f32.gmra.mrb[28].mxu0 %vm15909_vm1, %v12669_v26 }
 0x2d7   : > { %10614 = vmatprep.mubr.msk.f32.mxu0 %vm15909_vm1, %v3100_v3 }
 0x2da   : > { %10615 = vmatmul.mubr.msk.f32.gmra.mrb[30].mxu0 %vm15909_vm1, %v3101_v10 }
 0x2db   : > { %10619 = vmatprep.mubr.msk.f32.mxu0 %vm15909_vm1, %v16125_v34 }
 0x2de   : > { %10620 = vmatmul.mubr.msk.f32.vlgmr.msra.gmra.mrb[0].mxu0 %vm15909_vm1, %v16126_v37 }
 0x2df   : > { %10622 = vmatprep.mubr.msk.f32.mxu0 %vm15909_vm1, %v16127_v40 }
 0x2e2   : > { %10623 = vmatmul.mubr.msk.f32.gmra.mrb[2].mxu0 %vm15909_vm1, %v16128_v43 }
 0x2e3   : > { %10625 = vmatprep.mubr.msk.f32.mxu0 %vm15909_vm1, %v16129_v46 }
 0x2e6   : > { %10626 = vmatmul.mubr.msk.f32.gmra.mrb[4].mxu0 %vm15909_vm1, %v16130_v49 }
 0x2e7   : > { %10628 = vmatprep.mubr.msk.f32.mxu0 %vm15909_vm1, %v16131_v52 }
 0x2ea   : > { %10629 = vmatmul.mubr.msk.f32.gmra.mrb[6].mxu0 %vm15909_vm1, %v16149_v13 }
 0x2eb   : > { %10631 = vmatprep.mubr.msk.f32.mxu0 %vm15909_vm1, %v16150_v15 }
 0x2ee   : > { %10632 = vmatmul.mubr.msk.f32.gmra.mrb[8].mxu0 %vm15909_vm1, %v16151_v18 }
 0x2ef   : > { %10634 = vmatprep.mubr.msk.f32.mxu0 %vm15909_vm1, %v16152_v20 }
 0x2f2   : > { %10635 = vmatmul.mubr.msk.f32.gmra.mrb[10].mxu0 %vm15909_vm1, %v16153_v28 }
 0x2f3   : > { %10637 = vmatprep.mubr.msk.f32.mxu0 %vm15909_vm1, %v16154_v32 }
 0x2f6   : > { %10638 = vmatmul.mubr.msk.f32.gmra.mrb[12].mxu0 %vm15909_vm1, %v16155_v38 }
 0x2f7   : > { %10640 = vmatprep.mubr.msk.f32.mxu0 %vm15909_vm1, %v16156_v41 }
 0x2fa   : > { %10641 = vmatmul.mubr.msk.f32.gmra.mrb[14].mxu0 %vm15909_vm1, %v16140_v55 }
 0x2fb   : > { %10643 = vmatprep.mubr.msk.f32.mxu0 %vm15909_vm1, %v16157_v47 }
 0x2fe   : > { %10644 = vmatmul.mubr.msk.f32.gmra.mrb[16].mxu0 %vm15909_vm1, %v16142_v61 }
 0x2ff   : > { %10646 = vmatprep.mubr.msk.f32.mxu0 %vm15909_vm1, %v16143_v0 }
 0x302   : > { %10647 = vmatmul.mubr.msk.f32.gmra.mrb[18].mxu0 %vm15909_vm1, %v16144_v7 }
 0x303   : > { %10649 = vmatprep.mubr.msk.f32.mxu0 %vm15909_vm1, %v16158_v50 }
 0x306   : > { %10650 = vmatmul.mubr.msk.f32.gmra.mrb[20].mxu0 %vm15909_vm1, %v16146_v27 }
 0x307   : > { %10652 = vmatprep.mubr.msk.f32.mxu0 %vm15909_vm1, %v16159_v59 }
 0x30a   : > { %10653 = vmatmul.mubr.msk.f32.gmra.mrb[22].mxu0 %vm15909_vm1, %v12506_v1  ;;  %v3491_v1 = vld [vmem:[#allocation2 + $0x1a2] sm:$0xff] }
 0x30b   : > { %10655 = vmatprep.mubr.msk.f32.mxu0 %vm15909_vm1, %v16148_v58 }
 0x30e   : > { %10656 = vmatmul.mubr.msk.f32.gmra.mrb[24].mxu0 %vm15909_vm1, %v12514_v53  ;;  %v12925_v53 = vld [vmem:[%s15814_s2] ss:$0 sm:$0xff] }
 0x30f   : > { %10658 = vmatprep.mubr.msk.f32.mxu0 %vm15909_vm1, %v16160_v6 }
 0x312   : > { %10659 = vmatmul.mubr.msk.f32.gmra.mrb[26].mxu0 %vm15909_vm1, %v12522_v44 }
 0x313   : > { %10661 = vmatprep.mubr.msk.f32.mxu0 %vm15909_vm1, %v12738_v16 }
 0x316   : > { %10662 = vmatmul.mubr.msk.f32.gmra.mrb[28].mxu0 %vm15909_vm1, %v12742_v31 }
 0x317   : > { %10664 = vmatprep.mubr.msk.f32.mxu0 %vm15909_vm1, %v3490_v24 }
 0x31a   : > { %10665 = vmatmul.mubr.msk.f32.gmra.mrb[30].mxu0 %vm15909_vm1, %v3491_v1 }
 0x3b1   : > { %v10621_v62 = vpop.f32.mrb[0].mxu0 }
 0x3b2   : > { %v12928_v11 = vadd.f32 %v10621_v62, %v12925_v53  ;;  %v3659_v14 = vpop.f32.mrb[1].mxu0 }
 0x3b3   : > { %v12931_v35 = vadd.f32 %v12925_v53, %v3659_v14 }
 0x3b4   : > { %v3890_v51 = vsel %vm15909_vm1, %v12928_v11, 0.0 }
 0x3b5   : > { %v3889_v5 = vsel %vm15909_vm1, %v12931_v35, 0.0  ;;  %v10624_v44 = vpop.f32.mrb[2].mxu0 }
 0x3b6   : > { %v3669_v4 = vpop.f32.mrb[3].mxu0  ;;  %v12938_v56 = vadd.f32 %v10624_v44, %v12925_v53  ;;  %v3891_v22 = vadd.f32 %v3890_v51, %v3889_v5 }
 0x3b7   : > { %v12941_v19 = vadd.f32 %v12925_v53, %v3669_v4 }
 0x3b8   : > { %v3894_v37 = vsel %vm15909_vm1, %v12938_v56, 0.0 }
 0x3b9   : > { %v3892_v23 = vsel %vm15909_vm1, %v12941_v19, 0.0  ;;  %v10627_v26 = vpop.f32.mrb[4].mxu0 }
 0x3ba   : > { %v3893_v30 = vadd.f32 %v3892_v23, %v3891_v22  ;;  %v3679_v34 = vpop.f32.mrb[5].mxu0  ;;  %v12948_v40 = vadd.f32 %v10627_v26, %v12925_v53 }
 0x3bb   : > { %v12951_v43 = vadd.f32 %v12925_v53, %v3679_v34 }
 0x3bc   : > { %v3895_v46 = vadd.f32 %v3894_v37, %v3893_v30  ;;  %v3898_v61 = vsel %vm15909_vm1, %v12948_v40, 0.0 }
 0x3bd   : > { %v3896_v49 = vsel %vm15909_vm1, %v12951_v43, 0.0  ;;  %v10630_v52 = vpop.f32.mrb[6].mxu0 }
 0x3be   : > { %v3897_v55 = vadd.f32 %v3896_v49, %v3895_v46  ;;  %v3689_v58 = vpop.f32.mrb[7].mxu0  ;;  %v12958_v0 = vadd.f32 %v10630_v52, %v12925_v53 }
 0x3bf   : > { %v12961_v7 = vadd.f32 %v12925_v53, %v3689_v58 }
 0x3c0   : > { %v3899_v16 = vadd.f32 %v3898_v61, %v3897_v55  ;;  %v3902_v17 = vsel %vm15909_vm1, %v12958_v0, 0.0 }
 0x3c1   : > { %v3900_v27 = vsel %vm15909_vm1, %v12961_v7, 0.0  ;;  %v10633_v31 = vpop.f32.mrb[8].mxu0 }
 0x3c2   : > { %v3901_v21 = vadd.f32 %v3900_v27, %v3899_v16  ;;  %v3699_v25 = vpop.f32.mrb[9].mxu0  ;;  %v12968_v12 = vadd.f32 %v10633_v31, %v12925_v53 }
 0x3c3   : > { %v12971_v9 = vadd.f32 %v12925_v53, %v3699_v25 }
 0x3c4   : > { %v3903_v29 = vadd.f32 %v3902_v17, %v3901_v21  ;;  %v3906_v45 = vsel %vm15909_vm1, %v12968_v12, 0.0 }
 0x3c5   : > { %v3904_v33 = vsel %vm15909_vm1, %v12971_v9, 0.0  ;;  %v10636_v36 = vpop.f32.mrb[10].mxu0 }
 0x3c6   : > { %v3905_v39 = vadd.f32 %v3904_v33, %v3903_v29  ;;  %v3709_v42 = vpop.f32.mrb[11].mxu0  ;;  %v12978_v48 = vadd.f32 %v10636_v36, %v12925_v53 }
 0x3c7   : > { %v12981_v54 = vadd.f32 %v12925_v53, %v3709_v42 }
 0x3c8   : > { %v3907_v57 = vadd.f32 %v3906_v45, %v3905_v39  ;;  %v3910_v3 = vsel %vm15909_vm1, %v12978_v48, 0.0 }
 0x3c9   : > { %v3908_v60 = vsel %vm15909_vm1, %v12981_v54, 0.0  ;;  %v10639_v63 = vpop.f32.mrb[12].mxu0 }
 0x3ca   : > { %v3909_v2 = vadd.f32 %v3908_v60, %v3907_v57  ;;  %v3719_v8 = vpop.f32.mrb[13].mxu0  ;;  %v12988_v10 = vadd.f32 %v10639_v63, %v12925_v53 }
 0x3cb   : > { %v12991_v13 = vadd.f32 %v12925_v53, %v3719_v8 }
 0x3cc   : > { %v3911_v15 = vadd.f32 %v3910_v3, %v3909_v2  ;;  %v3914_v38 = vsel %vm15909_vm1, %v12988_v10, 0.0 }
 0x3cd   : > { %v3912_v18 = vsel %vm15909_vm1, %v12991_v13, 0.0  ;;  %v10642_v20 = vpop.f32.mrb[14].mxu0 }
 0x3ce   : > { %v3913_v28 = vadd.f32 %v3912_v18, %v3911_v15  ;;  %v3729_v32 = vpop.f32.mrb[15].mxu0  ;;  %v12998_v41 = vadd.f32 %v10642_v20, %v12925_v53 }
 0x3cf   : > { %v13001_v47 = vadd.f32 %v12925_v53, %v3729_v32 }
 0x3d0   : > { %v3915_v50 = vadd.f32 %v3914_v38, %v3913_v28  ;;  %v3918_v62 = vsel %vm15909_vm1, %v12998_v41, 0.0 }
 0x3d1   : > { %v3916_v59 = vsel %vm15909_vm1, %v13001_v47, 0.0  ;;  %v10645_v6 = vpop.f32.mrb[16].mxu0 }
 0x3d2   : > { %v3917_v24 = vadd.f32 %v3916_v59, %v3915_v50  ;;  %v3739_v1 = vpop.f32.mrb[17].mxu0  ;;  %v13008_v14 = vadd.f32 %v10645_v6, %v12925_v53 }
 0x3d3   : > { %v13011_v51 = vadd.f32 %v12925_v53, %v3739_v1 }
 0x3d4   : > { %v3919_v5 = vadd.f32 %v3918_v62, %v3917_v24  ;;  %v3922_v26 = vsel %vm15909_vm1, %v13008_v14, 0.0 }
 0x3d5   : > { %v3920_v44 = vsel %vm15909_vm1, %v13011_v51, 0.0  ;;  %v10648_v4 = vpop.f32.mrb[18].mxu0 }
 0x3d6   : > { %v3921_v22 = vadd.f32 %v3920_v44, %v3919_v5  ;;  %v3749_v23 = vpop.f32.mrb[19].mxu0  ;;  %v13018_v30 = vadd.f32 %v10648_v4, %v12925_v53 }
 0x3d7   : > { %v13021_v34 = vadd.f32 %v12925_v53, %v3749_v23 }
 0x3d8   : > { %v3923_v37 = vadd.f32 %v3922_v26, %v3921_v22  ;;  %v3926_v58 = vsel %vm15909_vm1, %v13018_v30, 0.0 }
 0x3d9   : > { %v3924_v46 = vsel %vm15909_vm1, %v13021_v34, 0.0  ;;  %v10651_v49 = vpop.f32.mrb[20].mxu0 }
 0x3da   : > { %v3925_v52 = vadd.f32 %v3924_v46, %v3923_v37  ;;  %v3759_v55 = vpop.f32.mrb[21].mxu0  ;;  %v13028_v61 = vadd.f32 %v10651_v49, %v12925_v53 }
 0x3db   : > { %v13031_v16 = vadd.f32 %v12925_v53, %v3759_v55 }
 0x3dc   : > { %v3927_v27 = vadd.f32 %v3926_v58, %v3925_v52  ;;  %v3930_v29 = vsel %vm15909_vm1, %v13028_v61, 0.0 }
 0x3dd   : > { %v3928_v31 = vsel %vm15909_vm1, %v13031_v16, 0.0  ;;  %v10654_v21 = vpop.f32.mrb[22].mxu0 }
 0x3de   : > { %v3929_v25 = vadd.f32 %v3928_v31, %v3927_v27  ;;  %v3769_v17 = vpop.f32.mrb[23].mxu0  ;;  %v3880_v33 = vadd.f32 %v10654_v21, %v12925_v53 }
 0x3df   : > { %v3879_v36 = vadd.f32 %v12925_v53, %v3769_v17 }
 0x3e0   : > { %v3931_v39 = vadd.f32 %v3930_v29, %v3929_v25  ;;  %v3934_v63 = vsel %vm15909_vm1, %v3880_v33, 0.0 }
 0x3e1   : > { %v3932_v42 = vsel %vm15909_vm1, %v3879_v36, 0.0  ;;  %v10657_v45 = vpop.f32.mrb[24].mxu0 }
 0x3e2   : > { %v3933_v57 = vadd.f32 %v3932_v42, %v3931_v39  ;;  %v3779_v60 = vpop.f32.mrb[25].mxu0  ;;  %v3882_v2 = vadd.f32 %v10657_v45, %v12925_v53 }
 0x3e3   : > { %v3881_v8 = vadd.f32 %v12925_v53, %v3779_v60 }
 0x3e4   : > { %v3935_v3 = vadd.f32 %v3934_v63, %v3933_v57  ;;  %v3938_v32 = vsel %vm15909_vm1, %v3882_v2, 0.0 }
 0x3e5   : > { %v3936_v15 = vsel %vm15909_vm1, %v3881_v8, 0.0  ;;  %v10660_v18 = vpop.f32.mrb[26].mxu0 }
 0x3e6   : > { %v3937_v20 = vadd.f32 %v3936_v15, %v3935_v3  ;;  %v3789_v28 = vpop.f32.mrb[27].mxu0  ;;  %v3884_v38 = vadd.f32 %v10660_v18, %v12925_v53 }
 0x3e7   : > { %v3883_v50 = vadd.f32 %v12925_v53, %v3789_v28 }
 0x3e8   : > { %v3939_v59 = vadd.f32 %v3938_v32, %v3937_v20  ;;  %v3942_v5 = vsel %vm15909_vm1, %v3884_v38, 0.0 }
 0x3e9   : > { %v3940_v6 = vsel %vm15909_vm1, %v3883_v50, 0.0  ;;  %v10663_v24 = vpop.f32.mrb[28].mxu0 }
 0x3ea   : > { %v3941_v1 = vadd.f32 %v3940_v6, %v3939_v59  ;;  %v3799_v62 = vpop.f32.mrb[29].mxu0  ;;  %v3886_v44 = vadd.f32 %v10663_v24, %v12925_v53 }
 0x3eb   : > { %v3885_v4 = vadd.f32 %v12925_v53, %v3799_v62 }
 0x3ec   : > { %v3943_v22 = vadd.f32 %v3942_v5, %v3941_v1  ;;  %v3946_v49 = vsel %vm15909_vm1, %v3886_v44, 0.0 }
 0x3ed   : > { %v3944_v23 = vsel %vm15909_vm1, %v3885_v4, 0.0  ;;  %v10666_v26 = vpop.f32.mrb[30].mxu0 }
 0x3ee   : > { %v3945_v37 = vadd.f32 %v3944_v23, %v3943_v22  ;;  %v3809_v46 = vpop.f32.mrb[31].mxu0  ;;  %v3888_v52 = vadd.f32 %v10666_v26, %v12925_v53 }
 0x3ef   : > { %v3887_v55 = vadd.f32 %v12925_v53, %v3809_v46 }
 0x3f0   : > { %v3947_v58 = vadd.f32 %v3946_v49, %v3945_v37  ;;  %v3950_v21 = vsel %vm15909_vm1, %v3888_v52, 0.0 }
 0x3f1   : > { %v3948_v27 = vsel %vm15909_vm1, %v3887_v55, 0.0 }
 0x3f2   : > { %v3949_v31 = vadd.f32 %v3948_v27, %v3947_v58 }
 0x3f4   : > { %v3951_v25 = vadd.f32 %v3950_v21, %v3949_v31 }
 0x3f6   : > { %v3952_v17 = vrot.slane %v3951_v25, 4 }
 0x3f8   : > { %v3953_v29 = vadd.f32 %v3952_v17, %v3951_v25 }
 0x3fa   : > { %v3954_v39 = vrot.slane %v3953_v29, 2 }
 0x3fc   : > { %v3955_v42 = vadd.f32 %v3954_v39, %v3953_v29 }
 0x3fe   : > { %v3956_v45 = vrot.slane %v3955_v42, 1 }
 0x400   : > { %v3957_v57 = vadd.f32 %v3956_v45, %v3955_v42 }
 0x402   : > { %v3959_v60 = vmul.f32 0.00390625, %v3957_v57 }
 0x404   : > { %v13058_v63 = vsub.f32 %v12981_v54, %v3959_v60  ;;  %v13061_v3 = vsub.f32 %v12978_v48, %v3959_v60  ;;  %v13064_v53 = vsub.f32 %v12991_v13, %v3959_v60  ;;  %v13067_v15 = vsub.f32 %v12988_v10, %v3959_v60 }
 0x405   : > { %v13070_v18 = vsub.f32 %v13001_v47, %v3959_v60  ;;  %v13073_v20 = vsub.f32 %v12998_v41, %v3959_v60  ;;  %v13076_v28 = vsub.f32 %v13011_v51, %v3959_v60  ;;  %v13079_v54 = vsub.f32 %v13008_v14, %v3959_v60 }
 0x406   : > { %v13082_v48 = vsub.f32 %v13021_v34, %v3959_v60  ;;  %v13085_v13 = vsub.f32 %v13018_v30, %v3959_v60  ;;  %v13088_v10 = vsub.f32 %v13031_v16, %v3959_v60  ;;  %v13091_v47 = vsub.f32 %v13028_v61, %v3959_v60 }
 0x407   : > { %v13093_v41 = vsub.f32 %v3879_v36, %v3959_v60  ;;  %v13095_v32 = vsub.f32 %v3880_v33, %v3959_v60  ;;  %v13097_v51 = vsub.f32 %v3881_v8, %v3959_v60  ;;  %v13099_v14 = vsub.f32 %v3882_v2, %v3959_v60 }
 0x408   : > { %v13101_v59 = vsub.f32 %v3883_v50, %v3959_v60  ;;  %v13103_v34 = vsub.f32 %v3884_v38, %v3959_v60  ;;  %v13105_v30 = vsub.f32 %v3885_v4, %v3959_v60  ;;  %v13107_v6 = vsub.f32 %v3886_v44, %v3959_v60 }
 0x409   : > { %v13109_v16 = vsub.f32 %v3887_v55, %v3959_v60  ;;  %v13111_v61 = vsub.f32 %v3888_v52, %v3959_v60  ;;  %v13114_v36 = vsub.f32 %v12931_v35, %v3959_v60  ;;  %v13117_v33 = vsub.f32 %v12928_v11, %v3959_v60 }
 0x40a   : > { %v13120_v2 = vsub.f32 %v12941_v19, %v3959_v60  ;;  %v13123_v8 = vsub.f32 %v12938_v56, %v3959_v60  ;;  %v13130_v24 = vsub.f32 %v12951_v43, %v3959_v60  ;;  %v13135_v11 = vsub.f32 %v12948_v40, %v3959_v60 }
 0x40b   : > { %v3992_v38 = vmul.f32 %v13114_v36, %v13114_v36  ;;  %v3993_v50 = vmul.f32 %v13117_v33, %v13117_v33  ;;  %v13142_v5 = vsub.f32 %v12961_v7, %v3959_v60  ;;  %v13148_v40 = vsub.f32 %v12958_v0, %v3959_v60 }
 0x40c   : > { %v3994_v35 = vmul.f32 %v13120_v2, %v13120_v2  ;;  %v3995_v19 = vmul.f32 %v13123_v8, %v13123_v8  ;;  %v3996_v43 = vmul.f32 %v13130_v24, %v13130_v24  ;;  %v3997_v22 = vmul.f32 %v13135_v11, %v13135_v11 }
 0x40d   : > { %v4024_v56 = vsel %vm15909_vm1, %v3992_v38, 0.0  ;;  %v4025_v1 = vsel %vm15909_vm1, %v3993_v50, 0.0  ;;  %v13154_v37 = vsub.f32 %v12971_v9, %v3959_v60  ;;  %v3998_v7 = vmul.f32 %v13142_v5, %v13142_v5 }
 0x40e   : > { %v4026_v62 = vadd.f32 %v4025_v1, %v4024_v56  ;;  %v4027_v44 = vsel %vm15909_vm1, %v3994_v35, 0.0  ;;  %v4029_v23 = vsel %vm15909_vm1, %v3995_v19, 0.0  ;;  %v4031_v46 = vsel %vm15909_vm1, %v3996_v43, 0.0 }
 0x40f   : > { %v13160_v52 = vsub.f32 %v12968_v12, %v3959_v60  ;;  %v3999_v0 = vmul.f32 %v13148_v40, %v13148_v40  ;;  %v4033_v55 = vsel %vm15909_vm1, %v3997_v22, 0.0  ;;  %v4000_v27 = vmul.f32 %v13154_v37, %v13154_v37 }
 0x410   : > { %v4028_v4 = vadd.f32 %v4027_v44, %v4026_v62  ;;  %v4035_v9 = vsel %vm15909_vm1, %v3998_v7, 0.0  ;;  %v4002_v12 = vmul.f32 %v13058_v63, %v13058_v63  ;;  %v4003_v42 = vmul.f32 %v13061_v3, %v13061_v3 }
 0x411   : > { %v4001_v21 = vmul.f32 %v13160_v52, %v13160_v52  ;;  %v4037_v25 = vsel %vm15909_vm1, %v3999_v0, 0.0  ;;  %v4039_v29 = vsel %vm15909_vm1, %v4000_v27, 0.0  ;;  %v4004_v60 = vmul.f32 %v13064_v53, %v13064_v53 }
 0x412   : > { %v4030_v26 = vadd.f32 %v4029_v23, %v4028_v4  ;;  %v4043_v38 = vsel %vm15909_vm1, %v4002_v12, 0.0  ;;  %v4005_v35 = vmul.f32 %v13067_v15, %v13067_v15  ;;  %v4045_v19 = vsel %vm15909_vm1, %v4003_v42, 0.0 }
 0x413   : > { %v4041_v45 = vsel %vm15909_vm1, %v4001_v21, 0.0  ;;  %v4006_v1 = vmul.f32 %v13070_v18, %v13070_v18  ;;  %v4047_v62 = vsel %vm15909_vm1, %v4004_v60, 0.0  ;;  %v4007_v44 = vmul.f32 %v13073_v20, %v13073_v20 }
 0x414   : > { %v4032_v49 = vadd.f32 %v4031_v46, %v4030_v26  ;;  %v4049_v4 = vsel %vm15909_vm1, %v4005_v35, 0.0  ;;  %v4008_v23 = vmul.f32 %v13076_v28, %v13076_v28  ;;  %v4009_v46 = vmul.f32 %v13079_v54, %v13079_v54 }
 0x415   : > { %v4051_v26 = vsel %vm15909_vm1, %v4006_v1, 0.0 }
 0x416   : > { %v4034_v58 = vadd.f32 %v4033_v55, %v4032_v49  ;;  %v4053_v49 = vsel %vm15909_vm1, %v4007_v44, 0.0  ;;  %v4010_v55 = vmul.f32 %v13082_v48, %v13082_v48 }
 0x418   : > { %v4036_v31 = vadd.f32 %v4035_v9, %v4034_v58  ;;  %v4055_v58 = vsel %vm15909_vm1, %v4008_v23, 0.0  ;;  %v4011_v9 = vmul.f32 %v13085_v13, %v13085_v13 }
 0x41a   : > { %v4038_v17 = vadd.f32 %v4037_v25, %v4036_v31  ;;  %v4057_v31 = vsel %vm15909_vm1, %v4009_v46, 0.0  ;;  %v4012_v25 = vmul.f32 %v13088_v10, %v13088_v10 }
 0x41c   : > { %v4040_v39 = vadd.f32 %v4039_v29, %v4038_v17  ;;  %v4059_v17 = vsel %vm15909_vm1, %v4010_v55, 0.0  ;;  %v4013_v29 = vmul.f32 %v13091_v47, %v13091_v47 }
 0x41e   : > { %v4042_v57 = vadd.f32 %v4041_v45, %v4040_v39  ;;  %v4061_v39 = vsel %vm15909_vm1, %v4011_v9, 0.0  ;;  %v4014_v45 = vmul.f32 %v13093_v41, %v13093_v41 }
 0x420   : > { %v4044_v50 = vadd.f32 %v4043_v38, %v4042_v57  ;;  %v4063_v57 = vsel %vm15909_vm1, %v4012_v25, 0.0  ;;  %v4015_v38 = vmul.f32 %v13095_v32, %v13095_v32 }
 0x422   : > { %v4046_v56 = vadd.f32 %v4045_v19, %v4044_v50  ;;  %v4065_v50 = vsel %vm15909_vm1, %v4013_v29, 0.0  ;;  %v4016_v19 = vmul.f32 %v13097_v51, %v13097_v51 }
 0x424   : > { %v4048_v43 = vadd.f32 %v4047_v62, %v4046_v56  ;;  %v4067_v56 = vsel %vm15909_vm1, %v4014_v45, 0.0  ;;  %v4017_v62 = vmul.f32 %v13099_v14, %v13099_v14 }
 0x426   : > { %v4050_v22 = vadd.f32 %v4049_v4, %v4048_v43  ;;  %v4069_v43 = vsel %vm15909_vm1, %v4015_v38, 0.0  ;;  %v4018_v4 = vmul.f32 %v13101_v59, %v13101_v59 }
 0x428   : > { %v4052_v7 = vadd.f32 %v4051_v26, %v4050_v22  ;;  %v4071_v22 = vsel %vm15909_vm1, %v4016_v19, 0.0  ;;  %v4019_v26 = vmul.f32 %v13103_v34, %v13103_v34 }
 0x42a   : > { %v4054_v0 = vadd.f32 %v4053_v49, %v4052_v7  ;;  %v4073_v7 = vsel %vm15909_vm1, %v4017_v62, 0.0  ;;  %v4020_v49 = vmul.f32 %v13105_v30, %v13105_v30 }
 0x42c   : > { %v4056_v27 = vadd.f32 %v4055_v58, %v4054_v0  ;;  %v4075_v0 = vsel %vm15909_vm1, %v4018_v4, 0.0  ;;  %v4021_v58 = vmul.f32 %v13107_v6, %v13107_v6 }
 0x42e   : > { %v4058_v21 = vadd.f32 %v4057_v31, %v4056_v27  ;;  %v4077_v27 = vsel %vm15909_vm1, %v4019_v26, 0.0  ;;  %v4022_v31 = vmul.f32 %v13109_v16, %v13109_v16 }
 0x430   : > { %v4060_v12 = vadd.f32 %v4059_v17, %v4058_v21  ;;  %v4079_v21 = vsel %vm15909_vm1, %v4020_v49, 0.0  ;;  %v4023_v17 = vmul.f32 %v13111_v61, %v13111_v61 }
 0x432   : > { %v4062_v42 = vadd.f32 %v4061_v39, %v4060_v12  ;;  %v4081_v12 = vsel %vm15909_vm1, %v4021_v58, 0.0  ;;  %v4083_v39 = vsel %vm15909_vm1, %v4022_v31, 0.0  ;;  %v4085_v45 = vsel %vm15909_vm1, %v4023_v17, 0.0 }
 0x433   : > { %v15905_v31 = vmov 1.0  }
 0x434   : > { %v4064_v60 = vadd.f32 %v4063_v57, %v4062_v42 }
 0x436   : > { %v4066_v35 = vadd.f32 %v4065_v50, %v4064_v60 }
 0x438   : > { %v4068_v1 = vadd.f32 %v4067_v56, %v4066_v35 }
 0x43a   : > { %v4070_v44 = vadd.f32 %v4069_v43, %v4068_v1 }
 0x43c   : > { %v4072_v23 = vadd.f32 %v4071_v22, %v4070_v44 }
 0x43e   : > { %v4074_v46 = vadd.f32 %v4073_v7, %v4072_v23 }
 0x440   : > { %v4076_v55 = vadd.f32 %v4075_v0, %v4074_v46 }
 0x442   : > { %v4078_v9 = vadd.f32 %v4077_v27, %v4076_v55 }
 0x444   : > { %v4080_v25 = vadd.f32 %v4079_v21, %v4078_v9 }
 0x446   : > { %v4082_v29 = vadd.f32 %v4081_v12, %v4080_v25 }
 0x448   : > { %v4084_v42 = vadd.f32 %v4083_v39, %v4082_v29 }
 0x44a   : > { %v4086_v57 = vadd.f32 %v4085_v45, %v4084_v42 }
 0x44c   : > { %v4087_v60 = vrot.slane %v4086_v57, 4 }
 0x44e   : > { %v4088_v38 = vadd.f32 %v4087_v60, %v4086_v57 }
 0x450   : > { %v4089_v50 = vrot.slane %v4088_v38, 2 }
 0x452   : > { %v4090_v35 = vadd.f32 %v4089_v50, %v4088_v38 }
 0x454   : > { %v4091_v19 = vrot.slane %v4090_v35, 1 }
 0x456   : > { %v4092_v56 = vadd.f32 %v4091_v19, %v4090_v35 }
 0x458   : > { %v4093_v1 = vmul.f32 0.00390625, %v4092_v56 }
 0x45a   : > { %v4094_v62 = vadd.f32 1e-05, %v4093_v1 }
 0x45c   : > { %11671 = vrsqrt.f32 %v4094_v62 }
 0x466   : > { %v13239_v43 = vpop.eup %11671 }
 0x467   : > { %v4126_v44 = vmul.f32 %v13239_v43, %v13109_v16  ;;  %v4096_v7 = vmul.f32 %v13239_v43, %v13114_v36  ;;  %v4097_v46 = vmul.f32 %v13239_v43, %v13117_v33  ;;  %v4098_v49 = vmul.f32 %v13239_v43, %v13120_v2 }
 0x468   : > { %v4099_v0 = vmul.f32 %v13239_v43, %v13123_v8  ;;  %v4100_v16 = vmul.f32 %v13239_v43, %v13130_v24  ;;  %v4101_v58 = vmul.f32 %v13239_v43, %v13135_v11  ;;  %v4102_v27 = vmul.f32 %v13239_v43, %v13142_v5 }
 0x469   : > { %v4190_v4 = vmul.f32 0.70710677, %v4126_v44  ;;  %v13257_v36 = vmul.f32 0.5, %v4126_v44  ;;  %v4103_v33 = vmul.f32 %v13239_v43, %v13148_v40  ;;  %v4104_v2 = vmul.f32 %v13239_v43, %v13154_v37 }
 0x46a   : > { %v4105_v24 = vmul.f32 %v13239_v43, %v13160_v52  ;;  %v4106_v11 = vmul.f32 %v13239_v43, %v13058_v63  ;;  %v4107_v5 = vmul.f32 %v13239_v43, %v13061_v3  ;;  %v4108_v9 = vmul.f32 %v13239_v43, %v13064_v53 }
 0x46b   : > { %v4286_v22 = vand.u32 2147483647, %v4190_v4  ;;  %vm4222_vm3 = vcmp.lt.f32.partialorder %v4190_v4, 0.0  ;;  %v4109_v40 = vmul.f32 %v13239_v43, %v13067_v15  ;;  %v4110_v37 = vmul.f32 %v13239_v43, %v13070_v18 }
 0x46c   : > { %v13276_v21 = vsel %vm4222_vm3, -1.0, %v15905_v31  ;;  %v13280_v52 = vmul.f32 %v13239_v43, %v13073_v20  ;;  %v13284_v63 = vmul.f32 %v13239_v43, %v13076_v28  ;;  %v13288_v3 = vmul.f32 %v13239_v43, %v13079_v54 }
 0x46d   : > { %v4318_v23 = vmul.f32 0.3275911, %v4286_v22  ;;  %v4734_v26 = vsub.f32 0.0, %v4286_v22  ;;  %v13292_v53 = vmul.f32 %v13239_v43, %v13082_v48  ;;  %v13296_v15 = vmul.f32 %v13239_v43, %v13085_v13 }
 0x46e   : > { %v13300_v18 = vmul.f32 %v13239_v43, %v13088_v10  ;;  %v13304_v20 = vmul.f32 %v13239_v43, %v13091_v47  ;;  %v13308_v54 = vmul.f32 %v13239_v43, %v13093_v41  ;;  %v13312_v48 = vmul.f32 %v13239_v43, %v13095_v32 }
 0x46f   : > { %v4350_v55 = vadd.f32 1.0, %v4318_v23  ;;  %v4766_v8 = vmul.f32 %v4734_v26, %v4286_v22  ;;  %v13316_v13 = vmul.f32 %v13239_v43, %v13097_v51  ;;  %v13318_v25 = vmul.f32 0.5, %v4096_v7 }
 0x470   : > { %v13320_v10 = vmul.f32 0.5, %v4097_v46  ;;  %v13322_v17 = vmul.f32 0.5, %v4098_v49  ;;  %v13324_v47 = vmul.f32 0.5, %v4099_v0  ;;  %v13326_v12 = vmul.f32 0.5, %v4100_v16 }
 0x471   : > { %11673 = vrcp.f32 %v4350_v55  ;;  %v4828_v28 = vmul.f32 1.442695, %v4766_v8  ;;  %16161 = vst [vmem:[#allocation36_spill] sm:$0xff] %v13318_v25  ;;  %v13328_v41 = vmul.f32 0.5, %v4101_v58  ;;  %v13330_v29 = vmul.f32 0.5, %v4102_v27 }
 0x472   : > { %16162 = vst [vmem:[#allocation37_spill] sm:$0xff] %v13320_v10  ;;  %16163 = vst [vmem:[#allocation40_spill] sm:$0xff] %v13322_v17  ;;  %v13332_v32 = vmul.f32 0.5, %v4103_v33  ;;  %v13334_v39 = vmul.f32 0.5, %v4104_v2  ;;  %v13336_v51 = vmul.f32 0.5, %v4105_v24  ;;  %v13338_v42 = vmul.f32 0.5, %v4106_v11 }
 0x473   : > { %16164 = vst [vmem:[#allocation41_spill] sm:$0xff] %v13324_v47  ;;  %16165 = vst [vmem:[#allocation42_spill] sm:$0xff] %v13326_v12  ;;  %v13340_v45 = vmul.f32 0.5, %v4107_v5  ;;  %v13342_v57 = vmul.f32 0.5, %v4108_v9  ;;  %v13344_v60 = vmul.f32 0.5, %v4109_v40  ;;  %v13346_v38 = vmul.f32 0.5, %v4110_v37 }
 0x474   : > { %16166 = vst [vmem:[#allocation43_spill] sm:$0xff] %v13328_v41  ;;  %16167 = vst [vmem:[#allocation44_spill] sm:$0xff] %v13330_v29  ;;  %v13348_v50 = vmul.f32 0.70710677, %v4096_v7  ;;  %v13352_v35 = vmul.f32 %v13239_v43, %v13099_v14  ;;  %v13354_v19 = vmul.f32 0.70710677, %v4097_v46  ;;  %v13364_v44 = vmul.f32 %v13239_v43, %v13101_v59 }
 0x475   : > { %16168 = vst [vmem:[#allocation45_spill] sm:$0xff] %v13332_v32  ;;  %16169 = vst [vmem:[#allocation46_spill] sm:$0xff] %v13334_v39  ;;  %v13356_v56 = vmul.f32 0.70710677, %v4098_v49  ;;  %v13358_v1 = vmul.f32 0.70710677, %v4099_v0  ;;  %v13375_v26 = vmul.f32 %v13239_v43, %v13103_v34  ;;  %v13383_v59 = vmul.f32 %v13239_v43, %v13105_v30 }
 0x476   : > { %16170 = vst [vmem:[#allocation47_spill] sm:$0xff] %v13336_v51  ;;  %16171 = vst [vmem:[#allocation48_spill] sm:$0xff] %v13338_v42  ;;  %v13366_v4 = vmul.f32 0.70710677, %v4100_v16  ;;  %v13368_v22 = vmul.f32 0.70710677, %v4101_v58  ;;  %v13393_v58 = vmul.f32 %v13239_v43, %v13107_v6  ;;  %11675 = vpow2.f32 %v4828_v28 }
 0x477   : > { %16172 = vst [vmem:[#allocation57_spill] sm:$0xff] %v13340_v45  ;;  %16173 = vst [vmem:[#allocation59_spill] sm:$0xff] %v13342_v57  ;;  %v13370_v23 = vmul.f32 0.70710677, %v4102_v27  ;;  %v13377_v7 = vmul.f32 0.70710677, %v4103_v33  ;;  %v13401_v33 = vmul.f32 %v13239_v43, %v13111_v61 }
 0x478   : > { %16174 = vst [vmem:[#allocation60_spill] sm:$0xff] %v13344_v60  ;;  %16175 = vst [vmem:[#allocation61_spill] sm:$0xff] %v13346_v38  ;;  %v13379_v46 = vmul.f32 0.70710677, %v4104_v2  ;;  %v13385_v49 = vmul.f32 0.70710677, %v4105_v24 }
 0x479   : > { %v13387_v0 = vmul.f32 0.70710677, %v4106_v11  ;;  %v13389_v55 = vmul.f32 0.70710677, %v4107_v5  ;;  %v13395_v34 = vmul.f32 0.70710677, %v4108_v9 }
 0x47a   : > { %v13397_v27 = vmul.f32 0.70710677, %v4109_v40  ;;  %v13403_v30 = vmul.f32 0.70710677, %v4110_v37  ;;  %v13406_v2 = vmul.f32 0.70710677, %v13280_v52 }
 0x47b   : > { %v13360_v62 = vpop.eup %11673  ;;  %v13409_v8 = vmul.f32 0.70710677, %v13284_v63  ;;  %v13413_v6 = vmul.f32 0.70710677, %v13288_v3  ;;  %v13416_v11 = vmul.f32 0.70710677, %v13292_v53 }
 0x47c   : > { %v4446_v14 = vmul.f32 1.0614054, %v13360_v62  ;;  %v13419_v5 = vmul.f32 0.70710677, %v13296_v15  ;;  %v13422_v61 = vmul.f32 0.70710677, %v13300_v18 }
 0x47d   : > { %v13425_v43 = vmul.f32 0.70710677, %v13304_v20  ;;  %v13428_v9 = vmul.f32 0.70710677, %v13308_v54  ;;  %v13431_v37 = vmul.f32 0.70710677, %v13312_v48 }
 0x47e   : > { %v4478_v16 = vadd.f32 -1.4531521, %v4446_v14  ;;  %v13434_v14 = vmul.f32 0.70710677, %v13316_v13  ;;  %v13440_v31 = vmul.f32 0.70710677, %v13364_v44 }
 0x47f   : > { %v13443_v38 = vmul.f32 0.70710677, %v13375_v26  ;;  %v13450_v57 = vmul.f32 0.70710677, %v13393_v58  ;;  %v13453_v45 = vmul.f32 0.70710677, %v13401_v33 }
 0x480   : > { %v4510_v24 = vmul.f32 %v13360_v62, %v4478_v16  ;;  %v13437_v16 = vmul.f32 0.70710677, %v13352_v35  ;;  %vm4192_vm4 = vcmp.lt.f32.partialorder %v13348_v50, 0.0  ;;  %vm4193_vm5 = vcmp.lt.f32.partialorder %v13354_v19, 0.0 }
 0x481   : > { %vm4194_vm6 = vcmp.lt.f32.partialorder %v13356_v56, 0.0  ;;  %vm4195_vm7 = vcmp.lt.f32.partialorder %v13358_v1, 0.0  ;;  %vm4196_vm8 = vcmp.lt.f32.partialorder %v13366_v4, 0.0  ;;  %vm4197_vm9 = vcmp.lt.f32.partialorder %v13368_v22, 0.0 }
 0x482   : > { %v4542_v40 = vadd.f32 1.4214138, %v4510_v24  ;;  %v13447_v24 = vmul.f32 0.70710677, %v13383_v59  ;;  %vm4207_vm1 = vcmp.lt.f32.partialorder %v13406_v2, 0.0  ;;  %vm4214_vm3 = vcmp.lt.f32.partialorder %v13428_v9, 0.0 }
 0x483   : > { %vm4215_vm2 = vcmp.lt.f32.partialorder %v13431_v37, 0.0  ;;  %vm4216_vm0 = vcmp.lt.f32.partialorder %v13434_v14, 0.0  ;;  %vm4217_vm11 = vcmp.lt.f32.partialorder %v13437_v16, 0.0  ;;  %vm4218_vm12 = vcmp.lt.f32.partialorder %v13440_v31, 0.0 }
 0x484   : > { %v4574_v60 = vmul.f32 %v13360_v62, %v4542_v40  ;;  %vm4219_vm13 = vcmp.lt.f32.partialorder %v13443_v38, 0.0  ;;  %vm4220_vm14 = vcmp.lt.f32.partialorder %v13447_v24, 0.0  ;;  %vm4221_vm10 = vcmp.lt.f32.partialorder %v13450_v57, 0.0 }
 0x485   : > { %vm4223_vm15 = vcmp.lt.f32.partialorder %v13453_v45, 0.0  ;;  %v16176_v42 = vmov 1.0  }
 0x486   : > { %v4606_v28 = vadd.f32 -0.28449672, %v4574_v60  ;;  %v13491_v51 = vsel %vm4192_vm4, -1.0, %v16176_v42  ;;  %v13506_v32 = vsel %vm4195_vm7, -1.0, %v16176_v42  ;;  %v13511_v29 = vsel %vm4196_vm8, -1.0, %v16176_v42 }
 0x487   : > { %16177 = vst [vmem:[#allocation63_spill] sm:$0xff] %v13491_v51  ;;  %16180 = vst [vmem:[#allocation50_spill] sm:$0xff] %v13506_v32  ;;  %vm16183_vm4 = vcmp.lt.f32.partialorder %v13370_v23, 0.0  ;;  %vm16189_vm7 = vcmp.lt.f32.partialorder %v13385_v49, 0.0  ;;  %vm16191_vm8 = vcmp.lt.f32.partialorder %v13387_v0, 0.0 }
 0x488   : > { %v4638_v40 = vmul.f32 %v13360_v62, %v4606_v28  ;;  %16181 = vst [vmem:[#allocation51_spill] sm:$0xff] %v13511_v29  ;;  %v13536_v17 = vsel %vm16189_vm7, -1.0, %v16176_v42  ;;  %v13541_v10 = vsel %vm16191_vm8, -1.0, %v16176_v42  ;;  %vm16202_vm7 = vcmp.lt.f32.partialorder %v13409_v8, 0.0 }
 0x489   : > { %16190 = vst [vmem:[#allocation56_spill] sm:$0xff] %v13536_v17  ;;  %16192 = vst [vmem:[#allocation58_spill] sm:$0xff] %v13541_v10  ;;  %vm16204_vm8 = vcmp.lt.f32.partialorder %v13413_v6, 0.0 }
 0x48a   : > { %v4670_v60 = vadd.f32 0.2548296, %v4638_v40  ;;  %v11676_v40 = vpop.eup %11675 }
 0x48c   : > { %v4702_v28 = vmul.f32 %v13360_v62, %v4670_v60  ;;  %v13496_v62 = vsel %vm4193_vm5, -1.0, %v16176_v42  ;;  %v13501_v60 = vsel %vm4194_vm6, -1.0, %v16176_v42  ;;  %vm16185_vm5 = vcmp.lt.f32.partialorder %v13377_v7, 0.0 }
 0x48d   : > { %16178 = vst [vmem:[#allocation65_spill] sm:$0xff] %v13496_v62  ;;  %16179 = vst [vmem:[#allocation49_spill] sm:$0xff] %v13501_v60  ;;  %v13526_v41 = vsel %vm16185_vm5, -1.0, %v16176_v42  ;;  %vm16187_vm6 = vcmp.lt.f32.partialorder %v13379_v46, 0.0  ;;  %vm16197_vm5 = vcmp.lt.f32.partialorder %v13397_v27, 0.0 }
 0x48e   : > { %v4862_v39 = vmul.f32 %v11676_v40, %v4702_v28  ;;  %v13516_v28 = vsel %vm4197_vm9, -1.0, %v16176_v42  ;;  %v13521_v40 = vsel %vm16183_vm4, -1.0, %v16176_v42  ;;  %16186 = vst [vmem:[#allocation54_spill] sm:$0xff] %v13526_v41  ;;  %v13531_v47 = vsel %vm16187_vm6, -1.0, %v16176_v42 }
 0x48f   : > { %16182 = vst [vmem:[#allocation52_spill] sm:$0xff] %v13516_v28  ;;  %16184 = vst [vmem:[#allocation53_spill] sm:$0xff] %v13521_v40  ;;  %vm16193_vm9 = vcmp.lt.f32.partialorder %v13389_v55, 0.0  ;;  %vm16195_vm4 = vcmp.lt.f32.partialorder %v13395_v34, 0.0  ;;  %vm16199_vm6 = vcmp.lt.f32.partialorder %v13403_v30, 0.0 }
 0x490   : > { %v4894_v12 = vsub.f32 1.0, %v4862_v39  ;;  %16188 = vst [vmem:[#allocation55_spill] sm:$0xff] %v13531_v47  ;;  %v13546_v25 = vsel %vm16193_vm9, -1.0, %v16176_v42  ;;  %v13551_v39 = vsel %vm16195_vm4, -1.0, %v16176_v42  ;;  %v13556_v47 = vsel %vm16197_vm5, -1.0, %v16176_v42 }
 0x491   : > { %16194 = vst [vmem:[#allocation62_spill] sm:$0xff] %v13546_v25  ;;  %16196 = vst [vmem:[#allocation64_spill] sm:$0xff] %v13551_v39  ;;  %v13561_v17 = vsel %vm16199_vm6, -1.0, %v16176_v42  ;;  %v13567_v25 = vsel %vm4207_vm1, -1.0, %v16176_v42  ;;  %v13572_v39 = vsel %vm16202_vm7, -1.0, %v16176_v42  ;;  %vm16206_vm9 = vcmp.lt.f32.partialorder %v13416_v11, 0.0 }
 0x492   : > { %16198 = vst [vmem:[#allocation66_spill] sm:$0xff] %v13556_v47  ;;  %16200 = vst [vmem:[#allocation67_spill] sm:$0xff] %v13561_v17  ;;  %v4926_v10 = vmul.f32 %v4894_v12, %v13276_v21  ;;  %v13577_v47 = vsel %vm16204_vm8, -1.0, %v16176_v42  ;;  %v13582_v17 = vsel %vm16206_vm9, -1.0, %v16176_v42  ;;  %vm16208_vm4 = vcmp.lt.f32.partialorder %v13419_v5, 0.0 }
 0x493   : > { %16201 = vst [vmem:[#allocation68_spill] sm:$0xff] %v13567_v25  ;;  %16203 = vst [vmem:[#allocation69_spill] sm:$0xff] %v13572_v39  ;;  %v13587_v21 = vsel %vm16208_vm4, -1.0, %v16176_v42  ;;  %vm16210_vm1 = vcmp.lt.f32.partialorder %v13422_v61, 0.0  ;;  %vm16212_vm5 = vcmp.lt.f32.partialorder %v13425_v43, 0.0  ;;  %v13636_v25 = vmul.f32 0.5, %v13280_v52 }
 0x494   : > { %16205 = vst [vmem:[#allocation70_spill] sm:$0xff] %v13577_v47  ;;  %16207 = vst [vmem:[#allocation71_spill] sm:$0xff] %v13582_v17  ;;  %v13592_v12 = vsel %vm16210_vm1, -1.0, %v16176_v42  ;;  %v13597_v39 = vsel %vm16212_vm5, -1.0, %v16176_v42  ;;  %v4958_v47 = vadd.f32 1.0, %v4926_v10  ;;  %v13602_v17 = vsel %vm4214_vm3, -1.0, %v16176_v42 }
 0x495   : > { %16209 = vst [vmem:[#allocation72_spill] sm:$0xff] %v13587_v21  ;;  %16211 = vst [vmem:[#allocation73_spill] sm:$0xff] %v13592_v12  ;;  %v13607_v21 = vsel %vm4215_vm2, -1.0, %v16176_v42  ;;  %v13612_v12 = vsel %vm4216_vm0, -1.0, %v16176_v42  ;;  %v13622_v10 = vsel %vm4218_vm12, -1.0, %v16176_v42  ;;  %v13658_v52 = vmul.f32 0.5, %v13296_v15 }
 0x496   : > { %16213 = vst [vmem:[#allocation74_spill] sm:$0xff] %v13597_v39  ;;  %16214 = vst [vmem:[#allocation75_spill] sm:$0xff] %v13602_v17  ;;  %v13617_v39 = vsel %vm4217_vm11, -1.0, %v16176_v42  ;;  %v13627_v17 = vsel %vm4219_vm13, -1.0, %v16176_v42  ;;  %vm16228_vm0 = vcmask 31744   ;;  %v13677_v15 = vmul.f32 0.5, %v13352_v35 }
 0x497   : > { %16215 = vst [vmem:[#allocation76_spill] sm:$0xff] %v13607_v21  ;;  %16216 = vst [vmem:[#allocation77_spill] sm:$0xff] %v13612_v12  ;;  %v13632_v21 = vsel %vm4220_vm14, -1.0, %v16176_v42  ;;  %v4990_v12 = vmul.f32 %v4958_v47, %v13257_v36  ;;  %v13655_v36 = vmul.f32 0.5, %v13292_v53  ;;  %v13662_v47 = vmul.f32 0.5, %v13300_v18 }
 0x498   : > { %16217 = vst [vmem:[#allocation78_spill] sm:$0xff] %v13617_v39  ;;  %16218 = vst [vmem:[#allocation79_spill] sm:$0xff] %v13622_v10  ;;  %v13641_v39 = vsel %vm4221_vm10, -1.0, %v16176_v42  ;;  %v13646_v10 = vsel %vm4223_vm15, -1.0, %v16176_v42  ;;  %v13665_v42 = vmul.f32 0.5, %v13304_v20  ;;  %v13674_v53 = vmul.f32 0.5, %v13316_v13 }
 0x499   : > { %16219 = vst [vmem:[#allocation80_spill] sm:$0xff] %v13627_v17  ;;  %16220 = vst [vmem:[#allocation81_spill] sm:$0xff] %v13632_v21  ;;  %v13649_v17 = vmul.f32 0.5, %v13284_v63  ;;  %v13652_v21 = vmul.f32 0.5, %v13288_v3  ;;  %v13668_v63 = vmul.f32 0.5, %v13308_v54  ;;  %v13671_v3 = vmul.f32 0.5, %v13312_v48 }
 0x49a   : > { %16221 = vst [vmem:[#allocation82_spill] sm:$0xff] %v13636_v25  ;;  %16222 = vst [vmem:[#allocation83_spill] sm:$0xff] %v13641_v39  ;;  %v13683_v18 = vmul.f32 0.5, %v13375_v26  ;;  %v13686_v20 = vmul.f32 0.5, %v13383_v59  ;;  %v13689_v54 = vmul.f32 0.5, %v13393_v58  ;;  %v13692_v48 = vmul.f32 0.5, %v13401_v33 }
 0x49b   : > { %16223 = vst [vmem:[#allocation84_spill] sm:$0xff] %v13646_v10  ;;  %16224 = vst [vmem:[#allocation85_spill] sm:$0xff] %v13649_v17  ;;  %v13695_v13 = vand.u32 2147483647, %v13348_v50  ;;  %v13698_v35 = vand.u32 2147483647, %v13354_v19 }
 0x49c   : > { %16225 = vst [vmem:[#allocation86_spill] sm:$0xff] %v13652_v21  ;;  %16226 = vst [vmem:[#allocation87_spill] sm:$0xff] %v13655_v36  ;;  %v13704_v26 = vand.u32 2147483647, %v13358_v1  ;;  %v13707_v59 = vand.u32 2147483647, %v13366_v4 }
 0x49d   : > { %16227 = vst [vmem:[#allocation88_spill] sm:$0xff] %v13658_v52  ;;  %5022 = vst.msk [vmem:[#allocation2 + $0x181] sm:$0xff] %vm16228_vm0, %v4990_v12  ;;  %v13680_v12 = vmul.f32 0.5, %v13364_v44  ;;  %v13701_v44 = vand.u32 2147483647, %v13356_v56  ;;  %vm16304_vm2 = vcmask 1043456  }
 0x49e   : > { %16229 = vst [vmem:[#allocation89_spill] sm:$0xff] %v13662_v47  ;;  %16230 = vst [vmem:[#allocation90_spill] sm:$0xff] %v13665_v42  ;;  %v13710_v58 = vand.u32 2147483647, %v13368_v22  ;;  %v13713_v33 = vand.u32 2147483647, %v13370_v23 }
 0x49f   : > { %16231 = vst [vmem:[#allocation91_spill] sm:$0xff] %v13668_v63  ;;  %16232 = vst [vmem:[#allocation92_spill] sm:$0xff] %v13671_v3  ;;  %v13716_v50 = vand.u32 2147483647, %v13377_v7  ;;  %v13719_v19 = vand.u32 2147483647, %v13379_v46 }
 0x4a0   : > { %16233 = vst [vmem:[#allocation93_spill] sm:$0xff] %v13674_v53  ;;  %16234 = vst [vmem:[#allocation94_spill] sm:$0xff] %v13677_v15  ;;  %v13722_v56 = vand.u32 2147483647, %v13385_v49  ;;  %v13725_v1 = vand.u32 2147483647, %v13387_v0 }
 0x4a1   : > { %16235 = vst [vmem:[#allocation95_spill] sm:$0xff] %v13680_v12  ;;  %16236 = vst [vmem:[#allocation96_spill] sm:$0xff] %v13683_v18  ;;  %v13728_v4 = vand.u32 2147483647, %v13389_v55  ;;  %v13731_v22 = vand.u32 2147483647, %v13395_v34 }
 0x4a2   : > { %16237 = vst [vmem:[#allocation97_spill] sm:$0xff] %v13686_v20  ;;  %16238 = vst [vmem:[#allocation98_spill] sm:$0xff] %v13689_v54  ;;  %v13734_v23 = vand.u32 2147483647, %v13397_v27  ;;  %v13737_v7 = vand.u32 2147483647, %v13403_v30 }
 0x4a3   : > { %16239 = vst [vmem:[#allocation99_spill] sm:$0xff] %v13692_v48  ;;  %16240 = vst [vmem:[#allocation100_spill] sm:$0xff] %v13719_v19  ;;  %v13740_v46 = vand.u32 2147483647, %v13406_v2  ;;  %v13743_v49 = vand.u32 2147483647, %v13409_v8 }
 0x4a4   : > { %16241 = vst [vmem:[#allocation101_spill] sm:$0xff] %v13722_v56  ;;  %16242 = vst [vmem:[#allocation102_spill] sm:$0xff] %v13725_v1  ;;  %v13746_v0 = vand.u32 2147483647, %v13413_v6  ;;  %v13749_v55 = vand.u32 2147483647, %v13416_v11 }
 0x4a5   : > { %16243 = vst [vmem:[#allocation103_spill] sm:$0xff] %v13728_v4  ;;  %16244 = vst [vmem:[#allocation104_spill] sm:$0xff] %v13731_v22  ;;  %v13752_v34 = vand.u32 2147483647, %v13419_v5  ;;  %v13755_v27 = vand.u32 2147483647, %v13422_v61 }
 0x4a6   : > { %16245 = vst [vmem:[#allocation105_spill] sm:$0xff] %v13734_v23  ;;  %16246 = vst [vmem:[#allocation106_spill] sm:$0xff] %v13737_v7  ;;  %v13758_v30 = vand.u32 2147483647, %v13425_v43  ;;  %v13761_v2 = vand.u32 2147483647, %v13428_v9 }
 0x4a7   : > { %16247 = vst [vmem:[#allocation107_spill] sm:$0xff] %v13740_v46  ;;  %16248 = vst [vmem:[#allocation108_spill] sm:$0xff] %v13743_v49  ;;  %v13764_v8 = vand.u32 2147483647, %v13431_v37  ;;  %v13767_v6 = vand.u32 2147483647, %v13434_v14 }
 0x4a8   : > { %16249 = vst [vmem:[#allocation109_spill] sm:$0xff] %v13746_v0  ;;  %16250 = vst [vmem:[#allocation110_spill] sm:$0xff] %v13749_v55  ;;  %v13770_v11 = vand.u32 2147483647, %v13437_v16  ;;  %v13773_v5 = vand.u32 2147483647, %v13440_v31 }
 0x4a9   : > { %16251 = vst [vmem:[#allocation111_spill] sm:$0xff] %v13752_v34  ;;  %16252 = vst [vmem:[#allocation112_spill] sm:$0xff] %v13755_v27  ;;  %v13776_v61 = vand.u32 2147483647, %v13443_v38  ;;  %v13779_v43 = vand.u32 2147483647, %v13447_v24 }
 0x4aa   : > { %16253 = vst [vmem:[#allocation113_spill] sm:$0xff] %v13758_v30  ;;  %16254 = vst [vmem:[#allocation114_spill] sm:$0xff] %v13761_v2  ;;  %v13782_v9 = vand.u32 2147483647, %v13450_v57  ;;  %v13785_v37 = vand.u32 2147483647, %v13453_v45 }
 0x4ab   : > { %16255 = vst [vmem:[#allocation115_spill] sm:$0xff] %v13764_v8  ;;  %16256 = vst [vmem:[#allocation116_spill] sm:$0xff] %v13767_v6  ;;  %v4288_v14 = vmul.f32 0.3275911, %v13695_v13  ;;  %v4289_v16 = vmul.f32 0.3275911, %v13698_v35 }
 0x4ac   : > { %16257 = vst [vmem:[#allocation117_spill] sm:$0xff] %v13770_v11  ;;  %16258 = vst [vmem:[#allocation118_spill] sm:$0xff] %v13773_v5  ;;  %v4290_v48 = vmul.f32 0.3275911, %v13701_v44  ;;  %v4291_v31 = vmul.f32 0.3275911, %v13704_v26 }
 0x4ad   : > { %16259 = vst [vmem:[#allocation119_spill] sm:$0xff] %v13776_v61  ;;  %16260 = vst [vmem:[#allocation120_spill] sm:$0xff] %v13779_v43  ;;  %v4292_v38 = vmul.f32 0.3275911, %v13707_v59  ;;  %v4293_v54 = vmul.f32 0.3275911, %v13710_v58 }
 0x4ae   : > { %16261 = vst [vmem:[#allocation121_spill] sm:$0xff] %v13782_v9  ;;  %16262 = vst [vmem:[#allocation122_spill] sm:$0xff] %v13785_v37  ;;  %v4294_v24 = vmul.f32 0.3275911, %v13713_v33  ;;  %v4295_v57 = vmul.f32 0.3275911, %v13716_v50 }
 0x4af   : > { %v4296_v20 = vmul.f32 0.3275911, %v13719_v19  ;;  %v4297_v45 = vmul.f32 0.3275911, %v13722_v56  ;;  %v4298_v18 = vmul.f32 0.3275911, %v13725_v1  ;;  %vm16306_vm10 = vmmov %vm16304_vm2 }
 0x4b0   : > { %v4299_v12 = vmul.f32 0.3275911, %v13728_v4  ;;  %v4300_v15 = vmul.f32 0.3275911, %v13731_v22  ;;  %v4301_v53 = vmul.f32 0.3275911, %v13734_v23  ;;  %vm16309_vm11 = vmmov %vm16304_vm2 }
 0x4b1   : > { %v4302_v3 = vmul.f32 0.3275911, %v13737_v7  ;;  %v4303_v63 = vmul.f32 0.3275911, %v13740_v46  ;;  %v4304_v42 = vmul.f32 0.3275911, %v13743_v49  ;;  %vm16477_vm13 = vmmov %vm16228_vm0 }
 0x4b2   : > { %v4305_v47 = vmul.f32 0.3275911, %v13746_v0  ;;  %v4306_v52 = vmul.f32 0.3275911, %v13749_v55  ;;  %v4307_v36 = vmul.f32 0.3275911, %v13752_v34  ;;  %vm16478_vm14 = vmmov %vm16228_vm0 }
 0x4b3   : > { %v4308_v21 = vmul.f32 0.3275911, %v13755_v27  ;;  %v4309_v17 = vmul.f32 0.3275911, %v13758_v30  ;;  %v4310_v25 = vmul.f32 0.3275911, %v13761_v2  ;;  %vm16483_vm15 = vmmov %vm16228_vm0 }
 0x4b4   : > { %v4311_v10 = vmul.f32 0.3275911, %v13764_v8  ;;  %v4312_v39 = vmul.f32 0.3275911, %v13767_v6  ;;  %v4313_v41 = vmul.f32 0.3275911, %v13770_v11  ;;  %vm16484_vm3 = vmmov %vm16228_vm0 }
 0x4b5   : > { %v4314_v40 = vmul.f32 0.3275911, %v13773_v5  ;;  %v4315_v28 = vmul.f32 0.3275911, %v13776_v61  ;;  %v4316_v29 = vmul.f32 0.3275911, %v13779_v43  ;;  %vm16485_vm6 = vmmov %vm16228_vm0 }
 0x4b6   : > { %v4317_v32 = vmul.f32 0.3275911, %v13782_v9  ;;  %v4319_v60 = vmul.f32 0.3275911, %v13785_v37  ;;  %v4320_v62 = vadd.f32 1.0, %v4288_v14  ;;  %v4321_v51 = vadd.f32 1.0, %v4289_v16  ;;  %vm16486_vm7 = vmmov %vm16228_vm0 }
 0x4b7   : > { %v4322_v30 = vadd.f32 1.0, %v4290_v48  ;;  %v4323_v2 = vadd.f32 1.0, %v4291_v31  ;;  %v4324_v27 = vadd.f32 1.0, %v4292_v38  ;;  %v4325_v8 = vadd.f32 1.0, %v4293_v54  ;;  %vm16487_vm8 = vmmov %vm16228_vm0 }
 0x4b8   : > { %v4326_v34 = vadd.f32 1.0, %v4294_v24  ;;  %v4327_v6 = vadd.f32 1.0, %v4295_v57  ;;  %v4328_v55 = vadd.f32 1.0, %v4296_v20  ;;  %v4329_v11 = vadd.f32 1.0, %v4297_v45  ;;  %vm16488_vm9 = vmmov %vm16228_vm0 }
 0x4b9   : > { %v4330_v0 = vadd.f32 1.0, %v4298_v18  ;;  %v4331_v5 = vadd.f32 1.0, %v4299_v12  ;;  %v4332_v49 = vadd.f32 1.0, %v4300_v15  ;;  %v4333_v61 = vadd.f32 1.0, %v4301_v53  ;;  %vm16493_vm4 = vmmov %vm16228_vm0 }
 0x4ba   : > { %v4334_v46 = vadd.f32 1.0, %v4302_v3  ;;  %v13818_v43 = vadd.f32 1.0, %v4303_v63  ;;  %v13820_v9 = vadd.f32 1.0, %v4304_v42  ;;  %v13822_v37 = vadd.f32 1.0, %v4305_v47  ;;  %vm16494_vm1 = vmmov %vm16228_vm0 }
 0x4bb   : > { %11677 = vrcp.f32 %v4320_v62  ;;  %v13824_v48 = vadd.f32 1.0, %v4306_v52  ;;  %v13826_v14 = vadd.f32 1.0, %v4307_v36  ;;  %v13828_v54 = vadd.f32 1.0, %v4308_v21  ;;  %vm16495_vm5 = vmmov %vm16228_vm0 }
 0x4bc   : > { %11679 = vrcp.f32 %v4321_v51  ;;  %v13830_v20 = vadd.f32 1.0, %v4309_v17  ;;  %v13832_v12 = vadd.f32 1.0, %v4310_v25  ;;  %v13834_v53 = vadd.f32 1.0, %v4311_v10 }
 0x4bd   : > { %11681 = vrcp.f32 %v4322_v30  ;;  %v13836_v63 = vadd.f32 1.0, %v4312_v39  ;;  %v13838_v42 = vadd.f32 1.0, %v4313_v41  ;;  %v13840_v47 = vadd.f32 1.0, %v4314_v40 }
 0x4be   : > { %11683 = vrcp.f32 %v4323_v2  ;;  %v13842_v62 = vadd.f32 1.0, %v4315_v28  ;;  %v13844_v36 = vadd.f32 1.0, %v4316_v29  ;;  %v13846_v21 = vadd.f32 1.0, %v4317_v32 }
 0x4bf   : > { %11685 = vrcp.f32 %v4324_v27  ;;  %v13848_v17 = vadd.f32 1.0, %v4319_v60  ;;  %v4704_v25 = vsub.f32 0.0, %v13695_v13  ;;  %v4705_v51 = vsub.f32 0.0, %v13698_v35 }
 0x4c0   : > { %11687 = vrcp.f32 %v4325_v8  ;;  %v4706_v41 = vsub.f32 0.0, %v13701_v44  ;;  %vm16340_vm12 = vcmask 24576  }
 0x4c1   : > { %11689 = vrcp.f32 %v4326_v34 }
 0x4c2   : > { %11691 = vrcp.f32 %v4327_v6  ;;  %v13911_v29 = vmul.f32 %v4706_v41, %v13701_v44 }
 0x4c3   : > { %11693 = vrcp.f32 %v4328_v55  ;;  %v13908_v55 = vmul.f32 %v4705_v51, %v13698_v35  ;;  %v16289_v35 = vsub.f32 0.0, %v13704_v26  ;;  %v16292_v51 = vsub.f32 0.0, %v13707_v59 }
 0x4c4   : > { %11695 = vrcp.f32 %v4329_v11  ;;  %16286 = vst [vmem:[#allocation130_spill] sm:$0xff] %v13911_v29 }
 0x4c5   : > { %v13864_v34 = vpop.eup %11677  ;;  %11697 = vrcp.f32 %v4330_v0  ;;  %16285 = vst [vmem:[#allocation129_spill] sm:$0xff] %v13908_v55  ;;  %v13924_v44 = vmul.f32 %v16289_v35, %v13704_v26  ;;  %v13932_v41 = vmul.f32 %v16292_v51, %v13707_v59  ;;  %v16299_v59 = vsub.f32 0.0, %v13716_v50 }
 0x4c6   : > { %v13869_v6 = vpop.eup %11679  ;;  %11699 = vrcp.f32 %v4331_v5 }
 0x4c7   : > { %v13874_v45 = vpop.eup %11681  ;;  %11701 = vrcp.f32 %v4332_v49  ;;  %v4416_v49 = vmul.f32 1.0614054, %v13864_v34  ;;  %v4417_v0 = vmul.f32 1.0614054, %v13869_v6  ;;  %16290 = vst [vmem:[#allocation133_spill] sm:$0xff] %v13924_v44  ;;  %16293 = vst [vmem:[#allocation135_spill] sm:$0xff] %v13932_v41 }
 0x4c8   : > { %v13879_v52 = vpop.eup %11683  ;;  %11703 = vrcp.f32 %v4333_v61  ;;  %v4418_v61 = vmul.f32 1.0614054, %v13874_v45 }
 0x4c9   : > { %16271 = vst [vmem:[#allocation123_spill] sm:$0xff] %v13879_v52  ;;  %v13884_v60 = vpop.eup %11685  ;;  %11705 = vrcp.f32 %v4334_v46  ;;  %v4419_v46 = vmul.f32 1.0614054, %v13879_v52  ;;  %v4448_v27 = vadd.f32 -1.4531521, %v4416_v49 }
 0x4ca   : > { %16275 = vst [vmem:[#allocation124_spill] sm:$0xff] %v13884_v60  ;;  %v13889_v32 = vpop.eup %11687  ;;  %11707 = vrcp.f32 %v13818_v43  ;;  %v13905_v43 = vmul.f32 %v4704_v25, %v13695_v13  ;;  %v4420_v40 = vmul.f32 1.0614054, %v13884_v60  ;;  %v4449_v39 = vadd.f32 -1.4531521, %v4417_v0 }
 0x4cb   : > { %16277 = vst [vmem:[#allocation125_spill] sm:$0xff] %v13889_v32  ;;  %v13895_v38 = vpop.eup %11689  ;;  %11709 = vrcp.f32 %v13820_v9  ;;  %v4421_v13 = vmul.f32 1.0614054, %v13889_v32  ;;  %v13957_v51 = vmul.f32 %v13864_v34, %v4448_v27 }
 0x4cc   : > { %16280 = vst [vmem:[#allocation126_spill] sm:$0xff] %v13895_v38  ;;  %v13901_v57 = vpop.eup %11691  ;;  %11711 = vrcp.f32 %v13822_v37  ;;  %16284 = vst [vmem:[#allocation128_spill] sm:$0xff] %v13905_v43  ;;  %v4450_v37 = vadd.f32 -1.4531521, %v4418_v61  ;;  %v4422_v26 = vmul.f32 1.0614054, %v13895_v38 }
 0x4cd   : > { %16283 = vst [vmem:[#allocation127_spill] sm:$0xff] %v13901_v57  ;;  %v13913_v9 = vpop.eup %11693  ;;  %11713 = vrcp.f32 %v13824_v48  ;;  %v4451_v48 = vadd.f32 -1.4531521, %v4419_v46  ;;  %v13951_v46 = vmul.f32 %v16299_v59, %v13716_v50 }
 0x4ce   : > { %16287 = vst [vmem:[#allocation131_spill] sm:$0xff] %v13913_v9  ;;  %v13917_v28 = vpop.eup %11695  ;;  %11715 = vrcp.f32 %v13826_v14  ;;  %v16294_v14 = vsub.f32 0.0, %v13710_v58  ;;  %v13967_v50 = vmul.f32 %v13874_v45, %v4450_v37  ;;  %v4454_v11 = vadd.f32 -1.4531521, %v4422_v26 }
 0x4cf   : > { %16288 = vst [vmem:[#allocation132_spill] sm:$0xff] %v13917_v28  ;;  %v13926_v25 = vpop.eup %11697  ;;  %11717 = vrcp.f32 %v13828_v54  ;;  %v16297_v54 = vsub.f32 0.0, %v13713_v33  ;;  %16300 = vst [vmem:[#allocation139_spill] sm:$0xff] %v13951_v46  ;;  %v4425_v27 = vmul.f32 1.0614054, %v13917_v28 }
 0x4d0   : > { %16291 = vst [vmem:[#allocation134_spill] sm:$0xff] %v13926_v25  ;;  %v13937_v0 = vmul.f32 %v16294_v14, %v13710_v58  ;;  %v13939_v49 = vpop.eup %11699  ;;  %11719 = vrcp.f32 %v13830_v20  ;;  %v4452_v58 = vadd.f32 -1.4531521, %v4420_v40  ;;  %v13960_v20 = vmul.f32 %v13869_v6, %v4449_v39 }
 0x4d1   : > { %16296 = vst [vmem:[#allocation137_spill] sm:$0xff] %v13939_v49  ;;  %v13946_v61 = vmul.f32 %v16297_v54, %v13713_v33  ;;  %v13953_v35 = vpop.eup %11701  ;;  %11721 = vrcp.f32 %v13832_v12  ;;  %v4423_v33 = vmul.f32 1.0614054, %v13901_v57  ;;  %v4453_v54 = vadd.f32 -1.4531521, %v4421_v13 }
 0x4d2   : > { %16295 = vst [vmem:[#allocation136_spill] sm:$0xff] %v13937_v0  ;;  %16301 = vst [vmem:[#allocation140_spill] sm:$0xff] %v13953_v35  ;;  %v13962_v14 = vpop.eup %11703  ;;  %11723 = vrcp.f32 %v13834_v53  ;;  %v9310_v12 = vld [vmem:[%s15815_s3 + $0x4] sm:$0xf]  ;;  %v4424_v39 = vmul.f32 1.0614054, %v13913_v9  ;;  %v13978_v53 = vmul.f32 %v13879_v52, %v4451_v48  ;;  %v13993_v46 = vmul.f32 %v13884_v60, %v4452_v58 }
 0x4d3   : > { %16298 = vst [vmem:[#allocation138_spill] sm:$0xff] %v13946_v61  ;;  %16302 = vst [vmem:[#allocation141_spill] sm:$0xff] %v13962_v14  ;;  %v13972_v40 = vpop.eup %11705  ;;  %11725 = vrcp.f32 %v13836_v63  ;;  %10667 = vmatprep.subr.msk.mxu1 %vm16304_vm2, %v9310_v12  ;;  %v4426_v37 = vmul.f32 1.0614054, %v13926_v25  ;;  %v4427_v59 = vmul.f32 1.0614054, %v13939_v49  ;;  %v4486_v24 = vmul.f32 %v13895_v38, %v4454_v11 }
 0x4d4   : > { %16303 = vst [vmem:[#allocation142_spill] sm:$0xff] %v13972_v40  ;;  %v13981_v13 = vpop.eup %11707  ;;  %11727 = vrcp.f32 %v13838_v42  ;;  %10668 = vmatpush3.msk.msra.mxu1 %vm16306_vm10, %v9310_v12  ;;  %v4428_v48 = vmul.f32 1.0614054, %v13953_v35  ;;  %v4429_v5 = vmul.f32 1.0614054, %v13962_v14  ;;  %vm16500_vm2 = vmmov %vm16228_vm0 }
 0x4d5   : > { %16305 = vst [vmem:[#allocation143_spill] sm:$0xff] %v13981_v13  ;;  %v13987_v63 = vpop.eup %11709  ;;  %11729 = vrcp.f32 %v13840_v47  ;;  %v5132_v42 = vld [vmem:[%s15815_s3] sm:$0xf]  ;;  %v4430_v26 = vmul.f32 1.0614054, %v13972_v40  ;;  %v14003_v47 = vmul.f32 %v13889_v32, %v4453_v54  ;;  %vm16501_vm10 = vmmov %vm16228_vm0 }
 0x4d6   : > { %16307 = vst [vmem:[#allocation144_spill] sm:$0xff] %v13987_v63  ;;  %v13998_v61 = vpop.eup %11711  ;;  %11731 = vrcp.f32 %v13842_v62  ;;  %v4455_v12 = vadd.f32 -1.4531521, %v4423_v33  ;;  %10717 = vmatprep.subr.msk.mxu1 %vm16309_vm11, %v5132_v42  ;;  %v4431_v58 = vmul.f32 1.0614054, %v13981_v13  ;;  %vm16502_vm11 = vmmov %vm16228_vm0 }
 0x4d7   : > { %16308 = vst [vmem:[#allocation145_spill] sm:$0xff] %v13998_v61  ;;  %v14006_v10 = vpop.eup %11713  ;;  %11733 = vrcp.f32 %v13844_v36  ;;  %v4456_v8 = vadd.f32 -1.4531521, %v4424_v39  ;;  %v4457_v0 = vadd.f32 -1.4531521, %v4425_v27 }
 0x4d8   : > { %16310 = vst [vmem:[#allocation146_spill] sm:$0xff] %v14006_v10  ;;  %v14010_v3 = vpop.eup %11715  ;;  %11735 = vrcp.f32 %v13846_v21  ;;  %v4432_v62 = vmul.f32 1.0614054, %v13987_v63  ;;  %v4458_v33 = vadd.f32 -1.4531521, %v4426_v37  ;;  %v4487_v21 = vmul.f32 %v13901_v57, %v4455_v12 }
 0x4d9   : > { %16311 = vst [vmem:[#allocation147_spill] sm:$0xff] %v14010_v3  ;;  %v4459_v15 = vadd.f32 -1.4531521, %v4427_v59  ;;  %v14014_v54 = vpop.eup %11717  ;;  %11737 = vrcp.f32 %v13848_v17  ;;  %v4433_v42 = vmul.f32 1.0614054, %v13998_v61  ;;  %v4488_v17 = vmul.f32 %v13913_v9, %v4456_v8 }
 0x4da   : > { %16312 = vst [vmem:[#allocation148_spill] sm:$0xff] %v14014_v54  ;;  %v4460_v41 = vadd.f32 -1.4531521, %v4428_v48  ;;  %v4461_v36 = vadd.f32 -1.4531521, %v4429_v5  ;;  %v14018_v18 = vpop.eup %11719  ;;  %v4489_v31 = vmul.f32 %v13917_v28, %v4457_v0 }
 0x4db   : > { %16313 = vst [vmem:[#allocation149_spill] sm:$0xff] %v14018_v18  ;;  %v4434_v39 = vmul.f32 1.0614054, %v14006_v10  ;;  %v4462_v27 = vadd.f32 -1.4531521, %v4430_v26  ;;  %v14023_v44 = vpop.eup %11721  ;;  %v4490_v26 = vmul.f32 %v13926_v25, %v4458_v33  ;;  %v4491_v11 = vmul.f32 %v13939_v49, %v4459_v15 }
 0x4dc   : > { %16314 = vst [vmem:[#allocation150_spill] sm:$0xff] %v14023_v44  ;;  %v4435_v37 = vmul.f32 1.0614054, %v14010_v3  ;;  %v4463_v59 = vadd.f32 -1.4531521, %v4431_v58  ;;  %v14028_v48 = vpop.eup %11723  ;;  %v4492_v58 = vmul.f32 %v13953_v35, %v4460_v41  ;;  %v4493_v8 = vmul.f32 %v13962_v14, %v4461_v36 }
 0x4dd   : > { %16315 = vst [vmem:[#allocation151_spill] sm:$0xff] %v14028_v48  ;;  %v4436_v5 = vmul.f32 1.0614054, %v14014_v54  ;;  %v4464_v16 = vadd.f32 -1.4531521, %v4432_v62  ;;  %v14033_v2 = vpop.eup %11725  ;;  %v4494_v62 = vmul.f32 %v13972_v40, %v4462_v27 }
 0x4de   : > { %16316 = vst [vmem:[#allocation152_spill] sm:$0xff] %v14033_v2  ;;  %v4437_v12 = vmul.f32 1.0614054, %v14018_v18  ;;  %v4465_v29 = vadd.f32 -1.4531521, %v4433_v42  ;;  %v14038_v55 = vpop.eup %11727  ;;  %v4495_v41 = vmul.f32 %v13981_v13, %v4463_v59 }
 0x4df   : > { %16317 = vst [vmem:[#allocation153_spill] sm:$0xff] %v14038_v55  ;;  %v4438_v0 = vmul.f32 1.0614054, %v14023_v44  ;;  %v4466_v43 = vadd.f32 -1.4531521, %v4434_v39  ;;  %v14045_v15 = vpop.eup %11729  ;;  %v4496_v39 = vmul.f32 %v13987_v63, %v4464_v16 }
 0x4e0   : > { %v14043_v33 = vadd.f32 1.4214138, %v13957_v51  ;;  %16318 = vst [vmem:[#allocation154_spill] sm:$0xff] %v14045_v15  ;;  %v4439_v30 = vmul.f32 1.0614054, %v14028_v48  ;;  %v14050_v36 = vpop.eup %11731 }
 0x4e1   : > { %v4440_v42 = vmul.f32 1.0614054, %v14033_v2  ;;  %v4467_v7 = vadd.f32 -1.4531521, %v4435_v37  ;;  %v4441_v23 = vmul.f32 1.0614054, %v14038_v55  ;;  %v14055_v51 = vpop.eup %11733  ;;  %v4497_v37 = vmul.f32 %v13998_v61, %v4465_v29 }
 0x4e2   : > { %v4468_v22 = vadd.f32 -1.4531521, %v4436_v5  ;;  %v4513_v27 = vadd.f32 1.4214138, %v13960_v20  ;;  %16319 = vst [vmem:[#allocation155_spill] sm:$0xff] %v14055_v51  ;;  %v14060_v19 = vpop.eup %11735  ;;  %v4498_v5 = vmul.f32 %v14006_v10, %v4466_v43 }
 0x4e3   : > { %v4442_v4 = vmul.f32 1.0614054, %v14045_v15  ;;  %v4443_v1 = vmul.f32 1.0614054, %v14050_v36  ;;  %v4469_v56 = vadd.f32 -1.4531521, %v4437_v12  ;;  %v14065_v63 = vpop.eup %11737  ;;  %v4499_v35 = vmul.f32 %v14010_v3, %v4467_v7 }
 0x4e4   : > { %v4444_v59 = vmul.f32 1.0614054, %v14055_v51  ;;  %v4470_v13 = vadd.f32 -1.4531521, %v4438_v0  ;;  %v4514_v16 = vadd.f32 1.4214138, %v13967_v50  ;;  %v4500_v61 = vmul.f32 %v14014_v54, %v4468_v22 }
 0x4e5   : > { %16320 = vst [vmem:[#allocation156_spill] sm:$0xff] %v14065_v63  ;;  %v4445_v20 = vmul.f32 1.0614054, %v14060_v19  ;;  %v4471_v40 = vadd.f32 -1.4531521, %v4439_v30  ;;  %v4501_v43 = vmul.f32 %v14018_v18, %v4469_v56 }
 0x4e6   : > { %v4472_v14 = vadd.f32 -1.4531521, %v4440_v42  ;;  %v4447_v12 = vmul.f32 1.0614054, %v14065_v63  ;;  %v4473_v29 = vadd.f32 -1.4531521, %v4441_v23  ;;  %v4502_v28 = vmul.f32 %v14023_v44, %v4470_v13 }
 0x4e7   : > { %v4515_v49 = vadd.f32 1.4214138, %v13978_v53  ;;  %v4474_v0 = vadd.f32 -1.4531521, %v4442_v4  ;;  %v4475_v25 = vadd.f32 -1.4531521, %v4443_v1  ;;  %v4503_v3 = vmul.f32 %v14028_v48, %v4471_v40 }
 0x4e8   : > { %v4516_v50 = vadd.f32 1.4214138, %v13993_v46  ;;  %v4476_v10 = vadd.f32 -1.4531521, %v4444_v59  ;;  %v4517_v30 = vadd.f32 1.4214138, %v14003_v47  ;;  %v4504_v23 = vmul.f32 %v14033_v2, %v4472_v14 }
 0x4e9   : > { %v4518_v42 = vadd.f32 1.4214138, %v4486_v24  ;;  %v4477_v7 = vadd.f32 -1.4531521, %v4445_v20  ;;  %v4519_v22 = vadd.f32 1.4214138, %v4487_v21  ;;  %v4505_v4 = vmul.f32 %v14038_v55, %v4473_v29 }
 0x4ea   : > { %v4479_v54 = vadd.f32 -1.4531521, %v4447_v12  ;;  %v4520_v1 = vadd.f32 1.4214138, %v4488_v17  ;;  %v4521_v53 = vadd.f32 1.4214138, %v4489_v31  ;;  %v4506_v56 = vmul.f32 %v14045_v15, %v4474_v0 }
 0x4eb   : > { %v4507_v46 = vmul.f32 %v14050_v36, %v4475_v25  ;;  %v4522_v59 = vadd.f32 1.4214138, %v4490_v26  ;;  %v4523_v13 = vadd.f32 1.4214138, %v4491_v11  ;;  %v4508_v47 = vmul.f32 %v14055_v51, %v4476_v10 }
 0x4ec   : > { %v4524_v24 = vadd.f32 1.4214138, %v4492_v58  ;;  %v4525_v20 = vadd.f32 1.4214138, %v4493_v8  ;;  %v4526_v44 = vadd.f32 1.4214138, %v4494_v62  ;;  %v4509_v40 = vmul.f32 %v14060_v19, %v4477_v7 }
 0x4ed   : > { %v4527_v14 = vadd.f32 1.4214138, %v4495_v41  ;;  %v4528_v21 = vadd.f32 1.4214138, %v4496_v39  ;;  %v4529_v12 = vadd.f32 1.4214138, %v4497_v37  ;;  %v4511_v29 = vmul.f32 %v14065_v63, %v4479_v54 }
 0x4ee   : > { %v4530_v17 = vadd.f32 1.4214138, %v4498_v5  ;;  %v4531_v31 = vadd.f32 1.4214138, %v4499_v35  ;;  %v4532_v55 = vadd.f32 1.4214138, %v4500_v61  ;;  %v4544_v26 = vmul.f32 %v13864_v34, %v14043_v33 }
 0x4ef   : > { %v4533_v0 = vadd.f32 1.4214138, %v4501_v43  ;;  %v4534_v15 = vadd.f32 1.4214138, %v4502_v28  ;;  %v4535_v25 = vadd.f32 1.4214138, %v4503_v3  ;;  %v4545_v8 = vmul.f32 %v13869_v6, %v4513_v27 }
 0x4f0   : > { %v4536_v10 = vadd.f32 1.4214138, %v4504_v23  ;;  %v4537_v11 = vadd.f32 1.4214138, %v4505_v4  ;;  %v4538_v58 = vadd.f32 1.4214138, %v4506_v56  ;;  %v4546_v37 = vmul.f32 %v13874_v45, %v4514_v16 }
 0x4f1   : > { %v4539_v62 = vadd.f32 1.4214138, %v4507_v46  ;;  %v4540_v41 = vadd.f32 1.4214138, %v4508_v47  ;;  %v4541_v39 = vadd.f32 1.4214138, %v4509_v40  ;;  %v4547_v35 = vmul.f32 %v13879_v52, %v4515_v49 }
 0x4f2   : > { %v4543_v54 = vadd.f32 1.4214138, %v4511_v29  ;;  %v4548_v61 = vmul.f32 %v13884_v60, %v4516_v50  ;;  %v4549_v28 = vmul.f32 %v13889_v32, %v4517_v30  ;;  %v4550_v3 = vmul.f32 %v13895_v38, %v4518_v42  ;;  %v16321_v43 = vld [vmem:[#allocation132_spill] sm:$0xff]  ;;  %v16322_v7 = vld [vmem:[#allocation134_spill] sm:$0xff]  ;;  %v16323_v4 = vld [vmem:[#allocation137_spill] sm:$0xff] }
 0x4f3   : > { %v4551_v33 = vmul.f32 %v13901_v57, %v4519_v22  ;;  %v4552_v5 = vmul.f32 %v13913_v9, %v4520_v1  ;;  %v4553_v27 = vmul.f32 %v16321_v43, %v4521_v53  ;;  %v4554_v23 = vmul.f32 %v16322_v7, %v4522_v59  ;;  %v16324_v16 = vld [vmem:[#allocation140_spill] sm:$0xff]  ;;  %v16325_v47 = vld [vmem:[#allocation141_spill] sm:$0xff]  ;;  %v16326_v40 = vld [vmem:[#allocation142_spill] sm:$0xff] }
 0x4f4   : > { %v4555_v56 = vmul.f32 %v16323_v4, %v4523_v13  ;;  %v4556_v46 = vmul.f32 %v16324_v16, %v4524_v24  ;;  %v4557_v49 = vmul.f32 %v16325_v47, %v4525_v20  ;;  %v4558_v50 = vmul.f32 %v16326_v40, %v4526_v44  ;;  %v16327_v29 = vld [vmem:[#allocation143_spill] sm:$0xff]  ;;  %v16328_v32 = vld [vmem:[#allocation144_spill] sm:$0xff]  ;;  %v16329_v38 = vld [vmem:[#allocation145_spill] sm:$0xff] }
 0x4f5   : > { %v4559_v30 = vmul.f32 %v16327_v29, %v4527_v14  ;;  %v4560_v42 = vmul.f32 %v16328_v32, %v4528_v21  ;;  %v4561_v22 = vmul.f32 %v16329_v38, %v4529_v12  ;;  %v16330_v57 = vld [vmem:[#allocation146_spill] sm:$0xff]  ;;  %v16331_v9 = vld [vmem:[#allocation147_spill] sm:$0xff]  ;;  %v16332_v43 = vld [vmem:[#allocation148_spill] sm:$0xff]  ;;  %v4565_v13 = vmul.f32 %v14018_v18, %v4533_v0 }
 0x4f6   : > { %v4562_v1 = vmul.f32 %v16330_v57, %v4530_v17  ;;  %v4563_v53 = vmul.f32 %v16331_v9, %v4531_v31  ;;  %v4564_v59 = vmul.f32 %v16332_v43, %v4532_v55  ;;  %v16333_v4 = vld [vmem:[#allocation150_spill] sm:$0xff]  ;;  %v4567_v20 = vmul.f32 %v14028_v48, %v4535_v25  ;;  %v16334_v40 = vld [vmem:[#allocation153_spill] sm:$0xff] }
 0x4f7   : > { %v4566_v24 = vmul.f32 %v16333_v4, %v4534_v15  ;;  %v4568_v44 = vmul.f32 %v14033_v2, %v4536_v10  ;;  %v4569_v14 = vmul.f32 %v16334_v40, %v4537_v11  ;;  %v16335_v29 = vld [vmem:[#allocation154_spill] sm:$0xff]  ;;  %v4571_v12 = vmul.f32 %v14050_v36, %v4539_v62  ;;  %v16336_v40 = vld [vmem:[#allocation100_spill] sm:$0xff] }
 0x4f8   : > { %v4570_v21 = vmul.f32 %v16335_v29, %v4538_v58  ;;  %v4572_v17 = vmul.f32 %v14055_v51, %v4540_v41  ;;  %v4576_v57 = vadd.f32 -0.28449672, %v4544_v26  ;;  %v4573_v31 = vmul.f32 %v14060_v19, %v4541_v39 }
 0x4f9   : > { %v4577_v55 = vadd.f32 -0.28449672, %v4545_v8  ;;  %v4578_v43 = vadd.f32 -0.28449672, %v4546_v37  ;;  %v4579_v0 = vadd.f32 -0.28449672, %v4547_v35  ;;  %v4575_v15 = vmul.f32 %v14065_v63, %v4543_v54 }
 0x4fa   : > { %v4580_v4 = vadd.f32 -0.28449672, %v4548_v61  ;;  %v4581_v25 = vadd.f32 -0.28449672, %v4549_v28  ;;  %v4582_v48 = vadd.f32 -0.28449672, %v4550_v3  ;;  %v4608_v8 = vmul.f32 %v13864_v34, %v4576_v57 }
 0x4fb   : > { %v4583_v10 = vadd.f32 -0.28449672, %v4551_v33  ;;  %v4584_v2 = vadd.f32 -0.28449672, %v4552_v5  ;;  %v4585_v11 = vadd.f32 -0.28449672, %v4553_v27  ;;  %v4609_v54 = vmul.f32 %v13869_v6, %v4577_v55 }
 0x4fc   : > { %v16337_v58 = vsub.f32 0.0, %v16336_v40  ;;  %v4586_v41 = vadd.f32 -0.28449672, %v4554_v23  ;;  %v4587_v26 = vadd.f32 -0.28449672, %v4555_v56  ;;  %v4610_v33 = vmul.f32 %v13874_v45, %v4578_v43 }
 0x4fd   : > { %v4588_v51 = vadd.f32 -0.28449672, %v4556_v46  ;;  %v4589_v39 = vadd.f32 -0.28449672, %v4557_v49  ;;  %v4590_v37 = vadd.f32 -0.28449672, %v4558_v50  ;;  %v4612_v23 = vmul.f32 %v13884_v60, %v4580_v4 }
 0x4fe   : > { %v14119_v62 = vmul.f32 %v16337_v58, %v16336_v40  ;;  %v4591_v35 = vadd.f32 -0.28449672, %v4559_v30  ;;  %v4592_v61 = vadd.f32 -0.28449672, %v4560_v42  ;;  %v4593_v28 = vadd.f32 -0.28449672, %v4561_v22 }
 0x4ff   : > { %v4594_v3 = vadd.f32 -0.28449672, %v4562_v1  ;;  %v4595_v5 = vadd.f32 -0.28449672, %v4563_v53  ;;  %v4596_v27 = vadd.f32 -0.28449672, %v4564_v59  ;;  %v4611_v40 = vmul.f32 %v13879_v52, %v4579_v0 }
 0x500   : > { %16338 = vst [vmem:[#allocation134_spill] sm:$0xff] %v14119_v62  ;;  %v5044_v56 = vld [vmem:[#allocation2 + $0x182] sm:$0x1]  ;;  %v4597_v46 = vadd.f32 -0.28449672, %v4565_v13  ;;  %v16339_v49 = vld [vmem:[#allocation125_spill] sm:$0xff] }
 0x501   : > { %v4598_v58 = vadd.f32 -0.28449672, %v4566_v24  ;;  %v4599_v57 = vadd.f32 -0.28449672, %v4567_v20  ;;  %v4613_v50 = vmul.f32 %v16339_v49, %v4581_v25  ;;  %5062 = vst.msk [vmem:[#allocation2 + $0x180] sm:$0x1] %vm16340_vm12, %v5044_v56  ;;  %v4618_v20 = vmul.f32 %v16322_v7, %v4586_v41  ;;  %vm16503_vm12 = vmmov %vm16228_vm0 }
 0x502   : > { %v4600_v30 = vadd.f32 -0.28449672, %v4568_v44  ;;  %v4601_v42 = vadd.f32 -0.28449672, %v4569_v14  ;;  %v4602_v22 = vadd.f32 -0.28449672, %v4570_v21  ;;  %v4620_v44 = vmul.f32 %v16324_v16, %v4588_v51 }
 0x503   : > { %v16341_v1 = vld [vmem:[#allocation126_spill] sm:$0xff]  ;;  %v4603_v43 = vadd.f32 -0.28449672, %v4571_v12  ;;  %v4604_v53 = vadd.f32 -0.28449672, %v4572_v17  ;;  %v16342_v62 = vld [vmem:[#allocation127_spill] sm:$0xff]  ;;  %v4621_v14 = vmul.f32 %v16325_v47, %v4589_v39 }
 0x504   : > { %v4614_v55 = vmul.f32 %v16341_v1, %v4582_v48  ;;  %v4605_v59 = vadd.f32 -0.28449672, %v4573_v31  ;;  %v4615_v0 = vmul.f32 %v16342_v62, %v4583_v10  ;;  %v4607_v52 = vadd.f32 -0.28449672, %v4575_v15  ;;  %v16343_v4 = vld [vmem:[#allocation131_spill] sm:$0xff]  ;;  %v16344_v13 = vld [vmem:[#allocation132_spill] sm:$0xff] }
 0x505   : > { %v4616_v60 = vmul.f32 %v16343_v4, %v4584_v2  ;;  %v4617_v24 = vmul.f32 %v16344_v13, %v4585_v11  ;;  %v16345_v25 = vld [vmem:[#allocation137_spill] sm:$0xff]  ;;  %v16346_v21 = vld [vmem:[#allocation142_spill] sm:$0xff]  ;;  %v16347_v12 = vld [vmem:[#allocation143_spill] sm:$0xff]  ;;  %v4624_v31 = vmul.f32 %v16328_v32, %v4592_v61  ;;  %v4625_v15 = vmul.f32 %v16329_v38, %v4593_v28 }
 0x506   : > { %v4619_v49 = vmul.f32 %v16345_v25, %v4587_v26  ;;  %v4622_v48 = vmul.f32 %v16346_v21, %v4590_v37  ;;  %v4623_v17 = vmul.f32 %v16347_v12, %v4591_v35  ;;  %v16348_v10 = vld [vmem:[#allocation146_spill] sm:$0xff]  ;;  %v4627_v11 = vmul.f32 %v16331_v9, %v4595_v5  ;;  %v16349_v56 = vld [vmem:[#allocation148_spill] sm:$0xff]  ;;  %v16351_v16 = vld [vmem:[#allocation151_spill] sm:$0xff] }
 0x507   : > { %v4626_v2 = vmul.f32 %v16348_v10, %v4594_v3  ;;  %v4628_v41 = vmul.f32 %v16349_v56, %v4596_v27  ;;  %v4629_v26 = vmul.f32 %v14018_v18, %v4597_v46  ;;  %v16350_v25 = vld [vmem:[#allocation150_spill] sm:$0xff]  ;;  %v4631_v39 = vmul.f32 %v16351_v16, %v4599_v57  ;;  %v16352_v47 = vld [vmem:[#allocation152_spill] sm:$0xff]  ;;  %v16353_v21 = vld [vmem:[#allocation153_spill] sm:$0xff] }
 0x508   : > { %v4630_v51 = vmul.f32 %v16350_v25, %v4598_v58  ;;  %v4632_v37 = vmul.f32 %v16352_v47, %v4600_v30  ;;  %v4633_v35 = vmul.f32 %v16353_v21, %v4601_v42  ;;  %v4640_v12 = vadd.f32 0.2548296, %v4608_v8  ;;  %v16354_v3 = vld [vmem:[#allocation155_spill] sm:$0xff]  ;;  %v16355_v58 = vld [vmem:[#allocation101_spill] sm:$0xff]  ;;  %v16357_v21 = vld [vmem:[#allocation102_spill] sm:$0xff] }
 0x509   : > { %v4634_v61 = vmul.f32 %v16335_v29, %v4602_v22  ;;  %v4635_v28 = vmul.f32 %v14050_v36, %v4603_v43  ;;  %v4636_v10 = vmul.f32 %v16354_v3, %v4604_v53  ;;  %v4641_v5 = vadd.f32 0.2548296, %v4609_v54 }
 0x50a   : > { %v4637_v27 = vmul.f32 %v14060_v19, %v4605_v59  ;;  %v4639_v46 = vmul.f32 %v14065_v63, %v4607_v52  ;;  %v4642_v18 = vadd.f32 0.2548296, %v4610_v33  ;;  %v16356_v57 = vsub.f32 0.0, %v16355_v58 }
 0x50b   : > { %v4643_v30 = vadd.f32 0.2548296, %v4611_v40  ;;  %v4644_v42 = vadd.f32 0.2548296, %v4612_v23  ;;  %v4645_v8 = vadd.f32 0.2548296, %v4613_v50  ;;  %v14164_v59 = vmul.f32 %v13864_v34, %v4640_v12 }
 0x50c   : > { %v14156_v16 = vmul.f32 %v16356_v57, %v16355_v58  ;;  %v16358_v22 = vsub.f32 0.0, %v16357_v21  ;;  %v4646_v53 = vadd.f32 0.2548296, %v4614_v55  ;;  %v4647_v54 = vadd.f32 0.2548296, %v4615_v0  ;;  %v16359_v0 = vld [vmem:[#allocation123_spill] sm:$0xff] }
 0x50d   : > { %v4648_v3 = vadd.f32 0.2548296, %v4616_v60  ;;  %v4649_v52 = vadd.f32 0.2548296, %v4617_v24  ;;  %v4650_v33 = vadd.f32 0.2548296, %v4618_v20  ;;  %v14167_v58 = vmul.f32 %v13869_v6, %v4641_v5 }
 0x50e   : > { %v14161_v43 = vmul.f32 %v16358_v22, %v16357_v21  ;;  %v4651_v63 = vadd.f32 0.2548296, %v4619_v49  ;;  %v4652_v40 = vadd.f32 0.2548296, %v4620_v44  ;;  %v4653_v23 = vadd.f32 0.2548296, %v4621_v14 }
 0x50f   : > { %v4654_v50 = vadd.f32 0.2548296, %v4622_v48  ;;  %v14170_v57 = vmul.f32 %v13874_v45, %v4642_v18  ;;  %v4655_v21 = vadd.f32 0.2548296, %v4623_v17  ;;  %v4656_v22 = vadd.f32 0.2548296, %v4624_v31 }
 0x510   : > { %v4657_v55 = vadd.f32 0.2548296, %v4625_v15  ;;  %v14173_v60 = vmul.f32 %v16359_v0, %v4643_v30  ;;  %v4658_v34 = vadd.f32 0.2548296, %v4626_v2  ;;  %v4659_v12 = vadd.f32 0.2548296, %v4627_v11 }
 0x511   : > { %v4660_v24 = vadd.f32 0.2548296, %v4628_v41  ;;  %v16360_v20 = vld [vmem:[#allocation124_spill] sm:$0xff]  ;;  %v4661_v6 = vadd.f32 0.2548296, %v4629_v26  ;;  %v16361_v14 = vld [vmem:[#allocation125_spill] sm:$0xff]  ;;  %v14182_v31 = vmul.f32 %v16341_v1, %v4646_v53  ;;  %v14185_v11 = vmul.f32 %v16342_v62, %v4647_v54 }
 0x512   : > { %v14176_v49 = vmul.f32 %v16360_v20, %v4644_v42  ;;  %v4662_v5 = vadd.f32 0.2548296, %v4630_v51  ;;  %v4663_v44 = vadd.f32 0.2548296, %v4631_v39  ;;  %v14179_v48 = vmul.f32 %v16361_v14, %v4645_v8  ;;  %v16363_v1 = vld [vmem:[#allocation140_spill] sm:$0xff]  ;;  %v16365_v62 = vld [vmem:[#allocation142_spill] sm:$0xff] }
 0x513   : > { %v4664_v18 = vadd.f32 0.2548296, %v4632_v37  ;;  %v4665_v45 = vadd.f32 0.2548296, %v4633_v35  ;;  %v4666_v17 = vadd.f32 0.2548296, %v4634_v61  ;;  %v14188_v26 = vmul.f32 %v16343_v4, %v4648_v3 }
 0x514   : > { %v4667_v15 = vadd.f32 0.2548296, %v4635_v28  ;;  %v4668_v30 = vadd.f32 0.2548296, %v4636_v10  ;;  %v4669_v2 = vadd.f32 0.2548296, %v4637_v27  ;;  %v14191_v51 = vmul.f32 %v16344_v13, %v4649_v52 }
 0x515   : > { %v4671_v41 = vadd.f32 0.2548296, %v4639_v46  ;;  %v14194_v39 = vmul.f32 %v16322_v7, %v4650_v33  ;;  %v16362_v37 = vld [vmem:[#allocation137_spill] sm:$0xff]  ;;  %v14200_v61 = vmul.f32 %v16363_v1, %v4652_v40  ;;  %v14206_v27 = vmul.f32 %v16365_v62, %v4654_v50  ;;  %v16366_v4 = vld [vmem:[#allocation143_spill] sm:$0xff]  ;;  %v16393_v1 = vld [vmem:[#allocation108_spill] sm:$0xff] }
 0x516   : > { %v14197_v35 = vmul.f32 %v16362_v37, %v4651_v63  ;;  %v16364_v10 = vld [vmem:[#allocation141_spill] sm:$0xff]  ;;  %v14209_v3 = vmul.f32 %v16366_v4, %v4655_v21  ;;  %v14212_v13 = vmul.f32 %v16328_v32, %v4656_v22  ;;  %v14215_v7 = vmul.f32 %v16329_v38, %v4657_v55  ;;  %v16367_v63 = vld [vmem:[#allocation146_spill] sm:$0xff]  ;;  %v16369_v32 = vld [vmem:[#allocation151_spill] sm:$0xff] }
 0x517   : > { %v14203_v28 = vmul.f32 %v16364_v10, %v4653_v23  ;;  %v14218_v46 = vmul.f32 %v16367_v63, %v4658_v34  ;;  %v14221_v42 = vmul.f32 %v16331_v9, %v4659_v12  ;;  %v14224_v8 = vmul.f32 %v16349_v56, %v4660_v24  ;;  %v16368_v53 = vld [vmem:[#allocation149_spill] sm:$0xff]  ;;  %v16375_v50 = vld [vmem:[#allocation155_spill] sm:$0xff]  ;;  %v16378_v22 = vld [vmem:[#allocation156_spill] sm:$0xff] }
 0x518   : > { %v14227_v54 = vmul.f32 %v16368_v53, %v4661_v6  ;;  %v14230_v52 = vmul.f32 %v16350_v25, %v4662_v5  ;;  %v14233_v33 = vmul.f32 %v16369_v32, %v4663_v44  ;;  %v14236_v38 = vmul.f32 %v16352_v47, %v4664_v18  ;;  %v16371_v40 = vld [vmem:[#allocation153_spill] sm:$0xff]  ;;  %v16380_v47 = vld [vmem:[#allocation103_spill] sm:$0xff]  ;;  %v16382_v12 = vld [vmem:[#allocation104_spill] sm:$0xff] }
 0x519   : > { %v14239_v23 = vmul.f32 %v16371_v40, %v4665_v45  ;;  %v14242_v9 = vmul.f32 %v16335_v29, %v4666_v17  ;;  %v14245_v56 = vmul.f32 %v14050_v36, %v4667_v15  ;;  %v14248_v21 = vmul.f32 %v16375_v50, %v4668_v30  ;;  %v16384_v20 = vld [vmem:[#allocation105_spill] sm:$0xff]  ;;  %v16386_v5 = vld [vmem:[#allocation106_spill] sm:$0xff]  ;;  %v16388_v14 = vld [vmem:[#allocation107_spill] sm:$0xff] }
 0x51a   : > { %16370 = vst [vmem:[#allocation144_spill] sm:$0xff] %v14236_v38  ;;  %v14251_v25 = vmul.f32 %v14060_v19, %v4669_v2  ;;  %v14254_v55 = vmul.f32 %v16378_v22, %v4671_v41  ;;  %v16381_v0 = vsub.f32 0.0, %v16380_v47  ;;  %v16383_v29 = vsub.f32 0.0, %v16382_v12  ;;  %v16390_v17 = vld [vmem:[#allocation128_spill] sm:$0xff]  ;;  %v16391_v30 = vld [vmem:[#allocation129_spill] sm:$0xff]  ;;  %v16392_v41 = vld [vmem:[#allocation130_spill] sm:$0xff] }
 0x51b   : > { %16372 = vst [vmem:[#allocation145_spill] sm:$0xff] %v14239_v23  ;;  %16373 = vst [vmem:[#allocation147_spill] sm:$0xff] %v14242_v9  ;;  %v16385_v36 = vsub.f32 0.0, %v16384_v20  ;;  %v16387_v44 = vsub.f32 0.0, %v16386_v5  ;;  %v16389_v18 = vsub.f32 0.0, %v16388_v14  ;;  %v16394_v10 = vsub.f32 0.0, %v16393_v1 }
 0x51c   : > { %16374 = vst [vmem:[#allocation154_spill] sm:$0xff] %v14245_v56  ;;  %16376 = vst [vmem:[#allocation100_spill] sm:$0xff] %v14248_v21  ;;  %v4747_v34 = vmul.f32 %v16381_v0, %v16380_v47  ;;  %v4748_v24 = vmul.f32 %v16383_v29, %v16382_v12  ;;  %v4768_v15 = vmul.f32 1.442695, %v16390_v17  ;;  %v4770_v2 = vmul.f32 1.442695, %v16391_v30 }
 0x51d   : > { %16377 = vst [vmem:[#allocation126_spill] sm:$0xff] %v14251_v25  ;;  %16379 = vst [vmem:[#allocation127_spill] sm:$0xff] %v14254_v55  ;;  %v4749_v6 = vmul.f32 %v16385_v36, %v16384_v20  ;;  %v4750_v19 = vmul.f32 %v16387_v44, %v16386_v5  ;;  %v4751_v45 = vmul.f32 %v16389_v18, %v16388_v14  ;;  %v4772_v37 = vmul.f32 1.442695, %v16392_v41  ;;  %v16395_v4 = vld [vmem:[#allocation109_spill] sm:$0xff]  ;;  %v16397_v32 = vld [vmem:[#allocation110_spill] sm:$0xff] }
 0x51e   : > { %v4752_v62 = vmul.f32 %v16394_v10, %v16393_v1  ;;  %v16396_v63 = vsub.f32 0.0, %v16395_v4  ;;  %v16398_v40 = vsub.f32 0.0, %v16397_v32  ;;  %v16399_v22 = vld [vmem:[#allocation133_spill] sm:$0xff]  ;;  %v16400_v0 = vld [vmem:[#allocation111_spill] sm:$0xff]  ;;  %v16402_v20 = vld [vmem:[#allocation112_spill] sm:$0xff]  ;;  %11739 = vpow2.f32 %v4768_v15 }
 0x51f   : > { %v4774_v47 = vmul.f32 1.442695, %v16399_v22  ;;  %v16401_v12 = vsub.f32 0.0, %v16400_v0  ;;  %v16403_v36 = vsub.f32 0.0, %v16402_v20  ;;  %v16404_v44 = vld [vmem:[#allocation135_spill] sm:$0xff]  ;;  %v16405_v18 = vld [vmem:[#allocation113_spill] sm:$0xff]  ;;  %11741 = vpow2.f32 %v4770_v2 }
 0x520   : > { %v4753_v53 = vmul.f32 %v16396_v63, %v16395_v4  ;;  %v4754_v50 = vmul.f32 %v16398_v40, %v16397_v32  ;;  %v4776_v14 = vmul.f32 1.442695, %v16404_v44  ;;  %v16406_v17 = vsub.f32 0.0, %v16405_v18  ;;  %v16407_v41 = vld [vmem:[#allocation114_spill] sm:$0xff]  ;;  %v16409_v4 = vld [vmem:[#allocation136_spill] sm:$0xff]  ;;  %v16410_v32 = vld [vmem:[#allocation115_spill] sm:$0xff] }
 0x521   : > { %v4755_v29 = vmul.f32 %v16401_v12, %v16400_v0  ;;  %v4756_v5 = vmul.f32 %v16403_v36, %v16402_v20  ;;  %v16408_v1 = vsub.f32 0.0, %v16407_v41  ;;  %v4778_v63 = vmul.f32 1.442695, %v16409_v4  ;;  %v16412_v0 = vld [vmem:[#allocation116_spill] sm:$0xff]  ;;  %v16414_v20 = vld [vmem:[#allocation138_spill] sm:$0xff]  ;;  %v16415_v44 = vld [vmem:[#allocation117_spill] sm:$0xff] }
 0x522   : > { %v4757_v30 = vmul.f32 %v16406_v17, %v16405_v18  ;;  %v16411_v40 = vsub.f32 0.0, %v16410_v32  ;;  %v16413_v15 = vsub.f32 0.0, %v16412_v0  ;;  %11743 = vpow2.f32 %v4772_v37  ;;  %v16417_v55 = vld [vmem:[#allocation118_spill] sm:$0xff]  ;;  %v16420_v25 = vld [vmem:[#allocation119_spill] sm:$0xff]  ;;  %v16422_v21 = vld [vmem:[#allocation120_spill] sm:$0xff] }
 0x523   : > { %v4758_v10 = vmul.f32 %v16408_v1, %v16407_v41  ;;  %v4780_v36 = vmul.f32 1.442695, %v16414_v20  ;;  %v16416_v18 = vsub.f32 0.0, %v16415_v44  ;;  %v16418_v2 = vsub.f32 0.0, %v16417_v55  ;;  %v16419_v1 = vld [vmem:[#allocation139_spill] sm:$0xff]  ;;  %v16425_v56 = vld [vmem:[#allocation121_spill] sm:$0xff] }
 0x524   : > { %v4759_v22 = vmul.f32 %v16411_v40, %v16410_v32  ;;  %v4760_v12 = vmul.f32 %v16413_v15, %v16412_v0  ;;  %11745 = vpow2.f32 %v4774_v47  ;;  %v4782_v4 = vmul.f32 1.442695, %v16419_v1  ;;  %v16424_v15 = vld [vmem:[#allocation134_spill] sm:$0xff] }
 0x525   : > { %v4761_v17 = vmul.f32 %v16416_v18, %v16415_v44  ;;  %v4762_v41 = vmul.f32 %v16418_v2, %v16417_v55  ;;  %v16421_v32 = vsub.f32 0.0, %v16420_v25  ;;  %v16423_v37 = vsub.f32 0.0, %v16422_v21  ;;  %v16427_v9 = vld [vmem:[#allocation122_spill] sm:$0xff] }
 0x526   : > { %11747 = vpow2.f32 %v4776_v14  ;;  %v4784_v20 = vmul.f32 1.442695, %v16424_v15  ;;  %v16426_v44 = vsub.f32 0.0, %v16425_v56  ;;  %v16428_v55 = vsub.f32 0.0, %v16427_v9 }
 0x527   : > { %v4763_v40 = vmul.f32 %v16421_v32, %v16420_v25  ;;  %v4764_v0 = vmul.f32 %v16423_v37, %v16422_v21  ;;  %11749 = vpow2.f32 %v4778_v63  ;;  %v4786_v2 = vmul.f32 1.442695, %v14156_v16 }
 0x528   : > { %v4765_v18 = vmul.f32 %v16426_v44, %v16425_v56  ;;  %v4767_v47 = vmul.f32 %v16428_v55, %v16427_v9  ;;  %11751 = vpow2.f32 %v4780_v36  ;;  %v4788_v25 = vmul.f32 1.442695, %v14161_v43  ;;  %v11740_v63 = vpop.eup %11739 }
 0x529   : > { %v4790_v1 = vmul.f32 1.442695, %v4747_v34  ;;  %v4792_v32 = vmul.f32 1.442695, %v4748_v24  ;;  %11753 = vpow2.f32 %v4782_v4  ;;  %v4794_v21 = vmul.f32 1.442695, %v4749_v6  ;;  %v11742_v43 = vpop.eup %11741 }
 0x52a   : > { %v4796_v14 = vmul.f32 1.442695, %v4750_v19  ;;  %v4798_v37 = vmul.f32 1.442695, %v4751_v45  ;;  %11755 = vpow2.f32 %v4784_v20  ;;  %v4800_v15 = vmul.f32 1.442695, %v4752_v62 }
 0x52b   : > { %v4802_v23 = vmul.f32 1.442695, %v4753_v53  ;;  %v4804_v56 = vmul.f32 1.442695, %v4754_v50  ;;  %11757 = vpow2.f32 %v4786_v2  ;;  %v4806_v44 = vmul.f32 1.442695, %v4755_v29 }
 0x52c   : > { %v4808_v38 = vmul.f32 1.442695, %v4756_v5  ;;  %v4810_v9 = vmul.f32 1.442695, %v4757_v30  ;;  %11759 = vpow2.f32 %v4788_v25  ;;  %v4812_v16 = vmul.f32 1.442695, %v4758_v10  ;;  %v11744_v19 = vpop.eup %11743 }
 0x52d   : > { %v4814_v36 = vmul.f32 1.442695, %v4759_v22  ;;  %v14327_v55 = vmul.f32 1.442695, %v4760_v12  ;;  %11761 = vpow2.f32 %v4790_v1  ;;  %v14329_v34 = vmul.f32 1.442695, %v4761_v17 }
 0x52e   : > { %v14331_v24 = vmul.f32 1.442695, %v4762_v41  ;;  %v4832_v6 = vmul.f32 %v11740_v63, %v14164_v59  ;;  %11763 = vpow2.f32 %v4792_v32  ;;  %v14334_v45 = vmul.f32 1.442695, %v4763_v40  ;;  %v11746_v50 = vpop.eup %11745  ;;  %v16431_v1 = vld [vmem:[#allocation49_spill] sm:$0xff] }
 0x52f   : > { %v14336_v62 = vmul.f32 1.442695, %v4764_v0  ;;  %v4833_v53 = vmul.f32 %v11742_v43, %v14167_v58  ;;  %11765 = vpow2.f32 %v4794_v21  ;;  %v14339_v29 = vmul.f32 1.442695, %v4765_v18  ;;  %v16429_v58 = vld [vmem:[#allocation63_spill] sm:$0xff]  ;;  %v16430_v18 = vld [vmem:[#allocation65_spill] sm:$0xff] }
 0x530   : > { %v4834_v5 = vmul.f32 %v11744_v19, %v14170_v57  ;;  %v4864_v30 = vsub.f32 1.0, %v4832_v6  ;;  %v11748_v10 = vpop.eup %11747  ;;  %11767 = vpow2.f32 %v4796_v14  ;;  %v14342_v22 = vmul.f32 1.442695, %v4767_v47 }
 0x531   : > { %v4835_v59 = vmul.f32 %v11746_v50, %v14173_v60  ;;  %v4865_v12 = vsub.f32 1.0, %v4833_v53  ;;  %v11750_v17 = vpop.eup %11749  ;;  %11769 = vpow2.f32 %v4798_v37  ;;  %v4836_v41 = vmul.f32 %v11748_v10, %v14176_v49  ;;  %v16432_v37 = vld [vmem:[#allocation50_spill] sm:$0xff] }
 0x532   : > { %v4866_v4 = vsub.f32 1.0, %v4834_v5  ;;  %v14347_v40 = vmul.f32 %v4864_v30, %v16429_v58  ;;  %v11752_v0 = vpop.eup %11751  ;;  %11771 = vpow2.f32 %v4800_v15  ;;  %v4837_v57 = vmul.f32 %v11750_v17, %v14179_v48 }
 0x533   : > { %v4867_v20 = vsub.f32 1.0, %v4835_v59  ;;  %v14351_v2 = vmul.f32 %v4865_v12, %v16430_v18  ;;  %v11754_v47 = vpop.eup %11753  ;;  %11773 = vpow2.f32 %v4802_v23  ;;  %v4838_v60 = vmul.f32 %v11752_v0, %v14182_v31  ;;  %v16433_v23 = vld [vmem:[#allocation51_spill] sm:$0xff] }
 0x534   : > { %v4868_v25 = vsub.f32 1.0, %v4836_v41  ;;  %v14355_v32 = vmul.f32 %v4866_v4, %v16431_v1  ;;  %v11756_v49 = vpop.eup %11755  ;;  %11775 = vpow2.f32 %v4804_v56  ;;  %v4839_v21 = vmul.f32 %v11754_v47, %v14185_v11  ;;  %v16434_v56 = vld [vmem:[#allocation52_spill] sm:$0xff] }
 0x535   : > { %v4869_v14 = vsub.f32 1.0, %v4837_v57  ;;  %v14359_v15 = vmul.f32 %v4867_v20, %v16432_v37  ;;  %v11758_v48 = vpop.eup %11757  ;;  %11777 = vpow2.f32 %v4806_v44  ;;  %v4840_v63 = vmul.f32 %v11756_v49, %v14188_v26  ;;  %v16435_v44 = vld [vmem:[#allocation53_spill] sm:$0xff]  ;;  %v16438_v57 = vld [vmem:[#allocation56_spill] sm:$0xff] }
 0x536   : > { %v4870_v43 = vsub.f32 1.0, %v4838_v60  ;;  %v14363_v6 = vmul.f32 %v4868_v25, %v16433_v23  ;;  %v11760_v31 = vpop.eup %11759  ;;  %11779 = vpow2.f32 %v4808_v38  ;;  %v4841_v19 = vmul.f32 %v11758_v48, %v14191_v51  ;;  %v16436_v38 = vld [vmem:[#allocation54_spill] sm:$0xff] }
 0x537   : > { %v4871_v53 = vsub.f32 1.0, %v4839_v21  ;;  %v14367_v50 = vmul.f32 %v4869_v14, %v16434_v56  ;;  %v11762_v11 = vpop.eup %11761  ;;  %11781 = vpow2.f32 %v4810_v9  ;;  %v4842_v5 = vmul.f32 %v11760_v31, %v14194_v39  ;;  %v16437_v9 = vld [vmem:[#allocation55_spill] sm:$0xff] }
 0x538   : > { %v4872_v30 = vsub.f32 1.0, %v4840_v63  ;;  %v14371_v10 = vmul.f32 %v4870_v43, %v16435_v44  ;;  %v11764_v26 = vpop.eup %11763  ;;  %11783 = vpow2.f32 %v4812_v16  ;;  %v4843_v59 = vmul.f32 %v11762_v11, %v14197_v35 }
 0x539   : > { %v4873_v12 = vsub.f32 1.0, %v4841_v19  ;;  %v14375_v17 = vmul.f32 %v4871_v53, %v16436_v38  ;;  %v11766_v51 = vpop.eup %11765  ;;  %11785 = vpow2.f32 %v4814_v36  ;;  %v4844_v41 = vmul.f32 %v11764_v26, %v14200_v61  ;;  %v16439_v61 = vld [vmem:[#allocation58_spill] sm:$0xff] }
 0x53a   : > { %v4874_v4 = vsub.f32 1.0, %v4842_v5  ;;  %v14379_v58 = vmul.f32 %v4872_v30, %v16437_v9  ;;  %v11768_v39 = vpop.eup %11767  ;;  %11787 = vpow2.f32 %v14327_v55  ;;  %v4845_v0 = vmul.f32 %v11766_v51, %v14203_v28  ;;  %v16440_v28 = vld [vmem:[#allocation62_spill] sm:$0xff] }
 0x53b   : > { %v4875_v16 = vsub.f32 1.0, %v4843_v59  ;;  %v14384_v35 = vmul.f32 %v4873_v12, %v16438_v57  ;;  %v11770_v20 = vpop.eup %11769  ;;  %11789 = vpow2.f32 %v14329_v34  ;;  %v4846_v36 = vmul.f32 %v11768_v39, %v14206_v27  ;;  %v16441_v27 = vld [vmem:[#allocation64_spill] sm:$0xff] }
 0x53c   : > { %v4876_v18 = vsub.f32 1.0, %v4844_v41  ;;  %v14389_v47 = vmul.f32 %v4874_v4, %v16439_v61  ;;  %v11772_v60 = vpop.eup %11771  ;;  %11791 = vpow2.f32 %v14331_v24  ;;  %v4847_v55 = vmul.f32 %v11770_v20, %v14209_v3  ;;  %v16442_v3 = vld [vmem:[#allocation66_spill] sm:$0xff] }
 0x53d   : > { %v4877_v25 = vsub.f32 1.0, %v4845_v0  ;;  %v14394_v1 = vmul.f32 %v4875_v16, %v16440_v28  ;;  %v11774_v49 = vpop.eup %11773  ;;  %11793 = vpow2.f32 %v14334_v45  ;;  %v4848_v34 = vmul.f32 %v11772_v60, %v14212_v13  ;;  %v16443_v13 = vld [vmem:[#allocation67_spill] sm:$0xff] }
 0x53e   : > { %v4878_v21 = vsub.f32 1.0, %v4846_v36  ;;  %v14399_v14 = vmul.f32 %v4876_v18, %v16441_v27  ;;  %v11776_v37 = vpop.eup %11775  ;;  %11795 = vpow2.f32 %v14336_v62  ;;  %v4849_v24 = vmul.f32 %v11774_v49, %v14215_v7  ;;  %v16444_v7 = vld [vmem:[#allocation68_spill] sm:$0xff] }
 0x53f   : > { %v4879_v48 = vsub.f32 1.0, %v4847_v55  ;;  %v14404_v63 = vmul.f32 %v4877_v25, %v16442_v3  ;;  %v11778_v43 = vpop.eup %11777  ;;  %11797 = vpow2.f32 %v14339_v29  ;;  %v4850_v45 = vmul.f32 %v11776_v37, %v14218_v46  ;;  %v16445_v29 = vld [vmem:[#allocation69_spill] sm:$0xff]  ;;  %v16449_v36 = vld [vmem:[#allocation144_spill] sm:$0xff]  ;;  %v16453_v37 = vld [vmem:[#allocation147_spill] sm:$0xff] }
 0x540   : > { %v4880_v23 = vsub.f32 1.0, %v4848_v34  ;;  %v14409_v31 = vmul.f32 %v4878_v21, %v16443_v13  ;;  %v11780_v19 = vpop.eup %11779  ;;  %11799 = vpow2.f32 %v14342_v22  ;;  %v4851_v62 = vmul.f32 %v11778_v43, %v14221_v42  ;;  %v16446_v22 = vld [vmem:[#allocation70_spill] sm:$0xff] }
 0x541   : > { %v4881_v53 = vsub.f32 1.0, %v4849_v24  ;;  %v14414_v56 = vmul.f32 %v4879_v48, %v16444_v7  ;;  %v11782_v11 = vpop.eup %11781  ;;  %v4852_v5 = vmul.f32 %v11780_v19, %v14224_v8  ;;  %v4882_v30 = vsub.f32 1.0, %v4850_v45  ;;  %v16447_v8 = vld [vmem:[#allocation71_spill] sm:$0xff]  ;;  %v16452_v34 = vld [vmem:[#allocation74_spill] sm:$0xff]  ;;  %v16456_v19 = vld [vmem:[#allocation76_spill] sm:$0xff] }
 0x542   : > { %v4912_v44 = vmul.f32 %v4880_v23, %v16445_v29  ;;  %v14419_v46 = vadd.f32 1.0, %v14347_v40  ;;  %v11784_v26 = vpop.eup %11783  ;;  %v4853_v59 = vmul.f32 %v11782_v11, %v14227_v54  ;;  %v4883_v12 = vsub.f32 1.0, %v4851_v62  ;;  %v16448_v54 = vld [vmem:[#allocation72_spill] sm:$0xff]  ;;  %v16454_v48 = vld [vmem:[#allocation75_spill] sm:$0xff]  ;;  %v16455_v23 = vld [vmem:[#allocation154_spill] sm:$0xff] }
 0x543   : > { %v4913_v38 = vmul.f32 %v4881_v53, %v16446_v22  ;;  %v14424_v42 = vadd.f32 1.0, %v14351_v2  ;;  %v11786_v51 = vpop.eup %11785  ;;  %v4854_v41 = vmul.f32 %v11784_v26, %v14230_v52  ;;  %v4884_v4 = vsub.f32 1.0, %v4852_v5  ;;  %v16450_v52 = vld [vmem:[#allocation73_spill] sm:$0xff]  ;;  %v16457_v11 = vld [vmem:[#allocation100_spill] sm:$0xff] }
 0x544   : > { %v4914_v9 = vmul.f32 %v4882_v30, %v16447_v8  ;;  %v14429_v39 = vadd.f32 1.0, %v14355_v32  ;;  %v11788_v40 = vpop.eup %11787  ;;  %v4855_v0 = vmul.f32 %v11786_v51, %v14233_v33  ;;  %v4885_v16 = vsub.f32 1.0, %v4853_v59  ;;  %v16451_v32 = vld [vmem:[#allocation145_spill] sm:$0xff]  ;;  %v16460_v51 = vld [vmem:[#allocation78_spill] sm:$0xff]  ;;  %v16461_v8 = vld [vmem:[#allocation127_spill] sm:$0xff] }
 0x545   : > { %v4915_v57 = vmul.f32 %v4883_v12, %v16448_v54  ;;  %v14434_v20 = vadd.f32 1.0, %v14359_v15  ;;  %v11790_v2 = vpop.eup %11789  ;;  %v4856_v18 = vmul.f32 %v11788_v40, %v16449_v36  ;;  %v4886_v61 = vsub.f32 1.0, %v4854_v41  ;;  %v16458_v30 = vld [vmem:[#allocation77_spill] sm:$0xff]  ;;  %v16459_v12 = vld [vmem:[#allocation126_spill] sm:$0xff]  ;;  %v16463_v36 = vld [vmem:[#allocation80_spill] sm:$0xff] }
 0x546   : > { %v4916_v60 = vmul.f32 %v4884_v4, %v16450_v52  ;;  %v4932_v55 = vadd.f32 1.0, %v14363_v6  ;;  %v11792_v25 = vpop.eup %11791  ;;  %v4857_v28 = vmul.f32 %v11790_v2, %v16451_v32  ;;  %v4887_v49 = vsub.f32 1.0, %v4855_v0 }
 0x547   : > { %v4917_v33 = vmul.f32 %v4885_v16, %v16452_v34  ;;  %v4933_v21 = vadd.f32 1.0, %v14367_v50  ;;  %v11794_v27 = vpop.eup %11793  ;;  %v4858_v15 = vmul.f32 %v11792_v25, %v16453_v37  ;;  %v4888_v24 = vsub.f32 1.0, %v4856_v18  ;;  %v16464_v25 = vld [vmem:[#allocation81_spill] sm:$0xff] }
 0x548   : > { %v4918_v3 = vmul.f32 %v4886_v61, %v16454_v48  ;;  %v4934_v43 = vadd.f32 1.0, %v14371_v10  ;;  %v11796_v45 = vpop.eup %11795  ;;  %v4859_v13 = vmul.f32 %v11794_v27, %v16455_v23  ;;  %v4889_v6 = vsub.f32 1.0, %v4857_v28 }
 0x549   : > { %v4919_v62 = vmul.f32 %v4887_v49, %v16456_v19  ;;  %v4935_v53 = vadd.f32 1.0, %v14375_v17  ;;  %v11798_v7 = vpop.eup %11797  ;;  %v4860_v5 = vmul.f32 %v11796_v45, %v16457_v11  ;;  %v4890_v50 = vsub.f32 1.0, %v4858_v15  ;;  %v16462_v17 = vld [vmem:[#allocation79_spill] sm:$0xff]  ;;  %v16466_v15 = vld [vmem:[#allocation84_spill] sm:$0xff] }
 0x54a   : > { %v4920_v29 = vmul.f32 %v4888_v24, %v16458_v30  ;;  %v4936_v26 = vadd.f32 1.0, %v14379_v58  ;;  %v11800_v59 = vpop.eup %11799  ;;  %v4861_v22 = vmul.f32 %v11798_v7, %v16459_v12  ;;  %v4891_v10 = vsub.f32 1.0, %v4859_v13  ;;  %v16465_v49 = vld [vmem:[#allocation83_spill] sm:$0xff]  ;;  %v16469_v30 = vld [vmem:[#allocation40_spill] sm:$0xff] }
 0x54b   : > { %v4921_v41 = vmul.f32 %v4889_v6, %v16460_v51  ;;  %v4937_v4 = vadd.f32 1.0, %v14384_v35  ;;  %v4863_v40 = vmul.f32 %v11800_v59, %v16461_v8  ;;  %v4892_v0 = vsub.f32 1.0, %v4860_v5  ;;  %v16473_v59 = vld [vmem:[#allocation44_spill] sm:$0xff]  ;;  %v16475_v51 = vld [vmem:[#allocation46_spill] sm:$0xff] }
 0x54c   : > { %v4922_v16 = vmul.f32 %v4890_v50, %v16462_v17  ;;  %v4938_v54 = vadd.f32 1.0, %v14389_v47  ;;  %v4893_v2 = vsub.f32 1.0, %v4861_v22  ;;  %v4923_v18 = vmul.f32 %v4891_v10, %v16463_v36  ;;  %v16467_v50 = vld [vmem:[#allocation36_spill] sm:$0xff]  ;;  %v16474_v22 = vld [vmem:[#allocation45_spill] sm:$0xff] }
 0x54d   : > { %v4939_v58 = vadd.f32 1.0, %v14394_v1  ;;  %v4940_v61 = vadd.f32 1.0, %v14399_v14  ;;  %v4895_v52 = vsub.f32 1.0, %v4863_v40  ;;  %v4924_v32 = vmul.f32 %v4892_v0, %v16464_v25  ;;  %v16480_v40 = vld [vmem:[#allocation57_spill] sm:$0xff]  ;;  %v16481_v0 = vld [vmem:[#allocation59_spill] sm:$0xff]  ;;  %v16482_v17 = vld [vmem:[#allocation60_spill] sm:$0xff] }
 0x54e   : > { %v4941_v28 = vadd.f32 1.0, %v14404_v63  ;;  %v4942_v35 = vadd.f32 1.0, %v14409_v31  ;;  %v4925_v34 = vmul.f32 %v4893_v2, %v16465_v49  ;;  %v4943_v27 = vadd.f32 1.0, %v14414_v56  ;;  %v16492_v2 = vld [vmem:[#allocation86_spill] sm:$0xff]  ;;  %v16498_v25 = vld [vmem:[#allocation89_spill] sm:$0xff]  ;;  %v16504_v49 = vld [vmem:[#allocation91_spill] sm:$0xff] }
 0x54f   : > { %v4944_v37 = vadd.f32 1.0, %v4912_v44  ;;  %v4945_v47 = vadd.f32 1.0, %v4913_v38  ;;  %v4927_v24 = vmul.f32 %v4895_v52, %v16466_v15  ;;  %v4946_v48 = vadd.f32 1.0, %v4914_v9  ;;  %v16468_v44 = vld [vmem:[#allocation37_spill] sm:$0xff] }
 0x550   : > { %v4947_v45 = vadd.f32 1.0, %v4915_v57  ;;  %v4948_v1 = vadd.f32 1.0, %v4916_v60  ;;  %v4949_v23 = vadd.f32 1.0, %v4917_v33  ;;  %v4950_v14 = vadd.f32 1.0, %v4918_v3  ;;  %v16470_v57 = vld [vmem:[#allocation41_spill] sm:$0xff]  ;;  %v16471_v33 = vld [vmem:[#allocation42_spill] sm:$0xff] }
 0x551   : > { %v4951_v13 = vadd.f32 1.0, %v4919_v62  ;;  %v4952_v6 = vadd.f32 1.0, %v4920_v29  ;;  %v4953_v19 = vadd.f32 1.0, %v4921_v41  ;;  %v4954_v7 = vadd.f32 1.0, %v4922_v16  ;;  %v16472_v62 = vld [vmem:[#allocation43_spill] sm:$0xff]  ;;  %v16491_v16 = vld [vmem:[#allocation85_spill] sm:$0xff] }
 0x552   : > { %v4955_v63 = vadd.f32 1.0, %v4923_v18  ;;  %v4956_v11 = vadd.f32 1.0, %v4924_v32  ;;  %v4957_v31 = vadd.f32 1.0, %v4925_v34  ;;  %v4959_v5 = vadd.f32 1.0, %v4927_v24  ;;  %v16496_v18 = vld [vmem:[#allocation87_spill] sm:$0xff]  ;;  %v16507_v24 = vld [vmem:[#allocation94_spill] sm:$0xff] }
 0x553   : > { %v4960_v56 = vmul.f32 %v14419_v46, %v16467_v50  ;;  %v4961_v38 = vmul.f32 %v14424_v42, %v16468_v44  ;;  %v4962_v9 = vmul.f32 %v14429_v39, %v16469_v30  ;;  %v4963_v60 = vmul.f32 %v14434_v20, %v16470_v57  ;;  %v16476_v46 = vld [vmem:[#allocation47_spill] sm:$0xff]  ;;  %v16479_v42 = vld [vmem:[#allocation48_spill] sm:$0xff]  ;;  %v16515_v44 = vld [vmem:[#allocation98_spill] sm:$0xff] }
 0x554   : > { %v4964_v3 = vmul.f32 %v4932_v55, %v16471_v33  ;;  %v4965_v29 = vmul.f32 %v4933_v21, %v16472_v62  ;;  %v4966_v12 = vmul.f32 %v4934_v43, %v16473_v59  ;;  %v4967_v10 = vmul.f32 %v4935_v53, %v16474_v22  ;;  %v16489_v43 = vld [vmem:[#allocation61_spill] sm:$0xff] }
 0x555   : > { %v4968_v41 = vmul.f32 %v4936_v26, %v16475_v51  ;;  %v4969_v8 = vmul.f32 %v4937_v4, %v16476_v46  ;;  %4992 = vst.msk [vmem:[#allocation2 + $0x19] sm:$0xff] %vm16477_vm13, %v4960_v56  ;;  %v4970_v39 = vmul.f32 %v4938_v54, %v16479_v42  ;;  %v4971_v20 = vmul.f32 %v4939_v58, %v16480_v40  ;;  %v16490_v26 = vld [vmem:[#allocation82_spill] sm:$0xff]  ;;  %vm16508_vm13 = vmmov %vm16228_vm0  ;;  %v16514_v56 = vld [vmem:[#allocation97_spill] sm:$0xff] }
 0x556   : > { %4993 = vst.msk [vmem:[#allocation2 + $0x21] sm:$0xff] %vm16478_vm14, %v4961_v38  ;;  %v4972_v55 = vmul.f32 %v4940_v61, %v16481_v0  ;;  %v4973_v21 = vmul.f32 %v4941_v28, %v16482_v17  ;;  %v4974_v53 = vmul.f32 %v4942_v35, %v16489_v43  ;;  %v4975_v4 = vmul.f32 %v4943_v27, %v16490_v26  ;;  %v16497_v61 = vld [vmem:[#allocation88_spill] sm:$0xff]  ;;  %v16499_v28 = vld [vmem:[#allocation90_spill] sm:$0xff]  ;;  %vm16509_vm14 = vmmov %vm16228_vm0 }
 0x557   : > { %4994 = vst.msk [vmem:[#allocation2 + $0x31] sm:$0xff] %vm16483_vm15, %v4962_v9  ;;  %v4976_v54 = vmul.f32 %v4944_v37, %v16491_v16  ;;  %v4977_v36 = vmul.f32 %v4945_v47, %v16492_v2  ;;  %v4978_v58 = vmul.f32 %v4946_v48, %v16496_v18  ;;  %v4979_v52 = vmul.f32 %v4947_v45, %v16497_v61  ;;  %v16505_v27 = vld [vmem:[#allocation92_spill] sm:$0xff]  ;;  %v16506_v47 = vld [vmem:[#allocation93_spill] sm:$0xff]  ;;  %vm16510_vm15 = vmmov %vm16228_vm0 }
 0x558   : > { %4995 = vst.msk [vmem:[#allocation2 + $0x39] sm:$0xff] %vm16484_vm3, %v4963_v60  ;;  %v4980_v32 = vmul.f32 %v4948_v1, %v16498_v25  ;;  %v4981_v35 = vmul.f32 %v4949_v23, %v16499_v28  ;;  %v4982_v34 = vmul.f32 %v4950_v14, %v16504_v49  ;;  %v4983_v37 = vmul.f32 %v4951_v13, %v16505_v27  ;;  %vm16511_vm3 = vmmov %vm16228_vm0  ;;  %v16512_v45 = vld [vmem:[#allocation95_spill] sm:$0xff]  ;;  %v16513_v23 = vld [vmem:[#allocation96_spill] sm:$0xff] }
 0x559   : > { %4996 = vst.msk [vmem:[#allocation2 + $0x49] sm:$0xff] %vm16485_vm6, %v4964_v3  ;;  %v4984_v15 = vmul.f32 %v4952_v6, %v16506_v47  ;;  %v4985_v48 = vmul.f32 %v4953_v19, %v16507_v24  ;;  %v4986_v1 = vmul.f32 %v4954_v7, %v16512_v45  ;;  %v4987_v50 = vmul.f32 %v4955_v63, %v16513_v23  ;;  %vm16516_vm6 = vmmov %vm16228_vm0  ;;  %v16520_v6 = vld [vmem:[#allocation99_spill] sm:$0xff]  ;;  %v11803_v38 = vld [vmem:[%s15815_s3] sm:$0xf] }
 0x55a   : > { %4997 = vst.msk [vmem:[#allocation2 + $0x51] sm:$0xff] %vm16486_vm7, %v4965_v29  ;;  %v4988_v14 = vmul.f32 %v4956_v11, %v16514_v56  ;;  %v4989_v13 = vmul.f32 %v4957_v31, %v16515_v44  ;;  %vm16517_vm7 = vmmov %vm16228_vm0  ;;  %v4991_v19 = vmul.f32 %v4959_v5, %v16520_v6  ;;  %v14541_v31 = vld [vmem:[%s15815_s3 + $0x8] sm:$0xf] }
 0x55b   : > { %5024 = vst.msk [vmem:[#allocation2 + $0x1] sm:$0xff] %vm16487_vm8, %v4962_v9  ;;  %vm16518_vm8 = vmmov %vm16228_vm0 }
 0x55c   : > { %5025 = vst.msk [vmem:[#allocation2 + $0x9] sm:$0xff] %vm16488_vm9, %v4963_v60  ;;  %vm16519_vm9 = vmmov %vm16228_vm0  ;;  %v5029_v7 = vld [vmem:[#allocation2 + $0x1a] sm:$0x1] }
 0x55d   : > { %4998 = vst.msk [vmem:[#allocation2 + $0x61] sm:$0xff] %vm16493_vm4, %v4966_v12  ;;  %vm16521_vm4 = vmmov %vm16228_vm0  ;;  %v14544_v5 = vld [vmem:[#allocation2 + $0x19] sm:$0xff]  ;;  %v14554_v30 = vld [vmem:[#allocation2 + $0x21] sm:$0xff] }
 0x55e   : > { %4999 = vst.msk [vmem:[#allocation2 + $0x69] sm:$0xff] %vm16494_vm1, %v4967_v10  ;;  %vm16522_vm1 = vmmov %vm16228_vm0  ;;  %v14558_v9 = vld [vmem:[#allocation2 + $0x31] sm:$0xff] }
 0x55f   : > { %5000 = vst.msk [vmem:[#allocation2 + $0x79] sm:$0xff] %vm16495_vm5, %v4968_v41  ;;  %vm16523_vm5 = vmmov %vm16228_vm0  ;;  %v14562_v57 = vld [vmem:[#allocation2 + $0x39] sm:$0xff]  ;;  %v5030_v3 = vld [vmem:[#allocation2 + $0x32] sm:$0x1] }
 0x560   : > { %5001 = vst.msk [vmem:[#allocation2 + $0x81] sm:$0xff] %vm16228_vm0, %v4969_v8  ;;  %5017 = vst.msk [vmem:[#allocation2 + $0x141] sm:$0xff] %vm16228_vm0, %v4985_v48  ;;  %v14566_v60 = vld [vmem:[#allocation2 + $0x49] sm:$0xff] }
 0x561   : > { %5002 = vst.msk [vmem:[#allocation2 + $0x91] sm:$0xff] %vm16500_vm2, %v4970_v39  ;;  %vm16524_vm2 = vmmov %vm16228_vm0  ;;  %v5031_v62 = vld [vmem:[#allocation2 + $0x4a] sm:$0x1]  ;;  %v14572_v59 = vld [vmem:[#allocation2 + $0x51] sm:$0xff] }
 0x562   : > { %5003 = vst.msk [vmem:[#allocation2 + $0x99] sm:$0xff] %vm16501_vm10, %v4971_v20  ;;  %vm16525_vm10 = vmmov %vm16228_vm0  ;;  %v5133_v63 = vld [vmem:[#allocation2 + $0x1] sm:$0xff]  ;;  %v5067_v2 = vld [vmem:[#allocation2 + $0x57] sm:$0x1] }
 0x563   : > { %5004 = vst.msk [vmem:[#allocation2 + $0xa9] sm:$0xff] %vm16502_vm11, %v4972_v55  ;;  %vm16526_vm11 = vmmov %vm16228_vm0  ;;  %v5134_v11 = vld [vmem:[#allocation2 + $0x9] sm:$0xff]  ;;  %v5028_v33 = vld [vmem:[#allocation2 + $0x2] sm:$0x1] }
 0x564   : > { %5005 = vst.msk [vmem:[#allocation2 + $0xb1] sm:$0xff] %vm16503_vm12, %v4973_v21  ;;  %vm16527_vm12 = vmmov %vm16228_vm0  ;;  %v5032_v29 = vld [vmem:[#allocation2 + $0x62] sm:$0x1] }
 0x565   : > { %5006 = vst.msk [vmem:[#allocation2 + $0xc1] sm:$0xff] %vm16508_vm13, %v4974_v53  ;;  %vm16528_vm13 = vmmov %vm16228_vm0  ;;  %v14578_v22 = vld [vmem:[#allocation2 + $0x61] sm:$0xff]  ;;  %v14586_v42 = vld [vmem:[#allocation2 + $0x69] sm:$0xff] }
 0x566   : > { %5007 = vst.msk [vmem:[#allocation2 + $0xc9] sm:$0xff] %vm16509_vm14, %v4975_v4  ;;  %vm16529_vm14 = vmmov %vm16228_vm0  ;;  %v5033_v12 = vld [vmem:[#allocation2 + $0x7a] sm:$0x1]  ;;  %v5064_v53 = vld [vmem:[#allocation2 + $0xf] sm:$0x1] }
 0x567   : > { %5008 = vst.msk [vmem:[#allocation2 + $0xd9] sm:$0xff] %vm16510_vm15, %v4976_v54  ;;  %vm16530_vm15 = vmmov %vm16228_vm0  ;;  %v14592_v40 = vld [vmem:[#allocation2 + $0x79] sm:$0xff]  ;;  %v14599_v17 = vld [vmem:[#allocation2 + $0x81] sm:$0xff] }
 0x568   : > { %5009 = vst.msk [vmem:[#allocation2 + $0xe1] sm:$0xff] %vm16511_vm3, %v4977_v36  ;;  %vm16531_vm3 = vcmask 24576   ;;  %v5034_v10 = vld [vmem:[#allocation2 + $0x92] sm:$0x1]  ;;  %v5065_v4 = vld [vmem:[#allocation2 + $0x27] sm:$0x1] }
 0x569   : > { %5010 = vst.msk [vmem:[#allocation2 + $0xf1] sm:$0xff] %vm16516_vm6, %v4978_v58  ;;  %vm16532_vm6 = vmmov %vm16228_vm0  ;;  %v14604_v43 = vld [vmem:[#allocation2 + $0x91] sm:$0xff]  ;;  %v14609_v26 = vld [vmem:[#allocation2 + $0x99] sm:$0xff] }
 0x56a   : > { %5011 = vst.msk [vmem:[#allocation2 + $0xf9] sm:$0xff] %vm16517_vm7, %v4979_v52  ;;  %10669 = vmatprep.mubr.msk.f32.mxu1 %vm16532_vm6, %v5133_v63  ;;  %vm16533_vm7 = vmmov %vm16228_vm0  ;;  %v5035_v51 = vld [vmem:[#allocation2 + $0xaa] sm:$0x1]  ;;  %v5066_v54 = vld [vmem:[#allocation2 + $0x3f] sm:$0x1] }
 0x56b   : > { %5012 = vst.msk [vmem:[#allocation2 + $0x109] sm:$0xff] %vm16518_vm8, %v4980_v32  ;;  %10670 = vmatmul.mubr.msk.f32.vlgmr.msra.gmra.mrb[0].mxu1 %vm16533_vm7, %v5134_v11  ;;  %vm16534_vm8 = vcmask 1043456   ;;  %v14614_v16 = vld [vmem:[#allocation2 + $0xa9] sm:$0xff]  ;;  %v14621_v18 = vld [vmem:[#allocation2 + $0xb1] sm:$0xff]  ;;  %v5069_v58 = vld [vmem:[#allocation2 + $0x87] sm:$0x1] }
 0x56c   : > { %5013 = vst.msk [vmem:[#allocation2 + $0x111] sm:$0xff] %vm16519_vm9, %v4981_v35  ;;  %10718 = vmatpush3.msk.msra.mxu1 %vm16534_vm8, %v11803_v38  ;;  %vm16535_vm9 = vmmov %vm16228_vm0  ;;  %v5036_v41 = vld [vmem:[#allocation2 + $0xc2] sm:$0x1]  ;;  %v5068_v36 = vld [vmem:[#allocation2 + $0x6f] sm:$0x1] }
 0x56d   : > { %5014 = vst.msk [vmem:[#allocation2 + $0x121] sm:$0xff] %vm16521_vm4, %v4982_v34  ;;  %10672 = vmatprep.mubr.msk.f32.mxu1 %vm16535_vm9, %v14544_v5  ;;  %vm16536_vm4 = vmmov %vm16534_vm8  ;;  %v14626_v61 = vld [vmem:[#allocation2 + $0xc1] sm:$0xff]  ;;  %v5070_v52 = vld [vmem:[#allocation2 + $0x9f] sm:$0x1] }
 0x56e   : > { %5015 = vst.msk [vmem:[#allocation2 + $0x129] sm:$0xff] %vm16522_vm1, %v4983_v37  ;;  %10767 = vmatprep.subr.msk.mxu1 %vm16536_vm4, %v14541_v31  ;;  %vm16537_vm1 = vmmov %vm16228_vm0  ;;  %v5037_v46 = vld [vmem:[#allocation2 + $0xda] sm:$0x1]  ;;  %v5071_v25 = vld [vmem:[#allocation2 + $0xb7] sm:$0x1] }
 0x56f   : > { %5016 = vst.msk [vmem:[#allocation2 + $0x139] sm:$0xff] %vm16523_vm5, %v4984_v15  ;;  %10673 = vmatmul.mubr.msk.f32.gmra.mrb[2].mxu1 %vm16537_vm1, %v14554_v30  ;;  %vm16538_vm5 = vmmov %vm16228_vm0  ;;  %v5072_v32 = vld [vmem:[#allocation2 + $0xcf] sm:$0x1]  ;;  %v5073_v28 = vld [vmem:[#allocation2 + $0xe7] sm:$0x1] }
 0x570   : > { %5018 = vst.msk [vmem:[#allocation2 + $0x151] sm:$0xff] %vm16524_vm2, %v4986_v1  ;;  %10675 = vmatprep.mubr.msk.f32.mxu1 %vm16538_vm5, %v14558_v9  ;;  %vm16539_vm2 = vmmov %vm16228_vm0  ;;  %v5038_v8 = vld [vmem:[#allocation2 + $0xf2] sm:$0x1]  ;;  %v14634_v35 = vld [vmem:[#allocation2 + $0xc9] sm:$0xff] }
 0x571   : > { %5019 = vst.msk [vmem:[#allocation2 + $0x159] sm:$0xff] %vm16525_vm10, %v4987_v50  ;;  %vm16540_vm10 = vmmov %vm16531_vm3  ;;  %v5074_v49 = vld [vmem:[#allocation2 + $0xff] sm:$0x1]  ;;  %v5077_v47 = vld [vmem:[#allocation2 + $0x147] sm:$0x1] }
 0x572   : > { %5020 = vst.msk [vmem:[#allocation2 + $0x169] sm:$0xff] %vm16526_vm11, %v4988_v14  ;;  %vm16541_vm11 = vmmov %vm16531_vm3  ;;  %v5039_v39 = vld [vmem:[#allocation2 + $0x10a] sm:$0x1]  ;;  %v14639_v34 = vld [vmem:[#allocation2 + $0xd9] sm:$0xff] }
 0x573   : > { %5021 = vst.msk [vmem:[#allocation2 + $0x171] sm:$0xff] %vm16527_vm12, %v4989_v13  ;;  %10676 = vmatmul.mubr.msk.f32.gmra.mrb[4].mxu1 %vm16228_vm0, %v14562_v57  ;;  %vm16542_vm12 = vmmov %vm16531_vm3  ;;  %v5075_v27 = vld [vmem:[#allocation2 + $0x117] sm:$0x1]  ;;  %v14646_v15 = vld [vmem:[#allocation2 + $0xe1] sm:$0xff] }
 0x574   : > { %5026 = vst.msk [vmem:[#allocation2 + $0x199] sm:$0xff] %vm16528_vm13, %v4988_v14  ;;  %10678 = vmatprep.mubr.msk.f32.mxu1 %vm16539_vm2, %v14566_v60  ;;  %vm16543_vm13 = vmmov %vm16531_vm3  ;;  %v5040_v20 = vld [vmem:[#allocation2 + $0x122] sm:$0x1]  ;;  %v14651_v48 = vld [vmem:[#allocation2 + $0xf1] sm:$0xff] }
 0x575   : > { %5027 = vst.msk [vmem:[#allocation2 + $0x1a1] sm:$0xff] %vm16529_vm14, %v4989_v13  ;;  %vm16544_vm14 = vmmov %vm16228_vm0  ;;  %v5076_v37 = vld [vmem:[#allocation2 + $0x12f] sm:$0x1]  ;;  %v14657_v1 = vld [vmem:[#allocation2 + $0xf9] sm:$0xff] }
 0x576   : > { %5023 = vst.msk [vmem:[#allocation2 + $0x189] sm:$0xff] %vm16530_vm15, %v4991_v19  ;;  %vm16545_vm15 = vmmov %vm16531_vm3  ;;  %v5041_v0 = vld [vmem:[#allocation2 + $0x13a] sm:$0x1]  ;;  %v14661_v56 = vld [vmem:[#allocation2 + $0x109] sm:$0xff] }
 0x577   : > { %5047 = vst.msk [vmem:[#allocation2 + $0x18] sm:$0x1] %vm16531_vm3, %v5029_v7  ;;  %10679 = vmatmul.mubr.msk.f32.gmra.mrb[6].mxu1 %vm16544_vm14, %v14572_v59  ;;  %vm16546_vm3 = vmmov %vm16228_vm0  ;;  %v5042_v55 = vld [vmem:[#allocation2 + $0x152] sm:$0x1]  ;;  %v14671_v44 = vld [vmem:[#allocation2 + $0x121] sm:$0xff] }
 0x578   : > { %5046 = vst.msk [vmem:[#allocation2] sm:$0x1] %vm16540_vm10, %v5028_v33  ;;  %10681 = vmatprep.mubr.msk.f32.mxu1 %vm16546_vm3, %v14578_v22  ;;  %vm16547_vm6 = vmmov %vm16540_vm10  ;;  %v5078_v24 = vld [vmem:[#allocation2 + $0x15f] sm:$0x1]  ;;  %v14667_v14 = vld [vmem:[#allocation2 + $0x111] sm:$0xff] }
 0x579   : > { %5048 = vst.msk [vmem:[#allocation2 + $0x30] sm:$0x1] %vm16541_vm11, %v5030_v3  ;;  %vm16548_vm7 = vmmov %vm16547_vm6  ;;  %v5043_v21 = vld [vmem:[#allocation2 + $0x16a] sm:$0x1]  ;;  %v14679_v6 = vld [vmem:[#allocation2 + $0x139] sm:$0xff] }
 0x57a   : > { %5049 = vst.msk [vmem:[#allocation2 + $0x48] sm:$0x1] %vm16542_vm12, %v5031_v62  ;;  %vm16549_vm8 = vmmov %vm16547_vm6  ;;  %v5079_v45 = vld [vmem:[#allocation2 + $0x177] sm:$0x1]  ;;  %v14675_v13 = vld [vmem:[#allocation2 + $0x129] sm:$0xff] }
 0x57b   : > { %5050 = vst.msk [vmem:[#allocation2 + $0x60] sm:$0x1] %vm16543_vm13, %v5032_v29  ;;  %vm16550_vm9 = vmmov %vm16547_vm6  ;;  %v5045_v50 = vld [vmem:[#allocation2 + $0x19a] sm:$0x1]  ;;  %v14683_v19 = vld [vmem:[#allocation2 + $0x141] sm:$0xff] }
 0x57c   : > { %5051 = vst.msk [vmem:[#allocation2 + $0x78] sm:$0x1] %vm16545_vm15, %v5033_v12  ;;  %vm16551_vm4 = vmmov %vm16547_vm6  ;;  %v14687_v7 = vld [vmem:[#allocation2 + $0x151] sm:$0xff]  ;;  %v5081_v63 = vld [vmem:[#allocation2 + $0x1a7] sm:$0x1] }
 0x57d   : > { %5052 = vst.msk [vmem:[#allocation2 + $0x90] sm:$0x1] %vm16547_vm6, %v5034_v10  ;;  %vm16552_vm1 = vmmov %vm16228_vm0  ;;  %v5080_v23 = vld [vmem:[#allocation2 + $0x18f] sm:$0x1]  ;;  %v14692_v11 = vld [vmem:[#allocation2 + $0x159] sm:$0xff] }
 0x57e   : > { %5053 = vst.msk [vmem:[#allocation2 + $0xa8] sm:$0x1] %vm16548_vm7, %v5035_v51  ;;  %10682 = vmatmul.mubr.msk.f32.gmra.mrb[8].mxu1 %vm16552_vm1, %v14586_v42  ;;  %vm16553_vm5 = vmmov %vm16551_vm4  ;;  %v14696_v38 = vld [vmem:[#allocation2 + $0x169] sm:$0xff]  ;;  %v14700_v33 = vld [vmem:[#allocation2 + $0x171] sm:$0xff] }
 0x57f   : > { %5054 = vst.msk [vmem:[#allocation2 + $0xc0] sm:$0x1] %vm16549_vm8, %v5036_v41  ;;  %10684 = vmatprep.mubr.msk.f32.mxu1 %vm16228_vm0, %v14592_v40  ;;  %vm16554_vm2 = vmmov %vm16551_vm4  ;;  %v5100_v3 = vld [vmem:[#allocation2] sm:$0xff]  ;;  %v5101_v62 = vld [vmem:[#allocation2 + $0x8] sm:$0xff] }
 0x580   : > { %5055 = vst.msk [vmem:[#allocation2 + $0xd8] sm:$0x1] %vm16550_vm9, %v5037_v46  ;;  %vm16555_vm10 = vmmov %vm16554_vm2  ;;  %v14708_v29 = vld [vmem:[%s15815_s3 + $0xc] sm:$0xf]  ;;  %v14711_v12 = vld [vmem:[#allocation2 + $0x18] sm:$0xff] }
 0x581   : > { %5056 = vst.msk [vmem:[#allocation2 + $0xf0] sm:$0x1] %vm16551_vm4, %v5038_v8  ;;  %vm16556_vm11 = vmmov %vm16554_vm2  ;;  %v14719_v10 = vld [vmem:[#allocation2 + $0x20] sm:$0xff]  ;;  %v14723_v51 = vld [vmem:[#allocation2 + $0x30] sm:$0xff] }
 0x582   : > { %5057 = vst.msk [vmem:[#allocation2 + $0x108] sm:$0x1] %vm16553_vm5, %v5039_v39  ;;  %vm16557_vm12 = vmmov %vm16228_vm0  ;;  %v14727_v41 = vld [vmem:[#allocation2 + $0x38] sm:$0xff]  ;;  %v14735_v46 = vld [vmem:[#allocation2 + $0x50] sm:$0xff] }
 0x583   : > { %5058 = vst.msk [vmem:[#allocation2 + $0x120] sm:$0x1] %vm16554_vm2, %v5040_v20  ;;  %10685 = vmatmul.mubr.msk.f32.gmra.mrb[10].mxu1 %vm16557_vm12, %v14599_v17  ;;  %vm16558_vm13 = vmmov %vm16554_vm2  ;;  %v14739_v8 = vld [vmem:[#allocation2 + $0x60] sm:$0xff]  ;;  %v14743_v39 = vld [vmem:[#allocation2 + $0x68] sm:$0xff] }
 0x584   : > { %5059 = vst.msk [vmem:[#allocation2 + $0x138] sm:$0x1] %vm16555_vm10, %v5041_v0  ;;  %vm16559_vm14 = vmmov %vm16228_vm0  ;;  %v14747_v20 = vld [vmem:[#allocation2 + $0x78] sm:$0xff]  ;;  %v14751_v0 = vld [vmem:[#allocation2 + $0x80] sm:$0xff] }
 0x585   : > { %5060 = vst.msk [vmem:[#allocation2 + $0x150] sm:$0x1] %vm16556_vm11, %v5042_v55  ;;  %10687 = vmatprep.mubr.msk.f32.mxu1 %vm16559_vm14, %v14604_v43  ;;  %vm16560_vm15 = vmmov %vm16554_vm2  ;;  %v14755_v55 = vld [vmem:[#allocation2 + $0x90] sm:$0xff] }
 0x586   : > { %5061 = vst.msk [vmem:[#allocation2 + $0x168] sm:$0x1] %vm16558_vm13, %v5043_v21  ;;  %vm16561_vm3 = vmmov %vm16228_vm0  ;;  %v14759_v21 = vld [vmem:[#allocation2 + $0x98] sm:$0xff] }
 0x587   : > { %5082 = vst.msk [vmem:[#allocation2 + $0x11] sm:$0x1] %vm16560_vm15, %v5064_v53  ;;  %10688 = vmatmul.mubr.msk.f32.gmra.mrb[12].mxu1 %vm16561_vm3, %v14609_v26  ;;  %vm16562_vm6 = vmmov %vm16554_vm2  ;;  %v14763_v53 = vld [vmem:[#allocation2 + $0xa8] sm:$0xff] }
 0x588   : > { %5083 = vst.msk [vmem:[#allocation2 + $0x29] sm:$0x1] %vm16562_vm6, %v5065_v4  ;;  %vm16563_vm7 = vmmov %vm16228_vm0  ;;  %v14767_v4 = vld [vmem:[#allocation2 + $0xb0] sm:$0xff] }
 0x589   : > { %10690 = vmatprep.mubr.msk.f32.mxu1 %vm16563_vm7, %v14614_v16  ;;  %vm16564_vm8 = vmmov %vm16554_vm2  ;;  %5088 = vst.msk [vmem:[#allocation2 + $0xa1] sm:$0x1] %vm16554_vm2, %v5070_v52  ;;  %v14787_v52 = vld [vmem:[#allocation2 + $0xf0] sm:$0xff] }
 0x58a   : > { %5084 = vst.msk [vmem:[#allocation2 + $0x41] sm:$0x1] %vm16564_vm8, %v5066_v54  ;;  %vm16565_vm9 = vmmov %vm16554_vm2  ;;  %v14771_v54 = vld [vmem:[#allocation2 + $0xc0] sm:$0xff] }
 0x58b   : > { %5085 = vst.msk [vmem:[#allocation2 + $0x59] sm:$0x1] %vm16565_vm9, %v5067_v2  ;;  %vm16566_vm4 = vmmov %vm16554_vm2  ;;  %v14775_v2 = vld [vmem:[#allocation2 + $0xc8] sm:$0xff] }
 0x58c   : > { %5086 = vst.msk [vmem:[#allocation2 + $0x71] sm:$0x1] %vm16566_vm4, %v5068_v36  ;;  %vm16567_vm1 = vmmov %vm16228_vm0  ;;  %v14779_v36 = vld [vmem:[#allocation2 + $0xd8] sm:$0xff] }
 0x58d   : > { %10691 = vmatmul.mubr.msk.f32.gmra.mrb[14].mxu1 %vm16567_vm1, %v14621_v18  ;;  %vm16568_vm5 = vmmov %vm16554_vm2  ;;  %16594 = vst [vmem:[#allocation131_spill] sm:$0xff] %v14696_v38 }
 0x58e   : > { %5087 = vst.msk [vmem:[#allocation2 + $0x89] sm:$0x1] %vm16568_vm5, %v5069_v58  ;;  %10693 = vmatprep.mubr.msk.f32.mxu1 %vm16228_vm0, %v14626_v61  ;;  %vm16569_vm10 = vmmov %vm16554_vm2  ;;  %v14783_v58 = vld [vmem:[#allocation2 + $0xe0] sm:$0xff] }
 0x58f   : > { %5089 = vst.msk [vmem:[#allocation2 + $0xb9] sm:$0x1] %vm16569_vm10, %v5071_v25  ;;  %vm16570_vm11 = vmmov %vm16554_vm2  ;;  %v14791_v25 = vld [vmem:[#allocation2 + $0xf8] sm:$0xff] }
 0x590   : > { %5090 = vst.msk [vmem:[#allocation2 + $0xd1] sm:$0x1] %vm16570_vm11, %v5072_v32  ;;  %vm16571_vm12 = vmmov %vm16554_vm2  ;;  %v14795_v32 = vld [vmem:[#allocation2 + $0x108] sm:$0xff] }
 0x591   : > { %5091 = vst.msk [vmem:[#allocation2 + $0xe9] sm:$0x1] %vm16571_vm12, %v5073_v28  ;;  %vm16572_vm13 = vmmov %vm16228_vm0  ;;  %v14799_v28 = vld [vmem:[#allocation2 + $0x110] sm:$0xff] }
 0x592   : > { %10694 = vmatmul.mubr.msk.f32.gmra.mrb[16].mxu1 %vm16572_vm13, %v14634_v35  ;;  %vm16573_vm14 = vmmov %vm16554_vm2  ;;  %16596 = vst [vmem:[#allocation132_spill] sm:$0xff] %v14700_v33 }
 0x593   : > { %5092 = vst.msk [vmem:[#allocation2 + $0x101] sm:$0x1] %vm16573_vm14, %v5074_v49  ;;  %vm16574_vm15 = vmmov %vm16228_vm0  ;;  %v14803_v49 = vld [vmem:[#allocation2 + $0x120] sm:$0xff] }
 0x594   : > { %10696 = vmatprep.mubr.msk.f32.mxu1 %vm16574_vm15, %v14639_v34  ;;  %vm16575_vm3 = vmmov %vm16554_vm2 }
 0x595   : > { %5093 = vst.msk [vmem:[#allocation2 + $0x119] sm:$0x1] %vm16575_vm3, %v5075_v27  ;;  %vm16576_vm6 = vmmov %vm16554_vm2  ;;  %v14807_v27 = vld [vmem:[#allocation2 + $0x128] sm:$0xff] }
 0x596   : > { %5094 = vst.msk [vmem:[#allocation2 + $0x131] sm:$0x1] %vm16576_vm6, %v5076_v37  ;;  %vm16577_vm7 = vmmov %vm16554_vm2  ;;  %v14811_v37 = vld [vmem:[#allocation2 + $0x138] sm:$0xff] }
 0x597   : > { %5095 = vst.msk [vmem:[#allocation2 + $0x149] sm:$0x1] %vm16577_vm7, %v5077_v47  ;;  %vm16578_vm8 = vmmov %vm16228_vm0  ;;  %v14815_v47 = vld [vmem:[#allocation2 + $0x140] sm:$0xff] }
 0x598   : > { %10697 = vmatmul.mubr.msk.f32.gmra.mrb[18].mxu1 %vm16578_vm8, %v14646_v15  ;;  %vm16579_vm9 = vmmov %vm16554_vm2 }
 0x599   : > { %5096 = vst.msk [vmem:[#allocation2 + $0x161] sm:$0x1] %vm16579_vm9, %v5078_v24  ;;  %vm16580_vm4 = vmmov %vm16228_vm0  ;;  %v14819_v24 = vld [vmem:[#allocation2 + $0x150] sm:$0xff] }
 0x59a   : > { %10699 = vmatprep.mubr.msk.f32.mxu1 %vm16580_vm4, %v14651_v48  ;;  %vm16581_vm1 = vmmov %vm16554_vm2 }
 0x59b   : > { %5097 = vst.msk [vmem:[#allocation2 + $0x179] sm:$0x1] %vm16581_vm1, %v5079_v45  ;;  %vm16582_vm5 = vmmov %vm16228_vm0  ;;  %v14823_v45 = vld [vmem:[#allocation2 + $0x158] sm:$0xff] }
 0x59c   : > { %10700 = vmatmul.mubr.msk.f32.gmra.mrb[20].mxu1 %vm16582_vm5, %v14657_v1  ;;  %vm16583_vm0 = vmmov %vm16581_vm1  ;;  %vm16600_vm5 = vcmask 1043456  }
 0x59d   : > { %5098 = vst.msk [vmem:[#allocation2 + $0x191] sm:$0x1] %vm16583_vm0, %v5080_v23  ;;  %vm16584_vm2 = vmmov %vm16583_vm0  ;;  %v14827_v23 = vld [vmem:[#allocation2 + $0x168] sm:$0xff] }
 0x59e   : > { %5063 = vst.msk [vmem:[#allocation2 + $0x198] sm:$0x1] %vm16584_vm2, %v5045_v50  ;;  %vm16585_vm10 = vmmov %vm16580_vm4  ;;  %v14831_v50 = vld [vmem:[#allocation2 + $0x170] sm:$0xff] }
 0x59f   : > { %10702 = vmatprep.mubr.msk.f32.mxu1 %vm16585_vm10, %v14661_v56  ;;  %vm16586_vm11 = vmmov %vm16580_vm4 }
 0x5a0   : > { %10703 = vmatmul.mubr.msk.f32.gmra.mrb[22].mxu1 %vm16586_vm11, %v14667_v14  ;;  %vm16587_vm12 = vmmov %vm16580_vm4 }
 0x5a1   : > { %10705 = vmatprep.mubr.msk.f32.mxu1 %vm16587_vm12, %v14671_v44  ;;  %vm16588_vm13 = vmmov %vm16580_vm4 }
 0x5a2   : > { %vm16589_vm14 = vmmov %vm16580_vm4 }
 0x5a3   : > { %vm16590_vm15 = vmmov %vm16580_vm4 }
 0x5a4   : > { %10706 = vmatmul.mubr.msk.f32.gmra.mrb[24].mxu1 %vm16588_vm13, %v14675_v13  ;;  %vm16591_vm3 = vmmov %vm16580_vm4 }
 0x5a5   : > { %10708 = vmatprep.mubr.msk.f32.mxu1 %vm16589_vm14, %v14679_v6  ;;  %vm16592_vm6 = vmmov %vm16583_vm0 }
 0x5a6   : > { %5099 = vst.msk [vmem:[#allocation2 + $0x1a9] sm:$0x1] %vm16592_vm6, %v5081_v63  ;;  %vm16593_vm7 = vmmov %vm16591_vm3  ;;  %v5815_v63 = vld [vmem:[#allocation2 + $0x2] sm:$0xff] }
 0x5a7   : > { %vm16595_vm8 = vmmov %vm16591_vm3 }
 0x5a8   : > { %10709 = vmatmul.mubr.msk.f32.gmra.mrb[26].mxu1 %vm16590_vm15, %v14683_v19  ;;  %vm16597_vm9 = vmmov %vm16591_vm3 }
 0x5a9   : > { %10711 = vmatprep.mubr.msk.f32.mxu1 %vm16591_vm3, %v14687_v7  ;;  %vm16598_vm4 = vmmov %vm16591_vm3 }
 0x5aa   : > { %vm16599_vm1 = vmmov %vm16591_vm3 }
 0x5ab   : > { %vm16601_vm0 = vmmov %vm16599_vm1 }
 0x5ac   : > { %10712 = vmatmul.mubr.msk.f32.gmra.mrb[28].mxu1 %vm16593_vm7, %v14692_v11  ;;  %vm16602_vm2 = vmmov %vm16600_vm5 }
 0x5ad   : > { %10714 = vmatprep.mubr.msk.f32.mxu1 %vm16595_vm8, %v14696_v38  ;;  %vm16603_vm10 = vmmov %vm16601_vm0  ;;  %v14854_v38 = vld [vmem:[#allocation2 + $0x32] sm:$0xff] }
 0x5ae   : > { %vm16604_vm11 = vmmov %vm16601_vm0  ;;  %16638 = vst [vmem:[#allocation152_spill] sm:$0xff] %v14854_v38 }
 0x5af   : > { %vm16605_vm12 = vmmov %vm16601_vm0 }
 0x5b0   : > { %10715 = vmatmul.mubr.msk.f32.gmra.mrb[30].mxu1 %vm16597_vm9, %v14700_v33  ;;  %vm16606_vm13 = vmmov %vm16601_vm0  ;;  %v14842_v33 = vld [vmem:[#allocation2 + $0x1a] sm:$0xff] }
 0x5b1   : > { %10719 = vmatprep.mubr.msk.f32.mxu1 %vm16598_vm4, %v5100_v3  ;;  %vm16607_vm14 = vmmov %vm16601_vm0  ;;  %v5816_v3 = vld [vmem:[#allocation2 + $0xa] sm:$0xff]  ;;  %16632 = vst [vmem:[#allocation148_spill] sm:$0xff] %v14842_v33 }
 0x5b2   : > { %vm16608_vm15 = vmmov %vm16601_vm0 }
 0x5b3   : > { %vm16609_vm3 = vmmov %vm16601_vm0 }
 0x5b4   : > { %10720 = vmatmul.mubr.msk.f32.vlgmr.msra.gmra.mrb[0].mxu1 %vm16599_vm1, %v5101_v62  ;;  %vm16610_vm6 = vmmov %vm16601_vm0  ;;  %v14839_v62 = vld [vmem:[%s15815_s3 + $0x10] sm:$0xf] }
 0x5b5   : > { %10768 = vmatpush3.msk.msra.mxu1 %vm16600_vm5, %v14541_v31  ;;  %10722 = vmatprep.mubr.msk.f32.mxu1 %vm16601_vm0, %v14711_v12  ;;  %v14731_v31 = vld [vmem:[#allocation2 + $0x48] sm:$0xff]  ;;  %vm16611_vm7 = vmmov %vm16601_vm0 }
 0x5b6   : > { %10817 = vmatprep.subr.msk.mxu1 %vm16602_vm2, %v14708_v29  ;;  %vm16612_vm8 = vmmov %vm16601_vm0 }
 0x5b7   : > { %vm16613_vm9 = vmmov %vm16601_vm0 }
 0x5b8   : > { %10723 = vmatmul.mubr.msk.f32.gmra.mrb[2].mxu1 %vm16603_vm10, %v14719_v10  ;;  %vm16614_vm4 = vmmov %vm16601_vm0 }
 0x5b9   : > { %10725 = vmatprep.mubr.msk.f32.mxu1 %vm16604_vm11, %v14723_v51  ;;  %vm16615_vm1 = vmmov %vm16601_vm0 }
 0x5ba   : > { %vm16616_vm5 = vmmov %vm16601_vm0 }
 0x5bb   : > { %vm16617_vm2 = vmmov %vm16601_vm0 }
 0x5bc   : > { %10726 = vmatmul.mubr.msk.f32.gmra.mrb[4].mxu1 %vm16605_vm12, %v14727_v41  ;;  %vm16618_vm10 = vmmov %vm16601_vm0 }
 0x5bd   : > { %10728 = vmatprep.mubr.msk.f32.mxu1 %vm16606_vm13, %v14731_v31  ;;  %vm16619_vm11 = vmmov %vm16601_vm0 }
 0x5be   : > { %vm16620_vm12 = vmmov %vm16601_vm0 }
 0x5bf   : > { %vm16621_vm13 = vmmov %vm16601_vm0 }
 0x5c0   : > { %10729 = vmatmul.mubr.msk.f32.gmra.mrb[6].mxu1 %vm16607_vm14, %v14735_v46  ;;  %vm16622_vm14 = vmmov %vm16601_vm0 }
 0x5c1   : > { %10731 = vmatprep.mubr.msk.f32.mxu1 %vm16608_vm15, %v14739_v8  ;;  %vm16623_vm15 = vmmov %vm16601_vm0 }
 0x5c4   : > { %10732 = vmatmul.mubr.msk.f32.gmra.mrb[8].mxu1 %vm16609_vm3, %v14743_v39  ;;  %vm16624_vm3 = vmmov %vm16601_vm0 }
 0x5c5   : > { %10734 = vmatprep.mubr.msk.f32.mxu1 %vm16610_vm6, %v14747_v20  ;;  %vm16625_vm6 = vmmov %vm16601_vm0 }
 0x5c8   : > { %10735 = vmatmul.mubr.msk.f32.gmra.mrb[10].mxu1 %vm16611_vm7, %v14751_v0  ;;  %vm16626_vm7 = vmmov %vm16601_vm0 }
 0x5c9   : > { %10737 = vmatprep.mubr.msk.f32.mxu1 %vm16612_vm8, %v14755_v55  ;;  %vm16627_vm8 = vmmov %vm16601_vm0 }
 0x5cc   : > { %10738 = vmatmul.mubr.msk.f32.gmra.mrb[12].mxu1 %vm16613_vm9, %v14759_v21  ;;  %vm16628_vm9 = vmmov %vm16601_vm0 }
 0x5cd   : > { %10740 = vmatprep.mubr.msk.f32.mxu1 %vm16614_vm4, %v14763_v53  ;;  %vm16629_vm4 = vmmov %vm16601_vm0 }
 0x5d0   : > { %10741 = vmatmul.mubr.msk.f32.gmra.mrb[14].mxu1 %vm16615_vm1, %v14767_v4  ;;  %vm16630_vm1 = vmmov %vm16601_vm0 }
 0x5d1   : > { %10743 = vmatprep.mubr.msk.f32.mxu1 %vm16616_vm5, %v14771_v54  ;;  %vm16631_vm5 = vmmov %vm16601_vm0 }
 0x5d4   : > { %10744 = vmatmul.mubr.msk.f32.gmra.mrb[16].mxu1 %vm16601_vm0, %v14775_v2 }
 0x5d5   : > { %10746 = vmatprep.mubr.msk.f32.mxu1 %vm16617_vm2, %v14779_v36  ;;  %vm16633_vm2 = vcmask 1043456  }
 0x5d8   : > { %10747 = vmatmul.mubr.msk.f32.gmra.mrb[18].mxu1 %vm16618_vm10, %v14783_v58  ;;  %vm16634_vm10 = vmmov %vm16601_vm0 }
 0x5d9   : > { %10749 = vmatprep.mubr.msk.f32.mxu1 %vm16619_vm11, %v14787_v52  ;;  %vm16635_vm11 = vmmov %vm16633_vm2 }
 0x5dc   : > { %10750 = vmatmul.mubr.msk.f32.gmra.mrb[20].mxu1 %vm16620_vm12, %v14791_v25  ;;  %vm16637_vm12 = vmmov %vm16601_vm0 }
 0x5dd   : > { %10752 = vmatprep.mubr.msk.f32.mxu1 %vm16621_vm13, %v14795_v32  ;;  %vm16639_vm13 = vmmov %vm16601_vm0 }
 0x5e0   : > { %10753 = vmatmul.mubr.msk.f32.gmra.mrb[22].mxu1 %vm16622_vm14, %v14799_v28  ;;  %vm16641_vm14 = vmmov %vm16601_vm0 }
 0x5e1   : > { %10755 = vmatprep.mubr.msk.f32.mxu1 %vm16623_vm15, %v14803_v49  ;;  %vm16643_vm15 = vmmov %vm16601_vm0 }
 0x5e4   : > { %10756 = vmatmul.mubr.msk.f32.gmra.mrb[24].mxu1 %vm16624_vm3, %v14807_v27  ;;  %vm16645_vm3 = vmmov %vm16601_vm0 }
 0x5e5   : > { %10758 = vmatprep.mubr.msk.f32.mxu1 %vm16625_vm6, %v14811_v37  ;;  %vm16647_vm6 = vmmov %vm16601_vm0 }
 0x5e8   : > { %10759 = vmatmul.mubr.msk.f32.gmra.mrb[26].mxu1 %vm16626_vm7, %v14815_v47  ;;  %vm16649_vm7 = vmmov %vm16601_vm0 }
 0x5e9   : > { %10761 = vmatprep.mubr.msk.f32.mxu1 %vm16627_vm8, %v14819_v24  ;;  %vm16651_vm8 = vmmov %vm16601_vm0 }
 0x5ec   : > { %10762 = vmatmul.mubr.msk.f32.gmra.mrb[28].mxu1 %vm16628_vm9, %v14823_v45  ;;  %vm16653_vm9 = vmmov %vm16601_vm0 }
 0x5ed   : > { %10764 = vmatprep.mubr.msk.f32.mxu1 %vm16629_vm4, %v14827_v23  ;;  %vm16655_vm4 = vmmov %vm16601_vm0 }
 0x5f0   : > { %10765 = vmatmul.mubr.msk.f32.gmra.mrb[30].mxu1 %vm16630_vm1, %v14831_v50  ;;  %vm16657_vm1 = vmmov %vm16601_vm0 }
 0x5f1   : > { %10769 = vmatprep.mubr.msk.f32.mxu1 %vm16631_vm5, %v5815_v63  ;;  %v14850_v63 = vld [vmem:[#allocation2 + $0x22] sm:$0xff]  ;;  %vm16659_vm5 = vmmov %vm16601_vm0 }
 0x5f2   : > { %16636 = vst [vmem:[#allocation150_spill] sm:$0xff] %v14850_v63 }
 0x5f4   : > { %10770 = vmatmul.mubr.msk.f32.vlgmr.msra.gmra.mrb[0].mxu1 %vm16601_vm0, %v5816_v3  ;;  %v14858_v3 = vld [vmem:[#allocation2 + $0x3a] sm:$0xff] }
 0x5f5   : > { %10818 = vmatpush3.msk.msra.mxu1 %vm16633_vm2, %v14708_v29  ;;  %10772 = vmatprep.mubr.msk.f32.mxu1 %vm16634_vm10, %v14842_v33  ;;  %16640 = vst [vmem:[#allocation101_spill] sm:$0xff] %v14858_v3  ;;  %v14862_v29 = vld [vmem:[#allocation2 + $0x4a] sm:$0xff]  ;;  %v14866_v33 = vld [vmem:[#allocation2 + $0x52] sm:$0xff]  ;;  %vm16662_vm2 = vmmov %vm16601_vm0 }
 0x5f6   : > { %10867 = vmatprep.subr.msk.mxu1 %vm16635_vm11, %v14839_v62  ;;  %16642 = vst [vmem:[#allocation102_spill] sm:$0xff] %v14862_v29  ;;  %16644 = vst [vmem:[#allocation123_spill] sm:$0xff] %v14866_v33 }
 0x5f7   : > { %vm16664_vm10 = vmmov %vm16601_vm0 }
 0x5f8   : > { %10773 = vmatmul.mubr.msk.f32.gmra.mrb[2].mxu1 %vm16637_vm12, %v14850_v63  ;;  %v14870_v63 = vld [vmem:[#allocation2 + $0x62] sm:$0xff]  ;;  %vm16666_vm11 = vmmov %vm16601_vm0 }
 0x5f9   : > { %10775 = vmatprep.mubr.msk.f32.mxu1 %vm16639_vm13, %v14854_v38  ;;  %16646 = vst [vmem:[#allocation124_spill] sm:$0xff] %v14870_v63  ;;  %v14874_v38 = vld [vmem:[#allocation2 + $0x6a] sm:$0xff]  ;;  %vm16668_vm12 = vmmov %vm16601_vm0 }
 0x5fa   : > { %16648 = vst [vmem:[#allocation125_spill] sm:$0xff] %v14874_v38  ;;  %vm16670_vm13 = vmmov %vm16601_vm0 }
 0x5fc   : > { %10776 = vmatmul.mubr.msk.f32.gmra.mrb[4].mxu1 %vm16641_vm14, %v14858_v3  ;;  %v14878_v3 = vld [vmem:[#allocation2 + $0x7a] sm:$0xff]  ;;  %vm16672_vm14 = vmmov %vm16601_vm0 }
 0x5fd   : > { %10778 = vmatprep.mubr.msk.f32.mxu1 %vm16643_vm15, %v14862_v29  ;;  %16650 = vst [vmem:[#allocation137_spill] sm:$0xff] %v14878_v3  ;;  %v14882_v29 = vld [vmem:[#allocation2 + $0x82] sm:$0xff]  ;;  %vm16674_vm15 = vmmov %vm16601_vm0 }
 0x5fe   : > { %16652 = vst [vmem:[#allocation140_spill] sm:$0xff] %v14882_v29 }
 0x600   : > { %10779 = vmatmul.mubr.msk.f32.gmra.mrb[6].mxu1 %vm16645_vm3, %v14866_v33  ;;  %v14886_v33 = vld [vmem:[#allocation2 + $0x92] sm:$0xff]  ;;  %vm16676_vm3 = vmmov %vm16601_vm0 }
 0x601   : > { %10781 = vmatprep.mubr.msk.f32.mxu1 %vm16647_vm6, %v14870_v63  ;;  %16654 = vst [vmem:[#allocation141_spill] sm:$0xff] %v14886_v33  ;;  %v14890_v63 = vld [vmem:[#allocation2 + $0x9a] sm:$0xff]  ;;  %vm16678_vm6 = vmmov %vm16601_vm0 }
 0x602   : > { %16656 = vst [vmem:[#allocation142_spill] sm:$0xff] %v14890_v63 }
 0x604   : > { %10782 = vmatmul.mubr.msk.f32.gmra.mrb[8].mxu1 %vm16649_vm7, %v14874_v38  ;;  %v14894_v38 = vld [vmem:[#allocation2 + $0xaa] sm:$0xff]  ;;  %vm16680_vm7 = vmmov %vm16601_vm0 }
 0x605   : > { %10784 = vmatprep.mubr.msk.f32.mxu1 %vm16651_vm8, %v14878_v3  ;;  %16658 = vst [vmem:[#allocation143_spill] sm:$0xff] %v14894_v38  ;;  %v14898_v3 = vld [vmem:[#allocation2 + $0xb2] sm:$0xff]  ;;  %vm16682_vm8 = vmmov %vm16601_vm0 }
 0x606   : > { %16660 = vst [vmem:[#allocation146_spill] sm:$0xff] %v14898_v3 }
 0x608   : > { %10785 = vmatmul.mubr.msk.f32.gmra.mrb[10].mxu1 %vm16653_vm9, %v14882_v29  ;;  %v14902_v29 = vld [vmem:[#allocation2 + $0xc2] sm:$0xff]  ;;  %vm16683_vm9 = vmmov %vm16601_vm0 }
 0x609   : > { %10787 = vmatprep.mubr.msk.f32.mxu1 %vm16655_vm4, %v14886_v33  ;;  %16661 = vst [vmem:[#allocation149_spill] sm:$0xff] %v14902_v29  ;;  %v14906_v33 = vld [vmem:[#allocation2 + $0xca] sm:$0xff]  ;;  %vm16685_vm4 = vmmov %vm16601_vm0 }
 0x60a   : > { %16663 = vst [vmem:[#allocation151_spill] sm:$0xff] %v14906_v33 }
 0x60c   : > { %10788 = vmatmul.mubr.msk.f32.gmra.mrb[12].mxu1 %vm16657_vm1, %v14890_v63  ;;  %v14910_v63 = vld [vmem:[#allocation2 + $0xda] sm:$0xff]  ;;  %vm16686_vm1 = vmmov %vm16601_vm0 }
 0x60d   : > { %10790 = vmatprep.mubr.msk.f32.mxu1 %vm16659_vm5, %v14894_v38  ;;  %16665 = vst [vmem:[#allocation153_spill] sm:$0xff] %v14910_v63  ;;  %v14914_v38 = vld [vmem:[#allocation2 + $0xe2] sm:$0xff]  ;;  %vm16687_vm5 = vmmov %vm16601_vm0 }
 0x60e   : > { %16667 = vst [vmem:[#allocation155_spill] sm:$0xff] %v14914_v38 }
 0x610   : > { %10791 = vmatmul.mubr.msk.f32.gmra.mrb[14].mxu1 %vm16601_vm0, %v14898_v3  ;;  %v14918_v3 = vld [vmem:[#allocation2 + $0xf2] sm:$0xff] }
 0x611   : > { %10793 = vmatprep.mubr.msk.f32.mxu1 %vm16662_vm2, %v14902_v29  ;;  %16669 = vst [vmem:[#allocation156_spill] sm:$0xff] %v14918_v3  ;;  %v14922_v29 = vld [vmem:[#allocation2 + $0xfa] sm:$0xff]  ;;  %vm16688_vm2 = vmmov %vm16601_vm0 }
 0x612   : > { %16671 = vst [vmem:[#allocation103_spill] sm:$0xff] %v14922_v29 }
 0x614   : > { %10794 = vmatmul.mubr.msk.f32.gmra.mrb[16].mxu1 %vm16664_vm10, %v14906_v33  ;;  %v14926_v33 = vld [vmem:[#allocation2 + $0x10a] sm:$0xff]  ;;  %vm16689_vm10 = vmmov %vm16601_vm0 }
 0x615   : > { %10796 = vmatprep.mubr.msk.f32.mxu1 %vm16666_vm11, %v14910_v63  ;;  %16673 = vst [vmem:[#allocation104_spill] sm:$0xff] %v14926_v33  ;;  %v14930_v63 = vld [vmem:[#allocation2 + $0x112] sm:$0xff]  ;;  %vm16690_vm11 = vcmask 1043456  }
 0x616   : > { %16675 = vst [vmem:[#allocation105_spill] sm:$0xff] %v14930_v63 }
 0x618   : > { %10797 = vmatmul.mubr.msk.f32.gmra.mrb[18].mxu1 %vm16668_vm12, %v14914_v38  ;;  %v14934_v38 = vld [vmem:[#allocation2 + $0x122] sm:$0xff]  ;;  %vm16691_vm12 = vmmov %vm16601_vm0 }
 0x619   : > { %10799 = vmatprep.mubr.msk.f32.mxu1 %vm16670_vm13, %v14918_v3  ;;  %16677 = vst [vmem:[#allocation106_spill] sm:$0xff] %v14934_v38  ;;  %v14938_v3 = vld [vmem:[#allocation2 + $0x12a] sm:$0xff]  ;;  %vm16692_vm13 = vmmov %vm16690_vm11 }
 0x61a   : > { %16679 = vst [vmem:[#allocation107_spill] sm:$0xff] %v14938_v3 }
 0x61c   : > { %10800 = vmatmul.mubr.msk.f32.gmra.mrb[20].mxu1 %vm16672_vm14, %v14922_v29  ;;  %v14942_v29 = vld [vmem:[#allocation2 + $0x13a] sm:$0xff]  ;;  %vm16693_vm14 = vmmov %vm16601_vm0 }
 0x61d   : > { %10802 = vmatprep.mubr.msk.f32.mxu1 %vm16674_vm15, %v14926_v33  ;;  %16681 = vst [vmem:[#allocation128_spill] sm:$0xff] %v14942_v29  ;;  %v14946_v33 = vld [vmem:[#allocation2 + $0x142] sm:$0xff]  ;;  %vm16694_vm15 = vmmov %vm16601_vm0 }
 0x620   : > { %10803 = vmatmul.mubr.msk.f32.gmra.mrb[22].mxu1 %vm16676_vm3, %v14930_v63  ;;  %v14950_v63 = vld [vmem:[#allocation2 + $0x152] sm:$0xff]  ;;  %vm16695_vm3 = vmmov %vm16601_vm0 }
 0x621   : > { %10805 = vmatprep.mubr.msk.f32.mxu1 %vm16678_vm6, %v14934_v38  ;;  %16684 = vst [vmem:[#allocation129_spill] sm:$0xff] %v14950_v63  ;;  %v14954_v38 = vld [vmem:[#allocation2 + $0x15a] sm:$0xff]  ;;  %vm16696_vm6 = vmmov %vm16601_vm0 }
 0x624   : > { %10806 = vmatmul.mubr.msk.f32.gmra.mrb[24].mxu1 %vm16680_vm7, %v14938_v3  ;;  %v14958_v3 = vld [vmem:[#allocation2 + $0x16a] sm:$0xff]  ;;  %vm16697_vm7 = vmmov %vm16601_vm0 }
 0x625   : > { %10808 = vmatprep.mubr.msk.f32.mxu1 %vm16682_vm8, %v14942_v29  ;;  %v14962_v29 = vld [vmem:[#allocation2 + $0x172] sm:$0xff]  ;;  %vm16698_vm8 = vmmov %vm16601_vm0 }
 0x628   : > { %10809 = vmatmul.mubr.msk.f32.gmra.mrb[26].mxu1 %vm16683_vm9, %v14946_v33  ;;  %vm16699_vm9 = vmmov %vm16601_vm0 }
 0x629   : > { %10811 = vmatprep.mubr.msk.f32.mxu1 %vm16685_vm4, %v14950_v63  ;;  %v9479_v63 = vld [vmem:[%s15815_s3 + $0x14] sm:$0xf]  ;;  %vm16700_vm4 = vmmov %vm16601_vm0 }
 0x62c   : > { %10812 = vmatmul.mubr.msk.f32.gmra.mrb[28].mxu1 %vm16686_vm1, %v14954_v38  ;;  %vm16701_vm1 = vmmov %vm16601_vm0 }
 0x62d   : > { %10814 = vmatprep.mubr.msk.f32.mxu1 %vm16687_vm5, %v14958_v3  ;;  %vm16702_vm5 = vmmov %vm16601_vm0 }
 0x630   : > { %10815 = vmatmul.mubr.msk.f32.gmra.mrb[30].mxu1 %vm16601_vm0, %v14962_v29 }
 0x631   : > { %10819 = vmatprep.mubr.msk.f32.mxu1 %vm16688_vm2, %v14711_v12  ;;  %vm16703_vm2 = vmmov %vm16601_vm0  ;;  %v15032_v12 = vld [vmem:[#allocation2 + $0x180] sm:$0xff] }
 0x634   : > { %10820 = vmatmul.mubr.msk.f32.vlgmr.msra.gmra.mrb[0].mxu1 %vm16689_vm10, %v14719_v10  ;;  %vm16704_vm10 = vmmov %vm16601_vm0  ;;  %v15036_v10 = vld [vmem:[#allocation2 + $0x188] sm:$0xff] }
 0x635   : > { %10868 = vmatpush3.msk.msra.mxu1 %vm16690_vm11, %v14839_v62  ;;  %10822 = vmatprep.mubr.msk.f32.mxu1 %vm16691_vm12, %v14723_v51  ;;  %vm16705_vm11 = vmmov %vm16601_vm0  ;;  %v9513_v62 = vld [vmem:[%s15815_s3 + $0x18] sm:$0xf] }
 0x636   : > { %10917 = vmatprep.subr.msk.mxu1 %vm16692_vm13, %v9479_v63  ;;  %vm16706_vm12 = vmmov %vm16601_vm0 }
 0x637   : > { %vm16707_vm13 = vmmov %vm16601_vm0 }
 0x638   : > { %10823 = vmatmul.mubr.msk.f32.gmra.mrb[2].mxu1 %vm16693_vm14, %v14727_v41  ;;  %vm16708_vm14 = vmmov %vm16601_vm0 }
 0x639   : > { %10825 = vmatprep.mubr.msk.f32.mxu1 %vm16694_vm15, %v14731_v31  ;;  %vm16709_vm15 = vmmov %vm16601_vm0 }
 0x63c   : > { %10826 = vmatmul.mubr.msk.f32.gmra.mrb[4].mxu1 %vm16695_vm3, %v14735_v46  ;;  %vm16710_vm3 = vmmov %vm16601_vm0 }
 0x63d   : > { %10828 = vmatprep.mubr.msk.f32.mxu1 %vm16696_vm6, %v14739_v8  ;;  %vm16711_vm6 = vmmov %vm16601_vm0 }
 0x640   : > { %10829 = vmatmul.mubr.msk.f32.gmra.mrb[6].mxu1 %vm16697_vm7, %v14743_v39  ;;  %vm16712_vm7 = vmmov %vm16601_vm0 }
 0x641   : > { %10831 = vmatprep.mubr.msk.f32.mxu1 %vm16698_vm8, %v14747_v20  ;;  %vm16713_vm8 = vmmov %vm16601_vm0 }
 0x644   : > { %10832 = vmatmul.mubr.msk.f32.gmra.mrb[8].mxu1 %vm16699_vm9, %v14751_v0  ;;  %vm16714_vm9 = vmmov %vm16601_vm0 }
 0x645   : > { %10834 = vmatprep.mubr.msk.f32.mxu1 %vm16700_vm4, %v14755_v55  ;;  %vm16715_vm4 = vmmov %vm16601_vm0 }
 0x648   : > { %10835 = vmatmul.mubr.msk.f32.gmra.mrb[10].mxu1 %vm16701_vm1, %v14759_v21  ;;  %vm16716_vm1 = vmmov %vm16601_vm0 }
 0x649   : > { %10837 = vmatprep.mubr.msk.f32.mxu1 %vm16702_vm5, %v14763_v53  ;;  %vm16717_vm5 = vmmov %vm16601_vm0 }
 0x64c   : > { %10838 = vmatmul.mubr.msk.f32.gmra.mrb[12].mxu1 %vm16601_vm0, %v14767_v4 }
 0x64d   : > { %10840 = vmatprep.mubr.msk.f32.mxu1 %vm16703_vm2, %v14771_v54  ;;  %vm16718_vm2 = vmmov %vm16601_vm0 }
 0x650   : > { %10841 = vmatmul.mubr.msk.f32.gmra.mrb[14].mxu1 %vm16704_vm10, %v14775_v2  ;;  %vm16719_vm10 = vmmov %vm16601_vm0 }
 0x651   : > { %10843 = vmatprep.mubr.msk.f32.mxu1 %vm16705_vm11, %v14779_v36  ;;  %vm16720_vm11 = vmmov %vm16601_vm0 }
 0x654   : > { %10844 = vmatmul.mubr.msk.f32.gmra.mrb[16].mxu1 %vm16706_vm12, %v14783_v58  ;;  %vm16721_vm12 = vmmov %vm16601_vm0 }
 0x655   : > { %10846 = vmatprep.mubr.msk.f32.mxu1 %vm16707_vm13, %v14787_v52  ;;  %vm16722_vm13 = vcmask 1043456  }
 0x658   : > { %10847 = vmatmul.mubr.msk.f32.gmra.mrb[18].mxu1 %vm16708_vm14, %v14791_v25  ;;  %vm16723_vm14 = vmmov %vm16601_vm0 }
 0x659   : > { %10849 = vmatprep.mubr.msk.f32.mxu1 %vm16709_vm15, %v14795_v32  ;;  %vm16724_vm15 = vmmov %vm16722_vm13 }
 0x65c   : > { %10850 = vmatmul.mubr.msk.f32.gmra.mrb[20].mxu1 %vm16710_vm3, %v14799_v28  ;;  %vm16725_vm3 = vmmov %vm16601_vm0 }
 0x65d   : > { %10852 = vmatprep.mubr.msk.f32.mxu1 %vm16711_vm6, %v14803_v49  ;;  %vm16726_vm6 = vmmov %vm16601_vm0 }
 0x660   : > { %10853 = vmatmul.mubr.msk.f32.gmra.mrb[22].mxu1 %vm16712_vm7, %v14807_v27  ;;  %vm16727_vm7 = vmmov %vm16601_vm0 }
 0x661   : > { %10855 = vmatprep.mubr.msk.f32.mxu1 %vm16713_vm8, %v14811_v37  ;;  %vm16728_vm8 = vmmov %vm16601_vm0 }
 0x664   : > { %10856 = vmatmul.mubr.msk.f32.gmra.mrb[24].mxu1 %vm16714_vm9, %v14815_v47  ;;  %vm16729_vm9 = vmmov %vm16601_vm0 }
 0x665   : > { %10858 = vmatprep.mubr.msk.f32.mxu1 %vm16715_vm4, %v14819_v24  ;;  %vm16730_vm4 = vmmov %vm16601_vm0 }
 0x668   : > { %10859 = vmatmul.mubr.msk.f32.gmra.mrb[26].mxu1 %vm16716_vm1, %v14823_v45  ;;  %vm16731_vm1 = vmmov %vm16601_vm0 }
 0x669   : > { %10861 = vmatprep.mubr.msk.f32.mxu1 %vm16717_vm5, %v14827_v23  ;;  %vm16732_vm5 = vmmov %vm16601_vm0 }
 0x66c   : > { %10862 = vmatmul.mubr.msk.f32.gmra.mrb[28].mxu1 %vm16601_vm0, %v14831_v50 }
 0x66d   : > { %10864 = vmatprep.mubr.msk.f32.mxu1 %vm16718_vm2, %v15032_v12  ;;  %vm16733_vm2 = vmmov %vm16601_vm0 }
 0x670   : > { %10865 = vmatmul.mubr.msk.f32.gmra.mrb[30].mxu1 %vm16719_vm10, %v15036_v10  ;;  %vm16734_vm10 = vmmov %vm16601_vm0 }
 0x671   : > { %10869 = vmatprep.mubr.msk.f32.mxu1 %vm16720_vm11, %v14544_v5  ;;  %vm16735_vm11 = vmmov %vm16601_vm0  ;;  %v16748_v5 = vld [vmem:[#allocation131_spill] sm:$0xff] }
 0x674   : > { %10870 = vmatmul.mubr.msk.f32.vlgmr.msra.gmra.mrb[0].mxu1 %vm16721_vm12, %v14554_v30  ;;  %vm16736_vm12 = vmmov %vm16601_vm0  ;;  %v16750_v30 = vld [vmem:[#allocation132_spill] sm:$0xff] }
 0x675   : > { %10918 = vmatpush3.msk.msra.mxu1 %vm16722_vm13, %v9479_v63  ;;  %10872 = vmatprep.mubr.msk.f32.mxu1 %vm16723_vm14, %v14558_v9  ;;  %vm16737_vm13 = vmmov %vm16601_vm0  ;;  %v15105_v9 = vld [vmem:[#allocation2 + $0x181] sm:$0xff] }
 0x676   : > { %10967 = vmatprep.subr.msk.mxu1 %vm16724_vm15, %v9513_v62  ;;  %vm16738_vm14 = vmmov %vm16601_vm0  ;;  %v16801_v63 = vld [vmem:[#allocation107_spill] sm:$0xff] }
 0x677   : > { %vm16739_vm15 = vmmov %vm16601_vm0 }
 0x678   : > { %10873 = vmatmul.mubr.msk.f32.gmra.mrb[2].mxu1 %vm16725_vm3, %v14562_v57  ;;  %vm16740_vm3 = vmmov %vm16601_vm0  ;;  %v15109_v57 = vld [vmem:[#allocation2 + $0x189] sm:$0xff] }
 0x679   : > { %10875 = vmatprep.mubr.msk.f32.mxu1 %vm16726_vm6, %v14566_v60  ;;  %vm16741_vm6 = vmmov %vm16601_vm0  ;;  %v16754_v60 = vld [vmem:[#allocation148_spill] sm:$0xff] }
 0x67c   : > { %10876 = vmatmul.mubr.msk.f32.gmra.mrb[4].mxu1 %vm16727_vm7, %v14572_v59  ;;  %vm16742_vm7 = vmmov %vm16601_vm0  ;;  %v9547_v59 = vld [vmem:[%s15815_s3 + $0x1c] sm:$0xf] }
 0x67d   : > { %10878 = vmatprep.mubr.msk.f32.mxu1 %vm16728_vm8, %v14578_v22  ;;  %vm16743_vm8 = vmmov %vm16601_vm0  ;;  %v16756_v22 = vld [vmem:[#allocation150_spill] sm:$0xff] }
 0x680   : > { %10879 = vmatmul.mubr.msk.f32.gmra.mrb[6].mxu1 %vm16729_vm9, %v14586_v42  ;;  %vm16744_vm9 = vmmov %vm16601_vm0  ;;  %v16759_v42 = vld [vmem:[#allocation152_spill] sm:$0xff] }
 0x681   : > { %10881 = vmatprep.mubr.msk.f32.mxu1 %vm16730_vm4, %v14592_v40  ;;  %vm16745_vm4 = vmmov %vm16601_vm0  ;;  %v16762_v40 = vld [vmem:[#allocation101_spill] sm:$0xff] }
 0x684   : > { %10882 = vmatmul.mubr.msk.f32.gmra.mrb[8].mxu1 %vm16731_vm1, %v14599_v17  ;;  %vm16746_vm1 = vmmov %vm16601_vm0  ;;  %v16764_v17 = vld [vmem:[#allocation102_spill] sm:$0xff] }
 0x685   : > { %10884 = vmatprep.mubr.msk.f32.mxu1 %vm16732_vm5, %v14604_v43  ;;  %vm16747_vm5 = vmmov %vm16601_vm0  ;;  %v16766_v43 = vld [vmem:[#allocation123_spill] sm:$0xff] }
 0x688   : > { %10885 = vmatmul.mubr.msk.f32.gmra.mrb[10].mxu1 %vm16601_vm0, %v14609_v26  ;;  %v16768_v26 = vld [vmem:[#allocation124_spill] sm:$0xff] }
 0x689   : > { %10887 = vmatprep.mubr.msk.f32.mxu1 %vm16733_vm2, %v14614_v16  ;;  %vm16749_vm2 = vmmov %vm16601_vm0  ;;  %v16770_v16 = vld [vmem:[#allocation125_spill] sm:$0xff] }
 0x68c   : > { %10888 = vmatmul.mubr.msk.f32.gmra.mrb[12].mxu1 %vm16734_vm10, %v14621_v18  ;;  %vm16751_vm10 = vmmov %vm16601_vm0  ;;  %v16772_v18 = vld [vmem:[#allocation137_spill] sm:$0xff] }
 0x68d   : > { %10890 = vmatprep.mubr.msk.f32.mxu1 %vm16735_vm11, %v14626_v61  ;;  %vm16752_vm11 = vmmov %vm16601_vm0  ;;  %v16774_v61 = vld [vmem:[#allocation140_spill] sm:$0xff] }
 0x690   : > { %10891 = vmatmul.mubr.msk.f32.gmra.mrb[14].mxu1 %vm16736_vm12, %v14634_v35  ;;  %vm16753_vm12 = vmmov %vm16601_vm0  ;;  %v16775_v35 = vld [vmem:[#allocation141_spill] sm:$0xff] }
 0x691   : > { %10893 = vmatprep.mubr.msk.f32.mxu1 %vm16737_vm13, %v14639_v34  ;;  %vm16755_vm13 = vmmov %vm16601_vm0  ;;  %v16777_v34 = vld [vmem:[#allocation142_spill] sm:$0xff] }
 0x694   : > { %10894 = vmatmul.mubr.msk.f32.gmra.mrb[16].mxu1 %vm16738_vm14, %v14646_v15  ;;  %vm16757_vm14 = vmmov %vm16601_vm0  ;;  %v16779_v15 = vld [vmem:[#allocation143_spill] sm:$0xff] }
 0x695   : > { %10896 = vmatprep.mubr.msk.f32.mxu1 %vm16739_vm15, %v14651_v48  ;;  %vm16758_vm15 = vcmask 1043456   ;;  %v16781_v48 = vld [vmem:[#allocation146_spill] sm:$0xff] }
 0x698   : > { %10897 = vmatmul.mubr.msk.f32.gmra.mrb[18].mxu1 %vm16740_vm3, %v14657_v1  ;;  %vm16760_vm3 = vmmov %vm16601_vm0  ;;  %v16783_v1 = vld [vmem:[#allocation149_spill] sm:$0xff] }
 0x699   : > { %10899 = vmatprep.mubr.msk.f32.mxu1 %vm16741_vm6, %v14661_v56  ;;  %vm16761_vm6 = vmmov %vm16758_vm15  ;;  %v16785_v56 = vld [vmem:[#allocation151_spill] sm:$0xff] }
 0x69c   : > { %10900 = vmatmul.mubr.msk.f32.gmra.mrb[20].mxu1 %vm16742_vm7, %v14667_v14  ;;  %vm16763_vm7 = vmmov %vm16601_vm0  ;;  %v16787_v14 = vld [vmem:[#allocation153_spill] sm:$0xff] }
 0x69d   : > { %10902 = vmatprep.mubr.msk.f32.mxu1 %vm16743_vm8, %v14671_v44  ;;  %vm16765_vm8 = vmmov %vm16601_vm0  ;;  %v16789_v44 = vld [vmem:[#allocation155_spill] sm:$0xff] }
 0x6a0   : > { %10903 = vmatmul.mubr.msk.f32.gmra.mrb[22].mxu1 %vm16744_vm9, %v14675_v13  ;;  %vm16767_vm9 = vmmov %vm16601_vm0  ;;  %v16791_v13 = vld [vmem:[#allocation156_spill] sm:$0xff] }
 0x6a1   : > { %10905 = vmatprep.mubr.msk.f32.mxu1 %vm16745_vm4, %v14679_v6  ;;  %vm16769_vm4 = vmmov %vm16601_vm0  ;;  %v16793_v6 = vld [vmem:[#allocation103_spill] sm:$0xff] }
 0x6a4   : > { %10906 = vmatmul.mubr.msk.f32.gmra.mrb[24].mxu1 %vm16746_vm1, %v14683_v19  ;;  %vm16771_vm1 = vmmov %vm16601_vm0  ;;  %v16795_v19 = vld [vmem:[#allocation104_spill] sm:$0xff] }
 0x6a5   : > { %10908 = vmatprep.mubr.msk.f32.mxu1 %vm16747_vm5, %v14687_v7  ;;  %vm16773_vm5 = vmmov %vm16601_vm0  ;;  %v16797_v7 = vld [vmem:[#allocation105_spill] sm:$0xff] }
 0x6a8   : > { %10909 = vmatmul.mubr.msk.f32.gmra.mrb[26].mxu1 %vm16601_vm0, %v14692_v11  ;;  %v16799_v11 = vld [vmem:[#allocation106_spill] sm:$0xff] }
 0x6a9   : > { %10911 = vmatprep.mubr.msk.f32.mxu1 %vm16749_vm2, %v16748_v5  ;;  %vm16776_vm2 = vmmov %vm16601_vm0  ;;  %v16805_v5 = vld [vmem:[#allocation129_spill] sm:$0xff] }
 0x6ac   : > { %10912 = vmatmul.mubr.msk.f32.gmra.mrb[28].mxu1 %vm16751_vm10, %v16750_v30  ;;  %vm16778_vm10 = vmmov %vm16601_vm0  ;;  %v15178_v30 = vld [vmem:[#allocation2 + $0x182] sm:$0xff] }
 0x6ad   : > { %10914 = vmatprep.mubr.msk.f32.mxu1 %vm16752_vm11, %v15105_v9  ;;  %vm16780_vm11 = vmmov %vm16601_vm0 }
 0x6b0   : > { %10915 = vmatmul.mubr.msk.f32.gmra.mrb[30].mxu1 %vm16753_vm12, %v15109_v57  ;;  %vm16782_vm12 = vmmov %vm16601_vm0 }
 0x6b1   : > { %10919 = vmatprep.mubr.msk.f32.mxu1 %vm16755_vm13, %v16754_v60  ;;  %vm16784_vm13 = vmmov %vm16601_vm0  ;;  %v15182_v60 = vld [vmem:[#allocation2 + $0x18a] sm:$0xff] }
 0x6b4   : > { %10920 = vmatmul.mubr.msk.f32.vlgmr.msra.gmra.mrb[0].mxu1 %vm16757_vm14, %v16756_v22  ;;  %vm16786_vm14 = vmmov %vm16601_vm0  ;;  %v9581_v22 = vld [vmem:[%s15815_s3 + $0x20] sm:$0xf] }
 0x6b5   : > { %10968 = vmatpush3.msk.msra.mxu1 %vm16758_vm15, %v9513_v62  ;;  %10922 = vmatprep.mubr.msk.f32.mxu1 %vm16760_vm3, %v16759_v42  ;;  %vm16788_vm15 = vmmov %vm16601_vm0  ;;  %v16803_v62 = vld [vmem:[#allocation128_spill] sm:$0xff] }
 0x6b6   : > { %11017 = vmatprep.subr.msk.mxu1 %vm16761_vm6, %v9547_v59  ;;  %vm16790_vm3 = vmmov %vm16601_vm0 }
 0x6b7   : > { %vm16792_vm6 = vmmov %vm16601_vm0 }
 0x6b8   : > { %10923 = vmatmul.mubr.msk.f32.gmra.mrb[2].mxu1 %vm16763_vm7, %v16762_v40  ;;  %vm16794_vm7 = vmmov %vm16601_vm0 }
 0x6b9   : > { %10925 = vmatprep.mubr.msk.f32.mxu1 %vm16765_vm8, %v16764_v17  ;;  %vm16796_vm8 = vmmov %vm16601_vm0 }
 0x6bc   : > { %10926 = vmatmul.mubr.msk.f32.gmra.mrb[4].mxu1 %vm16767_vm9, %v16766_v43  ;;  %vm16798_vm9 = vmmov %vm16601_vm0 }
 0x6bd   : > { %10928 = vmatprep.mubr.msk.f32.mxu1 %vm16769_vm4, %v16768_v26  ;;  %vm16800_vm4 = vmmov %vm16601_vm0 }
 0x6c0   : > { %10929 = vmatmul.mubr.msk.f32.gmra.mrb[6].mxu1 %vm16771_vm1, %v16770_v16  ;;  %vm16802_vm1 = vmmov %vm16601_vm0 }
 0x6c1   : > { %10931 = vmatprep.mubr.msk.f32.mxu1 %vm16773_vm5, %v16772_v18  ;;  %vm16804_vm5 = vmmov %vm16601_vm0 }
 0x6c4   : > { %10932 = vmatmul.mubr.msk.f32.gmra.mrb[8].mxu1 %vm16601_vm0, %v16774_v61 }
 0x6c5   : > { %10934 = vmatprep.mubr.msk.f32.mxu1 %vm16776_vm2, %v16775_v35  ;;  %vm16806_vm2 = vmmov %vm16601_vm0 }
 0x6c8   : > { %10935 = vmatmul.mubr.msk.f32.gmra.mrb[10].mxu1 %vm16778_vm10, %v16777_v34  ;;  %vm16807_vm10 = vmmov %vm16601_vm0 }
 0x6c9   : > { %10937 = vmatprep.mubr.msk.f32.mxu1 %vm16780_vm11, %v16779_v15  ;;  %vm16808_vm11 = vmmov %vm16601_vm0 }
 0x6cc   : > { %10938 = vmatmul.mubr.msk.f32.gmra.mrb[12].mxu1 %vm16782_vm12, %v16781_v48  ;;  %vm16809_vm12 = vmmov %vm16601_vm0 }
 0x6cd   : > { %10940 = vmatprep.mubr.msk.f32.mxu1 %vm16784_vm13, %v16783_v1  ;;  %vm16810_vm13 = vmmov %vm16601_vm0 }
 0x6d0   : > { %10941 = vmatmul.mubr.msk.f32.gmra.mrb[14].mxu1 %vm16786_vm14, %v16785_v56  ;;  %vm16811_vm14 = vmmov %vm16601_vm0 }
 0x6d1   : > { %10943 = vmatprep.mubr.msk.f32.mxu1 %vm16788_vm15, %v16787_v14  ;;  %vm16812_vm15 = vmmov %vm16601_vm0 }
 0x6d4   : > { %10944 = vmatmul.mubr.msk.f32.gmra.mrb[16].mxu1 %vm16790_vm3, %v16789_v44  ;;  %vm16813_vm3 = vmmov %vm16601_vm0 }
 0x6d5   : > { %10946 = vmatprep.mubr.msk.f32.mxu1 %vm16792_vm6, %v16791_v13  ;;  %vm16814_vm6 = vcmask 1043456  }
 0x6d8   : > { %10947 = vmatmul.mubr.msk.f32.gmra.mrb[18].mxu1 %vm16794_vm7, %v16793_v6  ;;  %vm16815_vm7 = vmmov %vm16601_vm0 }
 0x6d9   : > { %10949 = vmatprep.mubr.msk.f32.mxu1 %vm16796_vm8, %v16795_v19  ;;  %vm16816_vm8 = vmmov %vm16814_vm6 }
 0x6dc   : > { %10950 = vmatmul.mubr.msk.f32.gmra.mrb[20].mxu1 %vm16798_vm9, %v16797_v7  ;;  %vm16817_vm9 = vmmov %vm16601_vm0 }
 0x6dd   : > { %10952 = vmatprep.mubr.msk.f32.mxu1 %vm16800_vm4, %v16799_v11  ;;  %vm16818_vm4 = vmmov %vm16601_vm0 }
 0x6e0   : > { %10953 = vmatmul.mubr.msk.f32.gmra.mrb[22].mxu1 %vm16802_vm1, %v16801_v63  ;;  %vm16819_vm1 = vmmov %vm16601_vm0 }
 0x6e1   : > { %10955 = vmatprep.mubr.msk.f32.mxu1 %vm16804_vm5, %v16803_v62  ;;  %vm16820_vm5 = vmmov %vm16601_vm0 }
 0x6e4   : > { %10956 = vmatmul.mubr.msk.f32.gmra.mrb[24].mxu1 %vm16601_vm0, %v14946_v33 }
 0x6e5   : > { %10958 = vmatprep.mubr.msk.f32.mxu1 %vm16806_vm2, %v16805_v5  ;;  %vm16821_vm2 = vmmov %vm16601_vm0 }
 0x6e8   : > { %10959 = vmatmul.mubr.msk.f32.gmra.mrb[26].mxu1 %vm16807_vm10, %v14954_v38  ;;  %vm16822_vm10 = vmmov %vm16601_vm0 }
 0x6e9   : > { %10961 = vmatprep.mubr.msk.f32.mxu1 %vm16808_vm11, %v14958_v3  ;;  %vm16823_vm11 = vmmov %vm16601_vm0 }
 0x6ec   : > { %10962 = vmatmul.mubr.msk.f32.gmra.mrb[28].mxu1 %vm16809_vm12, %v14962_v29  ;;  %vm16824_vm12 = vmmov %vm16601_vm0 }
 0x6ed   : > { %10964 = vmatprep.mubr.msk.f32.mxu1 %vm16810_vm13, %v15178_v30  ;;  %vm16825_vm13 = vmmov %vm16601_vm0 }
 0x6f0   : > { %10965 = vmatmul.mubr.msk.f32.gmra.mrb[30].mxu1 %vm16811_vm14, %v15182_v60  ;;  %vm16826_vm14 = vmmov %vm16601_vm0 }
 0x6f1   : > { %10969 = vmatprep.mubr.msk.f32.mxu1 %vm16812_vm15, %v14723_v51  ;;  %vm16827_vm15 = vmmov %vm16601_vm0  ;;  %v7405_v51 = vld [vmem:[#allocation2 + $0x198] sm:$0xff] }
 0x6f4   : > { %10970 = vmatmul.mubr.msk.f32.vlgmr.msra.gmra.mrb[0].mxu1 %vm16813_vm3, %v14727_v41  ;;  %vm16828_vm3 = vmmov %vm16601_vm0  ;;  %v7406_v41 = vld [vmem:[#allocation2 + $0x1a0] sm:$0xff] }
 0x6f5   : > { %11018 = vmatpush3.msk.msra.mxu1 %vm16814_vm6, %v9547_v59  ;;  %10972 = vmatprep.mubr.msk.f32.mxu1 %vm16815_vm7, %v14731_v31  ;;  %vm16829_vm6 = vmmov %vm16601_vm0  ;;  %v7765_v31 = vld [vmem:[#allocation2 + $0x31] sm:$0xff]  ;;  %v7795_v59 = vld [vmem:[#allocation2 + $0x199] sm:$0xff] }
 0x6f6   : > { %11067 = vmatprep.subr.msk.mxu1 %vm16816_vm8, %v9581_v22  ;;  %vm16830_vm7 = vmmov %vm16601_vm0 }
 0x6f7   : > { %vm16831_vm8 = vmmov %vm16601_vm0 }
 0x6f8   : > { %10973 = vmatmul.mubr.msk.f32.gmra.mrb[2].mxu1 %vm16817_vm9, %v14735_v46  ;;  %vm16832_vm9 = vmmov %vm16601_vm0  ;;  %v7766_v46 = vld [vmem:[#allocation2 + $0x39] sm:$0xff] }
 0x6f9   : > { %10975 = vmatprep.mubr.msk.f32.mxu1 %vm16818_vm4, %v14739_v8  ;;  %vm16833_vm4 = vmmov %vm16601_vm0  ;;  %v7767_v8 = vld [vmem:[#allocation2 + $0x49] sm:$0xff] }
 0x6fc   : > { %10976 = vmatmul.mubr.msk.f32.gmra.mrb[4].mxu1 %vm16819_vm1, %v14743_v39  ;;  %vm16834_vm1 = vmmov %vm16601_vm0  ;;  %v7768_v39 = vld [vmem:[#allocation2 + $0x51] sm:$0xff] }
 0x6fd   : > { %10978 = vmatprep.mubr.msk.f32.mxu1 %vm16820_vm5, %v14747_v20  ;;  %vm16835_vm5 = vmmov %vm16601_vm0  ;;  %v7769_v20 = vld [vmem:[#allocation2 + $0x61] sm:$0xff] }
 0x700   : > { %10979 = vmatmul.mubr.msk.f32.gmra.mrb[6].mxu1 %vm16601_vm0, %v14751_v0  ;;  %v7770_v0 = vld [vmem:[#allocation2 + $0x69] sm:$0xff] }
 0x701   : > { %10981 = vmatprep.mubr.msk.f32.mxu1 %vm16821_vm2, %v14755_v55  ;;  %vm16836_vm2 = vmmov %vm16601_vm0  ;;  %v7771_v55 = vld [vmem:[#allocation2 + $0x79] sm:$0xff] }
 0x704   : > { %10982 = vmatmul.mubr.msk.f32.gmra.mrb[8].mxu1 %vm16822_vm10, %v14759_v21  ;;  %vm16837_vm10 = vmmov %vm16601_vm0  ;;  %v7772_v21 = vld [vmem:[#allocation2 + $0x81] sm:$0xff] }
 0x705   : > { %10984 = vmatprep.mubr.msk.f32.mxu1 %vm16823_vm11, %v14763_v53  ;;  %vm16838_vm11 = vmmov %vm16601_vm0  ;;  %v7773_v53 = vld [vmem:[#allocation2 + $0x91] sm:$0xff] }
 0x708   : > { %10985 = vmatmul.mubr.msk.f32.gmra.mrb[10].mxu1 %vm16824_vm12, %v14767_v4  ;;  %vm16839_vm12 = vmmov %vm16601_vm0  ;;  %v7774_v4 = vld [vmem:[#allocation2 + $0x99] sm:$0xff] }
 0x709   : > { %10987 = vmatprep.mubr.msk.f32.mxu1 %vm16825_vm13, %v14771_v54  ;;  %vm16840_vm13 = vmmov %vm16601_vm0  ;;  %v7775_v54 = vld [vmem:[#allocation2 + $0xa9] sm:$0xff] }
 0x70c   : > { %10988 = vmatmul.mubr.msk.f32.gmra.mrb[12].mxu1 %vm16826_vm14, %v14775_v2  ;;  %vm16841_vm14 = vmmov %vm16601_vm0  ;;  %v7776_v2 = vld [vmem:[#allocation2 + $0xb1] sm:$0xff] }
 0x70d   : > { %10990 = vmatprep.mubr.msk.f32.mxu1 %vm16827_vm15, %v14779_v36  ;;  %vm16842_vm15 = vmmov %vm16601_vm0  ;;  %v7777_v36 = vld [vmem:[#allocation2 + $0xc1] sm:$0xff] }
 0x710   : > { %10991 = vmatmul.mubr.msk.f32.gmra.mrb[14].mxu1 %vm16828_vm3, %v14783_v58  ;;  %vm16843_vm3 = vmmov %vm16601_vm0  ;;  %v7778_v58 = vld [vmem:[#allocation2 + $0xc9] sm:$0xff] }
 0x711   : > { %10993 = vmatprep.mubr.msk.f32.mxu1 %vm16829_vm6, %v14787_v52  ;;  %vm16844_vm6 = vmmov %vm16601_vm0  ;;  %v7779_v52 = vld [vmem:[#allocation2 + $0xd9] sm:$0xff] }
 0x714   : > { %10994 = vmatmul.mubr.msk.f32.gmra.mrb[16].mxu1 %vm16830_vm7, %v14791_v25  ;;  %vm16845_vm7 = vmmov %vm16601_vm0  ;;  %v7780_v25 = vld [vmem:[#allocation2 + $0xe1] sm:$0xff] }
 0x715   : > { %10996 = vmatprep.mubr.msk.f32.mxu1 %vm16831_vm8, %v14795_v32  ;;  %vm16846_vm8 = vcmask 1043456   ;;  %v7781_v32 = vld [vmem:[#allocation2 + $0xf1] sm:$0xff] }
 0x718   : > { %10997 = vmatmul.mubr.msk.f32.gmra.mrb[18].mxu1 %vm16832_vm9, %v14799_v28  ;;  %vm16847_vm9 = vmmov %vm16601_vm0  ;;  %v7782_v28 = vld [vmem:[#allocation2 + $0xf9] sm:$0xff] }
 0x719   : > { %10999 = vmatprep.mubr.msk.f32.mxu1 %vm16833_vm4, %v14803_v49  ;;  %vm16848_vm4 = vmmov %vm16601_vm0  ;;  %v7783_v49 = vld [vmem:[#allocation2 + $0x109] sm:$0xff] }
 0x71c   : > { %11000 = vmatmul.mubr.msk.f32.gmra.mrb[20].mxu1 %vm16834_vm1, %v14807_v27  ;;  %vm16849_vm1 = vmmov %vm16601_vm0  ;;  %v7784_v27 = vld [vmem:[#allocation2 + $0x111] sm:$0xff] }
 0x71d   : > { %11002 = vmatprep.mubr.msk.f32.mxu1 %vm16835_vm5, %v14811_v37  ;;  %vm16850_vm5 = vmmov %vm16601_vm0  ;;  %v7785_v37 = vld [vmem:[#allocation2 + $0x121] sm:$0xff] }
 0x720   : > { %11003 = vmatmul.mubr.msk.f32.gmra.mrb[22].mxu1 %vm16601_vm0, %v14815_v47  ;;  %v7786_v47 = vld [vmem:[#allocation2 + $0x129] sm:$0xff] }
 0x721   : > { %11005 = vmatprep.mubr.msk.f32.mxu1 %vm16836_vm2, %v14819_v24  ;;  %vm16851_vm2 = vmmov %vm16601_vm0  ;;  %v7787_v24 = vld [vmem:[#allocation2 + $0x139] sm:$0xff] }
 0x724   : > { %11006 = vmatmul.mubr.msk.f32.gmra.mrb[24].mxu1 %vm16837_vm10, %v14823_v45  ;;  %vm16852_vm10 = vmmov %vm16601_vm0  ;;  %v7788_v45 = vld [vmem:[#allocation2 + $0x141] sm:$0xff] }
 0x725   : > { %11008 = vmatprep.mubr.msk.f32.mxu1 %vm16838_vm11, %v14827_v23  ;;  %vm16853_vm11 = vmmov %vm16601_vm0  ;;  %v7789_v23 = vld [vmem:[#allocation2 + $0x151] sm:$0xff] }
 0x728   : > { %11009 = vmatmul.mubr.msk.f32.gmra.mrb[26].mxu1 %vm16839_vm12, %v14831_v50  ;;  %vm16854_vm12 = vmmov %vm16601_vm0  ;;  %v7790_v50 = vld [vmem:[#allocation2 + $0x159] sm:$0xff] }
 0x729   : > { %11011 = vmatprep.mubr.msk.f32.mxu1 %vm16840_vm13, %v15032_v12  ;;  %vm16855_vm13 = vmmov %vm16601_vm0  ;;  %v7791_v12 = vld [vmem:[#allocation2 + $0x169] sm:$0xff] }
 0x72c   : > { %11012 = vmatmul.mubr.msk.f32.gmra.mrb[28].mxu1 %vm16841_vm14, %v15036_v10  ;;  %vm16856_vm14 = vmmov %vm16601_vm0  ;;  %v7792_v10 = vld [vmem:[#allocation2 + $0x171] sm:$0xff] }
 0x72d   : > { %11014 = vmatprep.mubr.msk.f32.mxu1 %vm16842_vm15, %v7405_v51  ;;  %vm16857_vm15 = vmmov %vm16601_vm0 }
 0x730   : > { %11015 = vmatmul.mubr.msk.f32.gmra.mrb[30].mxu1 %vm16843_vm3, %v7406_v41  ;;  %vm16858_vm3 = vmmov %vm16601_vm0 }
 0x731   : > { %11019 = vmatprep.mubr.msk.f32.mxu1 %vm16844_vm6, %v7765_v31  ;;  %vm16859_vm6 = vmmov %vm16601_vm0 }
 0x734   : > { %11020 = vmatmul.mubr.msk.f32.vlgmr.msra.gmra.mrb[0].mxu1 %vm16845_vm7, %v7766_v46  ;;  %vm16860_vm7 = vmmov %vm16601_vm0 }
 0x735   : > { %11068 = vmatpush3.msk.msra.mxu1 %vm16846_vm8, %v9581_v22  ;;  %11022 = vmatprep.mubr.msk.f32.mxu1 %vm16847_vm9, %v7767_v8  ;;  %vm16861_vm8 = vmmov %vm16601_vm0  ;;  %v7796_v22 = vld [vmem:[#allocation2 + $0x1a1] sm:$0xff] }
 0x736   : > { %vm16862_vm9 = vmmov %vm16601_vm0 }
 0x738   : > { %11023 = vmatmul.mubr.msk.f32.gmra.mrb[2].mxu1 %vm16848_vm4, %v7768_v39  ;;  %vm16863_vm4 = vmmov %vm16601_vm0 }
 0x739   : > { %11025 = vmatprep.mubr.msk.f32.mxu1 %vm16849_vm1, %v7769_v20  ;;  %vm16864_vm1 = vmmov %vm16601_vm0 }
 0x73c   : > { %11026 = vmatmul.mubr.msk.f32.gmra.mrb[4].mxu1 %vm16850_vm5, %v7770_v0  ;;  %vm16865_vm5 = vmmov %vm16601_vm0 }
 0x73d   : > { %11028 = vmatprep.mubr.msk.f32.mxu1 %vm16601_vm0, %v7771_v55 }
 0x740   : > { %11029 = vmatmul.mubr.msk.f32.gmra.mrb[6].mxu1 %vm16851_vm2, %v7772_v21  ;;  %vm16866_vm2 = vmmov %vm16601_vm0 }
 0x741   : > { %11031 = vmatprep.mubr.msk.f32.mxu1 %vm16852_vm10, %v7773_v53  ;;  %vm16867_vm10 = vmmov %vm16601_vm0 }
 0x744   : > { %11032 = vmatmul.mubr.msk.f32.gmra.mrb[8].mxu1 %vm16853_vm11, %v7774_v4  ;;  %vm16868_vm11 = vmmov %vm16601_vm0 }
 0x745   : > { %11034 = vmatprep.mubr.msk.f32.mxu1 %vm16854_vm12, %v7775_v54  ;;  %vm16869_vm12 = vmmov %vm16601_vm0 }
 0x748   : > { %11035 = vmatmul.mubr.msk.f32.gmra.mrb[10].mxu1 %vm16855_vm13, %v7776_v2  ;;  %vm16870_vm13 = vmmov %vm16601_vm0 }
 0x749   : > { %11037 = vmatprep.mubr.msk.f32.mxu1 %vm16856_vm14, %v7777_v36  ;;  %vm16871_vm14 = vmmov %vm16601_vm0 }
 0x74c   : > { %11038 = vmatmul.mubr.msk.f32.gmra.mrb[12].mxu1 %vm16857_vm15, %v7778_v58  ;;  %vm16872_vm15 = vmmov %vm16601_vm0 }
 0x74d   : > { %11040 = vmatprep.mubr.msk.f32.mxu1 %vm16858_vm3, %v7779_v52  ;;  %vm16873_vm3 = vmmov %vm16601_vm0 }
 0x750   : > { %11041 = vmatmul.mubr.msk.f32.gmra.mrb[14].mxu1 %vm16859_vm6, %v7780_v25  ;;  %vm16874_vm6 = vmmov %vm16601_vm0 }
 0x751   : > { %11043 = vmatprep.mubr.msk.f32.mxu1 %vm16860_vm7, %v7781_v32  ;;  %vm16875_vm7 = vmmov %vm16601_vm0 }
 0x754   : > { %11044 = vmatmul.mubr.msk.f32.gmra.mrb[16].mxu1 %vm16861_vm8, %v7782_v28  ;;  %vm16876_vm8 = vmmov %vm16601_vm0 }
 0x755   : > { %11046 = vmatprep.mubr.msk.f32.mxu1 %vm16862_vm9, %v7783_v49  ;;  %vm16877_vm9 = vmmov %vm16601_vm0 }
 0x758   : > { %11047 = vmatmul.mubr.msk.f32.gmra.mrb[18].mxu1 %vm16863_vm4, %v7784_v27  ;;  %vm16878_vm4 = vmmov %vm16601_vm0 }
 0x759   : > { %11049 = vmatprep.mubr.msk.f32.mxu1 %vm16864_vm1, %v7785_v37  ;;  %vm16879_vm1 = vmmov %vm16601_vm0 }
 0x75c   : > { %11050 = vmatmul.mubr.msk.f32.gmra.mrb[20].mxu1 %vm16865_vm5, %v7786_v47  ;;  %vm16880_vm5 = vmmov %vm16601_vm0 }
 0x75d   : > { %11052 = vmatprep.mubr.msk.f32.mxu1 %vm16601_vm0, %v7787_v24 }
 0x760   : > { %11053 = vmatmul.mubr.msk.f32.gmra.mrb[22].mxu1 %vm16866_vm2, %v7788_v45  ;;  %vm16881_vm2 = vmmov %vm16601_vm0 }
 0x761   : > { %11055 = vmatprep.mubr.msk.f32.mxu1 %vm16867_vm10, %v7789_v23  ;;  %vm16882_vm10 = vmmov %vm16601_vm0 }
 0x764   : > { %11056 = vmatmul.mubr.msk.f32.gmra.mrb[24].mxu1 %vm16868_vm11, %v7790_v50  ;;  %vm16883_vm11 = vmmov %vm16601_vm0 }
 0x765   : > { %11058 = vmatprep.mubr.msk.f32.mxu1 %vm16869_vm12, %v7791_v12  ;;  %vm16884_vm12 = vmmov %vm16601_vm0 }
 0x768   : > { %11059 = vmatmul.mubr.msk.f32.gmra.mrb[26].mxu1 %vm16870_vm13, %v7792_v10  ;;  %vm16885_vm13 = vmmov %vm16601_vm0 }
 0x769   : > { %11061 = vmatprep.mubr.msk.f32.mxu1 %vm16871_vm14, %v15105_v9  ;;  %vm16886_vm14 = vmmov %vm16601_vm0  ;;  %v8185_v9 = vld [vmem:[#allocation2 + $0x19a] sm:$0xff] }
 0x76c   : > { %11062 = vmatmul.mubr.msk.f32.gmra.mrb[28].mxu1 %vm16872_vm15, %v15109_v57  ;;  %vm16887_vm15 = vmmov %vm16601_vm0 }
 0x76d   : > { %11064 = vmatprep.mubr.msk.f32.mxu1 %vm16873_vm3, %v7795_v59  ;;  %vm16888_vm3 = vmmov %vm16601_vm0 }
 0x770   : > { %11065 = vmatmul.mubr.msk.f32.gmra.mrb[30].mxu1 %vm16874_vm6, %v7796_v22  ;;  %vm16889_vm6 = vmmov %vm16601_vm0 }
 0x771   : > { %11069 = vmatprep.mubr.msk.f32.mxu1 %vm16875_vm7, %v16759_v42  ;;  %vm16890_vm7 = vmmov %vm16601_vm0 }
 0x774   : > { %11070 = vmatmul.mubr.msk.f32.vlgmr.msra.gmra.mrb[0].mxu1 %vm16876_vm8, %v16762_v40  ;;  %vm16891_vm8 = vmmov %vm16601_vm0 }
 0x775   : > { %11072 = vmatprep.mubr.msk.f32.mxu1 %vm16877_vm9, %v16764_v17  ;;  %vm16892_vm9 = vmmov %vm16601_vm0 }
 0x778   : > { %11073 = vmatmul.mubr.msk.f32.gmra.mrb[2].mxu1 %vm16878_vm4, %v16766_v43  ;;  %vm16893_vm4 = vmmov %vm16601_vm0 }
 0x779   : > { %11075 = vmatprep.mubr.msk.f32.mxu1 %vm16879_vm1, %v16768_v26  ;;  %vm16894_vm1 = vmmov %vm16601_vm0 }
 0x77c   : > { %11076 = vmatmul.mubr.msk.f32.gmra.mrb[4].mxu1 %vm16880_vm5, %v16770_v16  ;;  %vm16895_vm5 = vmmov %vm16601_vm0 }
 0x77d   : > { %11078 = vmatprep.mubr.msk.f32.mxu1 %vm16601_vm0, %v16772_v18 }
 0x780   : > { %11079 = vmatmul.mubr.msk.f32.gmra.mrb[6].mxu1 %vm16881_vm2, %v16774_v61  ;;  %vm16896_vm2 = vmmov %vm16601_vm0 }
 0x781   : > { %11081 = vmatprep.mubr.msk.f32.mxu1 %vm16882_vm10, %v16775_v35  ;;  %vm16897_vm10 = vmmov %vm16601_vm0 }
 0x784   : > { %11082 = vmatmul.mubr.msk.f32.gmra.mrb[8].mxu1 %vm16883_vm11, %v16777_v34  ;;  %vm16898_vm11 = vmmov %vm16601_vm0 }
 0x785   : > { %11084 = vmatprep.mubr.msk.f32.mxu1 %vm16884_vm12, %v16779_v15  ;;  %vm16899_vm12 = vmmov %vm16601_vm0 }
 0x788   : > { %11085 = vmatmul.mubr.msk.f32.gmra.mrb[10].mxu1 %vm16885_vm13, %v16781_v48  ;;  %vm16900_vm13 = vmmov %vm16601_vm0 }
 0x789   : > { %11087 = vmatprep.mubr.msk.f32.mxu1 %vm16886_vm14, %v16783_v1  ;;  %vm16901_vm14 = vmmov %vm16601_vm0 }
 0x78c   : > { %11088 = vmatmul.mubr.msk.f32.gmra.mrb[12].mxu1 %vm16887_vm15, %v16785_v56  ;;  %vm16902_vm15 = vmmov %vm16601_vm0 }
 0x78d   : > { %11090 = vmatprep.mubr.msk.f32.mxu1 %vm16888_vm3, %v16787_v14  ;;  %vm16903_vm3 = vmmov %vm16601_vm0 }
 0x790   : > { %11091 = vmatmul.mubr.msk.f32.gmra.mrb[14].mxu1 %vm16889_vm6, %v16789_v44  ;;  %vm16904_vm6 = vmmov %vm16601_vm0 }
 0x791   : > { %11093 = vmatprep.mubr.msk.f32.mxu1 %vm16890_vm7, %v16791_v13  ;;  %vm16905_vm7 = vmmov %vm16601_vm0 }
 0x794   : > { %11094 = vmatmul.mubr.msk.f32.gmra.mrb[16].mxu1 %vm16891_vm8, %v16793_v6  ;;  %vm16906_vm8 = vmmov %vm16601_vm0 }
 0x795   : > { %11096 = vmatprep.mubr.msk.f32.mxu1 %vm16892_vm9, %v16795_v19  ;;  %vm16907_vm9 = vmmov %vm16601_vm0 }
 0x798   : > { %11097 = vmatmul.mubr.msk.f32.gmra.mrb[18].mxu1 %vm16893_vm4, %v16797_v7  ;;  %vm16908_vm4 = vmmov %vm16601_vm0 }
 0x799   : > { %11099 = vmatprep.mubr.msk.f32.mxu1 %vm16894_vm1, %v16799_v11  ;;  %vm16909_vm1 = vmmov %vm16601_vm0 }
 0x79c   : > { %11100 = vmatmul.mubr.msk.f32.gmra.mrb[20].mxu1 %vm16895_vm5, %v16801_v63  ;;  %vm16910_vm5 = vmmov %vm16601_vm0 }
 0x79d   : > { %11102 = vmatprep.mubr.msk.f32.mxu1 %vm16601_vm0, %v16803_v62 }
 0x7a0   : > { %11103 = vmatmul.mubr.msk.f32.gmra.mrb[22].mxu1 %vm16896_vm2, %v14946_v33  ;;  %v8186_v33 = vld [vmem:[#allocation2 + $0x1a2] sm:$0xff]  ;;  %vm16911_vm2 = vmmov %vm16601_vm0 }
 0x7a1   : > { %11105 = vmatprep.mubr.msk.f32.mxu1 %vm16897_vm10, %v16805_v5  ;;  %vm16912_vm10 = vmmov %vm16601_vm0 }
 0x7a4   : > { %11106 = vmatmul.mubr.msk.f32.gmra.mrb[24].mxu1 %vm16898_vm11, %v14954_v38  ;;  %v15353_v38 = vld [vmem:[%s15816_s4] ss:$0 sm:$0xff]  ;;  %vm16913_vm11 = vmmov %vm16601_vm0 }
 0x7a5   : > { %11108 = vmatprep.mubr.msk.f32.mxu1 %vm16899_vm12, %v14958_v3  ;;  %vm16914_vm12 = vmmov %vm16601_vm0 }
 0x7a8   : > { %11109 = vmatmul.mubr.msk.f32.gmra.mrb[26].mxu1 %vm16900_vm13, %v14962_v29  ;;  %vm16915_vm13 = vmmov %vm16601_vm0 }
 0x7a9   : > { %11111 = vmatprep.mubr.msk.f32.mxu1 %vm16901_vm14, %v15178_v30  ;;  %vm16916_vm14 = vmmov %vm16601_vm0 }
 0x7ac   : > { %11112 = vmatmul.mubr.msk.f32.gmra.mrb[28].mxu1 %vm16902_vm15, %v15182_v60  ;;  %vm16917_vm15 = vmmov %vm16601_vm0 }
 0x7ad   : > { %11114 = vmatprep.mubr.msk.f32.mxu1 %vm16903_vm3, %v8185_v9  ;;  %vm16918_vm3 = vmmov %vm16601_vm0 }
 0x7b0   : > { %11115 = vmatmul.mubr.msk.f32.gmra.mrb[30].mxu1 %vm16904_vm6, %v8186_v33  ;;  %vm16919_vm6 = vmmov %vm16601_vm0 }
 0x847   : > { %v11071_v3 = vpop.f32.mrb[0].mxu1 }
 0x848   : > { %v15356_v29 = vadd.f32 %v11071_v3, %v15353_v38  ;;  %v8354_v57 = vpop.f32.mrb[1].mxu1 }
 0x849   : > { %v15359_v42 = vadd.f32 %v15353_v38, %v8354_v57 }
 0x84a   : > { %v8585_v40 = vsel %vm16905_vm7, %v15356_v29, 0.0  ;;  %vm16920_vm7 = vmmov %vm16601_vm0 }
 0x84b   : > { %v8584_v17 = vsel %vm16906_vm8, %v15359_v42, 0.0  ;;  %v11074_v43 = vpop.f32.mrb[2].mxu1  ;;  %vm16921_vm8 = vmmov %vm16601_vm0 }
 0x84c   : > { %v8364_v26 = vpop.f32.mrb[3].mxu1  ;;  %v15366_v16 = vadd.f32 %v11074_v43, %v15353_v38  ;;  %v8586_v61 = vadd.f32 %v8585_v40, %v8584_v17 }
 0x84d   : > { %v15369_v18 = vadd.f32 %v15353_v38, %v8364_v26 }
 0x84e   : > { %v8589_v1 = vsel %vm16908_vm4, %v15366_v16, 0.0  ;;  %vm16923_vm4 = vmmov %vm16601_vm0 }
 0x84f   : > { %v8587_v35 = vsel %vm16907_vm9, %v15369_v18, 0.0  ;;  %v11077_v34 = vpop.f32.mrb[4].mxu1  ;;  %vm16922_vm9 = vmmov %vm16601_vm0 }
 0x850   : > { %v8588_v15 = vadd.f32 %v8587_v35, %v8586_v61  ;;  %v8374_v48 = vpop.f32.mrb[5].mxu1  ;;  %v15376_v56 = vadd.f32 %v11077_v34, %v15353_v38 }
 0x851   : > { %v15379_v14 = vadd.f32 %v15353_v38, %v8374_v48 }
 0x852   : > { %v8590_v44 = vadd.f32 %v8589_v1, %v8588_v15  ;;  %v8593_v11 = vsel %vm16910_vm5, %v15376_v56, 0.0  ;;  %vm16925_vm5 = vmmov %vm16601_vm0 }
 0x853   : > { %v8591_v13 = vsel %vm16909_vm1, %v15379_v14, 0.0  ;;  %v11080_v6 = vpop.f32.mrb[6].mxu1  ;;  %vm16924_vm1 = vmmov %vm16601_vm0 }
 0x854   : > { %v8592_v19 = vadd.f32 %v8591_v13, %v8590_v44  ;;  %v8384_v7 = vpop.f32.mrb[7].mxu1  ;;  %v15386_v63 = vadd.f32 %v11080_v6, %v15353_v38 }
 0x855   : > { %v15389_v62 = vadd.f32 %v15353_v38, %v8384_v7 }
 0x856   : > { %v8594_v5 = vadd.f32 %v8593_v11, %v8592_v19  ;;  %v8597_v31 = vsel %vm16911_vm2, %v15386_v63, 0.0  ;;  %vm16926_vm2 = vmmov %vm16601_vm0 }
 0x857   : > { %v8595_v30 = vsel %vm16601_vm0, %v15389_v62, 0.0  ;;  %v11083_v60 = vpop.f32.mrb[8].mxu1 }
 0x858   : > { %v8596_v51 = vadd.f32 %v8595_v30, %v8594_v5  ;;  %v8394_v41 = vpop.f32.mrb[9].mxu1  ;;  %v15396_v46 = vadd.f32 %v11083_v60, %v15353_v38 }
 0x859   : > { %v15399_v8 = vadd.f32 %v15353_v38, %v8394_v41 }
 0x85a   : > { %v8598_v39 = vadd.f32 %v8597_v31, %v8596_v51  ;;  %v8601_v53 = vsel %vm16913_vm11, %v15396_v46, 0.0  ;;  %vm16928_vm11 = vmmov %vm16601_vm0 }
 0x85b   : > { %v8599_v20 = vsel %vm16912_vm10, %v15399_v8, 0.0  ;;  %v11086_v0 = vpop.f32.mrb[10].mxu1  ;;  %vm16927_vm10 = vmmov %vm16601_vm0 }
 0x85c   : > { %v8600_v55 = vadd.f32 %v8599_v20, %v8598_v39  ;;  %v8404_v21 = vpop.f32.mrb[11].mxu1  ;;  %v15406_v4 = vadd.f32 %v11086_v0, %v15353_v38 }
 0x85d   : > { %v15409_v54 = vadd.f32 %v15353_v38, %v8404_v21 }
 0x85e   : > { %v8602_v2 = vadd.f32 %v8601_v53, %v8600_v55  ;;  %v8605_v32 = vsel %vm16915_vm13, %v15406_v4, 0.0  ;;  %vm16930_vm13 = vmmov %vm16601_vm0 }
 0x85f   : > { %v8603_v36 = vsel %vm16914_vm12, %v15409_v54, 0.0  ;;  %v11089_v58 = vpop.f32.mrb[12].mxu1  ;;  %vm16929_vm12 = vmmov %vm16601_vm0 }
 0x860   : > { %v8604_v52 = vadd.f32 %v8603_v36, %v8602_v2  ;;  %v8414_v25 = vpop.f32.mrb[13].mxu1  ;;  %v15416_v28 = vadd.f32 %v11089_v58, %v15353_v38 }
 0x861   : > { %v15419_v49 = vadd.f32 %v15353_v38, %v8414_v25 }
 0x862   : > { %v8606_v27 = vadd.f32 %v8605_v32, %v8604_v52  ;;  %v8609_v23 = vsel %vm16917_vm15, %v15416_v28, 0.0  ;;  %vm16932_vm15 = vmmov %vm16601_vm0 }
 0x863   : > { %v8607_v37 = vsel %vm16916_vm14, %v15419_v49, 0.0  ;;  %v11092_v47 = vpop.f32.mrb[14].mxu1  ;;  %vm16931_vm14 = vmmov %vm16601_vm0 }
 0x864   : > { %v8608_v24 = vadd.f32 %v8607_v37, %v8606_v27  ;;  %v8424_v45 = vpop.f32.mrb[15].mxu1  ;;  %v15426_v50 = vadd.f32 %v11092_v47, %v15353_v38 }
 0x865   : > { %v15429_v12 = vadd.f32 %v15353_v38, %v8424_v45 }
 0x866   : > { %v8610_v10 = vadd.f32 %v8609_v23, %v8608_v24  ;;  %v8613_v3 = vsel %vm16919_vm6, %v15426_v50, 0.0  ;;  %vm16934_vm6 = vmmov %vm16601_vm0 }
 0x867   : > { %v8611_v59 = vsel %vm16918_vm3, %v15429_v12, 0.0  ;;  %v11095_v22 = vpop.f32.mrb[16].mxu1  ;;  %vm16933_vm3 = vmmov %vm16601_vm0 }
 0x868   : > { %v8612_v9 = vadd.f32 %v8611_v59, %v8610_v10  ;;  %v8434_v33 = vpop.f32.mrb[17].mxu1  ;;  %v15436_v57 = vadd.f32 %v11095_v22, %v15353_v38 }
 0x869   : > { %v15439_v40 = vadd.f32 %v15353_v38, %v8434_v33 }
 0x86a   : > { %v8614_v17 = vadd.f32 %v8613_v3, %v8612_v9  ;;  %v8617_v34 = vsel %vm16921_vm8, %v15436_v57, 0.0  ;;  %vm16936_vm8 = vmmov %vm16601_vm0 }
 0x86b   : > { %v8615_v43 = vsel %vm16920_vm7, %v15439_v40, 0.0  ;;  %v11098_v26 = vpop.f32.mrb[18].mxu1  ;;  %vm16935_vm7 = vmmov %vm16601_vm0 }
 0x86c   : > { %v8616_v61 = vadd.f32 %v8615_v43, %v8614_v17  ;;  %v8444_v35 = vpop.f32.mrb[19].mxu1  ;;  %v15446_v15 = vadd.f32 %v11098_v26, %v15353_v38 }
 0x86d   : > { %v15449_v48 = vadd.f32 %v15353_v38, %v8444_v35 }
 0x86e   : > { %v8618_v1 = vadd.f32 %v8617_v34, %v8616_v61  ;;  %v8621_v7 = vsel %vm16923_vm4, %v15446_v15, 0.0  ;;  %vm16938_vm4 = vmmov %vm16601_vm0 }
 0x86f   : > { %v8619_v44 = vsel %vm16922_vm9, %v15449_v48, 0.0  ;;  %v11101_v13 = vpop.f32.mrb[20].mxu1  ;;  %vm16937_vm9 = vmmov %vm16601_vm0 }
 0x870   : > { %v8620_v6 = vadd.f32 %v8619_v44, %v8618_v1  ;;  %v8454_v19 = vpop.f32.mrb[21].mxu1  ;;  %v15456_v11 = vadd.f32 %v11101_v13, %v15353_v38 }
 0x871   : > { %v15459_v5 = vadd.f32 %v15353_v38, %v8454_v19 }
 0x872   : > { %v8622_v30 = vadd.f32 %v8621_v7, %v8620_v6  ;;  %v8625_v39 = vsel %vm16925_vm5, %v15456_v11, 0.0  ;;  %vm16940_vm5 = vmmov %vm16601_vm0 }
 0x873   : > { %v8623_v60 = vsel %vm16924_vm1, %v15459_v5, 0.0  ;;  %v11104_v51 = vpop.f32.mrb[22].mxu1  ;;  %vm16939_vm1 = vmmov %vm16601_vm0 }
 0x874   : > { %v8624_v41 = vadd.f32 %v8623_v60, %v8622_v30  ;;  %v8464_v31 = vpop.f32.mrb[23].mxu1  ;;  %v8575_v20 = vadd.f32 %v11104_v51, %v15353_v38 }
 0x875   : > { %v8574_v0 = vadd.f32 %v15353_v38, %v8464_v31 }
 0x876   : > { %v8626_v55 = vadd.f32 %v8625_v39, %v8624_v41  ;;  %v8629_v58 = vsel %vm16926_vm2, %v8575_v20, 0.0  ;;  %vm16941_vm2 = vmmov %vm16601_vm0 }
 0x877   : > { %v8627_v21 = vsel %vm16601_vm0, %v8574_v0, 0.0  ;;  %v11107_v53 = vpop.f32.mrb[24].mxu1 }
 0x878   : > { %v8628_v2 = vadd.f32 %v8627_v21, %v8626_v55  ;;  %v8474_v36 = vpop.f32.mrb[25].mxu1  ;;  %v8577_v52 = vadd.f32 %v11107_v53, %v15353_v38 }
 0x879   : > { %v8576_v25 = vadd.f32 %v15353_v38, %v8474_v36 }
 0x87a   : > { %v8630_v32 = vadd.f32 %v8629_v58, %v8628_v2  ;;  %v8633_v45 = vsel %vm16928_vm11, %v8577_v52, 0.0  ;;  %vm16943_vm11 = vmmov %vm16601_vm0 }
 0x87b   : > { %v8631_v27 = vsel %vm16927_vm10, %v8576_v25, 0.0  ;;  %v11110_v37 = vpop.f32.mrb[26].mxu1  ;;  %vm16942_vm10 = vmmov %vm16601_vm0 }
 0x87c   : > { %v8632_v47 = vadd.f32 %v8631_v27, %v8630_v32  ;;  %v8484_v24 = vpop.f32.mrb[27].mxu1  ;;  %v8579_v23 = vadd.f32 %v11110_v37, %v15353_v38 }
 0x87d   : > { %v8578_v10 = vadd.f32 %v15353_v38, %v8484_v24 }
 0x87e   : > { %v8634_v59 = vadd.f32 %v8633_v45, %v8632_v47  ;;  %v8637_v17 = vsel %vm16930_vm13, %v8579_v23, 0.0  ;;  %vm16945_vm13 = vmmov %vm16601_vm0 }
 0x87f   : > { %v8635_v22 = vsel %vm16929_vm12, %v8578_v10, 0.0  ;;  %v11113_v9 = vpop.f32.mrb[28].mxu1  ;;  %vm16944_vm12 = vmmov %vm16601_vm0 }
 0x880   : > { %v8636_v33 = vadd.f32 %v8635_v22, %v8634_v59  ;;  %v8494_v3 = vpop.f32.mrb[29].mxu1  ;;  %v8581_v43 = vadd.f32 %v11113_v9, %v15353_v38 }
 0x881   : > { %v8580_v26 = vadd.f32 %v15353_v38, %v8494_v3 }
 0x882   : > { %v8638_v61 = vadd.f32 %v8637_v17, %v8636_v33  ;;  %v8641_v13 = vsel %vm16932_vm15, %v8581_v43, 0.0  ;;  %vm16947_vm15 = vmmov %vm16601_vm0 }
 0x883   : > { %v8639_v35 = vsel %vm16931_vm14, %v8580_v26, 0.0  ;;  %v11116_v34 = vpop.f32.mrb[30].mxu1  ;;  %vm16946_vm14 = vmmov %vm16601_vm0 }
 0x884   : > { %v8640_v1 = vadd.f32 %v8639_v35, %v8638_v61  ;;  %v8504_v44 = vpop.f32.mrb[31].mxu1  ;;  %v8583_v6 = vadd.f32 %v11116_v34, %v15353_v38 }
 0x885   : > { %v8582_v19 = vadd.f32 %v15353_v38, %v8504_v44 }
 0x886   : > { %v8642_v7 = vadd.f32 %v8641_v13, %v8640_v1  ;;  %v8645_v51 = vsel %vm16934_vm6, %v8583_v6, 0.0  ;;  %vm16949_vm6 = vmmov %vm16601_vm0 }
 0x887   : > { %v8643_v30 = vsel %vm16933_vm3, %v8582_v19, 0.0  ;;  %vm16948_vm3 = vmmov %vm16601_vm0 }
 0x888   : > { %v8644_v60 = vadd.f32 %v8643_v30, %v8642_v7 }
 0x88a   : > { %v8646_v41 = vadd.f32 %v8645_v51, %v8644_v60 }
 0x88c   : > { %v8647_v31 = vrot.slane %v8646_v41, 4 }
 0x88e   : > { %v8648_v39 = vadd.f32 %v8647_v31, %v8646_v41 }
 0x890   : > { %v8649_v55 = vrot.slane %v8648_v39, 2 }
 0x892   : > { %v8650_v21 = vadd.f32 %v8649_v55, %v8648_v39 }
 0x894   : > { %v8651_v53 = vrot.slane %v8650_v21, 1 }
 0x896   : > { %v8652_v2 = vadd.f32 %v8651_v53, %v8650_v21 }
 0x898   : > { %v8653_v36 = vmul.f32 0.00390625, %v8652_v2 }
 0x89a   : > { %v15486_v58 = vsub.f32 %v15409_v54, %v8653_v36  ;;  %v15489_v32 = vsub.f32 %v15406_v4, %v8653_v36  ;;  %v15492_v38 = vsub.f32 %v15419_v49, %v8653_v36  ;;  %v15495_v27 = vsub.f32 %v15416_v28, %v8653_v36 }
 0x89b   : > { %v15498_v37 = vsub.f32 %v15429_v12, %v8653_v36  ;;  %v15501_v47 = vsub.f32 %v15426_v50, %v8653_v36  ;;  %v15504_v24 = vsub.f32 %v15439_v40, %v8653_v36  ;;  %v15507_v54 = vsub.f32 %v15436_v57, %v8653_v36 }
 0x89c   : > { %v15510_v4 = vsub.f32 %v15449_v48, %v8653_v36  ;;  %v15513_v49 = vsub.f32 %v15446_v15, %v8653_v36  ;;  %v15516_v28 = vsub.f32 %v15459_v5, %v8653_v36  ;;  %v15519_v12 = vsub.f32 %v15456_v11, %v8653_v36 }
 0x89d   : > { %v15521_v50 = vsub.f32 %v8574_v0, %v8653_v36  ;;  %v15523_v45 = vsub.f32 %v8575_v20, %v8653_v36  ;;  %v15525_v40 = vsub.f32 %v8576_v25, %v8653_v36  ;;  %v15527_v57 = vsub.f32 %v8577_v52, %v8653_v36 }
 0x89e   : > { %v15529_v59 = vsub.f32 %v8578_v10, %v8653_v36  ;;  %v15531_v48 = vsub.f32 %v8579_v23, %v8653_v36  ;;  %v15533_v15 = vsub.f32 %v8580_v26, %v8653_v36  ;;  %v15535_v22 = vsub.f32 %v8581_v43, %v8653_v36 }
 0x89f   : > { %v15537_v5 = vsub.f32 %v8582_v19, %v8653_v36  ;;  %v15539_v11 = vsub.f32 %v8583_v6, %v8653_v36  ;;  %v15542_v0 = vsub.f32 %v15359_v42, %v8653_v36  ;;  %v15545_v20 = vsub.f32 %v15356_v29, %v8653_v36 }
 0x8a0   : > { %v15548_v52 = vsub.f32 %v15369_v18, %v8653_v36  ;;  %v15551_v25 = vsub.f32 %v15366_v16, %v8653_v36  ;;  %v15558_v9 = vsub.f32 %v15379_v14, %v8653_v36  ;;  %v15563_v29 = vsub.f32 %v15376_v56, %v8653_v36 }
 0x8a1   : > { %v8686_v23 = vmul.f32 %v15542_v0, %v15542_v0  ;;  %v8687_v10 = vmul.f32 %v15545_v20, %v15545_v20  ;;  %v15570_v17 = vsub.f32 %v15389_v62, %v8653_v36  ;;  %v15576_v56 = vsub.f32 %v15386_v63, %v8653_v36 }
 0x8a2   : > { %v8688_v42 = vmul.f32 %v15548_v52, %v15548_v52  ;;  %v8689_v18 = vmul.f32 %v15551_v25, %v15551_v25  ;;  %v8690_v14 = vmul.f32 %v15558_v9, %v15558_v9  ;;  %v8691_v61 = vmul.f32 %v15563_v29, %v15563_v29 }
 0x8a3   : > { %v8718_v16 = vsel %vm16935_vm7, %v8686_v23, 0.0  ;;  %v8719_v33 = vsel %vm16936_vm8, %v8687_v10, 0.0  ;;  %v15582_v1 = vsub.f32 %v15399_v8, %v8653_v36  ;;  %v8692_v62 = vmul.f32 %v15570_v17, %v15570_v17  ;;  %vm16950_vm7 = vmmov %vm16601_vm0 }
 0x8a4   : > { %v8720_v3 = vadd.f32 %v8719_v33, %v8718_v16  ;;  %v8721_v43 = vsel %vm16937_vm9, %v8688_v42, 0.0  ;;  %v8723_v35 = vsel %vm16938_vm4, %v8689_v18, 0.0  ;;  %v8725_v44 = vsel %vm16939_vm1, %v8690_v14, 0.0  ;;  %vm16951_vm8 = vmmov %vm16601_vm0 }
 0x8a5   : > { %v15588_v6 = vsub.f32 %v15396_v46, %v8653_v36  ;;  %v8693_v63 = vmul.f32 %v15576_v56, %v15576_v56  ;;  %v8727_v19 = vsel %vm16940_vm5, %v8691_v61, 0.0  ;;  %v8694_v30 = vmul.f32 %v15582_v1, %v15582_v1  ;;  %vm16952_vm9 = vmmov %vm16601_vm0 }
 0x8a6   : > { %v8722_v26 = vadd.f32 %v8721_v43, %v8720_v3  ;;  %v8729_v8 = vsel %vm16601_vm0, %v8692_v62, 0.0  ;;  %v8696_v46 = vmul.f32 %v15486_v58, %v15486_v58  ;;  %v8697_v21 = vmul.f32 %v15489_v32, %v15489_v32  ;;  %vm16953_vm4 = vmmov %vm16601_vm0 }
 0x8a7   : > { %v8695_v51 = vmul.f32 %v15588_v6, %v15588_v6  ;;  %v8731_v41 = vsel %vm16941_vm2, %v8693_v63, 0.0  ;;  %v8733_v39 = vsel %vm16942_vm10, %v8694_v30, 0.0  ;;  %v8698_v36 = vmul.f32 %v15492_v38, %v15492_v38  ;;  %vm16954_vm1 = vmmov %vm16601_vm0 }
 0x8a8   : > { %v8724_v34 = vadd.f32 %v8723_v35, %v8722_v26  ;;  %v8737_v23 = vsel %vm16944_vm12, %v8696_v46, 0.0  ;;  %v8699_v42 = vmul.f32 %v15495_v27, %v15495_v27  ;;  %v8739_v18 = vsel %vm16945_vm13, %v8697_v21, 0.0  ;;  %vm16955_vm5 = vmmov %vm16601_vm0 }
 0x8a9   : > { %v8735_v53 = vsel %vm16943_vm11, %v8695_v51, 0.0  ;;  %v8700_v33 = vmul.f32 %v15498_v37, %v15498_v37  ;;  %v8741_v3 = vsel %vm16946_vm14, %v8698_v36, 0.0  ;;  %v8701_v43 = vmul.f32 %v15501_v47, %v15501_v47  ;;  %vm16956_vm2 = vmmov %vm16601_vm0 }
 0x8aa   : > { %v8726_v13 = vadd.f32 %v8725_v44, %v8724_v34  ;;  %v8743_v26 = vsel %vm16947_vm15, %v8699_v42, 0.0  ;;  %v8702_v35 = vmul.f32 %v15504_v24, %v15504_v24  ;;  %v8703_v44 = vmul.f32 %v15507_v54, %v15507_v54  ;;  %vm16957_vm10 = vmmov %vm16601_vm0 }
 0x8ab   : > { %v8745_v34 = vsel %vm16948_vm3, %v8700_v33, 0.0  ;;  %vm16958_vm11 = vmmov %vm16601_vm0 }
 0x8ac   : > { %v8728_v7 = vadd.f32 %v8727_v19, %v8726_v13  ;;  %v8747_v13 = vsel %vm16949_vm6, %v8701_v43, 0.0  ;;  %v8704_v19 = vmul.f32 %v15510_v4, %v15510_v4  ;;  %vm16959_vm12 = vmmov %vm16601_vm0 }
 0x8ad   : > { %vm16960_vm13 = vmmov %vm16601_vm0 }
 0x8ae   : > { %v8730_v60 = vadd.f32 %v8729_v8, %v8728_v7  ;;  %v8749_v7 = vsel %vm16950_vm7, %v8702_v35, 0.0  ;;  %v8705_v8 = vmul.f32 %v15513_v49, %v15513_v49  ;;  %vm16961_vm14 = vmmov %vm16601_vm0 }
 0x8af   : > { %vm16962_vm15 = vmmov %vm16601_vm0 }
 0x8b0   : > { %v8732_v31 = vadd.f32 %v8731_v41, %v8730_v60  ;;  %v8751_v60 = vsel %vm16951_vm8, %v8703_v44, 0.0  ;;  %v8706_v41 = vmul.f32 %v15516_v28, %v15516_v28  ;;  %vm16963_vm3 = vmmov %vm16601_vm0 }
 0x8b1   : > { %vm16964_vm6 = vmmov %vm16601_vm0 }
 0x8b2   : > { %v8734_v55 = vadd.f32 %v8733_v39, %v8732_v31  ;;  %v8753_v31 = vsel %vm16952_vm9, %v8704_v19, 0.0  ;;  %v8707_v39 = vmul.f32 %v15519_v12, %v15519_v12 }
 0x8b4   : > { %v8736_v2 = vadd.f32 %v8735_v53, %v8734_v55  ;;  %v8755_v55 = vsel %vm16953_vm4, %v8705_v8, 0.0  ;;  %v8708_v53 = vmul.f32 %v15521_v50, %v15521_v50 }
 0x8b6   : > { %v8738_v10 = vadd.f32 %v8737_v23, %v8736_v2  ;;  %v8757_v2 = vsel %vm16954_vm1, %v8706_v41, 0.0  ;;  %v8709_v23 = vmul.f32 %v15523_v45, %v15523_v45 }
 0x8b8   : > { %v8740_v16 = vadd.f32 %v8739_v18, %v8738_v10  ;;  %v8759_v10 = vsel %vm16955_vm5, %v8707_v39, 0.0  ;;  %v8710_v18 = vmul.f32 %v15525_v40, %v15525_v40 }
 0x8ba   : > { %v8742_v14 = vadd.f32 %v8741_v3, %v8740_v16  ;;  %v8761_v16 = vsel %vm16601_vm0, %v8708_v53, 0.0  ;;  %v8711_v3 = vmul.f32 %v15527_v57, %v15527_v57 }
 0x8bc   : > { %v8744_v61 = vadd.f32 %v8743_v26, %v8742_v14  ;;  %v8763_v14 = vsel %vm16956_vm2, %v8709_v23, 0.0  ;;  %v8712_v26 = vmul.f32 %v15529_v59, %v15529_v59 }
 0x8be   : > { %v8746_v62 = vadd.f32 %v8745_v34, %v8744_v61  ;;  %v8765_v61 = vsel %vm16957_vm10, %v8710_v18, 0.0  ;;  %v8713_v34 = vmul.f32 %v15531_v48, %v15531_v48 }
 0x8c0   : > { %v8748_v63 = vadd.f32 %v8747_v13, %v8746_v62  ;;  %v8767_v62 = vsel %vm16958_vm11, %v8711_v3, 0.0  ;;  %v8714_v13 = vmul.f32 %v15533_v15, %v15533_v15 }
 0x8c2   : > { %v8750_v30 = vadd.f32 %v8749_v7, %v8748_v63  ;;  %v8769_v63 = vsel %vm16959_vm12, %v8712_v26, 0.0  ;;  %v8715_v7 = vmul.f32 %v15535_v22, %v15535_v22  ;;  %v16965_v26 = vld [vmem:[#allocation6_spill] sm:$0xff] }
 0x8c4   : > { %v8752_v51 = vadd.f32 %v8751_v60, %v8750_v30  ;;  %v8771_v30 = vsel %vm16960_vm13, %v8713_v34, 0.0  ;;  %v8716_v60 = vmul.f32 %v15537_v5, %v15537_v5  ;;  %v16966_v34 = vld [vmem:[#allocation7_spill] sm:$0xff] }
 0x8c6   : > { %v8754_v46 = vadd.f32 %v8753_v31, %v8752_v51  ;;  %v8773_v51 = vsel %vm16961_vm14, %v8714_v13, 0.0  ;;  %v8717_v31 = vmul.f32 %v15539_v11, %v15539_v11  ;;  %v16967_v13 = vld [vmem:[#allocation8_spill] sm:$0xff] }
 0x8c8   : > { %v8756_v21 = vadd.f32 %v8755_v55, %v8754_v46  ;;  %v8775_v46 = vsel %vm16962_vm15, %v8715_v7, 0.0  ;;  %v8777_v55 = vsel %vm16963_vm3, %v8716_v60, 0.0  ;;  %v8779_v53 = vsel %vm16964_vm6, %v8717_v31, 0.0  ;;  %v16968_v7 = vld [vmem:[#allocation9_spill] sm:$0xff] }
 0x8ca   : > { %v8758_v36 = vadd.f32 %v8757_v2, %v8756_v21 }
 0x8cc   : > { %v8760_v42 = vadd.f32 %v8759_v10, %v8758_v36 }
 0x8ce   : > { %v8762_v33 = vadd.f32 %v8761_v16, %v8760_v42 }
 0x8d0   : > { %v8764_v43 = vadd.f32 %v8763_v14, %v8762_v33 }
 0x8d2   : > { %v8766_v35 = vadd.f32 %v8765_v61, %v8764_v43 }
 0x8d4   : > { %v8768_v44 = vadd.f32 %v8767_v62, %v8766_v35 }
 0x8d6   : > { %v8770_v19 = vadd.f32 %v8769_v63, %v8768_v44 }
 0x8d8   : > { %v8772_v8 = vadd.f32 %v8771_v30, %v8770_v19 }
 0x8da   : > { %v8774_v41 = vadd.f32 %v8773_v51, %v8772_v8 }
 0x8dc   : > { %v8776_v39 = vadd.f32 %v8775_v46, %v8774_v41 }
 0x8de   : > { %v8778_v21 = vadd.f32 %v8777_v55, %v8776_v39 }
 0x8e0   : > { %v8780_v2 = vadd.f32 %v8779_v53, %v8778_v21 }
 0x8e2   : > { %v8781_v36 = vrot.slane %v8780_v2, 4 }
 0x8e4   : > { %v8782_v23 = vadd.f32 %v8781_v36, %v8780_v2 }
 0x8e6   : > { %v8783_v10 = vrot.slane %v8782_v23, 2 }
 0x8e8   : > { %v8784_v42 = vadd.f32 %v8783_v10, %v8782_v23 }
 0x8ea   : > { %v8785_v18 = vrot.slane %v8784_v42, 1 }
 0x8ec   : > { %v8786_v16 = vadd.f32 %v8785_v18, %v8784_v42 }
 0x8ee   : > { %v8787_v33 = vmul.f32 0.00390625, %v8786_v16 }
 0x8f0   : > { %v8788_v3 = vadd.f32 1e-05, %v8787_v33 }
 0x8f2   : > { %11801 = vrsqrt.f32 %v8788_v3 }
 0x8fc   : > { %v15667_v14 = vpop.eup %11801 }
 0x8fd   : > { %v8790_v43 = vmul.f32 %v15667_v14, %v15542_v0  ;;  %v8791_v35 = vmul.f32 %v15667_v14, %v15545_v20  ;;  %v8792_v44 = vmul.f32 %v15667_v14, %v15548_v52  ;;  %v8793_v19 = vmul.f32 %v15667_v14, %v15551_v25  ;;  %v16969_v20 = vld [vmem:[#allocation10_spill] sm:$0xff]  ;;  %v16970_v52 = vld [vmem:[#allocation11_spill] sm:$0xff]  ;;  %v16971_v25 = vld [vmem:[#allocation12_spill] sm:$0xff] }
 0x8fe   : > { %v8794_v30 = vmul.f32 %v15667_v14, %v15558_v9  ;;  %v8795_v60 = vmul.f32 %v15667_v14, %v15563_v29  ;;  %v8796_v41 = vmul.f32 %v15667_v14, %v15570_v17  ;;  %v8797_v46 = vmul.f32 %v15667_v14, %v15576_v56  ;;  %v16972_v9 = vld [vmem:[#allocation13_spill] sm:$0xff]  ;;  %v16973_v29 = vld [vmem:[#allocation14_spill] sm:$0xff]  ;;  %v16974_v17 = vld [vmem:[#allocation15_spill] sm:$0xff] }
 0x8ff   : > { %v8822_v61 = vadd.f32 %v8790_v43, %v16965_v26  ;;  %v8823_v62 = vadd.f32 %v8791_v35, %v16966_v34  ;;  %v8824_v63 = vadd.f32 %v8792_v44, %v16967_v13  ;;  %v8825_v0 = vadd.f32 %v8793_v19, %v16968_v7  ;;  %v16975_v56 = vld [vmem:[#allocation16_spill] sm:$0xff]  ;;  %v16982_v13 = vld [vmem:[#allocation23_spill] sm:$0xff] }
 0x900   : > { %v8826_v8 = vadd.f32 %v8794_v30, %v16969_v20  ;;  %v8827_v51 = vadd.f32 %v8795_v60, %v16970_v52  ;;  %v8828_v31 = vadd.f32 %v8796_v41, %v16971_v25  ;;  %v8829_v39 = vadd.f32 %v8797_v46, %v16972_v9  ;;  %v16983_v19 = vld [vmem:[#allocation24_spill] sm:$0xff]  ;;  %v16985_v20 = vld [vmem:[#allocation26_spill] sm:$0xff]  ;;  %v16986_v60 = vld [vmem:[#allocation27_spill] sm:$0xff] }
 0x901   : > { %8854 = vxpose.xlu1.b32.start [1/16] (narrow) %v8822_v61, 8  ;;  %v8798_v55 = vmul.f32 %v15667_v14, %v15582_v1  ;;  %v8799_v53 = vmul.f32 %v15667_v14, %v15588_v6  ;;  %v8800_v36 = vmul.f32 %v15667_v14, %v15486_v58  ;;  %v8801_v10 = vmul.f32 %v15667_v14, %v15489_v32  ;;  %v16976_v1 = vld [vmem:[#allocation17_spill] sm:$0xff]  ;;  %v16977_v6 = vld [vmem:[#allocation18_spill] sm:$0xff]  ;;  %v16978_v58 = vld [vmem:[#allocation19_spill] sm:$0xff] }
 0x902   : > { %v8802_v18 = vmul.f32 %v15667_v14, %v15492_v38  ;;  %v8803_v33 = vmul.f32 %v15667_v14, %v15495_v27  ;;  %v8804_v43 = vmul.f32 %v15667_v14, %v15498_v37  ;;  %v16979_v32 = vld [vmem:[#allocation20_spill] sm:$0xff]  ;;  %v8805_v61 = vmul.f32 %v15667_v14, %v15501_v47  ;;  %v16980_v38 = vld [vmem:[#allocation21_spill] sm:$0xff]  ;;  %v16989_v46 = vld [vmem:[#allocation30_spill] sm:$0xff] }
 0x903   : > { %v8830_v21 = vadd.f32 %v8798_v55, %v16973_v29  ;;  %v8831_v2 = vadd.f32 %v8799_v53, %v16974_v17  ;;  %v8832_v23 = vadd.f32 %v8800_v36, %v16975_v56  ;;  %v8833_v42 = vadd.f32 %v8801_v10, %v16976_v1  ;;  %v16988_v25 = vld [vmem:[#allocation29_spill] sm:$0xff]  ;;  %v16991_v29 = vld [vmem:[#allocation32_spill] sm:$0xff]  ;;  %v16993_v17 = vld [vmem:[#allocation34_spill] sm:$0xff] }
 0x904   : > { %v8834_v16 = vadd.f32 %v8802_v18, %v16977_v6  ;;  %v8835_v3 = vadd.f32 %v8803_v33, %v16978_v58  ;;  %v8836_v26 = vadd.f32 %v8804_v43, %v16979_v32  ;;  %v8837_v35 = vadd.f32 %v8805_v61, %v16980_v38  ;;  %v16994_v36 = vld [vmem:[#allocation35_spill] sm:$0xff] }
 0x905   : > { %8855 = vxpose.xlu1.b32.cont [2/16] (narrow) %v8823_v62, 8  ;;  %v8806_v34 = vmul.f32 %v15667_v14, %v15504_v24  ;;  %v8807_v27 = vmul.f32 %v15667_v14, %v15507_v54  ;;  %v16981_v62 = vld [vmem:[#allocation22_spill] sm:$0xff]  ;;  %v8808_v37 = vmul.f32 %v15667_v14, %v15510_v4  ;;  %v8809_v47 = vmul.f32 %v15667_v14, %v15513_v49  ;;  %v16996_v1 = vld [vmem:[#allocation39_spill] sm:$0xff] }
 0x906   : > { %v8810_v24 = vmul.f32 %v15667_v14, %v15516_v28  ;;  %v8811_v30 = vmul.f32 %v15667_v14, %v15519_v12  ;;  %v8813_v52 = vmul.f32 %v15667_v14, %v15523_v45  ;;  %v8814_v41 = vmul.f32 %v15667_v14, %v15525_v40 }
 0x907   : > { %v8838_v44 = vadd.f32 %v8806_v34, %v16981_v62  ;;  %v8840_v7 = vadd.f32 %v8808_v37, %v16983_v19  ;;  %v8816_v9 = vmul.f32 %v15667_v14, %v15529_v59  ;;  %v8817_v55 = vmul.f32 %v15667_v14, %v15531_v48 }
 0x908   : > { %v8842_v4 = vadd.f32 %v8810_v24, %v16985_v20  ;;  %v8843_v49 = vadd.f32 %v8811_v30, %v16986_v60  ;;  %v8845_v12 = vadd.f32 %v8813_v52, %v16988_v25  ;;  %v8819_v59 = vmul.f32 %v15667_v14, %v15535_v22 }
 0x909   : > { %8856 = vxpose.xlu1.b32.cont [3/16] (narrow) %v8824_v63, 8  ;;  %v8839_v63 = vadd.f32 %v8807_v27, %v16982_v13  ;;  %v8848_v40 = vadd.f32 %v8816_v9, %v16991_v29  ;;  %v8820_v48 = vmul.f32 %v15667_v14, %v15537_v5 }
 0x90a   : > { %v8851_v56 = vadd.f32 %v8819_v59, %v16994_v36 }
 0x90d   : > { %8857 = vxpose.xlu1.b32.cont [4/16] (narrow) %v8825_v0, 8  ;;  %v16984_v0 = vld [vmem:[#allocation25_spill] sm:$0xff] }
 0x90e   : > { %v8841_v54 = vadd.f32 %v8809_v47, %v16984_v0 }
 0x911   : > { %8858 = vxpose.xlu1.b32.cont [5/16] (narrow) %v8826_v8, 8  ;;  %v8812_v8 = vmul.f32 %v15667_v14, %v15521_v50  ;;  %v8846_v50 = vadd.f32 %v8814_v41, %v16989_v46 }
 0x915   : > { %8859 = vxpose.xlu1.b32.cont [6/16] (narrow) %v8827_v51, 8  ;;  %v16987_v51 = vld [vmem:[#allocation28_spill] sm:$0xff] }
 0x916   : > { %v8844_v28 = vadd.f32 %v8812_v8, %v16987_v51 }
 0x919   : > { %8860 = vxpose.xlu1.b32.cont [7/16] (narrow) %v8828_v31, 8  ;;  %v8815_v31 = vmul.f32 %v15667_v14, %v15527_v57  ;;  %v16992_v57 = vld [vmem:[#allocation33_spill] sm:$0xff] }
 0x91a   : > { %v8849_v53 = vadd.f32 %v8817_v55, %v16992_v57 }
 0x91d   : > { %8861 = vxpose.xlu1.b32.cont [8/16] (narrow) %v8829_v39, 8  ;;  %v16990_v39 = vld [vmem:[#allocation31_spill] sm:$0xff] }
 0x91e   : > { %v8847_v45 = vadd.f32 %v8815_v31, %v16990_v39 }
 0x921   : > { %8862 = vxpose.xlu1.b32.cont [9/16] (narrow) %v8830_v21, 8  ;;  %v8818_v21 = vmul.f32 %v15667_v14, %v15533_v15  ;;  %v16995_v15 = vld [vmem:[#allocation38_spill] sm:$0xff] }
 0x922   : > { %v8852_v10 = vadd.f32 %v8820_v48, %v16995_v15 }
 0x925   : > { %8863 = vxpose.xlu1.b32.cont [10/16] (narrow) %v8831_v2, 8  ;;  %v8850_v2 = vadd.f32 %v8818_v21, %v16993_v17 }
 0x929   : > { %8864 = vxpose.xlu1.b32.cont [11/16] (narrow) %v8832_v23, 8  ;;  %v8821_v23 = vmul.f32 %v15667_v14, %v15539_v11 }
 0x92d   : > { %8865 = vxpose.xlu1.b32.cont [12/16] (narrow) %v8833_v42, 8  ;;  %v8853_v42 = vadd.f32 %v8821_v23, %v16996_v1 }
 0x931   : > { %8866 = vxpose.xlu1.b32.cont [13/16] (narrow) %v8834_v16, 8 }
 0x935   : > { %8867 = vxpose.xlu1.b32.cont [14/16] (narrow) %v8835_v3, 8 }
 0x939   : > { %8868 = vxpose.xlu1.b32.cont [15/16] (narrow) %v8836_v26, 8 }
 0x93d   : > { %8869 = vxpose.xlu1.b32.end [16/16] (narrow) %v8837_v35, 8 }
 0x941   : > { %8886 = vxpose.xlu1.b32.start [1/16] (narrow) %v8838_v44, 8 }
 0x945   : > { %8887 = vxpose.xlu1.b32.cont [2/16] (narrow) %v8839_v63, 8 }
 0x949   : > { %8888 = vxpose.xlu1.b32.cont [3/16] (narrow) %v8840_v7, 8 }
 0x94d   : > { %8889 = vxpose.xlu1.b32.cont [4/16] (narrow) %v8841_v54, 8 }
 0x951   : > { %8890 = vxpose.xlu1.b32.cont [5/16] (narrow) %v8842_v4, 8 }
 0x955   : > { %8891 = vxpose.xlu1.b32.cont [6/16] (narrow) %v8843_v49, 8 }
 0x959   : > { %8892 = vxpose.xlu1.b32.cont [7/16] (narrow) %v8844_v28, 8 }
 0x95d   : > { %8893 = vxpose.xlu1.b32.cont [8/16] (narrow) %v8845_v12, 8 }
 0x961   : > { %8894 = vxpose.xlu1.b32.cont [9/16] (narrow) %v8846_v50, 8 }
 0x965   : > { %8895 = vxpose.xlu1.b32.cont [10/16] (narrow) %v8847_v45, 8 }
 0x969   : > { %8896 = vxpose.xlu1.b32.cont [11/16] (narrow) %v8848_v40, 8 }
 0x96d   : > { %8897 = vxpose.xlu1.b32.cont [12/16] (narrow) %v8849_v53, 8 }
 0x971   : > { %8898 = vxpose.xlu1.b32.cont [13/16] (narrow) %v8850_v2, 8 }
 0x975   : > { %8899 = vxpose.xlu1.b32.cont [14/16] (narrow) %v8851_v56, 8 }
 0x979   : > { %8900 = vxpose.xlu1.b32.cont [15/16] (narrow) %v8852_v10, 8 }
 0x97d   : > { %8901 = vxpose.xlu1.b32.end [16/16] (narrow) %v8853_v42, 8 }
 0x981   : > { %v8870_v22 = vpop.trf.xlu1 }
 0x9c1   : > { %v8902_v5 = vpop.trf.xlu1 }
 0x9c2   : > { %v8920_v18 = vcombine.low %v8870_v22, %v8902_v5 }
 0x9c4   : > { %8922 = vst [vmem:[%s217_s7] sm:$0xff] %v8920_v18 }
 0x9c5   : > { %11817 = shalt.err (!%p11814_p3)
}
 0x9c6   : > { %s11818_s16 = scalar_lea.hbm %s15770_s11, 128  ;;  %s11822_s25 = scalar_lea.hbm %s15817_s5, 256 }
 0x9c7   : > { %p11819_p4 = scmp.ne.s32.totalorder %s15770_s11, %s11818_s16  ;;  %p11823_p9 = scmp.lt.u32.totalorder %s15770_s11, %s15817_s5 }
 0x9c8   : > { %p11824_p10 = scmp.lt.u32.totalorder %s11822_s25, %s11818_s16  ;;  %p11826_p12 = scmp.lt.u32.totalorder %s11818_s16, %s15770_s11 }
 0x9c9   : > { %p11820_p7 = pnand %p11819_p4, %p11938_p5 }
 0x9ca   : > { %p11825_p11 = por %p11824_p10, %p11823_p9 }
 0x9cb   : > { %p11821_p8 = pneg %p11820_p7 }
 0x9cc   : > { %p11827_p13 = por %p11826_p12, %p11825_p11 }
 0x9ce   : > { %p11828_p0 = pnand %p11827_p13, %p11821_p8 }
 0x9d0   : > { %11831 = shalt.err (!%p11828_p0)
}
 0x9d1   : > { %11629 = dma.vmem_to_hbm [thread:$0]  (%p11938_p5), %s15772_s8, 128, %s15770_s11, %s8924_s12  }
 0x9d2 PF: > { %p11635_p1 = scmp.ge.s32.totalorder %s11866_s21, 2  ;;  %s8950_s6 = sand.u32 1, %s11854_s18  }
 0x9d3   : > { %s8951_s7 = scalar_lea.sflag [#allocation4], %s8950_s6 }
 0x9d4   : > { %p11632_p2 = pnand %p11635_p1, %p11942_p6 }
 0x9d6   : > { %11849 = dma.done.wait (!%p11632_p2), %s8951_s7, 128  }
 0x9d7   : > { %11851 = vsyncadd (!%p11632_p2), %s8951_s7, 4294967168  ;;  %p15_p3 = scmp.ge.s32.totalorder %s11925_s24, 4   ;;  %s16997_s18 = smov %s11858_s19 }
 0x9d8   : > { %s16998_s19 = smov %s11862_s20  ;;  %s16999_s20 = smov %s11936_s27 }
 0x9d9   : > { %s17000_s21 = smov %s11925_s24  ;;  %17 = sbr.rel (!%p15_p3) target bundleno = 3 (0x3), region = 94 }
 0x9e0   :  { %8956 = vsyncpa [#allocation4], 1 }
 0x9e1   :  { %8958 = vsyncpa [#allocation4 + $0x1], 1 }

</bundles_post_ra>
